<compile_context>
chip_gen: v7x
topology: tpu7x:2x2x1
jax: 0.10.0
libtpu: 0.0.40
codegen_flags: <defaults>
</compile_context>

<pallas_src>
import functools

import jax
import jax.numpy as jnp
from jax import lax
from jax.experimental import pallas as pl
from jax.experimental.pallas import tpu as pltpu

BN_EPS = 1e-5                       # PyTorch BatchNorm2d default
MAX_TILE_ROWS = 1024                # upper bound on the row tile
PATCH_TILE_BYTES = 4 * 1024 * 1024  # VMEM budget for one (double-buffered) patch tile
VMEM_LIMIT_BYTES = 32 * 1024 * 1024 # > v5e's 16 MiB scoped default, < v7x 64 MiB physical
# Flip to jnp.bfloat16 for ~2x MXU throughput and half the patch HBM traffic; kept f32 so the
# kernel matches the f32 PyTorch/XLA reference within tight tolerance.
MATMUL_DTYPE = jnp.float32


# ----------------------------- small helpers -----------------------------

def _round_up(x, m):
    return (x + m - 1) // m * m


def _choose_tile(m, k):
    """Row tile: as large as the VMEM budget allows, but always >= 2 grid steps (v7x megacore)."""
    cap = max(8, (PATCH_TILE_BYTES // (k * 4)) // 8 * 8)
    tm = max(8, min(MAX_TILE_ROWS, cap, _round_up(-(-m // 2), 8)))
    return tm, _round_up(m, tm)


def _pad_rows(a, mult):
    m = a.shape[0]
    mp = _round_up(m, mult)
    if mp == m:
        return a
    return jnp.pad(a, [(0, mp - m)] + [(0, 0)] * (a.ndim - 1))


def _extract_patches(x, k, stride, pad, pad_value=None):
    # x: [N, H, W, C] -> patches [N, OH, OW, k*k, C]  (tap order = kh*k + kw).
    # pad_value (per-channel) is the "neutral" value that the deferred affine maps to 0.
    n, h, w, c = x.shape
    xp = jnp.pad(x, ((0, 0), (pad, pad), (pad, pad), (0, 0)))
    if pad_value is not None:
        hh = jnp.arange(h + 2 * pad)
        ww = jnp.arange(w + 2 * pad)
        border = (((hh < pad) | (hh >= h + pad))[:, None]
                  | ((ww < pad) | (ww >= w + pad))[None, :])
        xp = xp + jnp.where(border, 1.0, 0.0)[None, :, :, None] * pad_value
    oh = (h + 2 * pad - k) // stride + 1
    ow = (w + 2 * pad - k) // stride + 1
    taps = []
    for i in range(k):
        for j in range(k):
            taps.append(
                lax.slice(
                    xp,
                    (0, i, j, 0),
                    (n, i + stride * (oh - 1) + 1, j + stride * (ow - 1) + 1, c),
                    (1, stride, stride, 1),
                )
            )
    return jnp.stack(taps, axis=3), oh, ow


# ----------------------------- fused conv Pallas kernel -----------------------------

def _fused_conv_kernel(p_ref, w_ref, b_ref, ps_ref, psh_ref, pa_ref, *out_refs,
                       m_total, pre_affine, pre_prelu, with_stats):
    # prologue: deferred BN affine + PReLU of the previous layer, applied to the patch tile
    t = p_ref[...].astype(jnp.float32)
    if pre_affine:
        t = t * ps_ref[...] + psh_ref[...]
    if pre_prelu:
        t = jnp.where(t >= 0.0, t, pa_ref[...] * t)

    # conv as patches x weights on the MXU, fused bias
    y = jnp.dot(t.astype(w_ref.dtype), w_ref[...],
                preferred_element_type=jnp.float32) + b_ref[...]
    y_ref = out_refs[0]
    y_ref[...] = y

    # epilogue: per-tile BatchNorm partials (sum, tile-centered M2), padded rows masked out
    if with_stats:
        stats_ref = out_refs[1]
        tm = y.shape[0]
        i = pl.program_id(0)
        rows = lax.broadcasted_iota(jnp.int32, (tm, 1), 0) + i * tm
        valid = (rows < m_total).astype(jnp.float32)
        cnt = jnp.minimum(tm, m_total - i * tm).astype(jnp.float32)
        s = jnp.sum(y * valid, axis=0, keepdims=True)               # (1, C)
        mu = s * (1.0 / cnt)
        d = (y - mu) * valid
        m2 = jnp.sum(d * d, axis=0, keepdims=True)                  # (1, C)
        stats_ref[...] = jnp.concatenate([s, m2], axis=0)[None]     # (1, 2, C)


def _combine_stats(stats, m, tm):
    # Chan's parallel combination of per-tile (sum, centered-M2) -> batch mean / biased variance.
    ntiles = stats.shape[0]
    counts = jnp.clip(m - tm * jnp.arange(ntiles), 1, tm).astype(jnp.float32)
    sums, m2s = stats[:, 0, :], stats[:, 1, :]
    total = jnp.float32(m)
    mean = jnp.sum(sums, axis=0) / total
    tile_mean = sums / counts[:, None]
    m2 = jnp.sum(m2s, axis=0) + jnp.sum(counts[:, None] * (tile_mean - mean) ** 2, axis=0)
    return mean, m2 / total


def fused_conv_pallas(x, w4d, bias, stride, pre=None, with_stats=False):
    """4x4 conv (stride s, pad 1) with fused deferred prologue activation and BN stat partials.

    x   : [N, H, W, Cin] raw (pre-activation) output of the previous layer, or the input image.
    pre : None or dict(scale=(Cin,)|None, shift=(Cin,)|None, alpha=scalar|None) — the previous
          layer's BN affine / PReLU, applied inside this kernel's prologue.
    Returns (y [N,OH,OW,Cout] raw conv output, mean|None, var|None).
    """
    n = x.shape[0]
    kh, kw, cin, cout = w4d.shape
    kk = kh * kw
    kdim = kk * cin

    pre_affine = pre is not None and pre.get("scale") is not None
    pre_prelu = pre is not None and pre.get("alpha") is not None
    if pre_affine:
        scale, shift = pre["scale"], pre["shift"]
        # neutral pad value: affine(v) == 0, so PReLU(affine(pad)) == 0 like the reference
        pad_value = -shift / jnp.where(scale == 0.0, 1.0, scale)
    else:
        scale = jnp.ones((cin,), jnp.float32)
        shift = jnp.zeros((cin,), jnp.float32)
        pad_value = None                         # PReLU(0) == 0: plain zero padding is correct
    alpha = pre["alpha"] if pre_prelu else jnp.float32(0.0)

    p5, oh, ow = _extract_patches(x, kh, stride, 1, pad_value=pad_value)
    m = n * oh * ow
    patches = p5.reshape(m, kdim).astype(MATMUL_DTYPE)
    tm, mp = _choose_tile(m, kdim)
    patches = _pad_rows(patches, tm)
    ntiles = mp // tm

    w2d = w4d.reshape(kdim, cout).astype(MATMUL_DTYPE)
    scale_k = jnp.tile(scale, kk).reshape(1, kdim)
    shift_k = jnp.tile(shift, kk).reshape(1, kdim)

    kernel = functools.partial(
        _fused_conv_kernel, m_total=m, pre_affine=pre_affine,
        pre_prelu=pre_prelu, with_stats=with_stats)

    in_specs = [
        pl.BlockSpec((tm, kdim), lambda i: (i, 0)),
        pl.BlockSpec((kdim, cout), lambda i: (0, 0)),
        pl.BlockSpec((1, cout), lambda i: (0, 0)),
        pl.BlockSpec((1, kdim), lambda i: (0, 0)),
        pl.BlockSpec((1, kdim), lambda i: (0, 0)),
        pl.BlockSpec((1, 1), lambda i: (0, 0)),
    ]
    out_shape = jax.ShapeDtypeStruct((mp, cout), jnp.float32)
    out_specs = pl.BlockSpec((tm, cout), lambda i: (i, 0))
    if with_stats:
        out_shape = (out_shape, jax.ShapeDtypeStruct((ntiles, 2, cout), jnp.float32))
        out_specs = (out_specs, pl.BlockSpec((1, 2, cout), lambda i: (i, 0, 0)))

    res = pl.pallas_call(
        kernel,
        out_shape=out_shape,
        grid=(ntiles,),
        in_specs=in_specs,
        out_specs=out_specs,
        compiler_params=pltpu.CompilerParams(
            dimension_semantics=("parallel",),   # per-tile stat partials keep this axis parallel
            vmem_limit_bytes=VMEM_LIMIT_BYTES),
    )(patches, w2d, bias.reshape(1, cout), scale_k, shift_k, jnp.reshape(alpha, (1, 1)))

    if with_stats:
        y, stats = res
        mean, var = _combine_stats(stats, m, tm)
    else:
        y, mean, var = res, None, None
    return y[:m].reshape(n, oh, ow, cout), mean, var


# ----------------------------- downsample (XLA glue, per review) -----------------------------

def avgpool_3x3_s2(x):
    # nn.AvgPool2d(kernel=3, stride=2, padding=1, count_include_pad=False) on the raw C=3 image.
    # Stays in XLA (tiny, runs once per scale); divisor map is analytic from border positions.
    n, h, w, c = x.shape
    ssum = lax.reduce_window(x, 0.0, lax.add, (1, 3, 3, 1), (1, 2, 2, 1),
                             ((0, 0), (1, 1), (1, 1), (0, 0)))
    oh, ow = ssum.shape[1], ssum.shape[2]

    def _valid(size, osize):
        idx = jnp.arange(osize)
        lo = jnp.maximum(2 * idx - 1, 0)
        hi = jnp.minimum(2 * idx + 1, size - 1)
        return (hi - lo + 1).astype(jnp.float32)

    cnt = _valid(h, oh)[:, None] * _valid(w, ow)[None, :]
    return ssum / cnt[None, :, :, None]


# ----------------------------- module forward -----------------------------

def discriminator_forward_pallas(x_nhwc, dparams):
    alpha = dparams["alpha"]
    h = x_nhwc
    pre = None                      # deferred (BN affine, PReLU) of the previous layer
    for layer in dparams["layers"]:
        y, mean, var = fused_conv_pallas(
            h, layer["w"], layer["bias"], layer["stride"],
            pre=pre, with_stats=layer["bn"] is not None)
        if layer["bn"] is not None:
            gamma, beta = layer["bn"]
            scale = gamma * lax.rsqrt(jnp.maximum(var, 0.0) + BN_EPS)
            shift = beta - mean * scale
            pre = dict(scale=scale, shift=shift, alpha=alpha if layer["prelu"] else None)
        elif layer["prelu"]:
            pre = dict(scale=None, shift=None, alpha=alpha)
        else:
            pre = None              # final conv: no trailing activation
        h = y
    return h


def multiscale_discriminator_forward(x_nchw, params_list):
    # NCHW in/out (PyTorch convention); NHWC internally.
    x = jnp.transpose(x_nchw, (0, 2, 3, 1)).astype(jnp.float32)
    results = []
    num_d = len(params_list)
    for i in range(num_d):
        out = discriminator_forward_pallas(x, params_list[i])
        results.append(jnp.transpose(out, (0, 3, 1, 2)))
        if i != num_d - 1:
            x = avgpool_3x3_s2(x)
    return results


# ----------------------------- parameter init -----------------------------

def init_discriminator_params(key, input_nc, ndf, n_layers):
    cfgs = [(input_nc, ndf, 2, False, True, False)]       # cin, cout, stride, bn, prelu, bias
    nf = 1
    for i in range(1, n_layers):
        nf_prev, nf = nf, min(2 ** i, 8)
        cfgs.append((ndf * nf_prev, ndf * nf, 2, True, True, False))
    nf_prev, nf = nf, min(2 ** n_layers, 8)
    cfgs.append((ndf * nf_prev, ndf * nf, 1, True, True, False))
    cfgs.append((ndf * nf, 1, 1, False, False, True))

    layers = []
    for (cin, cout, stride, has_bn, prelu, has_bias) in cfgs:
        key, kw, kb, kg, kbe = jax.random.split(key, 5)
        w = 0.02 * jax.random.normal(kw, (4, 4, cin, cout), jnp.float32)   # HWIO
        bias = (0.02 * jax.random.normal(kb, (cout,), jnp.float32)
                if has_bias else jnp.zeros((cout,), jnp.float32))
        bn = None
        if has_bn:
            gamma = 1.0 + 0.1 * jax.random.normal(kg, (cout,), jnp.float32)
            beta = 0.1 * jax.random.normal(kbe, (cout,), jnp.float32)
            bn = (gamma, beta)
        layers.append(dict(w=w, bias=bias, stride=stride, bn=bn, prelu=prelu))
    # single shared nn.PReLU() instance per discriminator (default init 0.25), as in the module
    return dict(layers=layers, alpha=jnp.float32(0.25))


# ----------------------------- pure-JAX reference -----------------------------

def ref_forward(x_nchw, params_list):
    x = jnp.transpose(x_nchw, (0, 2, 3, 1)).astype(jnp.float32)
    results = []
    num_d = len(params_list)
    for i in range(num_d):
        h = x
        dp = params_list[i]
        for layer in dp["layers"]:
            s = layer["stride"]
            y = lax.conv_general_dilated(
                h, layer["w"], (s, s), ((1, 1), (1, 1)),
                dimension_numbers=("NHWC", "HWIO", "NHWC"))
            y = y + layer["bias"]
            if layer["bn"] is not None:
                gamma, beta = layer["bn"]
                mean = jnp.mean(y, axis=(0, 1, 2))
                var = jnp.mean((y - mean) ** 2, axis=(0, 1, 2))
                y = (y - mean) * lax.rsqrt(var + BN_EPS) * gamma + beta
            if layer["prelu"]:
                y = jnp.where(y >= 0, y, dp["alpha"] * y)
            h = y
        results.append(jnp.transpose(h, (0, 3, 1, 2)))
        if i != num_d - 1:
            ssum = lax.reduce_window(x, 0.0, lax.add, (1, 3, 3, 1), (1, 2, 2, 1),
                                     ((0, 0), (1, 1), (1, 1), (0, 0)))
            cnt = lax.reduce_window(jnp.ones_like(x[..., :1]), 0.0, lax.add,
                                    (1, 3, 3, 1), (1, 2, 2, 1),
                                    ((0, 0), (1, 1), (1, 1), (0, 0)))
            x = ssum / cnt
    return results


# ----------------------------- main -----------------------------

if __name__ == "__main__":
    key = jax.random.PRNGKey(0)
    N, input_nc, H, W = 2, 3, 64, 64
    ndf, n_layers, num_D = 8, 3, 2

    kx, kp = jax.random.split(key)
    x = jax.random.normal(kx, (N, input_nc, H, W), jnp.float32)

    params_list = []
    for _ in range(num_D):
        kp, kd = jax.random.split(kp)
        params_list.append(init_discriminator_params(kd, input_nc, ndf, n_layers))

    fwd = jax.jit(lambda xx: multiscale_discriminator_forward(xx, params_list))
    outs = fwd(x)
    outs = [jax.block_until_ready(o) for o in outs]

    refs = ref_forward(x, params_list)
    for o, r in zip(outs, refs):
        assert o.shape == r.shape, (o.shape, r.shape)
        err = float(jnp.max(jnp.abs(o - r)))
        if err > 5e-3:
            raise AssertionError(f"Pallas/reference mismatch: max abs err {err}")

    print("KERNEL_OK")
</pallas_src>

<mosaic_0001>
module attributes {stable_mosaic.version = 11 : i64} {
  func.func @_fused_conv_kernel(%arg0: i32, %arg1: memref<1024x48xf32, #tpu.memory_space<vmem>>, %arg2: memref<48x8xf32, #tpu.memory_space<vmem>>, %arg3: memref<1x8xf32, #tpu.memory_space<vmem>>, %arg4: memref<1x48xf32, #tpu.memory_space<vmem>>, %arg5: memref<1x48xf32, #tpu.memory_space<vmem>>, %arg6: memref<1x1xf32, #tpu.memory_space<vmem>>, %arg7: memref<1024x8xf32, #tpu.memory_space<vmem>>) attributes {dimension_semantics = [#tpu.dimension_semantics<parallel>], iteration_bounds = array<i64: 2>, scalar_prefetch = 0 : i64, scratch_operands = 0 : i64, tpu.core_type = #tpu.core_type<tc>, window_params = [{transform_indices = @transform_0, window_bounds = array<i64: 1024, 48>}, {pipeline_mode = #tpu.pipeline_mode<synchronous>, transform_indices = @transform_1, window_bounds = array<i64: 48, 8>}, {pipeline_mode = #tpu.pipeline_mode<synchronous>, transform_indices = @transform_2, window_bounds = array<i64: 1, 8>}, {pipeline_mode = #tpu.pipeline_mode<synchronous>, transform_indices = @transform_3, window_bounds = array<i64: 1, 48>}, {pipeline_mode = #tpu.pipeline_mode<synchronous>, transform_indices = @transform_4, window_bounds = array<i64: 1, 48>}, {pipeline_mode = #tpu.pipeline_mode<synchronous>, transform_indices = @transform_5, window_bounds = array<i64: 1, 1>}, {transform_indices = @transform_6, window_bounds = array<i64: 1024, 8>}]} {
    %c0 = arith.constant 0 : index
    %c0_0 = arith.constant 0 : index
    %0 = vector.load %arg1[%c0, %c0_0] : memref<1024x48xf32, #tpu.memory_space<vmem>>, vector<1024x48xf32>
    %c0_1 = arith.constant 0 : index
    %c0_2 = arith.constant 0 : index
    %1 = vector.load %arg2[%c0_1, %c0_2] : memref<48x8xf32, #tpu.memory_space<vmem>>, vector<48x8xf32>
    %cst = arith.constant dense<0.000000e+00> : vector<1024x8xf32>
    %2 = tpu.matmul %0, %1, %cst {dimension_numbers = #tpu.dot_dimension_numbers<[1], [0], [0], [1], [0, 0, 1, 1], [], []>} : vector<1024x48xf32>, vector<48x8xf32>, vector<1024x8xf32> -> vector<1024x8xf32>
    %c0_3 = arith.constant 0 : index
    %c0_4 = arith.constant 0 : index
    %3 = vector.load %arg3[%c0_3, %c0_4] : memref<1x8xf32, #tpu.memory_space<vmem>>, vector<1x8xf32>
    %4 = vector.broadcast %3 : vector<1x8xf32> to vector<1024x8xf32>
    %5 = arith.addf %2, %4 : vector<1024x8xf32>
    %c0_5 = arith.constant 0 : index
    %c0_6 = arith.constant 0 : index
    %6 = vector.load %arg7[%c0_5, %c0_6] : memref<1024x8xf32, #tpu.memory_space<vmem>>, vector<1024x8xf32>
    tpu.vector_store %arg7[%c0_5, %c0_6], %5 {strides = array<i32>} : memref<1024x8xf32, #tpu.memory_space<vmem>>, vector<1024x8xf32>,
    return
  }
  func.func @transform_0(%arg0: i32) -> (i32, i32) {
    %c0_i32 = arith.constant 0 : i32
    %c0_i32_0 = arith.constant 0 : i32
    return %arg0, %c0_i32 : i32, i32
  }
  func.func @transform_1(%arg0: i32) -> (i32, i32) {
    %c0_i32 = arith.constant 0 : i32
    %c0_i32_0 = arith.constant 0 : i32
    %c0_i32_1 = arith.constant 0 : i32
    return %c0_i32, %c0_i32_0 : i32, i32
  }
  func.func @transform_2(%arg0: i32) -> (i32, i32) {
    %c0_i32 = arith.constant 0 : i32
    %c0_i32_0 = arith.constant 0 : i32
    %c0_i32_1 = arith.constant 0 : i32
    return %c0_i32, %c0_i32_0 : i32, i32
  }
  func.func @transform_3(%arg0: i32) -> (i32, i32) {
    %c0_i32 = arith.constant 0 : i32
    %c0_i32_0 = arith.constant 0 : i32
    %c0_i32_1 = arith.constant 0 : i32
    return %c0_i32, %c0_i32_0 : i32, i32
  }
  func.func @transform_4(%arg0: i32) -> (i32, i32) {
    %c0_i32 = arith.constant 0 : i32
    %c0_i32_0 = arith.constant 0 : i32
    %c0_i32_1 = arith.constant 0 : i32
    return %c0_i32, %c0_i32_0 : i32, i32
  }
  func.func @transform_5(%arg0: i32) -> (i32, i32) {
    %c0_i32 = arith.constant 0 : i32
    %c0_i32_0 = arith.constant 0 : i32
    %c0_i32_1 = arith.constant 0 : i32
    return %c0_i32, %c0_i32_0 : i32, i32
  }
  func.func @transform_6(%arg0: i32) -> (i32, i32) {
    %c0_i32 = arith.constant 0 : i32
    %c0_i32_0 = arith.constant 0 : i32
    return %arg0, %c0_i32 : i32, i32
  }
}

module attributes {stable_mosaic.version = 11 : i64} {
  func.func @_fused_conv_kernel(%arg0: i32, %arg1: memref<256x128xf32, #tpu.memory_space<vmem>>, %arg2: memref<128x16xf32, #tpu.memory_space<vmem>>, %arg3: memref<1x16xf32, #tpu.memory_space<vmem>>, %arg4: memref<1x128xf32, #tpu.memory_space<vmem>>, %arg5: memref<1x128xf32, #tpu.memory_space<vmem>>, %arg6: memref<1x1xf32, #tpu.memory_space<vmem>>, %arg7: memref<256x16xf32, #tpu.memory_space<vmem>>, %arg8: memref<1x2x16xf32, #tpu.memory_space<vmem>>) attributes {dimension_semantics = [#tpu.dimension_semantics<parallel>], iteration_bounds = array<i64: 2>, scalar_prefetch = 0 : i64, scratch_operands = 0 : i64, tpu.core_type = #tpu.core_type<tc>, window_params = [{transform_indices = @transform_0, window_bounds = array<i64: 256, 128>}, {pipeline_mode = #tpu.pipeline_mode<synchronous>, transform_indices = @transform_1, window_bounds = array<i64: 128, 16>}, {pipeline_mode = #tpu.pipeline_mode<synchronous>, transform_indices = @transform_2, window_bounds = array<i64: 1, 16>}, {pipeline_mode = #tpu.pipeline_mode<synchronous>, transform_indices = @transform_3, window_bounds = array<i64: 1, 128>}, {pipeline_mode = #tpu.pipeline_mode<synchronous>, transform_indices = @transform_4, window_bounds = array<i64: 1, 128>}, {pipeline_mode = #tpu.pipeline_mode<synchronous>, transform_indices = @transform_5, window_bounds = array<i64: 1, 1>}, {transform_indices = @transform_6, window_bounds = array<i64: 256, 16>}, {transform_indices = @transform_7, window_bounds = array<i64: 1, 2, 16>}]} {
    %c0 = arith.constant 0 : index
    %c0_0 = arith.constant 0 : index
    %0 = vector.load %arg1[%c0, %c0_0] : memref<256x128xf32, #tpu.memory_space<vmem>>, vector<256x128xf32>
    %cst = arith.constant 0.000000e+00 : f32
    %1 = vector.broadcast %cst : f32 to vector<256x128xf32>
    %2 = arith.cmpf oge, %0, %1 : vector<256x128xf32>
    %c0_1 = arith.constant 0 : index
    %c0_2 = arith.constant 0 : index
    %3 = vector.load %arg6[%c0_1, %c0_2] : memref<1x1xf32, #tpu.memory_space<vmem>>, vector<1x1xf32>
    %4 = vector.broadcast %3 : vector<1x1xf32> to vector<256x128xf32>
    %5 = arith.mulf %4, %0 : vector<256x128xf32>
    %6 = arith.select %2, %0, %5 : vector<256x128xi1>, vector<256x128xf32>
    %c0_3 = arith.constant 0 : index
    %c0_4 = arith.constant 0 : index
    %7 = vector.load %arg2[%c0_3, %c0_4] : memref<128x16xf32, #tpu.memory_space<vmem>>, vector<128x16xf32>
    %cst_5 = arith.constant dense<0.000000e+00> : vector<256x16xf32>
    %8 = tpu.matmul %6, %7, %cst_5 {dimension_numbers = #tpu.dot_dimension_numbers<[1], [0], [0], [1], [0, 0, 1, 1], [], []>} : vector<256x128xf32>, vector<128x16xf32>, vector<256x16xf32> -> vector<256x16xf32>
    %c0_6 = arith.constant 0 : index
    %c0_7 = arith.constant 0 : index
    %9 = vector.load %arg3[%c0_6, %c0_7] : memref<1x16xf32, #tpu.memory_space<vmem>>, vector<1x16xf32>
    %10 = vector.broadcast %9 : vector<1x16xf32> to vector<256x16xf32>
    %11 = arith.addf %8, %10 : vector<256x16xf32>
    %c0_8 = arith.constant 0 : index
    %c0_9 = arith.constant 0 : index
    %12 = vector.load %arg7[%c0_8, %c0_9] : memref<256x16xf32, #tpu.memory_space<vmem>>, vector<256x16xf32>
    tpu.vector_store %arg7[%c0_8, %c0_9], %11 {strides = array<i32>} : memref<256x16xf32, #tpu.memory_space<vmem>>, vector<256x16xf32>,
    %13 = tpu.iota {dimensions = array<i32: 0>} : vector<256x1xi32>
    %c256_i32 = arith.constant 256 : i32
    %14 = arith.muli %arg0, %c256_i32 : i32
    %15 = vector.broadcast %14 : i32 to vector<256x1xi32>
    %16 = arith.addi %13, %15 : vector<256x1xi32>
    %c512_i32 = arith.constant 512 : i32
    %17 = vector.broadcast %c512_i32 : i32 to vector<256x1xi32>
    %18 = arith.cmpi slt, %16, %17 : vector<256x1xi32>
    %19 = arith.extui %18 : vector<256x1xi1> to vector<256x1xi32>
    %20 = arith.sitofp %19 : vector<256x1xi32> to vector<256x1xf32>
    %c256_i32_10 = arith.constant 256 : i32
    %21 = arith.muli %arg0, %c256_i32_10 : i32
    %c512_i32_11 = arith.constant 512 : i32
    %22 = arith.subi %c512_i32_11, %21 : i32
    %c256_i32_12 = arith.constant 256 : i32
    %23 = arith.minsi %c256_i32_12, %22 : i32
    %24 = arith.sitofp %23 : i32 to f32
    %25 = vector.broadcast %20 : vector<256x1xf32> to vector<256x16xf32>
    %26 = arith.mulf %11, %25 : vector<256x16xf32>
    %cst_13 = arith.constant dense<0.000000e+00> : vector<16xf32>
    %27 = vector.multi_reduction <add>, %26, %cst_13 [0] : vector<256x16xf32> to vector<16xf32>
    %28 = vector.shape_cast %27 : vector<16xf32> to vector<1x16xf32>
    %cst_14 = arith.constant 1.000000e+00 : f32
    %29 = arith.divf %cst_14, %24 : f32
    %30 = vector.broadcast %29 : f32 to vector<1x16xf32>
    %31 = arith.mulf %28, %30 : vector<1x16xf32>
    %32 = vector.broadcast %31 : vector<1x16xf32> to vector<256x16xf32>
    %33 = arith.subf %11, %32 : vector<256x16xf32>
    %34 = vector.broadcast %20 : vector<256x1xf32> to vector<256x16xf32>
    %35 = arith.mulf %33, %34 : vector<256x16xf32>
    %36 = arith.mulf %35, %35 : vector<256x16xf32>
    %cst_15 = arith.constant dense<0.000000e+00> : vector<16xf32>
    %37 = vector.multi_reduction <add>, %36, %cst_15 [0] : vector<256x16xf32> to vector<16xf32>
    %38 = vector.shape_cast %37 : vector<16xf32> to vector<1x16xf32>
    %39 = tpu.concatenate %28, %38 in 0 : vector<1x16xf32>, vector<1x16xf32> -> vector<2x16xf32>
    %40 = vector.shape_cast %39 : vector<2x16xf32> to vector<1x2x16xf32>
    %c0_16 = arith.constant 0 : index
    %c0_17 = arith.constant 0 : index
    %c0_18 = arith.constant 0 : index
    %41 = vector.load %arg8[%c0_16, %c0_17, %c0_18] : memref<1x2x16xf32, #tpu.memory_space<vmem>>, vector<1x2x16xf32>
    tpu.vector_store %arg8[%c0_16, %c0_17, %c0_18], %40 {strides = array<i32>} : memref<1x2x16xf32, #tpu.memory_space<vmem>>, vector<1x2x16xf32>,
    return
  }
  func.func @transform_0(%arg0: i32) -> (i32, i32) {
    %c0_i32 = arith.constant 0 : i32
    %c0_i32_0 = arith.constant 0 : i32
    return %arg0, %c0_i32 : i32, i32
  }
  func.func @transform_1(%arg0: i32) -> (i32, i32) {
    %c0_i32 = arith.constant 0 : i32
    %c0_i32_0 = arith.constant 0 : i32
    %c0_i32_1 = arith.constant 0 : i32
    return %c0_i32, %c0_i32_0 : i32, i32
  }
  func.func @transform_2(%arg0: i32) -> (i32, i32) {
    %c0_i32 = arith.constant 0 : i32
    %c0_i32_0 = arith.constant 0 : i32
    %c0_i32_1 = arith.constant 0 : i32
    return %c0_i32, %c0_i32_0 : i32, i32
  }
  func.func @transform_3(%arg0: i32) -> (i32, i32) {
    %c0_i32 = arith.constant 0 : i32
    %c0_i32_0 = arith.constant 0 : i32
    %c0_i32_1 = arith.constant 0 : i32
    return %c0_i32, %c0_i32_0 : i32, i32
  }
  func.func @transform_4(%arg0: i32) -> (i32, i32) {
    %c0_i32 = arith.constant 0 : i32
    %c0_i32_0 = arith.constant 0 : i32
    %c0_i32_1 = arith.constant 0 : i32
    return %c0_i32, %c0_i32_0 : i32, i32
  }
  func.func @transform_5(%arg0: i32) -> (i32, i32) {
    %c0_i32 = arith.constant 0 : i32
    %c0_i32_0 = arith.constant 0 : i32
    %c0_i32_1 = arith.constant 0 : i32
    return %c0_i32, %c0_i32_0 : i32, i32
  }
  func.func @transform_6(%arg0: i32) -> (i32, i32) {
    %c0_i32 = arith.constant 0 : i32
    %c0_i32_0 = arith.constant 0 : i32
    return %arg0, %c0_i32 : i32, i32
  }
  func.func @transform_7(%arg0: i32) -> (i32, i32, i32) {
    %c0_i32 = arith.constant 0 : i32
    %c0_i32_0 = arith.constant 0 : i32
    %c0_i32_1 = arith.constant 0 : i32
    return %arg0, %c0_i32, %c0_i32_0 : i32, i32, i32
  }
}

module attributes {stable_mosaic.version = 11 : i64} {
  func.func @_fused_conv_kernel(%arg0: i32, %arg1: memref<64x256xf32, #tpu.memory_space<vmem>>, %arg2: memref<256x32xf32, #tpu.memory_space<vmem>>, %arg3: memref<1x32xf32, #tpu.memory_space<vmem>>, %arg4: memref<1x256xf32, #tpu.memory_space<vmem>>, %arg5: memref<1x256xf32, #tpu.memory_space<vmem>>, %arg6: memref<1x1xf32, #tpu.memory_space<vmem>>, %arg7: memref<64x32xf32, #tpu.memory_space<vmem>>, %arg8: memref<1x2x32xf32, #tpu.memory_space<vmem>>) attributes {dimension_semantics = [#tpu.dimension_semantics<parallel>], iteration_bounds = array<i64: 2>, scalar_prefetch = 0 : i64, scratch_operands = 0 : i64, tpu.core_type = #tpu.core_type<tc>, window_params = [{transform_indices = @transform_0, window_bounds = array<i64: 64, 256>}, {pipeline_mode = #tpu.pipeline_mode<synchronous>, transform_indices = @transform_1, window_bounds = array<i64: 256, 32>}, {pipeline_mode = #tpu.pipeline_mode<synchronous>, transform_indices = @transform_2, window_bounds = array<i64: 1, 32>}, {pipeline_mode = #tpu.pipeline_mode<synchronous>, transform_indices = @transform_3, window_bounds = array<i64: 1, 256>}, {pipeline_mode = #tpu.pipeline_mode<synchronous>, transform_indices = @transform_4, window_bounds = array<i64: 1, 256>}, {pipeline_mode = #tpu.pipeline_mode<synchronous>, transform_indices = @transform_5, window_bounds = array<i64: 1, 1>}, {transform_indices = @transform_6, window_bounds = array<i64: 64, 32>}, {transform_indices = @transform_7, window_bounds = array<i64: 1, 2, 32>}]} {
    %c0 = arith.constant 0 : index
    %c0_0 = arith.constant 0 : index
    %0 = vector.load %arg1[%c0, %c0_0] : memref<64x256xf32, #tpu.memory_space<vmem>>, vector<64x256xf32>
    %c0_1 = arith.constant 0 : index
    %c0_2 = arith.constant 0 : index
    %1 = vector.load %arg4[%c0_1, %c0_2] : memref<1x256xf32, #tpu.memory_space<vmem>>, vector<1x256xf32>
    %2 = vector.broadcast %1 : vector<1x256xf32> to vector<64x256xf32>
    %3 = arith.mulf %0, %2 : vector<64x256xf32>
    %c0_3 = arith.constant 0 : index
    %c0_4 = arith.constant 0 : index
    %4 = vector.load %arg5[%c0_3, %c0_4] : memref<1x256xf32, #tpu.memory_space<vmem>>, vector<1x256xf32>
    %5 = vector.broadcast %4 : vector<1x256xf32> to vector<64x256xf32>
    %6 = arith.addf %3, %5 : vector<64x256xf32>
    %cst = arith.constant 0.000000e+00 : f32
    %7 = vector.broadcast %cst : f32 to vector<64x256xf32>
    %8 = arith.cmpf oge, %6, %7 : vector<64x256xf32>
    %c0_5 = arith.constant 0 : index
    %c0_6 = arith.constant 0 : index
    %9 = vector.load %arg6[%c0_5, %c0_6] : memref<1x1xf32, #tpu.memory_space<vmem>>, vector<1x1xf32>
    %10 = vector.broadcast %9 : vector<1x1xf32> to vector<64x256xf32>
    %11 = arith.mulf %10, %6 : vector<64x256xf32>
    %12 = arith.select %8, %6, %11 : vector<64x256xi1>, vector<64x256xf32>
    %c0_7 = arith.constant 0 : index
    %c0_8 = arith.constant 0 : index
    %13 = vector.load %arg2[%c0_7, %c0_8] : memref<256x32xf32, #tpu.memory_space<vmem>>, vector<256x32xf32>
    %cst_9 = arith.constant dense<0.000000e+00> : vector<64x32xf32>
    %14 = tpu.matmul %12, %13, %cst_9 {dimension_numbers = #tpu.dot_dimension_numbers<[1], [0], [0], [1], [0, 0, 1, 1], [], []>} : vector<64x256xf32>, vector<256x32xf32>, vector<64x32xf32> -> vector<64x32xf32>
    %c0_10 = arith.constant 0 : index
    %c0_11 = arith.constant 0 : index
    %15 = vector.load %arg3[%c0_10, %c0_11] : memref<1x32xf32, #tpu.memory_space<vmem>>, vector<1x32xf32>
    %16 = vector.broadcast %15 : vector<1x32xf32> to vector<64x32xf32>
    %17 = arith.addf %14, %16 : vector<64x32xf32>
    %c0_12 = arith.constant 0 : index
    %c0_13 = arith.constant 0 : index
    %18 = vector.load %arg7[%c0_12, %c0_13] : memref<64x32xf32, #tpu.memory_space<vmem>>, vector<64x32xf32>
    tpu.vector_store %arg7[%c0_12, %c0_13], %17 {strides = array<i32>} : memref<64x32xf32, #tpu.memory_space<vmem>>, vector<64x32xf32>,
    %19 = tpu.iota {dimensions = array<i32: 0>} : vector<64x1xi32>
    %c64_i32 = arith.constant 64 : i32
    %20 = arith.muli %arg0, %c64_i32 : i32
    %21 = vector.broadcast %20 : i32 to vector<64x1xi32>
    %22 = arith.addi %19, %21 : vector<64x1xi32>
    %c128_i32 = arith.constant 128 : i32
    %23 = vector.broadcast %c128_i32 : i32 to vector<64x1xi32>
    %24 = arith.cmpi slt, %22, %23 : vector<64x1xi32>
    %25 = arith.extui %24 : vector<64x1xi1> to vector<64x1xi32>
    %26 = arith.sitofp %25 : vector<64x1xi32> to vector<64x1xf32>
    %c64_i32_14 = arith.constant 64 : i32
    %27 = arith.muli %arg0, %c64_i32_14 : i32
    %c128_i32_15 = arith.constant 128 : i32
    %28 = arith.subi %c128_i32_15, %27 : i32
    %c64_i32_16 = arith.constant 64 : i32
    %29 = arith.minsi %c64_i32_16, %28 : i32
    %30 = arith.sitofp %29 : i32 to f32
    %31 = vector.broadcast %26 : vector<64x1xf32> to vector<64x32xf32>
    %32 = arith.mulf %17, %31 : vector<64x32xf32>
    %cst_17 = arith.constant dense<0.000000e+00> : vector<32xf32>
    %33 = vector.multi_reduction <add>, %32, %cst_17 [0] : vector<64x32xf32> to vector<32xf32>
    %34 = vector.shape_cast %33 : vector<32xf32> to vector<1x32xf32>
    %cst_18 = arith.constant 1.000000e+00 : f32
    %35 = arith.divf %cst_18, %30 : f32
    %36 = vector.broadcast %35 : f32 to vector<1x32xf32>
    %37 = arith.mulf %34, %36 : vector<1x32xf32>
    %38 = vector.broadcast %37 : vector<1x32xf32> to vector<64x32xf32>
    %39 = arith.subf %17, %38 : vector<64x32xf32>
    %40 = vector.broadcast %26 : vector<64x1xf32> to vector<64x32xf32>
    %41 = arith.mulf %39, %40 : vector<64x32xf32>
    %42 = arith.mulf %41, %41 : vector<64x32xf32>
    %cst_19 = arith.constant dense<0.000000e+00> : vector<32xf32>
    %43 = vector.multi_reduction <add>, %42, %cst_19 [0] : vector<64x32xf32> to vector<32xf32>
    %44 = vector.shape_cast %43 : vector<32xf32> to vector<1x32xf32>
    %45 = tpu.concatenate %34, %44 in 0 : vector<1x32xf32>, vector<1x32xf32> -> vector<2x32xf32>
    %46 = vector.shape_cast %45 : vector<2x32xf32> to vector<1x2x32xf32>
    %c0_20 = arith.constant 0 : index
    %c0_21 = arith.constant 0 : index
    %c0_22 = arith.constant 0 : index
    %47 = vector.load %arg8[%c0_20, %c0_21, %c0_22] : memref<1x2x32xf32, #tpu.memory_space<vmem>>, vector<1x2x32xf32>
    tpu.vector_store %arg8[%c0_20, %c0_21, %c0_22], %46 {strides = array<i32>} : memref<1x2x32xf32, #tpu.memory_space<vmem>>, vector<1x2x32xf32>,
    return
  }
  func.func @transform_0(%arg0: i32) -> (i32, i32) {
    %c0_i32 = arith.constant 0 : i32
    %c0_i32_0 = arith.constant 0 : i32
    return %arg0, %c0_i32 : i32, i32
  }
  func.func @transform_1(%arg0: i32) -> (i32, i32) {
    %c0_i32 = arith.constant 0 : i32
    %c0_i32_0 = arith.constant 0 : i32
    %c0_i32_1 = arith.constant 0 : i32
    return %c0_i32, %c0_i32_0 : i32, i32
  }
  func.func @transform_2(%arg0: i32) -> (i32, i32) {
    %c0_i32 = arith.constant 0 : i32
    %c0_i32_0 = arith.constant 0 : i32
    %c0_i32_1 = arith.constant 0 : i32
    return %c0_i32, %c0_i32_0 : i32, i32
  }
  func.func @transform_3(%arg0: i32) -> (i32, i32) {
    %c0_i32 = arith.constant 0 : i32
    %c0_i32_0 = arith.constant 0 : i32
    %c0_i32_1 = arith.constant 0 : i32
    return %c0_i32, %c0_i32_0 : i32, i32
  }
  func.func @transform_4(%arg0: i32) -> (i32, i32) {
    %c0_i32 = arith.constant 0 : i32
    %c0_i32_0 = arith.constant 0 : i32
    %c0_i32_1 = arith.constant 0 : i32
    return %c0_i32, %c0_i32_0 : i32, i32
  }
  func.func @transform_5(%arg0: i32) -> (i32, i32) {
    %c0_i32 = arith.constant 0 : i32
    %c0_i32_0 = arith.constant 0 : i32
    %c0_i32_1 = arith.constant 0 : i32
    return %c0_i32, %c0_i32_0 : i32, i32
  }
  func.func @transform_6(%arg0: i32) -> (i32, i32) {
    %c0_i32 = arith.constant 0 : i32
    %c0_i32_0 = arith.constant 0 : i32
    return %arg0, %c0_i32 : i32, i32
  }
  func.func @transform_7(%arg0: i32) -> (i32, i32, i32) {
    %c0_i32 = arith.constant 0 : i32
    %c0_i32_0 = arith.constant 0 : i32
    %c0_i32_1 = arith.constant 0 : i32
    return %arg0, %c0_i32, %c0_i32_0 : i32, i32, i32
  }
}

module attributes {stable_mosaic.version = 11 : i64} {
  func.func @_fused_conv_kernel(%arg0: i32, %arg1: memref<56x512xf32, #tpu.memory_space<vmem>>, %arg2: memref<512x64xf32, #tpu.memory_space<vmem>>, %arg3: memref<1x64xf32, #tpu.memory_space<vmem>>, %arg4: memref<1x512xf32, #tpu.memory_space<vmem>>, %arg5: memref<1x512xf32, #tpu.memory_space<vmem>>, %arg6: memref<1x1xf32, #tpu.memory_space<vmem>>, %arg7: memref<56x64xf32, #tpu.memory_space<vmem>>, %arg8: memref<1x2x64xf32, #tpu.memory_space<vmem>>) attributes {dimension_semantics = [#tpu.dimension_semantics<parallel>], iteration_bounds = array<i64: 2>, scalar_prefetch = 0 : i64, scratch_operands = 0 : i64, tpu.core_type = #tpu.core_type<tc>, window_params = [{transform_indices = @transform_0, window_bounds = array<i64: 56, 512>}, {pipeline_mode = #tpu.pipeline_mode<synchronous>, transform_indices = @transform_1, window_bounds = array<i64: 512, 64>}, {pipeline_mode = #tpu.pipeline_mode<synchronous>, transform_indices = @transform_2, window_bounds = array<i64: 1, 64>}, {pipeline_mode = #tpu.pipeline_mode<synchronous>, transform_indices = @transform_3, window_bounds = array<i64: 1, 512>}, {pipeline_mode = #tpu.pipeline_mode<synchronous>, transform_indices = @transform_4, window_bounds = array<i64: 1, 512>}, {pipeline_mode = #tpu.pipeline_mode<synchronous>, transform_indices = @transform_5, window_bounds = array<i64: 1, 1>}, {transform_indices = @transform_6, window_bounds = array<i64: 56, 64>}, {transform_indices = @transform_7, window_bounds = array<i64: 1, 2, 64>}]} {
    %c0 = arith.constant 0 : index
    %c0_0 = arith.constant 0 : index
    %0 = vector.load %arg1[%c0, %c0_0] : memref<56x512xf32, #tpu.memory_space<vmem>>, vector<56x512xf32>
    %c0_1 = arith.constant 0 : index
    %c0_2 = arith.constant 0 : index
    %1 = vector.load %arg4[%c0_1, %c0_2] : memref<1x512xf32, #tpu.memory_space<vmem>>, vector<1x512xf32>
    %2 = vector.broadcast %1 : vector<1x512xf32> to vector<56x512xf32>
    %3 = arith.mulf %0, %2 : vector<56x512xf32>
    %c0_3 = arith.constant 0 : index
    %c0_4 = arith.constant 0 : index
    %4 = vector.load %arg5[%c0_3, %c0_4] : memref<1x512xf32, #tpu.memory_space<vmem>>, vector<1x512xf32>
    %5 = vector.broadcast %4 : vector<1x512xf32> to vector<56x512xf32>
    %6 = arith.addf %3, %5 : vector<56x512xf32>
    %cst = arith.constant 0.000000e+00 : f32
    %7 = vector.broadcast %cst : f32 to vector<56x512xf32>
    %8 = arith.cmpf oge, %6, %7 : vector<56x512xf32>
    %c0_5 = arith.constant 0 : index
    %c0_6 = arith.constant 0 : index
    %9 = vector.load %arg6[%c0_5, %c0_6] : memref<1x1xf32, #tpu.memory_space<vmem>>, vector<1x1xf32>
    %10 = vector.broadcast %9 : vector<1x1xf32> to vector<56x512xf32>
    %11 = arith.mulf %10, %6 : vector<56x512xf32>
    %12 = arith.select %8, %6, %11 : vector<56x512xi1>, vector<56x512xf32>
    %c0_7 = arith.constant 0 : index
    %c0_8 = arith.constant 0 : index
    %13 = vector.load %arg2[%c0_7, %c0_8] : memref<512x64xf32, #tpu.memory_space<vmem>>, vector<512x64xf32>
    %cst_9 = arith.constant dense<0.000000e+00> : vector<56x64xf32>
    %14 = tpu.matmul %12, %13, %cst_9 {dimension_numbers = #tpu.dot_dimension_numbers<[1], [0], [0], [1], [0, 0, 1, 1], [], []>} : vector<56x512xf32>, vector<512x64xf32>, vector<56x64xf32> -> vector<56x64xf32>
    %c0_10 = arith.constant 0 : index
    %c0_11 = arith.constant 0 : index
    %15 = vector.load %arg3[%c0_10, %c0_11] : memref<1x64xf32, #tpu.memory_space<vmem>>, vector<1x64xf32>
    %16 = vector.broadcast %15 : vector<1x64xf32> to vector<56x64xf32>
    %17 = arith.addf %14, %16 : vector<56x64xf32>
    %c0_12 = arith.constant 0 : index
    %c0_13 = arith.constant 0 : index
    %18 = vector.load %arg7[%c0_12, %c0_13] : memref<56x64xf32, #tpu.memory_space<vmem>>, vector<56x64xf32>
    tpu.vector_store %arg7[%c0_12, %c0_13], %17 {strides = array<i32>} : memref<56x64xf32, #tpu.memory_space<vmem>>, vector<56x64xf32>,
    %19 = tpu.iota {dimensions = array<i32: 0>} : vector<56x1xi32>
    %c56_i32 = arith.constant 56 : i32
    %20 = arith.muli %arg0, %c56_i32 : i32
    %21 = vector.broadcast %20 : i32 to vector<56x1xi32>
    %22 = arith.addi %19, %21 : vector<56x1xi32>
    %c98_i32 = arith.constant 98 : i32
    %23 = vector.broadcast %c98_i32 : i32 to vector<56x1xi32>
    %24 = arith.cmpi slt, %22, %23 : vector<56x1xi32>
    %25 = arith.extui %24 : vector<56x1xi1> to vector<56x1xi32>
    %26 = arith.sitofp %25 : vector<56x1xi32> to vector<56x1xf32>
    %c56_i32_14 = arith.constant 56 : i32
    %27 = arith.muli %arg0, %c56_i32_14 : i32
    %c98_i32_15 = arith.constant 98 : i32
    %28 = arith.subi %c98_i32_15, %27 : i32
    %c56_i32_16 = arith.constant 56 : i32
    %29 = arith.minsi %c56_i32_16, %28 : i32
    %30 = arith.sitofp %29 : i32 to f32
    %31 = vector.broadcast %26 : vector<56x1xf32> to vector<56x64xf32>
    %32 = arith.mulf %17, %31 : vector<56x64xf32>
    %cst_17 = arith.constant dense<0.000000e+00> : vector<64xf32>
    %33 = vector.multi_reduction <add>, %32, %cst_17 [0] : vector<56x64xf32> to vector<64xf32>
    %34 = vector.shape_cast %33 : vector<64xf32> to vector<1x64xf32>
    %cst_18 = arith.constant 1.000000e+00 : f32
    %35 = arith.divf %cst_18, %30 : f32
    %36 = vector.broadcast %35 : f32 to vector<1x64xf32>
    %37 = arith.mulf %34, %36 : vector<1x64xf32>
    %38 = vector.broadcast %37 : vector<1x64xf32> to vector<56x64xf32>
    %39 = arith.subf %17, %38 : vector<56x64xf32>
    %40 = vector.broadcast %26 : vector<56x1xf32> to vector<56x64xf32>
    %41 = arith.mulf %39, %40 : vector<56x64xf32>
    %42 = arith.mulf %41, %41 : vector<56x64xf32>
    %cst_19 = arith.constant dense<0.000000e+00> : vector<64xf32>
    %43 = vector.multi_reduction <add>, %42, %cst_19 [0] : vector<56x64xf32> to vector<64xf32>
    %44 = vector.shape_cast %43 : vector<64xf32> to vector<1x64xf32>
    %45 = tpu.concatenate %34, %44 in 0 : vector<1x64xf32>, vector<1x64xf32> -> vector<2x64xf32>
    %46 = vector.shape_cast %45 : vector<2x64xf32> to vector<1x2x64xf32>
    %c0_20 = arith.constant 0 : index
    %c0_21 = arith.constant 0 : index
    %c0_22 = arith.constant 0 : index
    %47 = vector.load %arg8[%c0_20, %c0_21, %c0_22] : memref<1x2x64xf32, #tpu.memory_space<vmem>>, vector<1x2x64xf32>
    tpu.vector_store %arg8[%c0_20, %c0_21, %c0_22], %46 {strides = array<i32>} : memref<1x2x64xf32, #tpu.memory_space<vmem>>, vector<1x2x64xf32>,
    return
  }
  func.func @transform_0(%arg0: i32) -> (i32, i32) {
    %c0_i32 = arith.constant 0 : i32
    %c0_i32_0 = arith.constant 0 : i32
    return %arg0, %c0_i32 : i32, i32
  }
  func.func @transform_1(%arg0: i32) -> (i32, i32) {
    %c0_i32 = arith.constant 0 : i32
    %c0_i32_0 = arith.constant 0 : i32
    %c0_i32_1 = arith.constant 0 : i32
    return %c0_i32, %c0_i32_0 : i32, i32
  }
  func.func @transform_2(%arg0: i32) -> (i32, i32) {
    %c0_i32 = arith.constant 0 : i32
    %c0_i32_0 = arith.constant 0 : i32
    %c0_i32_1 = arith.constant 0 : i32
    return %c0_i32, %c0_i32_0 : i32, i32
  }
  func.func @transform_3(%arg0: i32) -> (i32, i32) {
    %c0_i32 = arith.constant 0 : i32
    %c0_i32_0 = arith.constant 0 : i32
    %c0_i32_1 = arith.constant 0 : i32
    return %c0_i32, %c0_i32_0 : i32, i32
  }
  func.func @transform_4(%arg0: i32) -> (i32, i32) {
    %c0_i32 = arith.constant 0 : i32
    %c0_i32_0 = arith.constant 0 : i32
    %c0_i32_1 = arith.constant 0 : i32
    return %c0_i32, %c0_i32_0 : i32, i32
  }
  func.func @transform_5(%arg0: i32) -> (i32, i32) {
    %c0_i32 = arith.constant 0 : i32
    %c0_i32_0 = arith.constant 0 : i32
    %c0_i32_1 = arith.constant 0 : i32
    return %c0_i32, %c0_i32_0 : i32, i32
  }
  func.func @transform_6(%arg0: i32) -> (i32, i32) {
    %c0_i32 = arith.constant 0 : i32
    %c0_i32_0 = arith.constant 0 : i32
    return %arg0, %c0_i32 : i32, i32
  }
  func.func @transform_7(%arg0: i32) -> (i32, i32, i32) {
    %c0_i32 = arith.constant 0 : i32
    %c0_i32_0 = arith.constant 0 : i32
    %c0_i32_1 = arith.constant 0 : i32
    return %arg0, %c0_i32, %c0_i32_0 : i32, i32, i32
  }
}

module attributes {stable_mosaic.version = 11 : i64} {
  func.func @_fused_conv_kernel(%arg0: i32, %arg1: memref<256x48xf32, #tpu.memory_space<vmem>>, %arg2: memref<48x8xf32, #tpu.memory_space<vmem>>, %arg3: memref<1x8xf32, #tpu.memory_space<vmem>>, %arg4: memref<1x48xf32, #tpu.memory_space<vmem>>, %arg5: memref<1x48xf32, #tpu.memory_space<vmem>>, %arg6: memref<1x1xf32, #tpu.memory_space<vmem>>, %arg7: memref<256x8xf32, #tpu.memory_space<vmem>>) attributes {dimension_semantics = [#tpu.dimension_semantics<parallel>], iteration_bounds = array<i64: 2>, scalar_prefetch = 0 : i64, scratch_operands = 0 : i64, tpu.core_type = #tpu.core_type<tc>, window_params = [{transform_indices = @transform_0, window_bounds = array<i64: 256, 48>}, {pipeline_mode = #tpu.pipeline_mode<synchronous>, transform_indices = @transform_1, window_bounds = array<i64: 48, 8>}, {pipeline_mode = #tpu.pipeline_mode<synchronous>, transform_indices = @transform_2, window_bounds = array<i64: 1, 8>}, {pipeline_mode = #tpu.pipeline_mode<synchronous>, transform_indices = @transform_3, window_bounds = array<i64: 1, 48>}, {pipeline_mode = #tpu.pipeline_mode<synchronous>, transform_indices = @transform_4, window_bounds = array<i64: 1, 48>}, {pipeline_mode = #tpu.pipeline_mode<synchronous>, transform_indices = @transform_5, window_bounds = array<i64: 1, 1>}, {transform_indices = @transform_6, window_bounds = array<i64: 256, 8>}]} {
    %c0 = arith.constant 0 : index
    %c0_0 = arith.constant 0 : index
    %0 = vector.load %arg1[%c0, %c0_0] : memref<256x48xf32, #tpu.memory_space<vmem>>, vector<256x48xf32>
    %c0_1 = arith.constant 0 : index
    %c0_2 = arith.constant 0 : index
    %1 = vector.load %arg2[%c0_1, %c0_2] : memref<48x8xf32, #tpu.memory_space<vmem>>, vector<48x8xf32>
    %cst = arith.constant dense<0.000000e+00> : vector<256x8xf32>
    %2 = tpu.matmul %0, %1, %cst {dimension_numbers = #tpu.dot_dimension_numbers<[1], [0], [0], [1], [0, 0, 1, 1], [], []>} : vector<256x48xf32>, vector<48x8xf32>, vector<256x8xf32> -> vector<256x8xf32>
    %c0_3 = arith.constant 0 : index
    %c0_4 = arith.constant 0 : index
    %3 = vector.load %arg3[%c0_3, %c0_4] : memref<1x8xf32, #tpu.memory_space<vmem>>, vector<1x8xf32>
    %4 = vector.broadcast %3 : vector<1x8xf32> to vector<256x8xf32>
    %5 = arith.addf %2, %4 : vector<256x8xf32>
    %c0_5 = arith.constant 0 : index
    %c0_6 = arith.constant 0 : index
    %6 = vector.load %arg7[%c0_5, %c0_6] : memref<256x8xf32, #tpu.memory_space<vmem>>, vector<256x8xf32>
    tpu.vector_store %arg7[%c0_5, %c0_6], %5 {strides = array<i32>} : memref<256x8xf32, #tpu.memory_space<vmem>>, vector<256x8xf32>,
    return
  }
  func.func @transform_0(%arg0: i32) -> (i32, i32) {
    %c0_i32 = arith.constant 0 : i32
    %c0_i32_0 = arith.constant 0 : i32
    return %arg0, %c0_i32 : i32, i32
  }
  func.func @transform_1(%arg0: i32) -> (i32, i32) {
    %c0_i32 = arith.constant 0 : i32
    %c0_i32_0 = arith.constant 0 : i32
    %c0_i32_1 = arith.constant 0 : i32
    return %c0_i32, %c0_i32_0 : i32, i32
  }
  func.func @transform_2(%arg0: i32) -> (i32, i32) {
    %c0_i32 = arith.constant 0 : i32
    %c0_i32_0 = arith.constant 0 : i32
    %c0_i32_1 = arith.constant 0 : i32
    return %c0_i32, %c0_i32_0 : i32, i32
  }
  func.func @transform_3(%arg0: i32) -> (i32, i32) {
    %c0_i32 = arith.constant 0 : i32
    %c0_i32_0 = arith.constant 0 : i32
    %c0_i32_1 = arith.constant 0 : i32
    return %c0_i32, %c0_i32_0 : i32, i32
  }
  func.func @transform_4(%arg0: i32) -> (i32, i32) {
    %c0_i32 = arith.constant 0 : i32
    %c0_i32_0 = arith.constant 0 : i32
    %c0_i32_1 = arith.constant 0 : i32
    return %c0_i32, %c0_i32_0 : i32, i32
  }
  func.func @transform_5(%arg0: i32) -> (i32, i32) {
    %c0_i32 = arith.constant 0 : i32
    %c0_i32_0 = arith.constant 0 : i32
    %c0_i32_1 = arith.constant 0 : i32
    return %c0_i32, %c0_i32_0 : i32, i32
  }
  func.func @transform_6(%arg0: i32) -> (i32, i32) {
    %c0_i32 = arith.constant 0 : i32
    %c0_i32_0 = arith.constant 0 : i32
    return %arg0, %c0_i32 : i32, i32
  }
}

module attributes {stable_mosaic.version = 11 : i64} {
  func.func @_fused_conv_kernel(%arg0: i32, %arg1: memref<64x128xf32, #tpu.memory_space<vmem>>, %arg2: memref<128x16xf32, #tpu.memory_space<vmem>>, %arg3: memref<1x16xf32, #tpu.memory_space<vmem>>, %arg4: memref<1x128xf32, #tpu.memory_space<vmem>>, %arg5: memref<1x128xf32, #tpu.memory_space<vmem>>, %arg6: memref<1x1xf32, #tpu.memory_space<vmem>>, %arg7: memref<64x16xf32, #tpu.memory_space<vmem>>, %arg8: memref<1x2x16xf32, #tpu.memory_space<vmem>>) attributes {dimension_semantics = [#tpu.dimension_semantics<parallel>], iteration_bounds = array<i64: 2>, scalar_prefetch = 0 : i64, scratch_operands = 0 : i64, tpu.core_type = #tpu.core_type<tc>, window_params = [{transform_indices = @transform_0, window_bounds = array<i64: 64, 128>}, {pipeline_mode = #tpu.pipeline_mode<synchronous>, transform_indices = @transform_1, window_bounds = array<i64: 128, 16>}, {pipeline_mode = #tpu.pipeline_mode<synchronous>, transform_indices = @transform_2, window_bounds = array<i64: 1, 16>}, {pipeline_mode = #tpu.pipeline_mode<synchronous>, transform_indices = @transform_3, window_bounds = array<i64: 1, 128>}, {pipeline_mode = #tpu.pipeline_mode<synchronous>, transform_indices = @transform_4, window_bounds = array<i64: 1, 128>}, {pipeline_mode = #tpu.pipeline_mode<synchronous>, transform_indices = @transform_5, window_bounds = array<i64: 1, 1>}, {transform_indices = @transform_6, window_bounds = array<i64: 64, 16>}, {transform_indices = @transform_7, window_bounds = array<i64: 1, 2, 16>}]} {
    %c0 = arith.constant 0 : index
    %c0_0 = arith.constant 0 : index
    %0 = vector.load %arg1[%c0, %c0_0] : memref<64x128xf32, #tpu.memory_space<vmem>>, vector<64x128xf32>
    %cst = arith.constant 0.000000e+00 : f32
    %1 = vector.broadcast %cst : f32 to vector<64x128xf32>
    %2 = arith.cmpf oge, %0, %1 : vector<64x128xf32>
    %c0_1 = arith.constant 0 : index
    %c0_2 = arith.constant 0 : index
    %3 = vector.load %arg6[%c0_1, %c0_2] : memref<1x1xf32, #tpu.memory_space<vmem>>, vector<1x1xf32>
    %4 = vector.broadcast %3 : vector<1x1xf32> to vector<64x128xf32>
    %5 = arith.mulf %4, %0 : vector<64x128xf32>
    %6 = arith.select %2, %0, %5 : vector<64x128xi1>, vector<64x128xf32>
    %c0_3 = arith.constant 0 : index
    %c0_4 = arith.constant 0 : index
    %7 = vector.load %arg2[%c0_3, %c0_4] : memref<128x16xf32, #tpu.memory_space<vmem>>, vector<128x16xf32>
    %cst_5 = arith.constant dense<0.000000e+00> : vector<64x16xf32>
    %8 = tpu.matmul %6, %7, %cst_5 {dimension_numbers = #tpu.dot_dimension_numbers<[1], [0], [0], [1], [0, 0, 1, 1], [], []>} : vector<64x128xf32>, vector<128x16xf32>, vector<64x16xf32> -> vector<64x16xf32>
    %c0_6 = arith.constant 0 : index
    %c0_7 = arith.constant 0 : index
    %9 = vector.load %arg3[%c0_6, %c0_7] : memref<1x16xf32, #tpu.memory_space<vmem>>, vector<1x16xf32>
    %10 = vector.broadcast %9 : vector<1x16xf32> to vector<64x16xf32>
    %11 = arith.addf %8, %10 : vector<64x16xf32>
    %c0_8 = arith.constant 0 : index
    %c0_9 = arith.constant 0 : index
    %12 = vector.load %arg7[%c0_8, %c0_9] : memref<64x16xf32, #tpu.memory_space<vmem>>, vector<64x16xf32>
    tpu.vector_store %arg7[%c0_8, %c0_9], %11 {strides = array<i32>} : memref<64x16xf32, #tpu.memory_space<vmem>>, vector<64x16xf32>,
    %13 = tpu.iota {dimensions = array<i32: 0>} : vector<64x1xi32>
    %c64_i32 = arith.constant 64 : i32
    %14 = arith.muli %arg0, %c64_i32 : i32
    %15 = vector.broadcast %14 : i32 to vector<64x1xi32>
    %16 = arith.addi %13, %15 : vector<64x1xi32>
    %c128_i32 = arith.constant 128 : i32
    %17 = vector.broadcast %c128_i32 : i32 to vector<64x1xi32>
    %18 = arith.cmpi slt, %16, %17 : vector<64x1xi32>
    %19 = arith.extui %18 : vector<64x1xi1> to vector<64x1xi32>
    %20 = arith.sitofp %19 : vector<64x1xi32> to vector<64x1xf32>
    %c64_i32_10 = arith.constant 64 : i32
    %21 = arith.muli %arg0, %c64_i32_10 : i32
    %c128_i32_11 = arith.constant 128 : i32
    %22 = arith.subi %c128_i32_11, %21 : i32
    %c64_i32_12 = arith.constant 64 : i32
    %23 = arith.minsi %c64_i32_12, %22 : i32
    %24 = arith.sitofp %23 : i32 to f32
    %25 = vector.broadcast %20 : vector<64x1xf32> to vector<64x16xf32>
    %26 = arith.mulf %11, %25 : vector<64x16xf32>
    %cst_13 = arith.constant dense<0.000000e+00> : vector<16xf32>
    %27 = vector.multi_reduction <add>, %26, %cst_13 [0] : vector<64x16xf32> to vector<16xf32>
    %28 = vector.shape_cast %27 : vector<16xf32> to vector<1x16xf32>
    %cst_14 = arith.constant 1.000000e+00 : f32
    %29 = arith.divf %cst_14, %24 : f32
    %30 = vector.broadcast %29 : f32 to vector<1x16xf32>
    %31 = arith.mulf %28, %30 : vector<1x16xf32>
    %32 = vector.broadcast %31 : vector<1x16xf32> to vector<64x16xf32>
    %33 = arith.subf %11, %32 : vector<64x16xf32>
    %34 = vector.broadcast %20 : vector<64x1xf32> to vector<64x16xf32>
    %35 = arith.mulf %33, %34 : vector<64x16xf32>
    %36 = arith.mulf %35, %35 : vector<64x16xf32>
    %cst_15 = arith.constant dense<0.000000e+00> : vector<16xf32>
    %37 = vector.multi_reduction <add>, %36, %cst_15 [0] : vector<64x16xf32> to vector<16xf32>
    %38 = vector.shape_cast %37 : vector<16xf32> to vector<1x16xf32>
    %39 = tpu.concatenate %28, %38 in 0 : vector<1x16xf32>, vector<1x16xf32> -> vector<2x16xf32>
    %40 = vector.shape_cast %39 : vector<2x16xf32> to vector<1x2x16xf32>
    %c0_16 = arith.constant 0 : index
    %c0_17 = arith.constant 0 : index
    %c0_18 = arith.constant 0 : index
    %41 = vector.load %arg8[%c0_16, %c0_17, %c0_18] : memref<1x2x16xf32, #tpu.memory_space<vmem>>, vector<1x2x16xf32>
    tpu.vector_store %arg8[%c0_16, %c0_17, %c0_18], %40 {strides = array<i32>} : memref<1x2x16xf32, #tpu.memory_space<vmem>>, vector<1x2x16xf32>,
    return
  }
  func.func @transform_0(%arg0: i32) -> (i32, i32) {
    %c0_i32 = arith.constant 0 : i32
    %c0_i32_0 = arith.constant 0 : i32
    return %arg0, %c0_i32 : i32, i32
  }
  func.func @transform_1(%arg0: i32) -> (i32, i32) {
    %c0_i32 = arith.constant 0 : i32
    %c0_i32_0 = arith.constant 0 : i32
    %c0_i32_1 = arith.constant 0 : i32
    return %c0_i32, %c0_i32_0 : i32, i32
  }
  func.func @transform_2(%arg0: i32) -> (i32, i32) {
    %c0_i32 = arith.constant 0 : i32
    %c0_i32_0 = arith.constant 0 : i32
    %c0_i32_1 = arith.constant 0 : i32
    return %c0_i32, %c0_i32_0 : i32, i32
  }
  func.func @transform_3(%arg0: i32) -> (i32, i32) {
    %c0_i32 = arith.constant 0 : i32
    %c0_i32_0 = arith.constant 0 : i32
    %c0_i32_1 = arith.constant 0 : i32
    return %c0_i32, %c0_i32_0 : i32, i32
  }
  func.func @transform_4(%arg0: i32) -> (i32, i32) {
    %c0_i32 = arith.constant 0 : i32
    %c0_i32_0 = arith.constant 0 : i32
    %c0_i32_1 = arith.constant 0 : i32
    return %c0_i32, %c0_i32_0 : i32, i32
  }
  func.func @transform_5(%arg0: i32) -> (i32, i32) {
    %c0_i32 = arith.constant 0 : i32
    %c0_i32_0 = arith.constant 0 : i32
    %c0_i32_1 = arith.constant 0 : i32
    return %c0_i32, %c0_i32_0 : i32, i32
  }
  func.func @transform_6(%arg0: i32) -> (i32, i32) {
    %c0_i32 = arith.constant 0 : i32
    %c0_i32_0 = arith.constant 0 : i32
    return %arg0, %c0_i32 : i32, i32
  }
  func.func @transform_7(%arg0: i32) -> (i32, i32, i32) {
    %c0_i32 = arith.constant 0 : i32
    %c0_i32_0 = arith.constant 0 : i32
    %c0_i32_1 = arith.constant 0 : i32
    return %arg0, %c0_i32, %c0_i32_0 : i32, i32, i32
  }
}

module attributes {stable_mosaic.version = 11 : i64} {
  func.func @_fused_conv_kernel(%arg0: i32, %arg1: memref<16x256xf32, #tpu.memory_space<vmem>>, %arg2: memref<256x32xf32, #tpu.memory_space<vmem>>, %arg3: memref<1x32xf32, #tpu.memory_space<vmem>>, %arg4: memref<1x256xf32, #tpu.memory_space<vmem>>, %arg5: memref<1x256xf32, #tpu.memory_space<vmem>>, %arg6: memref<1x1xf32, #tpu.memory_space<vmem>>, %arg7: memref<16x32xf32, #tpu.memory_space<vmem>>, %arg8: memref<1x2x32xf32, #tpu.memory_space<vmem>>) attributes {dimension_semantics = [#tpu.dimension_semantics<parallel>], iteration_bounds = array<i64: 2>, scalar_prefetch = 0 : i64, scratch_operands = 0 : i64, tpu.core_type = #tpu.core_type<tc>, window_params = [{transform_indices = @transform_0, window_bounds = array<i64: 16, 256>}, {pipeline_mode = #tpu.pipeline_mode<synchronous>, transform_indices = @transform_1, window_bounds = array<i64: 256, 32>}, {pipeline_mode = #tpu.pipeline_mode<synchronous>, transform_indices = @transform_2, window_bounds = array<i64: 1, 32>}, {pipeline_mode = #tpu.pipeline_mode<synchronous>, transform_indices = @transform_3, window_bounds = array<i64: 1, 256>}, {pipeline_mode = #tpu.pipeline_mode<synchronous>, transform_indices = @transform_4, window_bounds = array<i64: 1, 256>}, {pipeline_mode = #tpu.pipeline_mode<synchronous>, transform_indices = @transform_5, window_bounds = array<i64: 1, 1>}, {transform_indices = @transform_6, window_bounds = array<i64: 16, 32>}, {transform_indices = @transform_7, window_bounds = array<i64: 1, 2, 32>}]} {
    %c0 = arith.constant 0 : index
    %c0_0 = arith.constant 0 : index
    %0 = vector.load %arg1[%c0, %c0_0] : memref<16x256xf32, #tpu.memory_space<vmem>>, vector<16x256xf32>
    %c0_1 = arith.constant 0 : index
    %c0_2 = arith.constant 0 : index
    %1 = vector.load %arg4[%c0_1, %c0_2] : memref<1x256xf32, #tpu.memory_space<vmem>>, vector<1x256xf32>
    %2 = vector.broadcast %1 : vector<1x256xf32> to vector<16x256xf32>
    %3 = arith.mulf %0, %2 : vector<16x256xf32>
    %c0_3 = arith.constant 0 : index
    %c0_4 = arith.constant 0 : index
    %4 = vector.load %arg5[%c0_3, %c0_4] : memref<1x256xf32, #tpu.memory_space<vmem>>, vector<1x256xf32>
    %5 = vector.broadcast %4 : vector<1x256xf32> to vector<16x256xf32>
    %6 = arith.addf %3, %5 : vector<16x256xf32>
    %cst = arith.constant 0.000000e+00 : f32
    %7 = vector.broadcast %cst : f32 to vector<16x256xf32>
    %8 = arith.cmpf oge, %6, %7 : vector<16x256xf32>
    %c0_5 = arith.constant 0 : index
    %c0_6 = arith.constant 0 : index
    %9 = vector.load %arg6[%c0_5, %c0_6] : memref<1x1xf32, #tpu.memory_space<vmem>>, vector<1x1xf32>
    %10 = vector.broadcast %9 : vector<1x1xf32> to vector<16x256xf32>
    %11 = arith.mulf %10, %6 : vector<16x256xf32>
    %12 = arith.select %8, %6, %11 : vector<16x256xi1>, vector<16x256xf32>
    %c0_7 = arith.constant 0 : index
    %c0_8 = arith.constant 0 : index
    %13 = vector.load %arg2[%c0_7, %c0_8] : memref<256x32xf32, #tpu.memory_space<vmem>>, vector<256x32xf32>
    %cst_9 = arith.constant dense<0.000000e+00> : vector<16x32xf32>
    %14 = tpu.matmul %12, %13, %cst_9 {dimension_numbers = #tpu.dot_dimension_numbers<[1], [0], [0], [1], [0, 0, 1, 1], [], []>} : vector<16x256xf32>, vector<256x32xf32>, vector<16x32xf32> -> vector<16x32xf32>
    %c0_10 = arith.constant 0 : index
    %c0_11 = arith.constant 0 : index
    %15 = vector.load %arg3[%c0_10, %c0_11] : memref<1x32xf32, #tpu.memory_space<vmem>>, vector<1x32xf32>
    %16 = vector.broadcast %15 : vector<1x32xf32> to vector<16x32xf32>
    %17 = arith.addf %14, %16 : vector<16x32xf32>
    %c0_12 = arith.constant 0 : index
    %c0_13 = arith.constant 0 : index
    %18 = vector.load %arg7[%c0_12, %c0_13] : memref<16x32xf32, #tpu.memory_space<vmem>>, vector<16x32xf32>
    tpu.vector_store %arg7[%c0_12, %c0_13], %17 {strides = array<i32>} : memref<16x32xf32, #tpu.memory_space<vmem>>, vector<16x32xf32>,
    %19 = tpu.iota {dimensions = array<i32: 0>} : vector<16x1xi32>
    %c16_i32 = arith.constant 16 : i32
    %20 = arith.muli %arg0, %c16_i32 : i32
    %21 = vector.broadcast %20 : i32 to vector<16x1xi32>
    %22 = arith.addi %19, %21 : vector<16x1xi32>
    %c32_i32 = arith.constant 32 : i32
    %23 = vector.broadcast %c32_i32 : i32 to vector<16x1xi32>
    %24 = arith.cmpi slt, %22, %23 : vector<16x1xi32>
    %25 = arith.extui %24 : vector<16x1xi1> to vector<16x1xi32>
    %26 = arith.sitofp %25 : vector<16x1xi32> to vector<16x1xf32>
    %c16_i32_14 = arith.constant 16 : i32
    %27 = arith.muli %arg0, %c16_i32_14 : i32
    %c32_i32_15 = arith.constant 32 : i32
    %28 = arith.subi %c32_i32_15, %27 : i32
    %c16_i32_16 = arith.constant 16 : i32
    %29 = arith.minsi %c16_i32_16, %28 : i32
    %30 = arith.sitofp %29 : i32 to f32
    %31 = vector.broadcast %26 : vector<16x1xf32> to vector<16x32xf32>
    %32 = arith.mulf %17, %31 : vector<16x32xf32>
    %cst_17 = arith.constant dense<0.000000e+00> : vector<32xf32>
    %33 = vector.multi_reduction <add>, %32, %cst_17 [0] : vector<16x32xf32> to vector<32xf32>
    %34 = vector.shape_cast %33 : vector<32xf32> to vector<1x32xf32>
    %cst_18 = arith.constant 1.000000e+00 : f32
    %35 = arith.divf %cst_18, %30 : f32
    %36 = vector.broadcast %35 : f32 to vector<1x32xf32>
    %37 = arith.mulf %34, %36 : vector<1x32xf32>
    %38 = vector.broadcast %37 : vector<1x32xf32> to vector<16x32xf32>
    %39 = arith.subf %17, %38 : vector<16x32xf32>
    %40 = vector.broadcast %26 : vector<16x1xf32> to vector<16x32xf32>
    %41 = arith.mulf %39, %40 : vector<16x32xf32>
    %42 = arith.mulf %41, %41 : vector<16x32xf32>
    %cst_19 = arith.constant dense<0.000000e+00> : vector<32xf32>
    %43 = vector.multi_reduction <add>, %42, %cst_19 [0] : vector<16x32xf32> to vector<32xf32>
    %44 = vector.shape_cast %43 : vector<32xf32> to vector<1x32xf32>
    %45 = tpu.concatenate %34, %44 in 0 : vector<1x32xf32>, vector<1x32xf32> -> vector<2x32xf32>
    %46 = vector.shape_cast %45 : vector<2x32xf32> to vector<1x2x32xf32>
    %c0_20 = arith.constant 0 : index
    %c0_21 = arith.constant 0 : index
    %c0_22 = arith.constant 0 : index
    %47 = vector.load %arg8[%c0_20, %c0_21, %c0_22] : memref<1x2x32xf32, #tpu.memory_space<vmem>>, vector<1x2x32xf32>
    tpu.vector_store %arg8[%c0_20, %c0_21, %c0_22], %46 {strides = array<i32>} : memref<1x2x32xf32, #tpu.memory_space<vmem>>, vector<1x2x32xf32>,
    return
  }
  func.func @transform_0(%arg0: i32) -> (i32, i32) {
    %c0_i32 = arith.constant 0 : i32
    %c0_i32_0 = arith.constant 0 : i32
    return %arg0, %c0_i32 : i32, i32
  }
  func.func @transform_1(%arg0: i32) -> (i32, i32) {
    %c0_i32 = arith.constant 0 : i32
    %c0_i32_0 = arith.constant 0 : i32
    %c0_i32_1 = arith.constant 0 : i32
    return %c0_i32, %c0_i32_0 : i32, i32
  }
  func.func @transform_2(%arg0: i32) -> (i32, i32) {
    %c0_i32 = arith.constant 0 : i32
    %c0_i32_0 = arith.constant 0 : i32
    %c0_i32_1 = arith.constant 0 : i32
    return %c0_i32, %c0_i32_0 : i32, i32
  }
  func.func @transform_3(%arg0: i32) -> (i32, i32) {
    %c0_i32 = arith.constant 0 : i32
    %c0_i32_0 = arith.constant 0 : i32
    %c0_i32_1 = arith.constant 0 : i32
    return %c0_i32, %c0_i32_0 : i32, i32
  }
  func.func @transform_4(%arg0: i32) -> (i32, i32) {
    %c0_i32 = arith.constant 0 : i32
    %c0_i32_0 = arith.constant 0 : i32
    %c0_i32_1 = arith.constant 0 : i32
    return %c0_i32, %c0_i32_0 : i32, i32
  }
  func.func @transform_5(%arg0: i32) -> (i32, i32) {
    %c0_i32 = arith.constant 0 : i32
    %c0_i32_0 = arith.constant 0 : i32
    %c0_i32_1 = arith.constant 0 : i32
    return %c0_i32, %c0_i32_0 : i32, i32
  }
  func.func @transform_6(%arg0: i32) -> (i32, i32) {
    %c0_i32 = arith.constant 0 : i32
    %c0_i32_0 = arith.constant 0 : i32
    return %arg0, %c0_i32 : i32, i32
  }
  func.func @transform_7(%arg0: i32) -> (i32, i32, i32) {
    %c0_i32 = arith.constant 0 : i32
    %c0_i32_0 = arith.constant 0 : i32
    %c0_i32_1 = arith.constant 0 : i32
    return %arg0, %c0_i32, %c0_i32_0 : i32, i32, i32
  }
}

module attributes {stable_mosaic.version = 11 : i64} {
  func.func @_fused_conv_kernel(%arg0: i32, %arg1: memref<16x512xf32, #tpu.memory_space<vmem>>, %arg2: memref<512x64xf32, #tpu.memory_space<vmem>>, %arg3: memref<1x64xf32, #tpu.memory_space<vmem>>, %arg4: memref<1x512xf32, #tpu.memory_space<vmem>>, %arg5: memref<1x512xf32, #tpu.memory_space<vmem>>, %arg6: memref<1x1xf32, #tpu.memory_space<vmem>>, %arg7: memref<16x64xf32, #tpu.memory_space<vmem>>, %arg8: memref<1x2x64xf32, #tpu.memory_space<vmem>>) attributes {dimension_semantics = [#tpu.dimension_semantics<parallel>], iteration_bounds = array<i64: 2>, scalar_prefetch = 0 : i64, scratch_operands = 0 : i64, tpu.core_type = #tpu.core_type<tc>, window_params = [{transform_indices = @transform_0, window_bounds = array<i64: 16, 512>}, {pipeline_mode = #tpu.pipeline_mode<synchronous>, transform_indices = @transform_1, window_bounds = array<i64: 512, 64>}, {pipeline_mode = #tpu.pipeline_mode<synchronous>, transform_indices = @transform_2, window_bounds = array<i64: 1, 64>}, {pipeline_mode = #tpu.pipeline_mode<synchronous>, transform_indices = @transform_3, window_bounds = array<i64: 1, 512>}, {pipeline_mode = #tpu.pipeline_mode<synchronous>, transform_indices = @transform_4, window_bounds = array<i64: 1, 512>}, {pipeline_mode = #tpu.pipeline_mode<synchronous>, transform_indices = @transform_5, window_bounds = array<i64: 1, 1>}, {transform_indices = @transform_6, window_bounds = array<i64: 16, 64>}, {transform_indices = @transform_7, window_bounds = array<i64: 1, 2, 64>}]} {
    %c0 = arith.constant 0 : index
    %c0_0 = arith.constant 0 : index
    %0 = vector.load %arg1[%c0, %c0_0] : memref<16x512xf32, #tpu.memory_space<vmem>>, vector<16x512xf32>
    %c0_1 = arith.constant 0 : index
    %c0_2 = arith.constant 0 : index
    %1 = vector.load %arg4[%c0_1, %c0_2] : memref<1x512xf32, #tpu.memory_space<vmem>>, vector<1x512xf32>
    %2 = vector.broadcast %1 : vector<1x512xf32> to vector<16x512xf32>
    %3 = arith.mulf %0, %2 : vector<16x512xf32>
    %c0_3 = arith.constant 0 : index
    %c0_4 = arith.constant 0 : index
    %4 = vector.load %arg5[%c0_3, %c0_4] : memref<1x512xf32, #tpu.memory_space<vmem>>, vector<1x512xf32>
    %5 = vector.broadcast %4 : vector<1x512xf32> to vector<16x512xf32>
    %6 = arith.addf %3, %5 : vector<16x512xf32>
    %cst = arith.constant 0.000000e+00 : f32
    %7 = vector.broadcast %cst : f32 to vector<16x512xf32>
    %8 = arith.cmpf oge, %6, %7 : vector<16x512xf32>
    %c0_5 = arith.constant 0 : index
    %c0_6 = arith.constant 0 : index
    %9 = vector.load %arg6[%c0_5, %c0_6] : memref<1x1xf32, #tpu.memory_space<vmem>>, vector<1x1xf32>
    %10 = vector.broadcast %9 : vector<1x1xf32> to vector<16x512xf32>
    %11 = arith.mulf %10, %6 : vector<16x512xf32>
    %12 = arith.select %8, %6, %11 : vector<16x512xi1>, vector<16x512xf32>
    %c0_7 = arith.constant 0 : index
    %c0_8 = arith.constant 0 : index
    %13 = vector.load %arg2[%c0_7, %c0_8] : memref<512x64xf32, #tpu.memory_space<vmem>>, vector<512x64xf32>
    %cst_9 = arith.constant dense<0.000000e+00> : vector<16x64xf32>
    %14 = tpu.matmul %12, %13, %cst_9 {dimension_numbers = #tpu.dot_dimension_numbers<[1], [0], [0], [1], [0, 0, 1, 1], [], []>} : vector<16x512xf32>, vector<512x64xf32>, vector<16x64xf32> -> vector<16x64xf32>
    %c0_10 = arith.constant 0 : index
    %c0_11 = arith.constant 0 : index
    %15 = vector.load %arg3[%c0_10, %c0_11] : memref<1x64xf32, #tpu.memory_space<vmem>>, vector<1x64xf32>
    %16 = vector.broadcast %15 : vector<1x64xf32> to vector<16x64xf32>
    %17 = arith.addf %14, %16 : vector<16x64xf32>
    %c0_12 = arith.constant 0 : index
    %c0_13 = arith.constant 0 : index
    %18 = vector.load %arg7[%c0_12, %c0_13] : memref<16x64xf32, #tpu.memory_space<vmem>>, vector<16x64xf32>
    tpu.vector_store %arg7[%c0_12, %c0_13], %17 {strides = array<i32>} : memref<16x64xf32, #tpu.memory_space<vmem>>, vector<16x64xf32>,
    %19 = tpu.iota {dimensions = array<i32: 0>} : vector<16x1xi32>
    %c16_i32 = arith.constant 16 : i32
    %20 = arith.muli %arg0, %c16_i32 : i32
    %21 = vector.broadcast %20 : i32 to vector<16x1xi32>
    %22 = arith.addi %19, %21 : vector<16x1xi32>
    %c18_i32 = arith.constant 18 : i32
    %23 = vector.broadcast %c18_i32 : i32 to vector<16x1xi32>
    %24 = arith.cmpi slt, %22, %23 : vector<16x1xi32>
    %25 = arith.extui %24 : vector<16x1xi1> to vector<16x1xi32>
    %26 = arith.sitofp %25 : vector<16x1xi32> to vector<16x1xf32>
    %c16_i32_14 = arith.constant 16 : i32
    %27 = arith.muli %arg0, %c16_i32_14 : i32
    %c18_i32_15 = arith.constant 18 : i32
    %28 = arith.subi %c18_i32_15, %27 : i32
    %c16_i32_16 = arith.constant 16 : i32
    %29 = arith.minsi %c16_i32_16, %28 : i32
    %30 = arith.sitofp %29 : i32 to f32
    %31 = vector.broadcast %26 : vector<16x1xf32> to vector<16x64xf32>
    %32 = arith.mulf %17, %31 : vector<16x64xf32>
    %cst_17 = arith.constant dense<0.000000e+00> : vector<64xf32>
    %33 = vector.multi_reduction <add>, %32, %cst_17 [0] : vector<16x64xf32> to vector<64xf32>
    %34 = vector.shape_cast %33 : vector<64xf32> to vector<1x64xf32>
    %cst_18 = arith.constant 1.000000e+00 : f32
    %35 = arith.divf %cst_18, %30 : f32
    %36 = vector.broadcast %35 : f32 to vector<1x64xf32>
    %37 = arith.mulf %34, %36 : vector<1x64xf32>
    %38 = vector.broadcast %37 : vector<1x64xf32> to vector<16x64xf32>
    %39 = arith.subf %17, %38 : vector<16x64xf32>
    %40 = vector.broadcast %26 : vector<16x1xf32> to vector<16x64xf32>
    %41 = arith.mulf %39, %40 : vector<16x64xf32>
    %42 = arith.mulf %41, %41 : vector<16x64xf32>
    %cst_19 = arith.constant dense<0.000000e+00> : vector<64xf32>
    %43 = vector.multi_reduction <add>, %42, %cst_19 [0] : vector<16x64xf32> to vector<64xf32>
    %44 = vector.shape_cast %43 : vector<64xf32> to vector<1x64xf32>
    %45 = tpu.concatenate %34, %44 in 0 : vector<1x64xf32>, vector<1x64xf32> -> vector<2x64xf32>
    %46 = vector.shape_cast %45 : vector<2x64xf32> to vector<1x2x64xf32>
    %c0_20 = arith.constant 0 : index
    %c0_21 = arith.constant 0 : index
    %c0_22 = arith.constant 0 : index
    %47 = vector.load %arg8[%c0_20, %c0_21, %c0_22] : memref<1x2x64xf32, #tpu.memory_space<vmem>>, vector<1x2x64xf32>
    tpu.vector_store %arg8[%c0_20, %c0_21, %c0_22], %46 {strides = array<i32>} : memref<1x2x64xf32, #tpu.memory_space<vmem>>, vector<1x2x64xf32>,
    return
  }
  func.func @transform_0(%arg0: i32) -> (i32, i32) {
    %c0_i32 = arith.constant 0 : i32
    %c0_i32_0 = arith.constant 0 : i32
    return %arg0, %c0_i32 : i32, i32
  }
  func.func @transform_1(%arg0: i32) -> (i32, i32) {
    %c0_i32 = arith.constant 0 : i32
    %c0_i32_0 = arith.constant 0 : i32
    %c0_i32_1 = arith.constant 0 : i32
    return %c0_i32, %c0_i32_0 : i32, i32
  }
  func.func @transform_2(%arg0: i32) -> (i32, i32) {
    %c0_i32 = arith.constant 0 : i32
    %c0_i32_0 = arith.constant 0 : i32
    %c0_i32_1 = arith.constant 0 : i32
    return %c0_i32, %c0_i32_0 : i32, i32
  }
  func.func @transform_3(%arg0: i32) -> (i32, i32) {
    %c0_i32 = arith.constant 0 : i32
    %c0_i32_0 = arith.constant 0 : i32
    %c0_i32_1 = arith.constant 0 : i32
    return %c0_i32, %c0_i32_0 : i32, i32
  }
  func.func @transform_4(%arg0: i32) -> (i32, i32) {
    %c0_i32 = arith.constant 0 : i32
    %c0_i32_0 = arith.constant 0 : i32
    %c0_i32_1 = arith.constant 0 : i32
    return %c0_i32, %c0_i32_0 : i32, i32
  }
  func.func @transform_5(%arg0: i32) -> (i32, i32) {
    %c0_i32 = arith.constant 0 : i32
    %c0_i32_0 = arith.constant 0 : i32
    %c0_i32_1 = arith.constant 0 : i32
    return %c0_i32, %c0_i32_0 : i32, i32
  }
  func.func @transform_6(%arg0: i32) -> (i32, i32) {
    %c0_i32 = arith.constant 0 : i32
    %c0_i32_0 = arith.constant 0 : i32
    return %arg0, %c0_i32 : i32, i32
  }
  func.func @transform_7(%arg0: i32) -> (i32, i32, i32) {
    %c0_i32 = arith.constant 0 : i32
    %c0_i32_0 = arith.constant 0 : i32
    %c0_i32_1 = arith.constant 0 : i32
    return %arg0, %c0_i32, %c0_i32_0 : i32, i32, i32
  }
}

module attributes {stable_mosaic.version = 11 : i64} {
  func.func @_fused_conv_kernel(%arg0: i32, %arg1: memref<40x1024xf32, #tpu.memory_space<vmem>>, %arg2: memref<1024x1xf32, #tpu.memory_space<vmem>>, %arg3: memref<1x1xf32, #tpu.memory_space<vmem>>, %arg4: memref<1x1024xf32, #tpu.memory_space<vmem>>, %arg5: memref<1x1024xf32, #tpu.memory_space<vmem>>, %arg6: memref<1x1xf32, #tpu.memory_space<vmem>>, %arg7: memref<40x1xf32, #tpu.memory_space<vmem>>) attributes {dimension_semantics = [#tpu.dimension_semantics<parallel>], iteration_bounds = array<i64: 2>, scalar_prefetch = 0 : i64, scratch_operands = 0 : i64, tpu.core_type = #tpu.core_type<tc>, window_params = [{transform_indices = @transform_0, window_bounds = array<i64: 40, 1024>}, {pipeline_mode = #tpu.pipeline_mode<synchronous>, transform_indices = @transform_1, window_bounds = array<i64: 1024, 1>}, {pipeline_mode = #tpu.pipeline_mode<synchronous>, transform_indices = @transform_2, window_bounds = array<i64: 1, 1>}, {pipeline_mode = #tpu.pipeline_mode<synchronous>, transform_indices = @transform_3, window_bounds = array<i64: 1, 1024>}, {pipeline_mode = #tpu.pipeline_mode<synchronous>, transform_indices = @transform_4, window_bounds = array<i64: 1, 1024>}, {pipeline_mode = #tpu.pipeline_mode<synchronous>, transform_indices = @transform_5, window_bounds = array<i64: 1, 1>}, {transform_indices = @transform_6, window_bounds = array<i64: 40, 1>}]} {
    %c0 = arith.constant 0 : index
    %c0_0 = arith.constant 0 : index
    %0 = vector.load %arg1[%c0, %c0_0] : memref<40x1024xf32, #tpu.memory_space<vmem>>, vector<40x1024xf32>
    %c0_1 = arith.constant 0 : index
    %c0_2 = arith.constant 0 : index
    %1 = vector.load %arg4[%c0_1, %c0_2] : memref<1x1024xf32, #tpu.memory_space<vmem>>, vector<1x1024xf32>
    %2 = vector.broadcast %1 : vector<1x1024xf32> to vector<40x1024xf32>
    %3 = arith.mulf %0, %2 : vector<40x1024xf32>
    %c0_3 = arith.constant 0 : index
    %c0_4 = arith.constant 0 : index
    %4 = vector.load %arg5[%c0_3, %c0_4] : memref<1x1024xf32, #tpu.memory_space<vmem>>, vector<1x1024xf32>
    %5 = vector.broadcast %4 : vector<1x1024xf32> to vector<40x1024xf32>
    %6 = arith.addf %3, %5 : vector<40x1024xf32>
    %cst = arith.constant 0.000000e+00 : f32
    %7 = vector.broadcast %cst : f32 to vector<40x1024xf32>
    %8 = arith.cmpf oge, %6, %7 : vector<40x1024xf32>
    %c0_5 = arith.constant 0 : index
    %c0_6 = arith.constant 0 : index
    %9 = vector.load %arg6[%c0_5, %c0_6] : memref<1x1xf32, #tpu.memory_space<vmem>>, vector<1x1xf32>
    %10 = vector.broadcast %9 : vector<1x1xf32> to vector<40x1024xf32>
    %11 = arith.mulf %10, %6 : vector<40x1024xf32>
    %12 = arith.select %8, %6, %11 : vector<40x1024xi1>, vector<40x1024xf32>
    %c0_7 = arith.constant 0 : index
    %c0_8 = arith.constant 0 : index
    %13 = vector.load %arg2[%c0_7, %c0_8] : memref<1024x1xf32, #tpu.memory_space<vmem>>, vector<1024x1xf32>
    %cst_9 = arith.constant dense<0.000000e+00> : vector<40x1xf32>
    %14 = tpu.matmul %12, %13, %cst_9 {dimension_numbers = #tpu.dot_dimension_numbers<[1], [0], [0], [1], [0, 0, 1, 1], [], []>} : vector<40x1024xf32>, vector<1024x1xf32>, vector<40x1xf32> -> vector<40x1xf32>
    %c0_10 = arith.constant 0 : index
    %c0_11 = arith.constant 0 : index
    %15 = vector.load %arg3[%c0_10, %c0_11] : memref<1x1xf32, #tpu.memory_space<vmem>>, vector<1x1xf32>
    %16 = vector.broadcast %15 : vector<1x1xf32> to vector<40x1xf32>
    %17 = arith.addf %14, %16 : vector<40x1xf32>
    %c0_12 = arith.constant 0 : index
    %c0_13 = arith.constant 0 : index
    %18 = vector.load %arg7[%c0_12, %c0_13] : memref<40x1xf32, #tpu.memory_space<vmem>>, vector<40x1xf32>
    tpu.vector_store %arg7[%c0_12, %c0_13], %17 {strides = array<i32>} : memref<40x1xf32, #tpu.memory_space<vmem>>, vector<40x1xf32>,
    return
  }
  func.func @transform_0(%arg0: i32) -> (i32, i32) {
    %c0_i32 = arith.constant 0 : i32
    %c0_i32_0 = arith.constant 0 : i32
    return %arg0, %c0_i32 : i32, i32
  }
  func.func @transform_1(%arg0: i32) -> (i32, i32) {
    %c0_i32 = arith.constant 0 : i32
    %c0_i32_0 = arith.constant 0 : i32
    %c0_i32_1 = arith.constant 0 : i32
    return %c0_i32, %c0_i32_0 : i32, i32
  }
  func.func @transform_2(%arg0: i32) -> (i32, i32) {
    %c0_i32 = arith.constant 0 : i32
    %c0_i32_0 = arith.constant 0 : i32
    %c0_i32_1 = arith.constant 0 : i32
    return %c0_i32, %c0_i32_0 : i32, i32
  }
  func.func @transform_3(%arg0: i32) -> (i32, i32) {
    %c0_i32 = arith.constant 0 : i32
    %c0_i32_0 = arith.constant 0 : i32
    %c0_i32_1 = arith.constant 0 : i32
    return %c0_i32, %c0_i32_0 : i32, i32
  }
  func.func @transform_4(%arg0: i32) -> (i32, i32) {
    %c0_i32 = arith.constant 0 : i32
    %c0_i32_0 = arith.constant 0 : i32
    %c0_i32_1 = arith.constant 0 : i32
    return %c0_i32, %c0_i32_0 : i32, i32
  }
  func.func @transform_5(%arg0: i32) -> (i32, i32) {
    %c0_i32 = arith.constant 0 : i32
    %c0_i32_0 = arith.constant 0 : i32
    %c0_i32_1 = arith.constant 0 : i32
    return %c0_i32, %c0_i32_0 : i32, i32
  }
  func.func @transform_6(%arg0: i32) -> (i32, i32) {
    %c0_i32 = arith.constant 0 : i32
    %c0_i32_0 = arith.constant 0 : i32
    return %arg0, %c0_i32 : i32, i32
  }
}

module attributes {stable_mosaic.version = 11 : i64} {
  func.func @_fused_conv_kernel(%arg0: i32, %arg1: memref<8x1024xf32, #tpu.memory_space<vmem>>, %arg2: memref<1024x1xf32, #tpu.memory_space<vmem>>, %arg3: memref<1x1xf32, #tpu.memory_space<vmem>>, %arg4: memref<1x1024xf32, #tpu.memory_space<vmem>>, %arg5: memref<1x1024xf32, #tpu.memory_space<vmem>>, %arg6: memref<1x1xf32, #tpu.memory_space<vmem>>, %arg7: memref<8x1xf32, #tpu.memory_space<vmem>>) attributes {dimension_semantics = [#tpu.dimension_semantics<parallel>], iteration_bounds = array<i64: 1>, scalar_prefetch = 0 : i64, scratch_operands = 0 : i64, tpu.core_type = #tpu.core_type<tc>, window_params = [{transform_indices = @transform_0, window_bounds = array<i64: 8, 1024>}, {pipeline_mode = #tpu.pipeline_mode<synchronous>, transform_indices = @transform_1, window_bounds = array<i64: 1024, 1>}, {pipeline_mode = #tpu.pipeline_mode<synchronous>, transform_indices = @transform_2, window_bounds = array<i64: 1, 1>}, {pipeline_mode = #tpu.pipeline_mode<synchronous>, transform_indices = @transform_3, window_bounds = array<i64: 1, 1024>}, {pipeline_mode = #tpu.pipeline_mode<synchronous>, transform_indices = @transform_4, window_bounds = array<i64: 1, 1024>}, {pipeline_mode = #tpu.pipeline_mode<synchronous>, transform_indices = @transform_5, window_bounds = array<i64: 1, 1>}, {transform_indices = @transform_6, window_bounds = array<i64: 8, 1>}]} {
    %c0 = arith.constant 0 : index
    %c0_0 = arith.constant 0 : index
    %0 = vector.load %arg1[%c0, %c0_0] : memref<8x1024xf32, #tpu.memory_space<vmem>>, vector<8x1024xf32>
    %c0_1 = arith.constant 0 : index
    %c0_2 = arith.constant 0 : index
    %1 = vector.load %arg4[%c0_1, %c0_2] : memref<1x1024xf32, #tpu.memory_space<vmem>>, vector<1x1024xf32>
    %2 = vector.broadcast %1 : vector<1x1024xf32> to vector<8x1024xf32>
    %3 = arith.mulf %0, %2 : vector<8x1024xf32>
    %c0_3 = arith.constant 0 : index
    %c0_4 = arith.constant 0 : index
    %4 = vector.load %arg5[%c0_3, %c0_4] : memref<1x1024xf32, #tpu.memory_space<vmem>>, vector<1x1024xf32>
    %5 = vector.broadcast %4 : vector<1x1024xf32> to vector<8x1024xf32>
    %6 = arith.addf %3, %5 : vector<8x1024xf32>
    %cst = arith.constant 0.000000e+00 : f32
    %7 = vector.broadcast %cst : f32 to vector<8x1024xf32>
    %8 = arith.cmpf oge, %6, %7 : vector<8x1024xf32>
    %c0_5 = arith.constant 0 : index
    %c0_6 = arith.constant 0 : index
    %9 = vector.load %arg6[%c0_5, %c0_6] : memref<1x1xf32, #tpu.memory_space<vmem>>, vector<1x1xf32>
    %10 = vector.broadcast %9 : vector<1x1xf32> to vector<8x1024xf32>
    %11 = arith.mulf %10, %6 : vector<8x1024xf32>
    %12 = arith.select %8, %6, %11 : vector<8x1024xi1>, vector<8x1024xf32>
    %c0_7 = arith.constant 0 : index
    %c0_8 = arith.constant 0 : index
    %13 = vector.load %arg2[%c0_7, %c0_8] : memref<1024x1xf32, #tpu.memory_space<vmem>>, vector<1024x1xf32>
    %cst_9 = arith.constant dense<0.000000e+00> : vector<8x1xf32>
    %14 = tpu.matmul %12, %13, %cst_9 {dimension_numbers = #tpu.dot_dimension_numbers<[1], [0], [0], [1], [0, 0, 1, 1], [], []>} : vector<8x1024xf32>, vector<1024x1xf32>, vector<8x1xf32> -> vector<8x1xf32>
    %c0_10 = arith.constant 0 : index
    %c0_11 = arith.constant 0 : index
    %15 = vector.load %arg3[%c0_10, %c0_11] : memref<1x1xf32, #tpu.memory_space<vmem>>, vector<1x1xf32>
    %16 = vector.broadcast %15 : vector<1x1xf32> to vector<8x1xf32>
    %17 = arith.addf %14, %16 : vector<8x1xf32>
    %c0_12 = arith.constant 0 : index
    %c0_13 = arith.constant 0 : index
    %18 = vector.load %arg7[%c0_12, %c0_13] : memref<8x1xf32, #tpu.memory_space<vmem>>, vector<8x1xf32>
    tpu.vector_store %arg7[%c0_12, %c0_13], %17 {strides = array<i32>} : memref<8x1xf32, #tpu.memory_space<vmem>>, vector<8x1xf32>,
    return
  }
  func.func @transform_0(%arg0: i32) -> (i32, i32) {
    %c0_i32 = arith.constant 0 : i32
    %c0_i32_0 = arith.constant 0 : i32
    return %arg0, %c0_i32 : i32, i32
  }
  func.func @transform_1(%arg0: i32) -> (i32, i32) {
    %c0_i32 = arith.constant 0 : i32
    %c0_i32_0 = arith.constant 0 : i32
    %c0_i32_1 = arith.constant 0 : i32
    return %c0_i32, %c0_i32_0 : i32, i32
  }
  func.func @transform_2(%arg0: i32) -> (i32, i32) {
    %c0_i32 = arith.constant 0 : i32
    %c0_i32_0 = arith.constant 0 : i32
    %c0_i32_1 = arith.constant 0 : i32
    return %c0_i32, %c0_i32_0 : i32, i32
  }
  func.func @transform_3(%arg0: i32) -> (i32, i32) {
    %c0_i32 = arith.constant 0 : i32
    %c0_i32_0 = arith.constant 0 : i32
    %c0_i32_1 = arith.constant 0 : i32
    return %c0_i32, %c0_i32_0 : i32, i32
  }
  func.func @transform_4(%arg0: i32) -> (i32, i32) {
    %c0_i32 = arith.constant 0 : i32
    %c0_i32_0 = arith.constant 0 : i32
    %c0_i32_1 = arith.constant 0 : i32
    return %c0_i32, %c0_i32_0 : i32, i32
  }
  func.func @transform_5(%arg0: i32) -> (i32, i32) {
    %c0_i32 = arith.constant 0 : i32
    %c0_i32_0 = arith.constant 0 : i32
    %c0_i32_1 = arith.constant 0 : i32
    return %c0_i32, %c0_i32_0 : i32, i32
  }
  func.func @transform_6(%arg0: i32) -> (i32, i32) {
    %c0_i32 = arith.constant 0 : i32
    %c0_i32_0 = arith.constant 0 : i32
    return %arg0, %c0_i32 : i32, i32
  }
}

</mosaic_0001>

<bundles_post_ra>
// kernel: _lambda_.10
= control target key start
LH: loop header
LB: loop body
LE: loop exit
PB: predicated region body
PF: predicated region fallthrough
CT: control target
= control target key end

     0   :  { %s2220_s21 = smov 0   ;;  %s2911_s0 = inlined_call_operand.vmem [shape: f32[2048,48], index: 0, kind: input, shape index: {}]   ;;  %s2912_s1 = inlined_call_operand.vmem [shape: f32[48,8], index: 1, kind: input, shape index: {}]   ;;  %s2913_s2 = inlined_call_operand.vmem [shape: f32[1,8], index: 2, kind: input, shape index: {}]   ;;  %s2914_s3 = inlined_call_operand.vmem [shape: f32[1,48], index: 3, kind: input, shape index: {}]   ;;  %s2915_s4 = inlined_call_operand.vmem [shape: f32[1,48], index: 4, kind: input, shape index: {}]   ;;  %s2916_s5 = inlined_call_operand.<no memory space> [shape: f32[1,1], index: 5, kind: input, shape index: {}]   ;;  %s2917_s6 = inlined_call_operand.vmem [shape: f32[2048,8], index: 6, kind: output, shape index: {}]  }
   0x1 LB: > { %s1673_s3 = sadd.s32 4294967295, %s2183_s21   ;;  %p1677_p0 = scmp.ge.s32.totalorder %s2183_s21, 1  ;;  %s2183_s21 = sphi %s2220_s21, %s18_s21  }
   0x2   : > { %p215_p1 = scmp.lt.s32.totalorder %s2183_s21, 3 }
   0x4   : > { %p216_p2 = pnand %p1677_p0, %p215_p1 }
   0x5   : > { %v385_v0 = vld [vmem:[%s2912_s1] sm:$0xff] (!%p216_p2)  ;;  %v386_v1 = vld [vmem:[%s2912_s1 + $0x8] sm:$0xff] (!%p216_p2)  ;;  %v387_v2 = vld [vmem:[%s2912_s1 + $0x10] sm:$0xff] (!%p216_p2)  ;;  %s1678_s26 = sshll.u32 (!%p216_p2), %s1673_s3, 7  ;;  %vm398_vm0 = vcmask (!%p216_p2), 392192   ;;  %vm1488_vm1 = vcmask (!%p216_p2), 64512  }
   0x6   : > { %219 = sbr.rel (%p216_p2) target bundleno = 361 (0x169), region = 44  ;;  %v2151_v3 = vpack.c.bf16 (!%p216_p2), %v386_v1, %v385_v0  ;;  %v388_v4 = vld [vmem:[%s2912_s1 + $0x18] sm:$0xff] (!%p216_p2)  ;;  %p246_p3 = scmp.lt.s32.totalorder (!%p216_p2), %s1678_s26, 255  ;;  %v389_v6 = vld [vmem:[%s2912_s1 + $0x20] sm:$0xff] (!%p216_p2)  ;;  %v390_v7 = vld [vmem:[%s2912_s1 + $0x28] sm:$0xff] (!%p216_p2) }
   0x7   : > { %v2155_v5 = vpack.c.bf16 (!%p216_p2), %v388_v4, %v387_v2  ;;  %v2159_v8 = vpack.c.bf16 (!%p216_p2), %v390_v7, %v389_v6 }
   0x8   : > { %2152 = vmatprep.subr.bf16.mxu0 (!%p216_p2), %v2151_v3  ;;  %2163 = vmatprep.subr.bf16.mxu1 (!%p216_p2), %v2151_v3 }
   0x9   : > { %2154 = vmatpush3.bf16.msra.mxu0 (!%p216_p2), %v2151_v3  ;;  %2166 = vmatpush3.bf16.msra.mxu1 (!%p216_p2), %v2151_v3 }
   0xa   : > { %2156 = vmatprep.subr.bf16.mxu0 (!%p216_p2), %v2155_v5  ;;  %2164 = vmatprep.subr.bf16.mxu1 (!%p216_p2), %v2155_v5 }
   0xd   : > { %s2919_s26 = smov (!%p246_p3, %s1678_s26), 255  ;;  %2158 = vmatpush3.bf16.msra.mxu0 %v2155_v5  ;;  %2167 = vmatpush3.bf16.msra.mxu1 %v2155_v5 }
   0xe   : > { %s1679_s9 = sshll.u32 %s2919_s26, 3  ;;  %2160 = vmatprep.subr.bf16.mxu0 %v2159_v8  ;;  %2165 = vmatprep.subr.bf16.mxu1 %v2159_v8 }
   0xf   : > { %s2254_s12 = scalar_lea.vmem %s2911_s0, %s1679_s9  ;;  %s2522_s17 = scalar_lea.vmem %s2917_s6, %s1679_s9 }
  0x10   : > { %v257_v9 = vld [vmem:[%s2254_s12] sm:$0xff]  ;;  %v258_v11 = vld [vmem:[%s2254_s12 + $0x8] sm:$0xff]  ;;  %v259_v13 = vld [vmem:[%s2254_s12 + $0x10] sm:$0xff] }
  0x11   : > { %v321_v10 = vld [vmem:[%s2254_s12 + $0x200] sm:$0xff]  ;;  %1959 = vmatprep.mubr.msk.f32.mxu0 %vm398_vm0, %v257_v9  ;;  %2162 = vmatpush3.bf16.msra.mxu0 %v2159_v8  ;;  %v322_v12 = vld [vmem:[%s2254_s12 + $0x208] sm:$0xff]  ;;  %v323_v14 = vld [vmem:[%s2254_s12 + $0x210] sm:$0xff] }
  0x12   : > { %2055 = vmatprep.mubr.msk.f32.mxu1 %vm398_vm0, %v321_v10  ;;  %2168 = vmatpush3.bf16.msra.mxu1 %v2159_v8  ;;  %v260_v15 = vld [vmem:[%s2254_s12 + $0x18] sm:$0xff]  ;;  %v261_v17 = vld [vmem:[%s2254_s12 + $0x20] sm:$0xff]  ;;  %v262_v19 = vld [vmem:[%s2254_s12 + $0x28] sm:$0xff] }
  0x13   : > { %v324_v16 = vld [vmem:[%s2254_s12 + $0x218] sm:$0xff]  ;;  %v325_v18 = vld [vmem:[%s2254_s12 + $0x220] sm:$0xff]  ;;  %v326_v20 = vld [vmem:[%s2254_s12 + $0x228] sm:$0xff] }
  0x14   : > { %1960 = vmatmul.mubr.msk.f32.vlgmr.msra.gmra.mrb[0].mxu0 %vm398_vm0, %v258_v11  ;;  %v263_v21 = vld [vmem:[%s2254_s12 + $0x30] sm:$0xff]  ;;  %v264_v23 = vld [vmem:[%s2254_s12 + $0x38] sm:$0xff]  ;;  %v265_v25 = vld [vmem:[%s2254_s12 + $0x40] sm:$0xff] }
  0x15   : > { %2056 = vmatmul.mubr.msk.f32.vlgmr.msra.gmra.mrb[0].mxu1 %vm398_vm0, %v322_v12  ;;  %1962 = vmatprep.mubr.msk.f32.mxu0 %vm398_vm0, %v259_v13  ;;  %v327_v22 = vld [vmem:[%s2254_s12 + $0x230] sm:$0xff]  ;;  %v328_v24 = vld [vmem:[%s2254_s12 + $0x238] sm:$0xff]  ;;  %v329_v26 = vld [vmem:[%s2254_s12 + $0x240] sm:$0xff] }
  0x16   : > { %2058 = vmatprep.mubr.msk.f32.mxu1 %vm398_vm0, %v323_v14  ;;  %v266_v27 = vld [vmem:[%s2254_s12 + $0x48] sm:$0xff]  ;;  %v267_v29 = vld [vmem:[%s2254_s12 + $0x50] sm:$0xff]  ;;  %v268_v31 = vld [vmem:[%s2254_s12 + $0x58] sm:$0xff] }
  0x17   : > { %v330_v28 = vld [vmem:[%s2254_s12 + $0x248] sm:$0xff]  ;;  %v331_v30 = vld [vmem:[%s2254_s12 + $0x250] sm:$0xff]  ;;  %v332_v32 = vld [vmem:[%s2254_s12 + $0x258] sm:$0xff] }
  0x18   : > { %1963 = vmatmul.mubr.msk.f32.gmra.mrb[2].mxu0 %vm398_vm0, %v260_v15  ;;  %v269_v33 = vld [vmem:[%s2254_s12 + $0x60] sm:$0xff]  ;;  %v270_v35 = vld [vmem:[%s2254_s12 + $0x68] sm:$0xff]  ;;  %v271_v37 = vld [vmem:[%s2254_s12 + $0x70] sm:$0xff] }
  0x19   : > { %2059 = vmatmul.mubr.msk.f32.gmra.mrb[2].mxu1 %vm398_vm0, %v324_v16  ;;  %1965 = vmatprep.mubr.msk.f32.mxu0 %vm398_vm0, %v261_v17  ;;  %v333_v34 = vld [vmem:[%s2254_s12 + $0x260] sm:$0xff]  ;;  %v334_v36 = vld [vmem:[%s2254_s12 + $0x268] sm:$0xff]  ;;  %v335_v38 = vld [vmem:[%s2254_s12 + $0x270] sm:$0xff] }
  0x1a   : > { %2061 = vmatprep.mubr.msk.f32.mxu1 %vm398_vm0, %v325_v18  ;;  %v272_v39 = vld [vmem:[%s2254_s12 + $0x78] sm:$0xff]  ;;  %v273_v41 = vld [vmem:[%s2254_s12 + $0x80] sm:$0xff]  ;;  %v274_v43 = vld [vmem:[%s2254_s12 + $0x88] sm:$0xff] }
  0x1b   : > { %v336_v40 = vld [vmem:[%s2254_s12 + $0x278] sm:$0xff]  ;;  %v337_v42 = vld [vmem:[%s2254_s12 + $0x280] sm:$0xff]  ;;  %v338_v44 = vld [vmem:[%s2254_s12 + $0x288] sm:$0xff] }
  0x1c   : > { %1966 = vmatmul.mubr.msk.f32.gmra.mrb[4].mxu0 %vm398_vm0, %v262_v19  ;;  %v275_v45 = vld [vmem:[%s2254_s12 + $0x90] sm:$0xff]  ;;  %v276_v47 = vld [vmem:[%s2254_s12 + $0x98] sm:$0xff]  ;;  %v277_v49 = vld [vmem:[%s2254_s12 + $0xa0] sm:$0xff] }
  0x1d   : > { %2062 = vmatmul.mubr.msk.f32.gmra.mrb[4].mxu1 %vm398_vm0, %v326_v20  ;;  %1968 = vmatprep.mubr.msk.f32.mxu0 %vm398_vm0, %v263_v21  ;;  %v339_v46 = vld [vmem:[%s2254_s12 + $0x290] sm:$0xff]  ;;  %v340_v48 = vld [vmem:[%s2254_s12 + $0x298] sm:$0xff]  ;;  %v341_v50 = vld [vmem:[%s2254_s12 + $0x2a0] sm:$0xff] }
  0x1e   : > { %2064 = vmatprep.mubr.msk.f32.mxu1 %vm398_vm0, %v327_v22  ;;  %v278_v51 = vld [vmem:[%s2254_s12 + $0xa8] sm:$0xff]  ;;  %v279_v53 = vld [vmem:[%s2254_s12 + $0xb0] sm:$0xff]  ;;  %v280_v55 = vld [vmem:[%s2254_s12 + $0xb8] sm:$0xff] }
  0x1f   : > { %v342_v52 = vld [vmem:[%s2254_s12 + $0x2a8] sm:$0xff]  ;;  %v343_v54 = vld [vmem:[%s2254_s12 + $0x2b0] sm:$0xff]  ;;  %v344_v56 = vld [vmem:[%s2254_s12 + $0x2b8] sm:$0xff] }
  0x20   : > { %1969 = vmatmul.mubr.msk.f32.gmra.mrb[6].mxu0 %vm398_vm0, %v264_v23  ;;  %v281_v57 = vld [vmem:[%s2254_s12 + $0xc0] sm:$0xff]  ;;  %v282_v59 = vld [vmem:[%s2254_s12 + $0xc8] sm:$0xff]  ;;  %v283_v61 = vld [vmem:[%s2254_s12 + $0xd0] sm:$0xff] }
  0x21   : > { %2065 = vmatmul.mubr.msk.f32.gmra.mrb[6].mxu1 %vm398_vm0, %v328_v24  ;;  %1971 = vmatprep.mubr.msk.f32.mxu0 %vm398_vm0, %v265_v25  ;;  %v345_v58 = vld [vmem:[%s2254_s12 + $0x2c0] sm:$0xff]  ;;  %v346_v60 = vld [vmem:[%s2254_s12 + $0x2c8] sm:$0xff]  ;;  %v347_v62 = vld [vmem:[%s2254_s12 + $0x2d0] sm:$0xff] }
  0x22   : > { %2067 = vmatprep.mubr.msk.f32.mxu1 %vm398_vm0, %v329_v26  ;;  %v284_v63 = vld [vmem:[%s2254_s12 + $0xd8] sm:$0xff]  ;;  %v285_v1 = vld [vmem:[%s2254_s12 + $0xe0] sm:$0xff]  ;;  %v286_v3 = vld [vmem:[%s2254_s12 + $0xe8] sm:$0xff] }
  0x23   : > { %v348_v0 = vld [vmem:[%s2254_s12 + $0x2d8] sm:$0xff]  ;;  %v349_v2 = vld [vmem:[%s2254_s12 + $0x2e0] sm:$0xff]  ;;  %v350_v4 = vld [vmem:[%s2254_s12 + $0x2e8] sm:$0xff] }
  0x24   : > { %1972 = vmatmul.mubr.msk.f32.gmra.mrb[8].mxu0 %vm398_vm0, %v266_v27  ;;  %v287_v5 = vld [vmem:[%s2254_s12 + $0xf0] sm:$0xff]  ;;  %v288_v7 = vld [vmem:[%s2254_s12 + $0xf8] sm:$0xff]  ;;  %v289_v9 = vld [vmem:[%s2254_s12 + $0x100] sm:$0xff] }
  0x25   : > { %2068 = vmatmul.mubr.msk.f32.gmra.mrb[8].mxu1 %vm398_vm0, %v330_v28  ;;  %1974 = vmatprep.mubr.msk.f32.mxu0 %vm398_vm0, %v267_v29  ;;  %v351_v6 = vld [vmem:[%s2254_s12 + $0x2f0] sm:$0xff]  ;;  %v352_v8 = vld [vmem:[%s2254_s12 + $0x2f8] sm:$0xff]  ;;  %v353_v10 = vld [vmem:[%s2254_s12 + $0x300] sm:$0xff] }
  0x26   : > { %2070 = vmatprep.mubr.msk.f32.mxu1 %vm398_vm0, %v331_v30  ;;  %v290_v11 = vld [vmem:[%s2254_s12 + $0x108] sm:$0xff]  ;;  %v291_v13 = vld [vmem:[%s2254_s12 + $0x110] sm:$0xff]  ;;  %v292_v15 = vld [vmem:[%s2254_s12 + $0x118] sm:$0xff] }
  0x27   : > { %v354_v12 = vld [vmem:[%s2254_s12 + $0x308] sm:$0xff]  ;;  %v355_v14 = vld [vmem:[%s2254_s12 + $0x310] sm:$0xff]  ;;  %v356_v16 = vld [vmem:[%s2254_s12 + $0x318] sm:$0xff] }
  0x28   : > { %1975 = vmatmul.mubr.msk.f32.gmra.mrb[10].mxu0 %vm398_vm0, %v268_v31  ;;  %v293_v17 = vld [vmem:[%s2254_s12 + $0x120] sm:$0xff]  ;;  %v294_v19 = vld [vmem:[%s2254_s12 + $0x128] sm:$0xff]  ;;  %v295_v21 = vld [vmem:[%s2254_s12 + $0x130] sm:$0xff] }
  0x29   : > { %2071 = vmatmul.mubr.msk.f32.gmra.mrb[10].mxu1 %vm398_vm0, %v332_v32  ;;  %1977 = vmatprep.mubr.msk.f32.mxu0 %vm398_vm0, %v269_v33  ;;  %v357_v18 = vld [vmem:[%s2254_s12 + $0x320] sm:$0xff]  ;;  %v358_v20 = vld [vmem:[%s2254_s12 + $0x328] sm:$0xff]  ;;  %v359_v22 = vld [vmem:[%s2254_s12 + $0x330] sm:$0xff] }
  0x2a   : > { %2073 = vmatprep.mubr.msk.f32.mxu1 %vm398_vm0, %v333_v34  ;;  %v296_v23 = vld [vmem:[%s2254_s12 + $0x138] sm:$0xff]  ;;  %v297_v25 = vld [vmem:[%s2254_s12 + $0x140] sm:$0xff]  ;;  %v298_v27 = vld [vmem:[%s2254_s12 + $0x148] sm:$0xff] }
  0x2b   : > { %v360_v24 = vld [vmem:[%s2254_s12 + $0x338] sm:$0xff]  ;;  %v361_v26 = vld [vmem:[%s2254_s12 + $0x340] sm:$0xff]  ;;  %v362_v28 = vld [vmem:[%s2254_s12 + $0x348] sm:$0xff] }
  0x2c   : > { %1978 = vmatmul.mubr.msk.f32.gmra.mrb[12].mxu0 %vm398_vm0, %v270_v35  ;;  %v299_v29 = vld [vmem:[%s2254_s12 + $0x150] sm:$0xff]  ;;  %v300_v31 = vld [vmem:[%s2254_s12 + $0x158] sm:$0xff]  ;;  %v301_v33 = vld [vmem:[%s2254_s12 + $0x160] sm:$0xff] }
  0x2d   : > { %2074 = vmatmul.mubr.msk.f32.gmra.mrb[12].mxu1 %vm398_vm0, %v334_v36  ;;  %1980 = vmatprep.mubr.msk.f32.mxu0 %vm398_vm0, %v271_v37  ;;  %v363_v30 = vld [vmem:[%s2254_s12 + $0x350] sm:$0xff]  ;;  %v364_v32 = vld [vmem:[%s2254_s12 + $0x358] sm:$0xff]  ;;  %v365_v34 = vld [vmem:[%s2254_s12 + $0x360] sm:$0xff] }
  0x2e   : > { %2076 = vmatprep.mubr.msk.f32.mxu1 %vm398_vm0, %v335_v38  ;;  %v302_v35 = vld [vmem:[%s2254_s12 + $0x168] sm:$0xff]  ;;  %v303_v37 = vld [vmem:[%s2254_s12 + $0x170] sm:$0xff] }
  0x2f   : > { %v366_v36 = vld [vmem:[%s2254_s12 + $0x368] sm:$0xff]  ;;  %v367_v38 = vld [vmem:[%s2254_s12 + $0x370] sm:$0xff] }
  0x30   : > { %1981 = vmatmul.mubr.msk.f32.gmra.mrb[14].mxu0 %vm398_vm0, %v272_v39  ;;  %v304_v39 = vld [vmem:[%s2254_s12 + $0x178] sm:$0xff] }
  0x31   : > { %2077 = vmatmul.mubr.msk.f32.gmra.mrb[14].mxu1 %vm398_vm0, %v336_v40  ;;  %1983 = vmatprep.mubr.msk.f32.mxu0 %vm398_vm0, %v273_v41  ;;  %v368_v40 = vld [vmem:[%s2254_s12 + $0x378] sm:$0xff]  ;;  %v305_v41 = vld [vmem:[%s2254_s12 + $0x180] sm:$0xff] }
  0x32   : > { %2079 = vmatprep.mubr.msk.f32.mxu1 %vm398_vm0, %v337_v42  ;;  %v369_v42 = vld [vmem:[%s2254_s12 + $0x380] sm:$0xff] }
  0x34   : > { %1984 = vmatmul.mubr.msk.f32.gmra.mrb[16].mxu0 %vm398_vm0, %v274_v43  ;;  %v306_v43 = vld [vmem:[%s2254_s12 + $0x188] sm:$0xff] }
  0x35   : > { %2080 = vmatmul.mubr.msk.f32.gmra.mrb[16].mxu1 %vm398_vm0, %v338_v44  ;;  %1986 = vmatprep.mubr.msk.f32.mxu0 %vm398_vm0, %v275_v45  ;;  %v370_v44 = vld [vmem:[%s2254_s12 + $0x388] sm:$0xff]  ;;  %v307_v45 = vld [vmem:[%s2254_s12 + $0x190] sm:$0xff] }
  0x36   : > { %2082 = vmatprep.mubr.msk.f32.mxu1 %vm398_vm0, %v339_v46  ;;  %v371_v46 = vld [vmem:[%s2254_s12 + $0x390] sm:$0xff] }
  0x38   : > { %1987 = vmatmul.mubr.msk.f32.gmra.mrb[18].mxu0 %vm398_vm0, %v276_v47  ;;  %v308_v47 = vld [vmem:[%s2254_s12 + $0x198] sm:$0xff] }
  0x39   : > { %2083 = vmatmul.mubr.msk.f32.gmra.mrb[18].mxu1 %vm398_vm0, %v340_v48  ;;  %1989 = vmatprep.mubr.msk.f32.mxu0 %vm398_vm0, %v277_v49  ;;  %v372_v48 = vld [vmem:[%s2254_s12 + $0x398] sm:$0xff]  ;;  %v309_v49 = vld [vmem:[%s2254_s12 + $0x1a0] sm:$0xff] }
  0x3a   : > { %2085 = vmatprep.mubr.msk.f32.mxu1 %vm398_vm0, %v341_v50  ;;  %v373_v50 = vld [vmem:[%s2254_s12 + $0x3a0] sm:$0xff] }
  0x3c   : > { %1990 = vmatmul.mubr.msk.f32.gmra.mrb[20].mxu0 %vm398_vm0, %v278_v51  ;;  %v310_v51 = vld [vmem:[%s2254_s12 + $0x1a8] sm:$0xff] }
  0x3d   : > { %2086 = vmatmul.mubr.msk.f32.gmra.mrb[20].mxu1 %vm398_vm0, %v342_v52  ;;  %1992 = vmatprep.mubr.msk.f32.mxu0 %vm398_vm0, %v279_v53  ;;  %v374_v52 = vld [vmem:[%s2254_s12 + $0x3a8] sm:$0xff]  ;;  %v311_v53 = vld [vmem:[%s2254_s12 + $0x1b0] sm:$0xff] }
  0x3e   : > { %2088 = vmatprep.mubr.msk.f32.mxu1 %vm398_vm0, %v343_v54  ;;  %v375_v54 = vld [vmem:[%s2254_s12 + $0x3b0] sm:$0xff] }
  0x40   : > { %1993 = vmatmul.mubr.msk.f32.gmra.mrb[22].mxu0 %vm398_vm0, %v280_v55  ;;  %v312_v55 = vld [vmem:[%s2254_s12 + $0x1b8] sm:$0xff] }
  0x41   : > { %2089 = vmatmul.mubr.msk.f32.gmra.mrb[22].mxu1 %vm398_vm0, %v344_v56  ;;  %1995 = vmatprep.mubr.msk.f32.mxu0 %vm398_vm0, %v281_v57  ;;  %v376_v56 = vld [vmem:[%s2254_s12 + $0x3b8] sm:$0xff]  ;;  %v313_v57 = vld [vmem:[%s2254_s12 + $0x1c0] sm:$0xff] }
  0x42   : > { %2091 = vmatprep.mubr.msk.f32.mxu1 %vm398_vm0, %v345_v58  ;;  %v377_v58 = vld [vmem:[%s2254_s12 + $0x3c0] sm:$0xff] }
  0x44   : > { %1996 = vmatmul.mubr.msk.f32.gmra.mrb[24].mxu0 %vm398_vm0, %v282_v59  ;;  %v314_v59 = vld [vmem:[%s2254_s12 + $0x1c8] sm:$0xff] }
  0x45   : > { %2092 = vmatmul.mubr.msk.f32.gmra.mrb[24].mxu1 %vm398_vm0, %v346_v60  ;;  %1998 = vmatprep.mubr.msk.f32.mxu0 %vm398_vm0, %v283_v61  ;;  %v378_v60 = vld [vmem:[%s2254_s12 + $0x3c8] sm:$0xff]  ;;  %v315_v61 = vld [vmem:[%s2254_s12 + $0x1d0] sm:$0xff] }
  0x46   : > { %2094 = vmatprep.mubr.msk.f32.mxu1 %vm398_vm0, %v347_v62  ;;  %v379_v62 = vld [vmem:[%s2254_s12 + $0x3d0] sm:$0xff] }
  0x48   : > { %1999 = vmatmul.mubr.msk.f32.gmra.mrb[26].mxu0 %vm398_vm0, %v284_v63  ;;  %v316_v63 = vld [vmem:[%s2254_s12 + $0x1d8] sm:$0xff] }
  0x49   : > { %2095 = vmatmul.mubr.msk.f32.gmra.mrb[26].mxu1 %vm398_vm0, %v348_v0  ;;  %2001 = vmatprep.mubr.msk.f32.mxu0 %vm398_vm0, %v285_v1  ;;  %v380_v0 = vld [vmem:[%s2254_s12 + $0x3d8] sm:$0xff]  ;;  %v317_v1 = vld [vmem:[%s2254_s12 + $0x1e0] sm:$0xff] }
  0x4a   : > { %2097 = vmatprep.mubr.msk.f32.mxu1 %vm398_vm0, %v349_v2  ;;  %v381_v2 = vld [vmem:[%s2254_s12 + $0x3e0] sm:$0xff] }
  0x4c   : > { %2002 = vmatmul.mubr.msk.f32.gmra.mrb[28].mxu0 %vm398_vm0, %v286_v3  ;;  %v318_v3 = vld [vmem:[%s2254_s12 + $0x1e8] sm:$0xff] }
  0x4d   : > { %2098 = vmatmul.mubr.msk.f32.gmra.mrb[28].mxu1 %vm398_vm0, %v350_v4  ;;  %2004 = vmatprep.mubr.msk.f32.mxu0 %vm398_vm0, %v287_v5  ;;  %v382_v4 = vld [vmem:[%s2254_s12 + $0x3e8] sm:$0xff]  ;;  %v319_v5 = vld [vmem:[%s2254_s12 + $0x1f0] sm:$0xff] }
  0x4e   : > { %2100 = vmatprep.mubr.msk.f32.mxu1 %vm398_vm0, %v351_v6  ;;  %v383_v6 = vld [vmem:[%s2254_s12 + $0x3f0] sm:$0xff] }
  0x50   : > { %2005 = vmatmul.mubr.msk.f32.gmra.mrb[30].mxu0 %vm398_vm0, %v288_v7  ;;  %v320_v7 = vld [vmem:[%s2254_s12 + $0x1f8] sm:$0xff] }
  0x51   : > { %2101 = vmatmul.mubr.msk.f32.gmra.mrb[30].mxu1 %vm398_vm0, %v352_v8  ;;  %2007 = vmatprep.mubr.msk.f32.mxu0 %vm398_vm0, %v289_v9  ;;  %v384_v8 = vld [vmem:[%s2254_s12 + $0x3f8] sm:$0xff]  ;;  %v2515_v9 = vld [vmem:[%s2913_s2] ss:$0 sm:$0xff] }
  0x52   : > { %2103 = vmatprep.mubr.msk.f32.mxu1 %vm398_vm0, %v353_v10 }
  0x54   : > { %2008 = vmatmul.mubr.msk.f32.gmra.mrb[32].mxu0 %vm398_vm0, %v290_v11 }
  0x55   : > { %2104 = vmatmul.mubr.msk.f32.gmra.mrb[32].mxu1 %vm398_vm0, %v354_v12  ;;  %2010 = vmatprep.mubr.msk.f32.mxu0 %vm398_vm0, %v291_v13 }
  0x56   : > { %2106 = vmatprep.mubr.msk.f32.mxu1 %vm398_vm0, %v355_v14 }
  0x58   : > { %2011 = vmatmul.mubr.msk.f32.gmra.mrb[34].mxu0 %vm398_vm0, %v292_v15 }
  0x59   : > { %2107 = vmatmul.mubr.msk.f32.gmra.mrb[34].mxu1 %vm398_vm0, %v356_v16  ;;  %2013 = vmatprep.mubr.msk.f32.mxu0 %vm398_vm0, %v293_v17 }
  0x5a   : > { %2109 = vmatprep.mubr.msk.f32.mxu1 %vm398_vm0, %v357_v18 }
  0x5c   : > { %2014 = vmatmul.mubr.msk.f32.gmra.mrb[36].mxu0 %vm398_vm0, %v294_v19 }
  0x5d   : > { %2110 = vmatmul.mubr.msk.f32.gmra.mrb[36].mxu1 %vm398_vm0, %v358_v20  ;;  %2016 = vmatprep.mubr.msk.f32.mxu0 %vm398_vm0, %v295_v21 }
  0x5e   : > { %2112 = vmatprep.mubr.msk.f32.mxu1 %vm398_vm0, %v359_v22 }
  0x60   : > { %2017 = vmatmul.mubr.msk.f32.gmra.mrb[38].mxu0 %vm398_vm0, %v296_v23 }
  0x61   : > { %2113 = vmatmul.mubr.msk.f32.gmra.mrb[38].mxu1 %vm398_vm0, %v360_v24  ;;  %2019 = vmatprep.mubr.msk.f32.mxu0 %vm398_vm0, %v297_v25 }
  0x62   : > { %2115 = vmatprep.mubr.msk.f32.mxu1 %vm398_vm0, %v361_v26 }
  0x64   : > { %2020 = vmatmul.mubr.msk.f32.gmra.mrb[40].mxu0 %vm398_vm0, %v298_v27 }
  0x65   : > { %2116 = vmatmul.mubr.msk.f32.gmra.mrb[40].mxu1 %vm398_vm0, %v362_v28  ;;  %2022 = vmatprep.mubr.msk.f32.mxu0 %vm398_vm0, %v299_v29 }
  0x66   : > { %2118 = vmatprep.mubr.msk.f32.mxu1 %vm398_vm0, %v363_v30 }
  0x68   : > { %2023 = vmatmul.mubr.msk.f32.gmra.mrb[42].mxu0 %vm398_vm0, %v300_v31 }
  0x69   : > { %2119 = vmatmul.mubr.msk.f32.gmra.mrb[42].mxu1 %vm398_vm0, %v364_v32  ;;  %2025 = vmatprep.mubr.msk.f32.mxu0 %vm398_vm0, %v301_v33 }
  0x6a   : > { %2121 = vmatprep.mubr.msk.f32.mxu1 %vm398_vm0, %v365_v34 }
  0x6c   : > { %2026 = vmatmul.mubr.msk.f32.gmra.mrb[44].mxu0 %vm398_vm0, %v302_v35 }
  0x6d   : > { %2122 = vmatmul.mubr.msk.f32.gmra.mrb[44].mxu1 %vm398_vm0, %v366_v36  ;;  %2028 = vmatprep.mubr.msk.f32.mxu0 %vm398_vm0, %v303_v37 }
  0x6e   : > { %2124 = vmatprep.mubr.msk.f32.mxu1 %vm398_vm0, %v367_v38 }
  0x70   : > { %2029 = vmatmul.mubr.msk.f32.gmra.mrb[46].mxu0 %vm398_vm0, %v304_v39 }
  0x71   : > { %2125 = vmatmul.mubr.msk.f32.gmra.mrb[46].mxu1 %vm398_vm0, %v368_v40  ;;  %2031 = vmatprep.mubr.msk.f32.mxu0 %vm398_vm0, %v305_v41 }
  0x72   : > { %2127 = vmatprep.mubr.msk.f32.mxu1 %vm398_vm0, %v369_v42 }
  0x74   : > { %2032 = vmatmul.mubr.msk.f32.gmra.mrb[48].mxu0 %vm398_vm0, %v306_v43 }
  0x75   : > { %2128 = vmatmul.mubr.msk.f32.gmra.mrb[48].mxu1 %vm398_vm0, %v370_v44  ;;  %2034 = vmatprep.mubr.msk.f32.mxu0 %vm398_vm0, %v307_v45 }
  0x76   : > { %2130 = vmatprep.mubr.msk.f32.mxu1 %vm398_vm0, %v371_v46 }
  0x78   : > { %2035 = vmatmul.mubr.msk.f32.gmra.mrb[50].mxu0 %vm398_vm0, %v308_v47 }
  0x79   : > { %2131 = vmatmul.mubr.msk.f32.gmra.mrb[50].mxu1 %vm398_vm0, %v372_v48  ;;  %2037 = vmatprep.mubr.msk.f32.mxu0 %vm398_vm0, %v309_v49 }
  0x7a   : > { %2133 = vmatprep.mubr.msk.f32.mxu1 %vm398_vm0, %v373_v50 }
  0x7c   : > { %2038 = vmatmul.mubr.msk.f32.gmra.mrb[52].mxu0 %vm398_vm0, %v310_v51 }
  0x7d   : > { %2134 = vmatmul.mubr.msk.f32.gmra.mrb[52].mxu1 %vm398_vm0, %v374_v52  ;;  %2040 = vmatprep.mubr.msk.f32.mxu0 %vm398_vm0, %v311_v53 }
  0x7e   : > { %2136 = vmatprep.mubr.msk.f32.mxu1 %vm398_vm0, %v375_v54 }
  0x80   : > { %2041 = vmatmul.mubr.msk.f32.gmra.mrb[54].mxu0 %vm398_vm0, %v312_v55 }
  0x81   : > { %2137 = vmatmul.mubr.msk.f32.gmra.mrb[54].mxu1 %vm398_vm0, %v376_v56  ;;  %2043 = vmatprep.mubr.msk.f32.mxu0 %vm398_vm0, %v313_v57 }
  0x82   : > { %2139 = vmatprep.mubr.msk.f32.mxu1 %vm398_vm0, %v377_v58 }
  0x84   : > { %2044 = vmatmul.mubr.msk.f32.gmra.mrb[56].mxu0 %vm398_vm0, %v314_v59 }
  0x85   : > { %2140 = vmatmul.mubr.msk.f32.gmra.mrb[56].mxu1 %vm398_vm0, %v378_v60  ;;  %2046 = vmatprep.mubr.msk.f32.mxu0 %vm398_vm0, %v315_v61 }
  0x86   : > { %2142 = vmatprep.mubr.msk.f32.mxu1 %vm398_vm0, %v379_v62 }
  0x88   : > { %2047 = vmatmul.mubr.msk.f32.gmra.mrb[58].mxu0 %vm398_vm0, %v316_v63 }
  0x89   : > { %2143 = vmatmul.mubr.msk.f32.gmra.mrb[58].mxu1 %vm398_vm0, %v380_v0  ;;  %2049 = vmatprep.mubr.msk.f32.mxu0 %vm398_vm0, %v317_v1 }
  0x8a   : > { %2145 = vmatprep.mubr.msk.f32.mxu1 %vm398_vm0, %v381_v2 }
  0x8c   : > { %2050 = vmatmul.mubr.msk.f32.gmra.mrb[60].mxu0 %vm398_vm0, %v318_v3 }
  0x8d   : > { %2146 = vmatmul.mubr.msk.f32.gmra.mrb[60].mxu1 %vm398_vm0, %v382_v4  ;;  %2052 = vmatprep.mubr.msk.f32.mxu0 %vm398_vm0, %v319_v5 }
  0x8e   : > { %2148 = vmatprep.mubr.msk.f32.mxu1 %vm398_vm0, %v383_v6 }
  0x90   : > { %2053 = vmatmul.mubr.msk.f32.gmra.mrb[62].mxu0 %vm398_vm0, %v320_v7 }
  0x91   : > { %2149 = vmatmul.mubr.msk.f32.gmra.mrb[62].mxu1 %vm398_vm0, %v384_v8 }
  0xe7   : > { %v1961_v10 = vpop.f32.mrb[0].mxu0 }
  0xe8   : > { %v2057_v11 = vpop.f32.mrb[0].mxu1  ;;  %v855_v12 = vadd.f32 %v1961_v10, %v2515_v9  ;;  %v849_v14 = vpop.f32.mrb[1].mxu0 }
  0xe9   : > { %v1175_v13 = vadd.f32 %v2057_v11, %v2515_v9  ;;  %v1169_v15 = vpop.f32.mrb[1].mxu1  ;;  %v850_v16 = vadd.f32 %v2515_v9, %v849_v14 }
  0xea   : > { %v1170_v17 = vadd.f32 %v2515_v9, %v1169_v15  ;;  %1490 = vst.msk [vmem:[%s2522_s17 + $0x8] sm:$0xff] %vm1488_vm1, %v855_v12 }
  0xeb   : > { %1554 = vst.msk [vmem:[%s2522_s17 + $0x208] sm:$0xff] %vm1488_vm1, %v1175_v13  ;;  %1489 = vst.msk [vmem:[%s2522_s17] sm:$0xff] %vm1488_vm1, %v850_v16  ;;  %v1964_v18 = vpop.f32.mrb[2].mxu0 }
  0xec   : > { %1553 = vst.msk [vmem:[%s2522_s17 + $0x200] sm:$0xff] %vm1488_vm1, %v1170_v17  ;;  %v2060_v19 = vpop.f32.mrb[2].mxu1  ;;  %v865_v20 = vadd.f32 %v1964_v18, %v2515_v9  ;;  %v859_v22 = vpop.f32.mrb[3].mxu0 }
  0xed   : > { %v1185_v21 = vadd.f32 %v2060_v19, %v2515_v9  ;;  %v1179_v23 = vpop.f32.mrb[3].mxu1  ;;  %v860_v24 = vadd.f32 %v2515_v9, %v859_v22 }
  0xee   : > { %v1180_v25 = vadd.f32 %v2515_v9, %v1179_v23  ;;  %1492 = vst.msk [vmem:[%s2522_s17 + $0x18] sm:$0xff] %vm1488_vm1, %v865_v20 }
  0xef   : > { %1556 = vst.msk [vmem:[%s2522_s17 + $0x218] sm:$0xff] %vm1488_vm1, %v1185_v21  ;;  %1491 = vst.msk [vmem:[%s2522_s17 + $0x10] sm:$0xff] %vm1488_vm1, %v860_v24  ;;  %v1967_v26 = vpop.f32.mrb[4].mxu0 }
  0xf0   : > { %1555 = vst.msk [vmem:[%s2522_s17 + $0x210] sm:$0xff] %vm1488_vm1, %v1180_v25  ;;  %v2063_v27 = vpop.f32.mrb[4].mxu1  ;;  %v875_v28 = vadd.f32 %v1967_v26, %v2515_v9  ;;  %v869_v30 = vpop.f32.mrb[5].mxu0 }
  0xf1   : > { %v1195_v29 = vadd.f32 %v2063_v27, %v2515_v9  ;;  %v1189_v31 = vpop.f32.mrb[5].mxu1  ;;  %v870_v32 = vadd.f32 %v2515_v9, %v869_v30 }
  0xf2   : > { %v1190_v33 = vadd.f32 %v2515_v9, %v1189_v31  ;;  %1494 = vst.msk [vmem:[%s2522_s17 + $0x28] sm:$0xff] %vm1488_vm1, %v875_v28 }
  0xf3   : > { %1558 = vst.msk [vmem:[%s2522_s17 + $0x228] sm:$0xff] %vm1488_vm1, %v1195_v29  ;;  %1493 = vst.msk [vmem:[%s2522_s17 + $0x20] sm:$0xff] %vm1488_vm1, %v870_v32  ;;  %v1970_v34 = vpop.f32.mrb[6].mxu0 }
  0xf4   : > { %1557 = vst.msk [vmem:[%s2522_s17 + $0x220] sm:$0xff] %vm1488_vm1, %v1190_v33  ;;  %v2066_v35 = vpop.f32.mrb[6].mxu1  ;;  %v885_v36 = vadd.f32 %v1970_v34, %v2515_v9  ;;  %v879_v38 = vpop.f32.mrb[7].mxu0 }
  0xf5   : > { %v1205_v37 = vadd.f32 %v2066_v35, %v2515_v9  ;;  %v1199_v39 = vpop.f32.mrb[7].mxu1  ;;  %v880_v40 = vadd.f32 %v2515_v9, %v879_v38 }
  0xf6   : > { %v1200_v41 = vadd.f32 %v2515_v9, %v1199_v39  ;;  %1496 = vst.msk [vmem:[%s2522_s17 + $0x38] sm:$0xff] %vm1488_vm1, %v885_v36 }
  0xf7   : > { %1560 = vst.msk [vmem:[%s2522_s17 + $0x238] sm:$0xff] %vm1488_vm1, %v1205_v37  ;;  %1495 = vst.msk [vmem:[%s2522_s17 + $0x30] sm:$0xff] %vm1488_vm1, %v880_v40  ;;  %v1973_v42 = vpop.f32.mrb[8].mxu0 }
  0xf8   : > { %1559 = vst.msk [vmem:[%s2522_s17 + $0x230] sm:$0xff] %vm1488_vm1, %v1200_v41  ;;  %v2069_v43 = vpop.f32.mrb[8].mxu1  ;;  %v895_v44 = vadd.f32 %v1973_v42, %v2515_v9  ;;  %v889_v46 = vpop.f32.mrb[9].mxu0 }
  0xf9   : > { %v1215_v45 = vadd.f32 %v2069_v43, %v2515_v9  ;;  %v1209_v47 = vpop.f32.mrb[9].mxu1  ;;  %v890_v48 = vadd.f32 %v2515_v9, %v889_v46 }
  0xfa   : > { %v1210_v49 = vadd.f32 %v2515_v9, %v1209_v47  ;;  %1498 = vst.msk [vmem:[%s2522_s17 + $0x48] sm:$0xff] %vm1488_vm1, %v895_v44 }
  0xfb   : > { %1562 = vst.msk [vmem:[%s2522_s17 + $0x248] sm:$0xff] %vm1488_vm1, %v1215_v45  ;;  %1497 = vst.msk [vmem:[%s2522_s17 + $0x40] sm:$0xff] %vm1488_vm1, %v890_v48  ;;  %v1976_v50 = vpop.f32.mrb[10].mxu0 }
  0xfc   : > { %1561 = vst.msk [vmem:[%s2522_s17 + $0x240] sm:$0xff] %vm1488_vm1, %v1210_v49  ;;  %v2072_v51 = vpop.f32.mrb[10].mxu1  ;;  %v905_v52 = vadd.f32 %v1976_v50, %v2515_v9  ;;  %v899_v54 = vpop.f32.mrb[11].mxu0 }
  0xfd   : > { %v1225_v53 = vadd.f32 %v2072_v51, %v2515_v9  ;;  %v1219_v55 = vpop.f32.mrb[11].mxu1  ;;  %v900_v56 = vadd.f32 %v2515_v9, %v899_v54 }
  0xfe   : > { %v1220_v57 = vadd.f32 %v2515_v9, %v1219_v55  ;;  %1500 = vst.msk [vmem:[%s2522_s17 + $0x58] sm:$0xff] %vm1488_vm1, %v905_v52 }
  0xff   : > { %1564 = vst.msk [vmem:[%s2522_s17 + $0x258] sm:$0xff] %vm1488_vm1, %v1225_v53  ;;  %1499 = vst.msk [vmem:[%s2522_s17 + $0x50] sm:$0xff] %vm1488_vm1, %v900_v56  ;;  %v1979_v58 = vpop.f32.mrb[12].mxu0 }
 0x100   : > { %1563 = vst.msk [vmem:[%s2522_s17 + $0x250] sm:$0xff] %vm1488_vm1, %v1220_v57  ;;  %v2075_v59 = vpop.f32.mrb[12].mxu1  ;;  %v915_v60 = vadd.f32 %v1979_v58, %v2515_v9  ;;  %v909_v62 = vpop.f32.mrb[13].mxu0 }
 0x101   : > { %v1235_v61 = vadd.f32 %v2075_v59, %v2515_v9  ;;  %v1229_v63 = vpop.f32.mrb[13].mxu1  ;;  %v910_v0 = vadd.f32 %v2515_v9, %v909_v62 }
 0x102   : > { %v1230_v1 = vadd.f32 %v2515_v9, %v1229_v63  ;;  %1502 = vst.msk [vmem:[%s2522_s17 + $0x68] sm:$0xff] %vm1488_vm1, %v915_v60 }
 0x103   : > { %1566 = vst.msk [vmem:[%s2522_s17 + $0x268] sm:$0xff] %vm1488_vm1, %v1235_v61  ;;  %1501 = vst.msk [vmem:[%s2522_s17 + $0x60] sm:$0xff] %vm1488_vm1, %v910_v0  ;;  %v1982_v2 = vpop.f32.mrb[14].mxu0 }
 0x104   : > { %1565 = vst.msk [vmem:[%s2522_s17 + $0x260] sm:$0xff] %vm1488_vm1, %v1230_v1  ;;  %v2078_v3 = vpop.f32.mrb[14].mxu1  ;;  %v925_v4 = vadd.f32 %v1982_v2, %v2515_v9  ;;  %v919_v6 = vpop.f32.mrb[15].mxu0 }
 0x105   : > { %v1245_v5 = vadd.f32 %v2078_v3, %v2515_v9  ;;  %v1239_v7 = vpop.f32.mrb[15].mxu1  ;;  %v920_v8 = vadd.f32 %v2515_v9, %v919_v6 }
 0x106   : > { %v1240_v10 = vadd.f32 %v2515_v9, %v1239_v7  ;;  %1504 = vst.msk [vmem:[%s2522_s17 + $0x78] sm:$0xff] %vm1488_vm1, %v925_v4 }
 0x107   : > { %1568 = vst.msk [vmem:[%s2522_s17 + $0x278] sm:$0xff] %vm1488_vm1, %v1245_v5  ;;  %1503 = vst.msk [vmem:[%s2522_s17 + $0x70] sm:$0xff] %vm1488_vm1, %v920_v8  ;;  %v1985_v11 = vpop.f32.mrb[16].mxu0 }
 0x108   : > { %1567 = vst.msk [vmem:[%s2522_s17 + $0x270] sm:$0xff] %vm1488_vm1, %v1240_v10  ;;  %v2081_v12 = vpop.f32.mrb[16].mxu1  ;;  %v935_v13 = vadd.f32 %v1985_v11, %v2515_v9  ;;  %v929_v15 = vpop.f32.mrb[17].mxu0 }
 0x109   : > { %v1255_v14 = vadd.f32 %v2081_v12, %v2515_v9  ;;  %v1249_v16 = vpop.f32.mrb[17].mxu1  ;;  %v930_v17 = vadd.f32 %v2515_v9, %v929_v15 }
 0x10a   : > { %v1250_v18 = vadd.f32 %v2515_v9, %v1249_v16  ;;  %1506 = vst.msk [vmem:[%s2522_s17 + $0x88] sm:$0xff] %vm1488_vm1, %v935_v13 }
 0x10b   : > { %1570 = vst.msk [vmem:[%s2522_s17 + $0x288] sm:$0xff] %vm1488_vm1, %v1255_v14  ;;  %1505 = vst.msk [vmem:[%s2522_s17 + $0x80] sm:$0xff] %vm1488_vm1, %v930_v17  ;;  %v1988_v19 = vpop.f32.mrb[18].mxu0 }
 0x10c   : > { %1569 = vst.msk [vmem:[%s2522_s17 + $0x280] sm:$0xff] %vm1488_vm1, %v1250_v18  ;;  %v2084_v20 = vpop.f32.mrb[18].mxu1  ;;  %v945_v21 = vadd.f32 %v1988_v19, %v2515_v9  ;;  %v939_v23 = vpop.f32.mrb[19].mxu0 }
 0x10d   : > { %v1265_v22 = vadd.f32 %v2084_v20, %v2515_v9  ;;  %v1259_v24 = vpop.f32.mrb[19].mxu1  ;;  %v940_v25 = vadd.f32 %v2515_v9, %v939_v23 }
 0x10e   : > { %v1260_v26 = vadd.f32 %v2515_v9, %v1259_v24  ;;  %1508 = vst.msk [vmem:[%s2522_s17 + $0x98] sm:$0xff] %vm1488_vm1, %v945_v21 }
 0x10f   : > { %1572 = vst.msk [vmem:[%s2522_s17 + $0x298] sm:$0xff] %vm1488_vm1, %v1265_v22  ;;  %1507 = vst.msk [vmem:[%s2522_s17 + $0x90] sm:$0xff] %vm1488_vm1, %v940_v25  ;;  %v1991_v27 = vpop.f32.mrb[20].mxu0 }
 0x110   : > { %1571 = vst.msk [vmem:[%s2522_s17 + $0x290] sm:$0xff] %vm1488_vm1, %v1260_v26  ;;  %v2087_v28 = vpop.f32.mrb[20].mxu1  ;;  %v955_v29 = vadd.f32 %v1991_v27, %v2515_v9  ;;  %v949_v31 = vpop.f32.mrb[21].mxu0 }
 0x111   : > { %v1275_v30 = vadd.f32 %v2087_v28, %v2515_v9  ;;  %v1269_v32 = vpop.f32.mrb[21].mxu1  ;;  %v950_v33 = vadd.f32 %v2515_v9, %v949_v31 }
 0x112   : > { %v1270_v34 = vadd.f32 %v2515_v9, %v1269_v32  ;;  %1510 = vst.msk [vmem:[%s2522_s17 + $0xa8] sm:$0xff] %vm1488_vm1, %v955_v29 }
 0x113   : > { %1574 = vst.msk [vmem:[%s2522_s17 + $0x2a8] sm:$0xff] %vm1488_vm1, %v1275_v30  ;;  %1509 = vst.msk [vmem:[%s2522_s17 + $0xa0] sm:$0xff] %vm1488_vm1, %v950_v33  ;;  %v1994_v35 = vpop.f32.mrb[22].mxu0 }
 0x114   : > { %1573 = vst.msk [vmem:[%s2522_s17 + $0x2a0] sm:$0xff] %vm1488_vm1, %v1270_v34  ;;  %v2090_v36 = vpop.f32.mrb[22].mxu1  ;;  %v965_v37 = vadd.f32 %v1994_v35, %v2515_v9  ;;  %v959_v39 = vpop.f32.mrb[23].mxu0 }
 0x115   : > { %v1285_v38 = vadd.f32 %v2090_v36, %v2515_v9  ;;  %v1279_v40 = vpop.f32.mrb[23].mxu1  ;;  %v960_v41 = vadd.f32 %v2515_v9, %v959_v39 }
 0x116   : > { %v1280_v42 = vadd.f32 %v2515_v9, %v1279_v40  ;;  %1512 = vst.msk [vmem:[%s2522_s17 + $0xb8] sm:$0xff] %vm1488_vm1, %v965_v37 }
 0x117   : > { %1576 = vst.msk [vmem:[%s2522_s17 + $0x2b8] sm:$0xff] %vm1488_vm1, %v1285_v38  ;;  %1511 = vst.msk [vmem:[%s2522_s17 + $0xb0] sm:$0xff] %vm1488_vm1, %v960_v41  ;;  %v1997_v43 = vpop.f32.mrb[24].mxu0 }
 0x118   : > { %1575 = vst.msk [vmem:[%s2522_s17 + $0x2b0] sm:$0xff] %vm1488_vm1, %v1280_v42  ;;  %v2093_v44 = vpop.f32.mrb[24].mxu1  ;;  %v975_v45 = vadd.f32 %v1997_v43, %v2515_v9  ;;  %v969_v47 = vpop.f32.mrb[25].mxu0 }
 0x119   : > { %v1295_v46 = vadd.f32 %v2093_v44, %v2515_v9  ;;  %v1289_v48 = vpop.f32.mrb[25].mxu1  ;;  %v970_v49 = vadd.f32 %v2515_v9, %v969_v47 }
 0x11a   : > { %v1290_v50 = vadd.f32 %v2515_v9, %v1289_v48  ;;  %1514 = vst.msk [vmem:[%s2522_s17 + $0xc8] sm:$0xff] %vm1488_vm1, %v975_v45 }
 0x11b   : > { %1578 = vst.msk [vmem:[%s2522_s17 + $0x2c8] sm:$0xff] %vm1488_vm1, %v1295_v46  ;;  %1513 = vst.msk [vmem:[%s2522_s17 + $0xc0] sm:$0xff] %vm1488_vm1, %v970_v49  ;;  %v2000_v51 = vpop.f32.mrb[26].mxu0 }
 0x11c   : > { %1577 = vst.msk [vmem:[%s2522_s17 + $0x2c0] sm:$0xff] %vm1488_vm1, %v1290_v50  ;;  %v2096_v52 = vpop.f32.mrb[26].mxu1  ;;  %v985_v53 = vadd.f32 %v2000_v51, %v2515_v9  ;;  %v979_v55 = vpop.f32.mrb[27].mxu0 }
 0x11d   : > { %v1305_v54 = vadd.f32 %v2096_v52, %v2515_v9  ;;  %v1299_v56 = vpop.f32.mrb[27].mxu1  ;;  %v980_v57 = vadd.f32 %v2515_v9, %v979_v55 }
 0x11e   : > { %v1300_v58 = vadd.f32 %v2515_v9, %v1299_v56  ;;  %1516 = vst.msk [vmem:[%s2522_s17 + $0xd8] sm:$0xff] %vm1488_vm1, %v985_v53 }
 0x11f   : > { %1580 = vst.msk [vmem:[%s2522_s17 + $0x2d8] sm:$0xff] %vm1488_vm1, %v1305_v54  ;;  %1515 = vst.msk [vmem:[%s2522_s17 + $0xd0] sm:$0xff] %vm1488_vm1, %v980_v57  ;;  %v2003_v59 = vpop.f32.mrb[28].mxu0 }
 0x120   : > { %1579 = vst.msk [vmem:[%s2522_s17 + $0x2d0] sm:$0xff] %vm1488_vm1, %v1300_v58  ;;  %v2099_v60 = vpop.f32.mrb[28].mxu1  ;;  %v995_v61 = vadd.f32 %v2003_v59, %v2515_v9  ;;  %v989_v63 = vpop.f32.mrb[29].mxu0 }
 0x121   : > { %v1315_v62 = vadd.f32 %v2099_v60, %v2515_v9  ;;  %v1309_v0 = vpop.f32.mrb[29].mxu1  ;;  %v990_v1 = vadd.f32 %v2515_v9, %v989_v63 }
 0x122   : > { %v1310_v2 = vadd.f32 %v2515_v9, %v1309_v0  ;;  %1518 = vst.msk [vmem:[%s2522_s17 + $0xe8] sm:$0xff] %vm1488_vm1, %v995_v61 }
 0x123   : > { %1582 = vst.msk [vmem:[%s2522_s17 + $0x2e8] sm:$0xff] %vm1488_vm1, %v1315_v62  ;;  %1517 = vst.msk [vmem:[%s2522_s17 + $0xe0] sm:$0xff] %vm1488_vm1, %v990_v1  ;;  %v2006_v3 = vpop.f32.mrb[30].mxu0 }
 0x124   : > { %1581 = vst.msk [vmem:[%s2522_s17 + $0x2e0] sm:$0xff] %vm1488_vm1, %v1310_v2  ;;  %v2102_v4 = vpop.f32.mrb[30].mxu1  ;;  %v1005_v5 = vadd.f32 %v2006_v3, %v2515_v9  ;;  %v999_v7 = vpop.f32.mrb[31].mxu0 }
 0x125   : > { %v1325_v6 = vadd.f32 %v2102_v4, %v2515_v9  ;;  %v1319_v8 = vpop.f32.mrb[31].mxu1  ;;  %v1000_v10 = vadd.f32 %v2515_v9, %v999_v7 }
 0x126   : > { %v1320_v11 = vadd.f32 %v2515_v9, %v1319_v8  ;;  %1520 = vst.msk [vmem:[%s2522_s17 + $0xf8] sm:$0xff] %vm1488_vm1, %v1005_v5 }
 0x127   : > { %1584 = vst.msk [vmem:[%s2522_s17 + $0x2f8] sm:$0xff] %vm1488_vm1, %v1325_v6  ;;  %1519 = vst.msk [vmem:[%s2522_s17 + $0xf0] sm:$0xff] %vm1488_vm1, %v1000_v10  ;;  %v2009_v12 = vpop.f32.mrb[32].mxu0 }
 0x128   : > { %1583 = vst.msk [vmem:[%s2522_s17 + $0x2f0] sm:$0xff] %vm1488_vm1, %v1320_v11  ;;  %v2105_v13 = vpop.f32.mrb[32].mxu1  ;;  %v1015_v14 = vadd.f32 %v2009_v12, %v2515_v9  ;;  %v1009_v16 = vpop.f32.mrb[33].mxu0 }
 0x129   : > { %v1335_v15 = vadd.f32 %v2105_v13, %v2515_v9  ;;  %v1329_v17 = vpop.f32.mrb[33].mxu1  ;;  %v1010_v18 = vadd.f32 %v2515_v9, %v1009_v16 }
 0x12a   : > { %v1330_v19 = vadd.f32 %v2515_v9, %v1329_v17  ;;  %1522 = vst.msk [vmem:[%s2522_s17 + $0x108] sm:$0xff] %vm1488_vm1, %v1015_v14 }
 0x12b   : > { %1586 = vst.msk [vmem:[%s2522_s17 + $0x308] sm:$0xff] %vm1488_vm1, %v1335_v15  ;;  %1521 = vst.msk [vmem:[%s2522_s17 + $0x100] sm:$0xff] %vm1488_vm1, %v1010_v18  ;;  %v2012_v20 = vpop.f32.mrb[34].mxu0 }
 0x12c   : > { %1585 = vst.msk [vmem:[%s2522_s17 + $0x300] sm:$0xff] %vm1488_vm1, %v1330_v19  ;;  %v2108_v21 = vpop.f32.mrb[34].mxu1  ;;  %v1025_v22 = vadd.f32 %v2012_v20, %v2515_v9  ;;  %v1019_v24 = vpop.f32.mrb[35].mxu0 }
 0x12d   : > { %v1345_v23 = vadd.f32 %v2108_v21, %v2515_v9  ;;  %v1339_v25 = vpop.f32.mrb[35].mxu1  ;;  %v1020_v26 = vadd.f32 %v2515_v9, %v1019_v24 }
 0x12e   : > { %v1340_v27 = vadd.f32 %v2515_v9, %v1339_v25  ;;  %1524 = vst.msk [vmem:[%s2522_s17 + $0x118] sm:$0xff] %vm1488_vm1, %v1025_v22 }
 0x12f   : > { %1588 = vst.msk [vmem:[%s2522_s17 + $0x318] sm:$0xff] %vm1488_vm1, %v1345_v23  ;;  %1523 = vst.msk [vmem:[%s2522_s17 + $0x110] sm:$0xff] %vm1488_vm1, %v1020_v26  ;;  %v2015_v28 = vpop.f32.mrb[36].mxu0 }
 0x130   : > { %1587 = vst.msk [vmem:[%s2522_s17 + $0x310] sm:$0xff] %vm1488_vm1, %v1340_v27  ;;  %v2111_v29 = vpop.f32.mrb[36].mxu1  ;;  %v1035_v30 = vadd.f32 %v2015_v28, %v2515_v9  ;;  %v1029_v32 = vpop.f32.mrb[37].mxu0 }
 0x131   : > { %v1355_v31 = vadd.f32 %v2111_v29, %v2515_v9  ;;  %v1349_v33 = vpop.f32.mrb[37].mxu1  ;;  %v1030_v34 = vadd.f32 %v2515_v9, %v1029_v32 }
 0x132   : > { %v1350_v35 = vadd.f32 %v2515_v9, %v1349_v33  ;;  %1526 = vst.msk [vmem:[%s2522_s17 + $0x128] sm:$0xff] %vm1488_vm1, %v1035_v30 }
 0x133   : > { %1590 = vst.msk [vmem:[%s2522_s17 + $0x328] sm:$0xff] %vm1488_vm1, %v1355_v31  ;;  %1525 = vst.msk [vmem:[%s2522_s17 + $0x120] sm:$0xff] %vm1488_vm1, %v1030_v34  ;;  %v2018_v36 = vpop.f32.mrb[38].mxu0 }
 0x134   : > { %1589 = vst.msk [vmem:[%s2522_s17 + $0x320] sm:$0xff] %vm1488_vm1, %v1350_v35  ;;  %v2114_v37 = vpop.f32.mrb[38].mxu1  ;;  %v1045_v38 = vadd.f32 %v2018_v36, %v2515_v9  ;;  %v1039_v40 = vpop.f32.mrb[39].mxu0 }
 0x135   : > { %v1365_v39 = vadd.f32 %v2114_v37, %v2515_v9  ;;  %v1359_v41 = vpop.f32.mrb[39].mxu1  ;;  %v1040_v42 = vadd.f32 %v2515_v9, %v1039_v40 }
 0x136   : > { %v1360_v43 = vadd.f32 %v2515_v9, %v1359_v41  ;;  %1528 = vst.msk [vmem:[%s2522_s17 + $0x138] sm:$0xff] %vm1488_vm1, %v1045_v38 }
 0x137   : > { %1592 = vst.msk [vmem:[%s2522_s17 + $0x338] sm:$0xff] %vm1488_vm1, %v1365_v39  ;;  %1527 = vst.msk [vmem:[%s2522_s17 + $0x130] sm:$0xff] %vm1488_vm1, %v1040_v42  ;;  %v2021_v44 = vpop.f32.mrb[40].mxu0 }
 0x138   : > { %1591 = vst.msk [vmem:[%s2522_s17 + $0x330] sm:$0xff] %vm1488_vm1, %v1360_v43  ;;  %v2117_v45 = vpop.f32.mrb[40].mxu1  ;;  %v1055_v46 = vadd.f32 %v2021_v44, %v2515_v9  ;;  %v1049_v48 = vpop.f32.mrb[41].mxu0 }
 0x139   : > { %v1375_v47 = vadd.f32 %v2117_v45, %v2515_v9  ;;  %v1369_v49 = vpop.f32.mrb[41].mxu1  ;;  %v1050_v50 = vadd.f32 %v2515_v9, %v1049_v48 }
 0x13a   : > { %v1370_v51 = vadd.f32 %v2515_v9, %v1369_v49  ;;  %1530 = vst.msk [vmem:[%s2522_s17 + $0x148] sm:$0xff] %vm1488_vm1, %v1055_v46 }
 0x13b   : > { %1594 = vst.msk [vmem:[%s2522_s17 + $0x348] sm:$0xff] %vm1488_vm1, %v1375_v47  ;;  %1529 = vst.msk [vmem:[%s2522_s17 + $0x140] sm:$0xff] %vm1488_vm1, %v1050_v50  ;;  %v2024_v52 = vpop.f32.mrb[42].mxu0 }
 0x13c   : > { %1593 = vst.msk [vmem:[%s2522_s17 + $0x340] sm:$0xff] %vm1488_vm1, %v1370_v51  ;;  %v2120_v53 = vpop.f32.mrb[42].mxu1  ;;  %v1065_v54 = vadd.f32 %v2024_v52, %v2515_v9  ;;  %v1059_v56 = vpop.f32.mrb[43].mxu0 }
 0x13d   : > { %v1385_v55 = vadd.f32 %v2120_v53, %v2515_v9  ;;  %v1379_v57 = vpop.f32.mrb[43].mxu1  ;;  %v1060_v58 = vadd.f32 %v2515_v9, %v1059_v56 }
 0x13e   : > { %v1380_v59 = vadd.f32 %v2515_v9, %v1379_v57  ;;  %1532 = vst.msk [vmem:[%s2522_s17 + $0x158] sm:$0xff] %vm1488_vm1, %v1065_v54 }
 0x13f   : > { %1596 = vst.msk [vmem:[%s2522_s17 + $0x358] sm:$0xff] %vm1488_vm1, %v1385_v55  ;;  %1531 = vst.msk [vmem:[%s2522_s17 + $0x150] sm:$0xff] %vm1488_vm1, %v1060_v58  ;;  %v2027_v60 = vpop.f32.mrb[44].mxu0 }
 0x140   : > { %1595 = vst.msk [vmem:[%s2522_s17 + $0x350] sm:$0xff] %vm1488_vm1, %v1380_v59  ;;  %v2123_v61 = vpop.f32.mrb[44].mxu1  ;;  %v1075_v62 = vadd.f32 %v2027_v60, %v2515_v9  ;;  %v1069_v0 = vpop.f32.mrb[45].mxu0 }
 0x141   : > { %v1395_v63 = vadd.f32 %v2123_v61, %v2515_v9  ;;  %v1389_v1 = vpop.f32.mrb[45].mxu1  ;;  %v1070_v2 = vadd.f32 %v2515_v9, %v1069_v0 }
 0x142   : > { %v1390_v3 = vadd.f32 %v2515_v9, %v1389_v1  ;;  %1534 = vst.msk [vmem:[%s2522_s17 + $0x168] sm:$0xff] %vm1488_vm1, %v1075_v62 }
 0x143   : > { %1598 = vst.msk [vmem:[%s2522_s17 + $0x368] sm:$0xff] %vm1488_vm1, %v1395_v63  ;;  %1533 = vst.msk [vmem:[%s2522_s17 + $0x160] sm:$0xff] %vm1488_vm1, %v1070_v2  ;;  %v2030_v4 = vpop.f32.mrb[46].mxu0 }
 0x144   : > { %1597 = vst.msk [vmem:[%s2522_s17 + $0x360] sm:$0xff] %vm1488_vm1, %v1390_v3  ;;  %v2126_v5 = vpop.f32.mrb[46].mxu1  ;;  %v1085_v6 = vadd.f32 %v2030_v4, %v2515_v9  ;;  %v1079_v8 = vpop.f32.mrb[47].mxu0 }
 0x145   : > { %v1405_v7 = vadd.f32 %v2126_v5, %v2515_v9  ;;  %v1399_v10 = vpop.f32.mrb[47].mxu1  ;;  %v1080_v11 = vadd.f32 %v2515_v9, %v1079_v8 }
 0x146   : > { %v1400_v12 = vadd.f32 %v2515_v9, %v1399_v10  ;;  %1536 = vst.msk [vmem:[%s2522_s17 + $0x178] sm:$0xff] %vm1488_vm1, %v1085_v6 }
 0x147   : > { %1600 = vst.msk [vmem:[%s2522_s17 + $0x378] sm:$0xff] %vm1488_vm1, %v1405_v7  ;;  %1535 = vst.msk [vmem:[%s2522_s17 + $0x170] sm:$0xff] %vm1488_vm1, %v1080_v11  ;;  %v2033_v13 = vpop.f32.mrb[48].mxu0 }
 0x148   : > { %1599 = vst.msk [vmem:[%s2522_s17 + $0x370] sm:$0xff] %vm1488_vm1, %v1400_v12  ;;  %v2129_v14 = vpop.f32.mrb[48].mxu1  ;;  %v1095_v15 = vadd.f32 %v2033_v13, %v2515_v9  ;;  %v1089_v17 = vpop.f32.mrb[49].mxu0 }
 0x149   : > { %v1415_v16 = vadd.f32 %v2129_v14, %v2515_v9  ;;  %v1409_v18 = vpop.f32.mrb[49].mxu1  ;;  %v1090_v19 = vadd.f32 %v2515_v9, %v1089_v17 }
 0x14a   : > { %v1410_v20 = vadd.f32 %v2515_v9, %v1409_v18  ;;  %1538 = vst.msk [vmem:[%s2522_s17 + $0x188] sm:$0xff] %vm1488_vm1, %v1095_v15 }
 0x14b   : > { %1602 = vst.msk [vmem:[%s2522_s17 + $0x388] sm:$0xff] %vm1488_vm1, %v1415_v16  ;;  %1537 = vst.msk [vmem:[%s2522_s17 + $0x180] sm:$0xff] %vm1488_vm1, %v1090_v19  ;;  %v2036_v21 = vpop.f32.mrb[50].mxu0 }
 0x14c   : > { %1601 = vst.msk [vmem:[%s2522_s17 + $0x380] sm:$0xff] %vm1488_vm1, %v1410_v20  ;;  %v2132_v22 = vpop.f32.mrb[50].mxu1  ;;  %v1105_v23 = vadd.f32 %v2036_v21, %v2515_v9  ;;  %v1099_v25 = vpop.f32.mrb[51].mxu0 }
 0x14d   : > { %v1425_v24 = vadd.f32 %v2132_v22, %v2515_v9  ;;  %v1419_v26 = vpop.f32.mrb[51].mxu1  ;;  %v1100_v27 = vadd.f32 %v2515_v9, %v1099_v25 }
 0x14e   : > { %v1420_v28 = vadd.f32 %v2515_v9, %v1419_v26  ;;  %1540 = vst.msk [vmem:[%s2522_s17 + $0x198] sm:$0xff] %vm1488_vm1, %v1105_v23 }
 0x14f   : > { %1604 = vst.msk [vmem:[%s2522_s17 + $0x398] sm:$0xff] %vm1488_vm1, %v1425_v24  ;;  %1539 = vst.msk [vmem:[%s2522_s17 + $0x190] sm:$0xff] %vm1488_vm1, %v1100_v27  ;;  %v2039_v29 = vpop.f32.mrb[52].mxu0 }
 0x150   : > { %1603 = vst.msk [vmem:[%s2522_s17 + $0x390] sm:$0xff] %vm1488_vm1, %v1420_v28  ;;  %v2135_v30 = vpop.f32.mrb[52].mxu1  ;;  %v1115_v31 = vadd.f32 %v2039_v29, %v2515_v9  ;;  %v1109_v33 = vpop.f32.mrb[53].mxu0 }
 0x151   : > { %v1435_v32 = vadd.f32 %v2135_v30, %v2515_v9  ;;  %v1429_v34 = vpop.f32.mrb[53].mxu1  ;;  %v1110_v35 = vadd.f32 %v2515_v9, %v1109_v33 }
 0x152   : > { %v1430_v36 = vadd.f32 %v2515_v9, %v1429_v34  ;;  %1542 = vst.msk [vmem:[%s2522_s17 + $0x1a8] sm:$0xff] %vm1488_vm1, %v1115_v31 }
 0x153   : > { %1606 = vst.msk [vmem:[%s2522_s17 + $0x3a8] sm:$0xff] %vm1488_vm1, %v1435_v32  ;;  %1541 = vst.msk [vmem:[%s2522_s17 + $0x1a0] sm:$0xff] %vm1488_vm1, %v1110_v35  ;;  %v2042_v37 = vpop.f32.mrb[54].mxu0 }
 0x154   : > { %1605 = vst.msk [vmem:[%s2522_s17 + $0x3a0] sm:$0xff] %vm1488_vm1, %v1430_v36  ;;  %v2138_v38 = vpop.f32.mrb[54].mxu1  ;;  %v1125_v39 = vadd.f32 %v2042_v37, %v2515_v9  ;;  %v1119_v41 = vpop.f32.mrb[55].mxu0 }
 0x155   : > { %v1445_v40 = vadd.f32 %v2138_v38, %v2515_v9  ;;  %v1439_v42 = vpop.f32.mrb[55].mxu1  ;;  %v1120_v43 = vadd.f32 %v2515_v9, %v1119_v41 }
 0x156   : > { %v1440_v44 = vadd.f32 %v2515_v9, %v1439_v42  ;;  %1544 = vst.msk [vmem:[%s2522_s17 + $0x1b8] sm:$0xff] %vm1488_vm1, %v1125_v39 }
 0x157   : > { %1608 = vst.msk [vmem:[%s2522_s17 + $0x3b8] sm:$0xff] %vm1488_vm1, %v1445_v40  ;;  %1543 = vst.msk [vmem:[%s2522_s17 + $0x1b0] sm:$0xff] %vm1488_vm1, %v1120_v43  ;;  %v2045_v45 = vpop.f32.mrb[56].mxu0 }
 0x158   : > { %1607 = vst.msk [vmem:[%s2522_s17 + $0x3b0] sm:$0xff] %vm1488_vm1, %v1440_v44  ;;  %v2141_v46 = vpop.f32.mrb[56].mxu1  ;;  %v1135_v47 = vadd.f32 %v2045_v45, %v2515_v9  ;;  %v1129_v49 = vpop.f32.mrb[57].mxu0 }
 0x159   : > { %v1455_v48 = vadd.f32 %v2141_v46, %v2515_v9  ;;  %v1449_v50 = vpop.f32.mrb[57].mxu1  ;;  %v1130_v51 = vadd.f32 %v2515_v9, %v1129_v49 }
 0x15a   : > { %v1450_v52 = vadd.f32 %v2515_v9, %v1449_v50  ;;  %1546 = vst.msk [vmem:[%s2522_s17 + $0x1c8] sm:$0xff] %vm1488_vm1, %v1135_v47 }
 0x15b   : > { %1610 = vst.msk [vmem:[%s2522_s17 + $0x3c8] sm:$0xff] %vm1488_vm1, %v1455_v48  ;;  %1545 = vst.msk [vmem:[%s2522_s17 + $0x1c0] sm:$0xff] %vm1488_vm1, %v1130_v51  ;;  %v2048_v53 = vpop.f32.mrb[58].mxu0 }
 0x15c   : > { %1609 = vst.msk [vmem:[%s2522_s17 + $0x3c0] sm:$0xff] %vm1488_vm1, %v1450_v52  ;;  %v2144_v54 = vpop.f32.mrb[58].mxu1  ;;  %v1145_v55 = vadd.f32 %v2048_v53, %v2515_v9  ;;  %v1139_v57 = vpop.f32.mrb[59].mxu0 }
 0x15d   : > { %v1465_v56 = vadd.f32 %v2144_v54, %v2515_v9  ;;  %v1459_v58 = vpop.f32.mrb[59].mxu1  ;;  %v1140_v59 = vadd.f32 %v2515_v9, %v1139_v57 }
 0x15e   : > { %v1460_v60 = vadd.f32 %v2515_v9, %v1459_v58  ;;  %1548 = vst.msk [vmem:[%s2522_s17 + $0x1d8] sm:$0xff] %vm1488_vm1, %v1145_v55 }
 0x15f   : > { %1612 = vst.msk [vmem:[%s2522_s17 + $0x3d8] sm:$0xff] %vm1488_vm1, %v1465_v56  ;;  %1547 = vst.msk [vmem:[%s2522_s17 + $0x1d0] sm:$0xff] %vm1488_vm1, %v1140_v59  ;;  %v2051_v61 = vpop.f32.mrb[60].mxu0 }
 0x160   : > { %1611 = vst.msk [vmem:[%s2522_s17 + $0x3d0] sm:$0xff] %vm1488_vm1, %v1460_v60  ;;  %v2147_v62 = vpop.f32.mrb[60].mxu1  ;;  %v1155_v63 = vadd.f32 %v2051_v61, %v2515_v9  ;;  %v1149_v1 = vpop.f32.mrb[61].mxu0 }
 0x161   : > { %v1475_v0 = vadd.f32 %v2147_v62, %v2515_v9  ;;  %v1469_v2 = vpop.f32.mrb[61].mxu1  ;;  %v1150_v3 = vadd.f32 %v2515_v9, %v1149_v1 }
 0x162   : > { %v1470_v4 = vadd.f32 %v2515_v9, %v1469_v2  ;;  %1550 = vst.msk [vmem:[%s2522_s17 + $0x1e8] sm:$0xff] %vm1488_vm1, %v1155_v63 }
 0x163   : > { %1614 = vst.msk [vmem:[%s2522_s17 + $0x3e8] sm:$0xff] %vm1488_vm1, %v1475_v0  ;;  %1549 = vst.msk [vmem:[%s2522_s17 + $0x1e0] sm:$0xff] %vm1488_vm1, %v1150_v3  ;;  %v2054_v5 = vpop.f32.mrb[62].mxu0 }
 0x164   : > { %1613 = vst.msk [vmem:[%s2522_s17 + $0x3e0] sm:$0xff] %vm1488_vm1, %v1470_v4  ;;  %v2150_v6 = vpop.f32.mrb[62].mxu1  ;;  %v1165_v7 = vadd.f32 %v2054_v5, %v2515_v9  ;;  %v1159_v10 = vpop.f32.mrb[63].mxu0 }
 0x165   : > { %v1485_v8 = vadd.f32 %v2150_v6, %v2515_v9  ;;  %v1479_v11 = vpop.f32.mrb[63].mxu1  ;;  %v1160_v12 = vadd.f32 %v2515_v9, %v1159_v10 }
 0x166   : > { %v1480_v13 = vadd.f32 %v2515_v9, %v1479_v11  ;;  %1552 = vst.msk [vmem:[%s2522_s17 + $0x1f8] sm:$0xff] %vm1488_vm1, %v1165_v7 }
 0x167   : > { %1616 = vst.msk [vmem:[%s2522_s17 + $0x3f8] sm:$0xff] %vm1488_vm1, %v1485_v8  ;;  %1551 = vst.msk [vmem:[%s2522_s17 + $0x1f0] sm:$0xff] %vm1488_vm1, %v1160_v12 }
 0x168   : > { %1615 = vst.msk [vmem:[%s2522_s17 + $0x3f0] sm:$0xff] %vm1488_vm1, %v1480_v13 }
 0x169 PF: > { %s18_s21 = sadd.s32 1, %s2183_s21  }
 0x16a   : > { %p15_p4 = scmp.ge.s32.totalorder %s18_s21, 4  }
 0x16c   :  { %17 = sbr.rel (!%p15_p4) target bundleno = 1 (0x1), region = 74 }

// kernel: _lambda_.11
= control target key start
LH: loop header
LB: loop body
LE: loop exit
PB: predicated region body
PF: predicated region fallthrough
CT: control target
= control target key end

     0   :  { %s1534_s26 = smov 0   ;;  %s2320_s0 = inlined_call_operand.vmem [shape: f32[512,128], index: 0, kind: input, shape index: {}]   ;;  %s2321_s1 = inlined_call_operand.vmem [shape: f32[128,16], index: 1, kind: input, shape index: {}]   ;;  %s2322_s2 = inlined_call_operand.vmem [shape: f32[1,16], index: 2, kind: input, shape index: {}]   ;;  %s2323_s3 = inlined_call_operand.vmem [shape: f32[1,128], index: 3, kind: input, shape index: {}]   ;;  %s2324_s4 = inlined_call_operand.vmem [shape: f32[1,128], index: 4, kind: input, shape index: {}]   ;;  %s2325_s5 = inlined_call_operand.<no memory space> [shape: f32[1,1], index: 5, kind: input, shape index: {}]   ;;  %s2326_s6 = inlined_call_operand.vmem [shape: f32[512,16], index: 6, kind: output, shape index: {0}]   ;;  %s2327_s7 = inlined_call_operand.vmem [shape: f32[2,2,16], index: 7, kind: output, shape index: {1}]  }
   0x1   :  { %v13_v0 = vstv %s2325_s5 }
   0x2   :  { %14 = vst [vmem:[#allocation2] sm:$0x1] %v13_v0 }
   0x3 LB: > { %s1540_s3 = sadd.s32 4294967295, %s1487_s26   ;;  %p1247_p0 = scmp.ge.s32.totalorder %s1487_s26, 1  ;;  %s1487_s26 = sphi %s1534_s26, %s20_s26  }
   0x4   : > { %p243_p1 = scmp.lt.s32.totalorder %s1487_s26, 3 }
   0x6   : > { %p244_p2 = pnand %p1247_p0, %p243_p1 }
   0x8   : > { %247 = sbr.rel (%p244_p2) target bundleno = 528 (0x210), region = 44 }
   0xf   : > { %v1253_v1 = vld [vmem:[#allocation2] ss:$0 sm:$0xff]  ;;  %v434_v3 = vld [vmem:[%s2321_s1 + $0x8] sm:$0xff]  ;;  %v1489_v4 = vmov 0   ;;  %v435_v6 = vld [vmem:[%s2321_s1 + $0x10] sm:$0xff]  ;;  %s1248_s10 = sshll.u32 %s1540_s3, 5 }
  0x10   : > { %v433_v2 = vld [vmem:[%s2321_s1] sm:$0xff]  ;;  %1478 = vset.pattern.permute.xlu0 %v1489_v4  ;;  %v436_v7 = vld [vmem:[%s2321_s1 + $0x18] sm:$0xff]  ;;  %v438_v10 = vld [vmem:[%s2321_s1 + $0x28] sm:$0xff]  ;;  %p280_p3 = scmp.lt.s32.totalorder %s1248_s10, 63  ;;  %s1255_s15 = sshll.u32 %s1540_s3, 8 }
  0x11   : > { %v1418_v5 = vpack.c.bf16 %v434_v3, %v433_v2  ;;  %366 = vperm.xlu0 %1478, %v1253_v1   ;;  %v1422_v8 = vpack.c.bf16 %v436_v7, %v435_v6  ;;  %v437_v9 = vld [vmem:[%s2321_s1 + $0x20] sm:$0xff]  ;;  %v439_v12 = vld [vmem:[%s2321_s1 + $0x30] sm:$0xff]  ;;  %v440_v13 = vld [vmem:[%s2321_s1 + $0x38] sm:$0xff]  ;;  %s877_s16 = ssub.s32 512, %s1255_s15  ;;  %p291_p5 = scmp.lt.s32.totalorder %s1540_s3, 1 }
  0x12   : > { %v1426_v11 = vpack.c.bf16 %v438_v10, %v437_v9  ;;  %v1430_v14 = vpack.c.bf16 %v440_v13, %v439_v12  ;;  %v441_v15 = vld [vmem:[%s2321_s1 + $0x40] sm:$0xff]  ;;  %v442_v16 = vld [vmem:[%s2321_s1 + $0x48] sm:$0xff]  ;;  %v443_v18 = vld [vmem:[%s2321_s1 + $0x50] sm:$0xff]  ;;  %s2386_s10 = smov (!%p280_p3, %s1248_s10), 63  ;;  %p878_p4 = scmp.lt.s32.totalorder %s877_s16, 256 }
  0x13   : > { %1419 = vmatprep.subr.bf16.mxu0 %v1418_v5  ;;  %1450 = vmatprep.subr.bf16.mxu1 %v1418_v5  ;;  %v1434_v17 = vpack.c.bf16 %v442_v16, %v441_v15  ;;  %v444_v19 = vld [vmem:[%s2321_s1 + $0x58] sm:$0xff]  ;;  %v445_v21 = vld [vmem:[%s2321_s1 + $0x60] sm:$0xff]  ;;  %v446_v22 = vld [vmem:[%s2321_s1 + $0x68] sm:$0xff]  ;;  %s1249_s11 = sshll.u32 %s2386_s10, 3  ;;  %s2390_s3 = smov (!%p291_p5, %s1540_s3), 1 }
  0x14   : > { %1421 = vmatpush3.bf16.msra.mxu0 %v1418_v5  ;;  %1458 = vmatpush3.bf16.msra.mxu1 %v1418_v5  ;;  %v1438_v20 = vpack.c.bf16 %v444_v19, %v443_v18  ;;  %v1442_v23 = vpack.c.bf16 %v446_v22, %v445_v21  ;;  %v447_v24 = vld [vmem:[%s2321_s1 + $0x70] sm:$0xff]  ;;  %v448_v25 = vld [vmem:[%s2321_s1 + $0x78] sm:$0xff]  ;;  %s1601_s14 = scalar_lea.vmem %s2320_s0, %s1249_s11  ;;  %s2388_s16 = smov (!%p878_p4, %s877_s16), 256 }
  0x15   : > { %1423 = vmatprep.subr.bf16.mxu0 %v1422_v8  ;;  %1451 = vmatprep.subr.bf16.mxu1 %v1422_v8  ;;  %v1446_v26 = vpack.c.bf16 %v448_v25, %v447_v24  ;;  %v295_v27 = vld [vmem:[%s1601_s14] sm:$0xff]  ;;  %v296_v29 = vld [vmem:[%s1601_s14 + $0x8] sm:$0xff]  ;;  %v297_v31 = vld [vmem:[%s1601_s14 + $0x10] sm:$0xff]  ;;  %s880_s17 = scvt.s32.f32 %s2388_s16  ;;  %s1721_s22 = scalar_lea.vmem %s2326_s6, %s1249_s11 }
  0x16   : > { %v311_v28 = vld [vmem:[%s1601_s14 + $0x80] sm:$0xff]  ;;  %v312_v30 = vld [vmem:[%s1601_s14 + $0x88] sm:$0xff]  ;;  %vm327_vm0 = vcmp.ge.f32.partialorder %v295_v27, 0.0  ;;  %v313_v32 = vld [vmem:[%s1601_s14 + $0x90] sm:$0xff]  ;;  %vm328_vm2 = vcmp.ge.f32.partialorder %v296_v29, 0.0  ;;  %vm329_vm4 = vcmp.ge.f32.partialorder %v297_v31, 0.0 }
  0x17   : > { %v298_v33 = vld [vmem:[%s1601_s14 + $0x18] sm:$0xff]  ;;  %vm343_vm1 = vcmp.ge.f32.partialorder %v311_v28, 0.0  ;;  %vm344_vm3 = vcmp.ge.f32.partialorder %v312_v30, 0.0  ;;  %vm345_vm5 = vcmp.ge.f32.partialorder %v313_v32, 0.0  ;;  %v299_v43 = vld [vmem:[%s1601_s14 + $0x20] sm:$0xff]  ;;  %v300_v51 = vld [vmem:[%s1601_s14 + $0x28] sm:$0xff] }
  0x18   : > { %1425 = vmatpush3.bf16.msra.mxu0 %v1422_v8  ;;  %1459 = vmatpush3.bf16.msra.mxu1 %v1422_v8  ;;  %v314_v39 = vld [vmem:[%s1601_s14 + $0x98] sm:$0xff]  ;;  %v315_v44 = vld [vmem:[%s1601_s14 + $0xa0] sm:$0xff]  ;;  %vm330_vm6 = vcmp.ge.f32.partialorder %v298_v33, 0.0  ;;  %v316_v52 = vld [vmem:[%s1601_s14 + $0xa8] sm:$0xff]  ;;  %vm331_vm8 = vcmp.ge.f32.partialorder %v299_v43, 0.0  ;;  %vm332_vm10 = vcmp.ge.f32.partialorder %v300_v51, 0.0 }
  0x19   : > { %1427 = vmatprep.subr.bf16.mxu0 %v1426_v11  ;;  %1452 = vmatprep.subr.bf16.mxu1 %v1426_v11  ;;  %vm346_vm7 = vcmp.ge.f32.partialorder %v314_v39, 0.0  ;;  %v301_v56 = vld [vmem:[%s1601_s14 + $0x30] sm:$0xff]  ;;  %vm347_vm9 = vcmp.ge.f32.partialorder %v315_v44, 0.0  ;;  %vm348_vm11 = vcmp.ge.f32.partialorder %v316_v52, 0.0  ;;  %v302_v63 = vld [vmem:[%s1601_s14 + $0x38] sm:$0xff]  ;;  %v303_v4 = vld [vmem:[%s1601_s14 + $0x40] sm:$0xff] }
  0x1a   : > { %v317_v57 = vld [vmem:[%s1601_s14 + $0xb0] sm:$0xff]  ;;  %vm333_vm12 = vcmp.ge.f32.partialorder %v301_v56, 0.0  ;;  %v318_v3 = vld [vmem:[%s1601_s14 + $0xb8] sm:$0xff]  ;;  %v319_v5 = vld [vmem:[%s1601_s14 + $0xc0] sm:$0xff]  ;;  %vm334_vm14 = vcmp.ge.f32.partialorder %v302_v63, 0.0  ;;  %s1252_s24 = sshll.u32 %s2390_s3, 1 }
  0x1b   : > { %vm349_vm13 = vcmp.ge.f32.partialorder %v317_v57, 0.0  ;;  %v320_v12 = vld [vmem:[%s1601_s14 + $0xc8] sm:$0xff]  ;;  %vm350_vm15 = vcmp.ge.f32.partialorder %v318_v3, 0.0  ;;  %v305_v16 = vld [vmem:[%s1601_s14 + $0x50] sm:$0xff]  ;;  %s294_s5 = scalar_lea.vmem %s2327_s7, %s1252_s24 }
  0x1c   : > { %1429 = vmatpush3.bf16.msra.mxu0 %v1426_v11  ;;  %1460 = vmatpush3.bf16.msra.mxu1 %v1426_v11  ;;  %v304_v11 = vld [vmem:[%s1601_s14 + $0x48] sm:$0xff] }
  0x1d   : > { %1431 = vmatprep.subr.bf16.mxu0 %v1430_v14  ;;  %1453 = vmatprep.subr.bf16.mxu1 %v1430_v14 }
  0x20   : > { %1433 = vmatpush3.bf16.msra.mxu0 %v1430_v14  ;;  %1461 = vmatpush3.bf16.msra.mxu1 %v1430_v14 }
  0x21   : > { %1435 = vmatprep.subr.bf16.mxu0 %v1434_v17  ;;  %1454 = vmatprep.subr.bf16.mxu1 %v1434_v17 }
  0x24   : > { %1437 = vmatpush3.bf16.msra.mxu0 %v1434_v17  ;;  %1462 = vmatpush3.bf16.msra.mxu1 %v1434_v17  ;;  %v321_v17 = vld [vmem:[%s1601_s14 + $0xd0] sm:$0xff] }
  0x25   : > { %1439 = vmatprep.subr.bf16.mxu0 %v1438_v20  ;;  %1455 = vmatprep.subr.bf16.mxu1 %v1438_v20 }
  0x28   : > { %1441 = vmatpush3.bf16.msra.mxu0 %v1438_v20  ;;  %1463 = vmatpush3.bf16.msra.mxu1 %v1438_v20 }
  0x29   : > { %1443 = vmatprep.subr.bf16.mxu0 %v1442_v23  ;;  %1456 = vmatprep.subr.bf16.mxu1 %v1442_v23 }
  0x2c   : > { %1445 = vmatpush3.bf16.msra.mxu0 %v1442_v23  ;;  %1464 = vmatpush3.bf16.msra.mxu1 %v1442_v23  ;;  %v306_v23 = vld [vmem:[%s1601_s14 + $0x58] sm:$0xff] }
  0x2d   : > { %1447 = vmatprep.subr.bf16.mxu0 %v1446_v26  ;;  %1457 = vmatprep.subr.bf16.mxu1 %v1446_v26 }
  0x30   : > { %1449 = vmatpush3.bf16.msra.mxu0 %v1446_v26  ;;  %1465 = vmatpush3.bf16.msra.mxu1 %v1446_v26 }
  0x90   : > { %v1610_v34 = vpop.permute.xlu0 %366 }
  0x91   : > { %v369_v35 = vmul.f32 %v1610_v34, %v295_v27  ;;  %v385_v36 = vmul.f32 %v1610_v34, %v311_v28  ;;  %v370_v37 = vmul.f32 %v1610_v34, %v296_v29  ;;  %v386_v38 = vmul.f32 %v1610_v34, %v312_v30 }
  0x92   : > { %v371_v40 = vmul.f32 %v1610_v34, %v297_v31  ;;  %v387_v41 = vmul.f32 %v1610_v34, %v313_v32  ;;  %v372_v42 = vmul.f32 %v1610_v34, %v298_v33  ;;  %v388_v50 = vmul.f32 %v1610_v34, %v314_v39 }
  0x93   : > { %v401_v45 = vsel %vm327_vm0, %v295_v27, %v369_v35  ;;  %v417_v46 = vsel %vm343_vm1, %v311_v28, %v385_v36  ;;  %v402_v47 = vsel %vm328_vm2, %v296_v29, %v370_v37  ;;  %v418_v48 = vsel %vm344_vm3, %v312_v30, %v386_v38  ;;  %v322_v27 = vld [vmem:[%s1601_s14 + $0xd8] sm:$0xff]  ;;  %v307_v28 = vld [vmem:[%s1601_s14 + $0x60] sm:$0xff]  ;;  %v308_v36 = vld [vmem:[%s1601_s14 + $0x68] sm:$0xff] }
  0x94   : > { %1370 = vmatprep.mubr.f32.mxu0 %v401_v45  ;;  %1394 = vmatprep.mubr.f32.mxu1 %v417_v46  ;;  %v403_v49 = vsel %vm329_vm4, %v297_v31, %v371_v40  ;;  %v419_v53 = vsel %vm345_vm5, %v313_v32, %v387_v41  ;;  %v373_v54 = vmul.f32 %v1610_v34, %v299_v43  ;;  %vm335_vm0 = vcmp.ge.f32.partialorder %v303_v4, 0.0  ;;  %v323_v29 = vld [vmem:[%s1601_s14 + $0xe0] sm:$0xff]  ;;  %v324_v40 = vld [vmem:[%s1601_s14 + $0xe8] sm:$0xff]  ;;  %v309_v41 = vld [vmem:[%s1601_s14 + $0x70] sm:$0xff] }
  0x95   : > { %1371 = vmatmul.mubr.f32.vlgmr.msra.gmra.mrb[0].mxu0 %v402_v47  ;;  %1395 = vmatmul.mubr.f32.vlgmr.msra.gmra.mrb[0].mxu1 %v418_v48  ;;  %v389_v55 = vmul.f32 %v1610_v34, %v315_v44  ;;  %v404_v58 = vsel %vm330_vm6, %v298_v33, %v372_v42  ;;  %v420_v59 = vsel %vm346_vm7, %v314_v39, %v388_v50  ;;  %vm351_vm1 = vcmp.ge.f32.partialorder %v319_v5, 0.0  ;;  %v325_v42 = vld [vmem:[%s1601_s14 + $0xf0] sm:$0xff] }
  0x96   : > { %1373 = vmatprep.mubr.f32.mxu0 %v403_v49  ;;  %1397 = vmatprep.mubr.f32.mxu1 %v419_v53  ;;  %v374_v60 = vmul.f32 %v1610_v34, %v300_v51  ;;  %v390_v61 = vmul.f32 %v1610_v34, %v316_v52  ;;  %v375_v62 = vmul.f32 %v1610_v34, %v301_v56  ;;  %vm336_vm2 = vcmp.ge.f32.partialorder %v304_v11, 0.0 }
  0x97   : > { %v405_v0 = vsel %vm331_vm8, %v299_v43, %v373_v54  ;;  %v421_v1 = vsel %vm347_vm9, %v315_v44, %v389_v55  ;;  %v391_v2 = vmul.f32 %v1610_v34, %v317_v57  ;;  %v376_v6 = vmul.f32 %v1610_v34, %v302_v63 }
  0x98   : > { %v406_v7 = vsel %vm332_vm10, %v300_v51, %v374_v60  ;;  %v422_v8 = vsel %vm348_vm11, %v316_v52, %v390_v61  ;;  %v407_v9 = vsel %vm333_vm12, %v301_v56, %v375_v62  ;;  %v392_v10 = vmul.f32 %v1610_v34, %v318_v3  ;;  %v310_v51 = vld [vmem:[%s1601_s14 + $0x78] sm:$0xff] }
  0x99   : > { %1374 = vmatmul.mubr.f32.gmra.mrb[2].mxu0 %v404_v58  ;;  %1398 = vmatmul.mubr.f32.gmra.mrb[2].mxu1 %v420_v59  ;;  %v423_v13 = vsel %vm349_vm13, %v317_v57, %v391_v2  ;;  %v377_v14 = vmul.f32 %v1610_v34, %v303_v4  ;;  %v393_v15 = vmul.f32 %v1610_v34, %v319_v5  ;;  %vm352_vm3 = vcmp.ge.f32.partialorder %v320_v12, 0.0  ;;  %v326_v52 = vld [vmem:[%s1601_s14 + $0xf8] sm:$0xff] }
  0x9a   : > { %1376 = vmatprep.mubr.f32.mxu0 %v405_v0  ;;  %1400 = vmatprep.mubr.f32.mxu1 %v421_v1  ;;  %v408_v18 = vsel %vm334_vm14, %v302_v63, %v376_v6  ;;  %v424_v19 = vsel %vm350_vm15, %v318_v3, %v392_v10  ;;  %v378_v20 = vmul.f32 %v1610_v34, %v304_v11  ;;  %vm337_vm4 = vcmp.ge.f32.partialorder %v305_v16, 0.0 }
  0x9b   : > { %v394_v21 = vmul.f32 %v1610_v34, %v320_v12  ;;  %v379_v22 = vmul.f32 %v1610_v34, %v305_v16  ;;  %v409_v24 = vsel %vm335_vm0, %v303_v4, %v377_v14  ;;  %v425_v25 = vsel %vm351_vm1, %v319_v5, %v393_v15 }
  0x9c   : > { %v395_v26 = vmul.f32 %v1610_v34, %v321_v17  ;;  %vm353_vm5 = vcmp.ge.f32.partialorder %v321_v17, 0.0  ;;  %vm338_vm6 = vcmp.ge.f32.partialorder %v306_v23, 0.0  ;;  %v380_v30 = vmul.f32 %v1610_v34, %v306_v23 }
  0x9d   : > { %1377 = vmatmul.mubr.f32.gmra.mrb[4].mxu0 %v406_v7  ;;  %1401 = vmatmul.mubr.f32.gmra.mrb[4].mxu1 %v422_v8  ;;  %v410_v31 = vsel %vm336_vm2, %v304_v11, %v378_v20  ;;  %v426_v32 = vsel %vm352_vm3, %v320_v12, %v394_v21  ;;  %v411_v33 = vsel %vm337_vm4, %v305_v16, %v379_v22  ;;  %vm354_vm7 = vcmp.ge.f32.partialorder %v322_v27, 0.0 }
  0x9e   : > { %1379 = vmatprep.mubr.f32.mxu0 %v407_v9  ;;  %1403 = vmatprep.mubr.f32.mxu1 %v423_v13  ;;  %v396_v35 = vmul.f32 %v1610_v34, %v322_v27  ;;  %v427_v37 = vsel %vm353_vm5, %v321_v17, %v395_v26  ;;  %v381_v38 = vmul.f32 %v1610_v34, %v307_v28  ;;  %vm339_vm8 = vcmp.ge.f32.partialorder %v307_v28, 0.0  ;;  %v1704_v13 = vld [vmem:[%s2322_s2] ss:$0 sm:$0xff] }
  0x9f   : > { %v397_v39 = vmul.f32 %v1610_v34, %v323_v29  ;;  %vm355_vm9 = vcmp.ge.f32.partialorder %v323_v29, 0.0  ;;  %v412_v43 = vsel %vm338_vm6, %v306_v23, %v380_v30  ;;  %vm340_vm10 = vcmp.ge.f32.partialorder %v308_v36, 0.0 }
  0xa0   : > { %v428_v44 = vsel %vm354_vm7, %v322_v27, %v396_v35  ;;  %v382_v45 = vmul.f32 %v1610_v34, %v308_v36  ;;  %v398_v46 = vmul.f32 %v1610_v34, %v324_v40  ;;  %v383_v47 = vmul.f32 %v1610_v34, %v309_v41 }
  0xa1   : > { %1380 = vmatmul.mubr.f32.gmra.mrb[6].mxu0 %v408_v18  ;;  %1404 = vmatmul.mubr.f32.gmra.mrb[6].mxu1 %v424_v19  ;;  %v413_v48 = vsel %vm339_vm8, %v307_v28, %v381_v38  ;;  %v429_v49 = vsel %vm355_vm9, %v323_v29, %v397_v39  ;;  %vm356_vm11 = vcmp.ge.f32.partialorder %v324_v40, 0.0  ;;  %v399_v50 = vmul.f32 %v1610_v34, %v325_v42 }
  0xa2   : > { %1382 = vmatprep.mubr.f32.mxu0 %v409_v24  ;;  %1406 = vmatprep.mubr.f32.mxu1 %v425_v25  ;;  %vm341_vm12 = vcmp.ge.f32.partialorder %v309_v41, 0.0  ;;  %vm357_vm13 = vcmp.ge.f32.partialorder %v325_v42, 0.0  ;;  %v414_v53 = vsel %vm340_vm10, %v308_v36, %v382_v45  ;;  %v430_v54 = vsel %vm356_vm11, %v324_v40, %v398_v46 }
  0xa3   : > { %v384_v55 = vmul.f32 %v1610_v34, %v310_v51  ;;  %v400_v56 = vmul.f32 %v1610_v34, %v326_v52  ;;  %v415_v57 = vsel %vm341_vm12, %v309_v41, %v383_v47  ;;  %v431_v58 = vsel %vm357_vm13, %v325_v42, %v399_v50 }
  0xa4   : > { %vm342_vm14 = vcmp.ge.f32.partialorder %v310_v51, 0.0  ;;  %vm358_vm15 = vcmp.ge.f32.partialorder %v326_v52, 0.0  ;;  %v982_v61 = vstv %s880_s17  ;;  %v714_v62 = vlaneseq }
  0xa5   : > { %1383 = vmatmul.mubr.f32.gmra.mrb[8].mxu0 %v410_v31  ;;  %1407 = vmatmul.mubr.f32.gmra.mrb[8].mxu1 %v426_v32  ;;  %v416_v59 = vsel %vm342_vm14, %v310_v51, %v384_v55  ;;  %v432_v60 = vsel %vm358_vm15, %v326_v52, %v400_v56  ;;  %1479 = vrcp.f32 %v982_v61  ;;  %v1687_v1 = vstv %s1255_s15 }
  0xa6   : > { %1385 = vmatprep.mubr.f32.mxu0 %v411_v33  ;;  %1409 = vmatprep.mubr.f32.mxu1 %v427_v37  ;;  %v1684_v63 = vshrl.u32 %v714_v62, 7  ;;  %vm681_vm2 = vcmask 130048   ;;  %v2331_v15 = vmov 0.0  }
  0xa8   : > { %v716_v0 = vadd.s32 8, %v1684_v63  ;;  %v749_v3 = vadd.s32 %v1687_v1, %v1684_v63  ;;  %v718_v4 = vadd.s32 24, %v1684_v63  ;;  %v717_v5 = vadd.s32 16, %v1684_v63 }
  0xa9   : > { %1386 = vmatmul.mubr.f32.gmra.mrb[10].mxu0 %v412_v43  ;;  %1410 = vmatmul.mubr.f32.gmra.mrb[10].mxu1 %v428_v44  ;;  %v732_v6 = vadd.s32 136, %v1684_v63  ;;  %v720_v9 = vadd.s32 40, %v1684_v63  ;;  %v719_v10 = vadd.s32 32, %v1684_v63  ;;  %v722_v11 = vadd.s32 56, %v1684_v63 }
  0xaa   : > { %1388 = vmatprep.mubr.f32.mxu0 %v413_v48  ;;  %1412 = vmatprep.mubr.f32.mxu1 %v429_v49  ;;  %v750_v2 = vadd.s32 %v1687_v1, %v716_v0  ;;  %vm781_vm1 = vcmp.lt.s32.totalorder %v749_v3, 512  ;;  %v752_v7 = vadd.s32 %v1687_v1, %v718_v4  ;;  %v751_v8 = vadd.s32 %v1687_v1, %v717_v5 }
  0xab   : > { %v721_v12 = vadd.s32 48, %v1684_v63  ;;  %v731_v14 = vadd.s32 128, %v1684_v63  ;;  %v1711_v17 = vadd.s32 %v1687_v1, %v732_v6  ;;  %v1714_v18 = vsel %vm781_vm1, 1.0, %v2331_v15 }
  0xac   : > { %vm782_vm0 = vcmp.lt.s32.totalorder %v750_v2, 512  ;;  %vm784_vm3 = vcmp.lt.s32.totalorder %v752_v7, 512  ;;  %vm783_vm4 = vcmp.lt.s32.totalorder %v751_v8, 512  ;;  %v754_v21 = vadd.s32 %v1687_v1, %v720_v9 }
  0xad   : > { %1389 = vmatmul.mubr.f32.gmra.mrb[12].mxu0 %v414_v53  ;;  %1413 = vmatmul.mubr.f32.gmra.mrb[12].mxu1 %v430_v54  ;;  %v1708_v16 = vsel %vm782_vm0, 1.0, %v2331_v15  ;;  %v753_v22 = vadd.s32 %v1687_v1, %v719_v10  ;;  %v756_v23 = vadd.s32 %v1687_v1, %v722_v11  ;;  %v755_v28 = vadd.s32 %v1687_v1, %v721_v12 }
  0xae   : > { %1391 = vmatprep.mubr.f32.mxu0 %v415_v57  ;;  %1415 = vmatprep.mubr.f32.mxu1 %v431_v58  ;;  %v724_v29 = vadd.s32 72, %v1684_v63  ;;  %v1741_v32 = vadd.s32 %v1687_v1, %v731_v14  ;;  %v1744_v33 = vadd.s32 152, %v1684_v63  ;;  %v1756_v36 = vsel %vm784_vm3, 1.0, %v2331_v15 }
  0xaf   : > { %v1480_v34 = vpop.eup %1479  ;;  %v1760_v37 = vsel %vm783_vm4, 1.0, %v2331_v15  ;;  %v723_v38 = vadd.s32 64, %v1684_v63  ;;  %vm786_vm5 = vcmp.lt.s32.totalorder %v754_v21, 512  ;;  %vm785_vm6 = vcmp.lt.s32.totalorder %v753_v22, 512 }
  0xb0   : > { %1466 = vpush %v1480_v34  ;;  %vm788_vm7 = vcmp.lt.s32.totalorder %v756_v23, 512  ;;  %vm787_vm8 = vcmp.lt.s32.totalorder %v755_v28, 512  ;;  %v758_v46 = vadd.s32 %v1687_v1, %v724_v29  ;;  %v1793_v51 = vsel %vm786_vm5, 1.0, %v2331_v15 }
  0xb1   : > { %1392 = vmatmul.mubr.f32.gmra.mrb[14].mxu0 %v416_v59  ;;  %1416 = vmatmul.mubr.f32.gmra.mrb[14].mxu1 %v432_v60  ;;  %v1796_v52 = vsel %vm785_vm6, 1.0, %v2331_v15  ;;  %v757_v53 = vadd.s32 %v1687_v1, %v723_v38  ;;  %v726_v54 = vadd.s32 88, %v1684_v63  ;;  %v1812_v59 = vsel %vm788_vm7, 1.0, %v2331_v15 }
  0xb2   : > { %v725_v60 = vadd.s32 80, %v1684_v63  ;;  %v1823_v3 = vsel %vm787_vm8, 1.0, %v2331_v15  ;;  %vm790_vm9 = vcmp.lt.s32.totalorder %v758_v46, 512  ;;  %v728_v9 = vadd.s32 104, %v1684_v63 }
  0xb3   : > { %vm789_vm10 = vcmp.lt.s32.totalorder %v757_v53, 512  ;;  %v760_v8 = vadd.s32 %v1687_v1, %v726_v54  ;;  %vm797_vm11 = vcmp.lt.s32.totalorder %v1741_v32, 512  ;;  %v727_v28 = vadd.s32 96, %v1684_v63 }
  0xb4   : > { %vm798_vm0 = vcmp.lt.s32.totalorder %v1711_v17, 512 }
  0xb5   : > { %vm792_vm12 = vcmp.lt.s32.totalorder %v760_v8, 512 }
  0xe1   : > { %s1467_s23 = spop %1466 }
 0x168   : > { %v1372_v19 = vpop.f32.mrb[0].mxu0  ;;  %v1396_v20 = vpop.f32.mrb[0].mxu1 }
 0x169   : > { %v1727_v24 = vadd.f32 %v1372_v19, %v1704_v13  ;;  %v1730_v25 = vadd.f32 %v1396_v20, %v1704_v13  ;;  %v522_v26 = vpop.f32.mrb[1].mxu0  ;;  %v602_v27 = vpop.f32.mrb[1].mxu1  ;;  %v759_v20 = vadd.s32 %v1687_v1, %v725_v60  ;;  %v730_v60 = vadd.s32 120, %v1684_v63 }
 0x16a   : > { %v1735_v30 = vadd.f32 %v1704_v13, %v522_v26  ;;  %v1738_v31 = vadd.f32 %v1704_v13, %v602_v27  ;;  %v1858_v27 = vsel %vm790_vm9, 1.0, %v2331_v15 }
 0x16b   : > { %2348 = vst [vmem:[#allocation3_spill] sm:$0xff] %v1730_v25  ;;  %683 = vst.msk [vmem:[%s1721_s22 + $0x8] sm:$0xff] %vm681_vm2, %v1727_v24  ;;  %v882_v35 = vmul.f32 %v1708_v16, %v1727_v24  ;;  %vm791_vm13 = vcmp.lt.s32.totalorder %v759_v20, 512 }
 0x16c   : > { %699 = vst.msk [vmem:[%s1721_s22 + $0x88] sm:$0xff] %vm681_vm2, %v1730_v25  ;;  %682 = vst.msk [vmem:[%s1721_s22] sm:$0xff] %vm681_vm2, %v1735_v30  ;;  %v881_v39 = vmul.f32 %v1714_v18, %v1735_v30  ;;  %v1375_v40 = vpop.f32.mrb[2].mxu0  ;;  %v1399_v41 = vpop.f32.mrb[2].mxu1 }
 0x16d   : > { %698 = vst.msk [vmem:[%s1721_s22 + $0x80] sm:$0xff] %vm681_vm2, %v1738_v31  ;;  %v1772_v42 = vadd.f32 %v1375_v40, %v1704_v13  ;;  %v1775_v43 = vadd.f32 %v1399_v41, %v1704_v13  ;;  %v532_v44 = vpop.f32.mrb[3].mxu0  ;;  %v612_v45 = vpop.f32.mrb[3].mxu1  ;;  %v914_v47 = vsel %vm681_vm2, %v882_v35, 0.0 }
 0x16e   : > { %v913_v48 = vsel %vm681_vm2, %v881_v39, 0.0  ;;  %v1781_v49 = vadd.f32 %v1704_v13, %v532_v44  ;;  %v1784_v50 = vadd.f32 %v1704_v13, %v612_v45  ;;  %v1870_v39 = vsel %vm789_vm10, 1.0, %v2331_v15 }
 0x16f   : > { %685 = vst.msk [vmem:[%s1721_s22 + $0x18] sm:$0xff] %vm681_vm2, %v1772_v42  ;;  %701 = vst.msk [vmem:[%s1721_s22 + $0x98] sm:$0xff] %vm681_vm2, %v1775_v43  ;;  %v884_v55 = vmul.f32 %v1756_v36, %v1772_v42  ;;  %v915_v61 = vadd.f32 %v914_v47, %v913_v48  ;;  %v762_v44 = vadd.s32 %v1687_v1, %v728_v9 }
 0x170   : > { %2349 = vst [vmem:[#allocation4_spill] sm:$0xff] %v1784_v50  ;;  %684 = vst.msk [vmem:[%s1721_s22 + $0x10] sm:$0xff] %vm681_vm2, %v1781_v49  ;;  %v883_v56 = vmul.f32 %v1760_v37, %v1781_v49  ;;  %v1378_v57 = vpop.f32.mrb[4].mxu0  ;;  %v1402_v58 = vpop.f32.mrb[4].mxu1 }
 0x171   : > { %700 = vst.msk [vmem:[%s1721_s22 + $0x90] sm:$0xff] %vm681_vm2, %v1784_v50  ;;  %v1816_v34 = vadd.f32 %v1378_v57, %v1704_v13  ;;  %v1819_v62 = vadd.f32 %v1402_v58, %v1704_v13  ;;  %v542_v0 = vpop.f32.mrb[5].mxu0  ;;  %v622_v2 = vpop.f32.mrb[5].mxu1  ;;  %v918_v10 = vsel %vm681_vm2, %v884_v55, 0.0  ;;  %v761_v58 = vadd.s32 %v1687_v1, %v727_v28 }
 0x172   : > { %v916_v4 = vsel %vm681_vm2, %v883_v56, 0.0  ;;  %v1827_v5 = vadd.f32 %v1704_v13, %v542_v0  ;;  %v1830_v6 = vadd.f32 %v1704_v13, %v622_v2  ;;  %vm794_vm14 = vcmp.lt.s32.totalorder %v762_v44, 512 }
 0x173   : > { %v917_v7 = vadd.f32 %v916_v4, %v915_v61  ;;  %687 = vst.msk [vmem:[%s1721_s22 + $0x28] sm:$0xff] %vm681_vm2, %v1816_v34  ;;  %703 = vst.msk [vmem:[%s1721_s22 + $0xa8] sm:$0xff] %vm681_vm2, %v1819_v62  ;;  %v886_v11 = vmul.f32 %v1793_v51, %v1816_v34  ;;  %v729_v4 = vadd.s32 112, %v1684_v63  ;;  %vm793_vm15 = vcmp.lt.s32.totalorder %v761_v58, 512 }
 0x174   : > { %686 = vst.msk [vmem:[%s1721_s22 + $0x20] sm:$0xff] %vm681_vm2, %v1827_v5  ;;  %v885_v12 = vmul.f32 %v1796_v52, %v1827_v5  ;;  %702 = vst.msk [vmem:[%s1721_s22 + $0xa0] sm:$0xff] %vm681_vm2, %v1830_v6  ;;  %v1381_v14 = vpop.f32.mrb[6].mxu0  ;;  %v1405_v19 = vpop.f32.mrb[6].mxu1  ;;  %v735_v58 = vadd.s32 160, %v1684_v63 }
 0x175   : > { %v919_v21 = vadd.f32 %v918_v10, %v917_v7  ;;  %v1854_v22 = vadd.f32 %v1381_v14, %v1704_v13  ;;  %v552_v23 = vpop.f32.mrb[7].mxu0  ;;  %v632_v26 = vpop.f32.mrb[7].mxu1  ;;  %v1863_v35 = vadd.f32 %v1405_v19, %v1704_v13  ;;  %v922_v45 = vsel %vm681_vm2, %v886_v11, 0.0 }
 0x176   : > { %v920_v29 = vsel %vm681_vm2, %v885_v12, 0.0  ;;  %v1866_v38 = vadd.f32 %v1704_v13, %v552_v23  ;;  %v1876_v41 = vadd.f32 %v1704_v13, %v632_v26  ;;  %v1914_v10 = vsel %vm792_vm12, 1.0, %v2331_v15 }
 0x177   : > { %v921_v40 = vadd.f32 %v920_v29, %v919_v21  ;;  %689 = vst.msk [vmem:[%s1721_s22 + $0x38] sm:$0xff] %vm681_vm2, %v1854_v22  ;;  %v888_v46 = vmul.f32 %v1812_v59, %v1854_v22  ;;  %705 = vst.msk [vmem:[%s1721_s22 + $0xb8] sm:$0xff] %vm681_vm2, %v1863_v35  ;;  %v1918_v11 = vsel %vm791_vm13, 1.0, %v2331_v15  ;;  %v764_v29 = vadd.s32 %v1687_v1, %v730_v60 }
 0x178   : > { %688 = vst.msk [vmem:[%s1721_s22 + $0x30] sm:$0xff] %vm681_vm2, %v1866_v38  ;;  %v887_v47 = vmul.f32 %v1823_v3, %v1866_v38  ;;  %v1384_v48 = vpop.f32.mrb[8].mxu0  ;;  %v1408_v53 = vpop.f32.mrb[8].mxu1  ;;  %704 = vst.msk [vmem:[%s1721_s22 + $0xb0] sm:$0xff] %vm681_vm2, %v1876_v41 }
 0x179   : > { %v923_v54 = vadd.f32 %v922_v45, %v921_v40  ;;  %v1894_v55 = vadd.f32 %v1384_v48, %v1704_v13  ;;  %v562_v56 = vpop.f32.mrb[9].mxu0  ;;  %v642_v57 = vpop.f32.mrb[9].mxu1  ;;  %v1900_v0 = vadd.f32 %v1408_v53, %v1704_v13  ;;  %2350 = vst [vmem:[#allocation5_spill] sm:$0xff] %v1914_v10  ;;  %v926_v12 = vsel %vm681_vm2, %v888_v46, 0.0 }
 0x17a   : > { %v924_v61 = vsel %vm681_vm2, %v887_v47, 0.0  ;;  %v1903_v2 = vadd.f32 %v1704_v13, %v562_v56  ;;  %v1910_v9 = vadd.f32 %v1704_v13, %v642_v57  ;;  %v763_v47 = vadd.s32 %v1687_v1, %v729_v4 }
 0x17b   : > { %v925_v7 = vadd.f32 %v924_v61, %v923_v54  ;;  %691 = vst.msk [vmem:[%s1721_s22 + $0x48] sm:$0xff] %vm681_vm2, %v1894_v55  ;;  %v890_v14 = vmul.f32 %v1858_v27, %v1894_v55  ;;  %707 = vst.msk [vmem:[%s1721_s22 + $0xc8] sm:$0xff] %vm681_vm2, %v1900_v0  ;;  %v1950_v48 = vsel %vm797_vm11, 1.0, %v2331_v15  ;;  %v733_v53 = vadd.s32 144, %v1684_v63 }
 0x17c   : > { %690 = vst.msk [vmem:[%s1721_s22 + $0x40] sm:$0xff] %vm681_vm2, %v1903_v2  ;;  %v889_v8 = vmul.f32 %v1870_v39, %v1903_v2  ;;  %v1387_v19 = vpop.f32.mrb[10].mxu0  ;;  %v1411_v21 = vpop.f32.mrb[10].mxu1  ;;  %706 = vst.msk [vmem:[%s1721_s22 + $0xc0] sm:$0xff] %vm681_vm2, %v1910_v9  ;;  %v1972_v4 = vsel %vm794_vm14, 1.0, %v2331_v15  ;;  %vm796_vm1 = vcmp.lt.s32.totalorder %v764_v29, 512 }
 0x17d   : > { %v927_v20 = vadd.f32 %v926_v12, %v925_v7  ;;  %v1935_v23 = vadd.f32 %v1387_v19, %v1704_v13  ;;  %v572_v26 = vpop.f32.mrb[11].mxu0  ;;  %v652_v28 = vpop.f32.mrb[11].mxu1  ;;  %v1941_v45 = vadd.f32 %v1411_v21, %v1704_v13  ;;  %2351 = vst [vmem:[#allocation6_spill] sm:$0xff] %v1950_v48  ;;  %v930_v57 = vsel %vm681_vm2, %v890_v14, 0.0  ;;  %2352 = vst [vmem:[#allocation7_spill] sm:$0xff] %v1972_v4 }
 0x17e   : > { %v928_v40 = vsel %vm681_vm2, %v889_v8, 0.0  ;;  %v1944_v46 = vadd.f32 %v1704_v13, %v572_v26  ;;  %v1957_v56 = vadd.f32 %v1704_v13, %v652_v28  ;;  %v1982_v19 = vsel %vm793_vm15, 1.0, %v2331_v15 }
 0x17f   : > { %v929_v54 = vadd.f32 %v928_v40, %v927_v20  ;;  %693 = vst.msk [vmem:[%s1721_s22 + $0x58] sm:$0xff] %vm681_vm2, %v1935_v23  ;;  %v892_v60 = vmul.f32 %v1914_v10, %v1935_v23  ;;  %709 = vst.msk [vmem:[%s1721_s22 + $0xd8] sm:$0xff] %vm681_vm2, %v1941_v45  ;;  %vm795_vm3 = vcmp.lt.s32.totalorder %v763_v47, 512  ;;  %v767_v28 = vadd.s32 %v1687_v1, %v733_v53 }
 0x180   : > { %692 = vst.msk [vmem:[%s1721_s22 + $0x50] sm:$0xff] %vm681_vm2, %v1944_v46  ;;  %v891_v32 = vmul.f32 %v1918_v11, %v1944_v46  ;;  %v1390_v61 = vpop.f32.mrb[12].mxu0  ;;  %v1414_v7 = vpop.f32.mrb[12].mxu1  ;;  %708 = vst.msk [vmem:[%s1721_s22 + $0xd0] sm:$0xff] %vm681_vm2, %v1957_v56  ;;  %v769_v10 = vadd.s32 %v1687_v1, %v735_v58 }
 0x181   : > { %v931_v12 = vadd.f32 %v930_v57, %v929_v54  ;;  %v1978_v14 = vadd.f32 %v1390_v61, %v1704_v13  ;;  %v582_v8 = vpop.f32.mrb[13].mxu0  ;;  %2353 = vst [vmem:[#allocation8_spill] sm:$0xff] %v1982_v19  ;;  %v662_v21 = vpop.f32.mrb[13].mxu1  ;;  %v1986_v20 = vadd.f32 %v1414_v7, %v1704_v13  ;;  %v736_v57 = vadd.s32 168, %v1684_v63 }
 0x182   : > { %v932_v44 = vsel %vm681_vm2, %v891_v32, 0.0  ;;  %v1989_v26 = vadd.f32 %v1704_v13, %v582_v8  ;;  %v1997_v54 = vadd.f32 %v1704_v13, %v662_v21  ;;  %v934_v32 = vsel %vm681_vm2, %v892_v60, 0.0 }
 0x183   : > { %v933_v40 = vadd.f32 %v932_v44, %v931_v12  ;;  %695 = vst.msk [vmem:[%s1721_s22 + $0x68] sm:$0xff] %vm681_vm2, %v1978_v14  ;;  %v894_v61 = vmul.f32 %v1972_v4, %v1978_v14  ;;  %711 = vst.msk [vmem:[%s1721_s22 + $0xe8] sm:$0xff] %vm681_vm2, %v1986_v20  ;;  %v2019_v21 = vsel %vm796_vm1, 1.0, %v2331_v15  ;;  %v2023_v4 = vsel %vm795_vm3, 1.0, %v2331_v15 }
 0x184   : > { %694 = vst.msk [vmem:[%s1721_s22 + $0x60] sm:$0xff] %vm681_vm2, %v1989_v26  ;;  %v893_v53 = vmul.f32 %v1982_v19, %v1989_v26  ;;  %v1393_v7 = vpop.f32.mrb[14].mxu0  ;;  %v1417_v12 = vpop.f32.mrb[14].mxu1  ;;  %710 = vst.msk [vmem:[%s1721_s22 + $0xe0] sm:$0xff] %vm681_vm2, %v1997_v54  ;;  %vm799_vm4 = vcmp.lt.s32.totalorder %v767_v28, 512  ;;  %vm801_vm6 = vcmp.lt.s32.totalorder %v769_v10, 512 }
 0x185   : > { %v935_v8 = vadd.f32 %v934_v32, %v933_v40  ;;  %v2015_v60 = vadd.f32 %v1393_v7, %v1704_v13  ;;  %2355 = vst [vmem:[#allocation10_spill] sm:$0xff] %v2019_v21  ;;  %v592_v44 = vpop.f32.mrb[15].mxu0  ;;  %v672_v19 = vpop.f32.mrb[15].mxu1  ;;  %v768_v40 = vadd.s32 %v1687_v1, %v1744_v33  ;;  %v2029_v7 = vadd.f32 %v1417_v12, %v1704_v13 }
 0x186   : > { %v936_v32 = vsel %vm681_vm2, %v893_v53, 0.0  ;;  %v2032_v29 = vadd.f32 %v1704_v13, %v592_v44  ;;  %v2039_v15 = vadd.f32 %v1704_v13, %v672_v19  ;;  %v737_v33 = vadd.s32 176, %v1684_v63 }
 0x187   : > { %2354 = vst [vmem:[#allocation9_spill] sm:$0xff] %v2015_v60  ;;  %v937_v47 = vadd.f32 %v936_v32, %v935_v8  ;;  %697 = vst.msk [vmem:[%s1721_s22 + $0x78] sm:$0xff] %vm681_vm2, %v2015_v60  ;;  %v938_v53 = vsel %vm681_vm2, %v894_v61, 0.0  ;;  %v896_v12 = vmul.f32 %v2019_v21, %v2015_v60  ;;  %v2356_v8 = vmov 0.0  }
 0x188   : > { %713 = vst.msk [vmem:[%s1721_s22 + $0xf8] sm:$0xff] %vm681_vm2, %v2029_v7  ;;  %696 = vst.msk [vmem:[%s1721_s22 + $0x70] sm:$0xff] %vm681_vm2, %v2032_v29  ;;  %v895_v58 = vmul.f32 %v2023_v4, %v2032_v29  ;;  %v2056_v13 = vsel %vm798_vm0, 1.0, %v2356_v8  ;;  %v770_v19 = vadd.s32 %v1687_v1, %v736_v57  ;;  %v897_v44 = vmul.f32 %v1950_v48, %v1738_v31 }
 0x189   : > { %2357 = vst [vmem:[#allocation11_spill] sm:$0xff] %v2056_v13  ;;  %v939_v61 = vadd.f32 %v938_v53, %v937_v47  ;;  %712 = vst.msk [vmem:[%s1721_s22 + $0xf0] sm:$0xff] %vm681_vm2, %v2039_v15  ;;  %vm800_vm5 = vcmp.lt.s32.totalorder %v768_v40, 512  ;;  %v738_v32 = vadd.s32 184, %v1684_v63  ;;  %v2068_v60 = vsel %vm799_vm4, 1.0, %v2356_v8 }
 0x18a   : > { %v940_v21 = vsel %vm681_vm2, %v895_v58, 0.0  ;;  %2358 = vst [vmem:[#allocation12_spill] sm:$0xff] %v2068_v60  ;;  %v898_v57 = vmul.f32 %v2056_v13, %v1730_v25  ;;  %v771_v47 = vadd.s32 %v1687_v1, %v737_v33  ;;  %v739_v53 = vadd.s32 192, %v1684_v63 }
 0x18b   : > { %v941_v17 = vadd.f32 %v940_v21, %v939_v61  ;;  %v942_v48 = vsel %vm681_vm2, %v896_v12, 0.0  ;;  %v2076_v40 = vsel %vm800_vm5, 1.0, %v2356_v8  ;;  %vm802_vm7 = vcmp.lt.s32.totalorder %v770_v19, 512 }
 0x18c   : > { %2359 = vst [vmem:[#allocation13_spill] sm:$0xff] %v2076_v40  ;;  %v944_v28 = vsel %vm681_vm2, %v897_v44, 0.0  ;;  %v899_v10 = vmul.f32 %v2068_v60, %v1784_v50  ;;  %v772_v21 = vadd.s32 %v1687_v1, %v738_v32  ;;  %v740_v61 = vadd.s32 200, %v1684_v63 }
 0x18d   : > { %v943_v58 = vadd.f32 %v942_v48, %v941_v17  ;;  %v2084_v33 = vsel %vm801_vm6, 1.0, %v2356_v8  ;;  %v741_v13 = vadd.s32 208, %v1684_v63  ;;  %v946_v25 = vsel %vm681_vm2, %v898_v57, 0.0 }
 0x18e   : > { %v900_v48 = vmul.f32 %v2076_v40, %v1775_v43  ;;  %vm803_vm8 = vcmp.lt.s32.totalorder %v771_v47, 512  ;;  %v773_v19 = vadd.s32 %v1687_v1, %v739_v53  ;;  %v2092_v44 = vsel %vm802_vm7, 1.0, %v2356_v8 }
 0x18f   : > { %v945_v12 = vadd.f32 %v944_v28, %v943_v58  ;;  %2360 = vst [vmem:[#allocation14_spill] sm:$0xff] %v2092_v44  ;;  %v742_v32 = vadd.s32 216, %v1684_v63  ;;  %v948_v60 = vsel %vm681_vm2, %v899_v10, 0.0  ;;  %v901_v50 = vmul.f32 %v2084_v33, %v1830_v6 }
 0x190   : > { %vm804_vm9 = vcmp.lt.s32.totalorder %v772_v21, 512  ;;  %v774_v57 = vadd.s32 %v1687_v1, %v740_v61  ;;  %v2100_v58 = vsel %vm803_vm8, 1.0, %v2356_v8  ;;  %v775_v47 = vadd.s32 %v1687_v1, %v741_v13 }
 0x191   : > { %v947_v17 = vadd.f32 %v946_v25, %v945_v12  ;;  %2361 = vst [vmem:[#allocation15_spill] sm:$0xff] %v2100_v58  ;;  %v950_v28 = vsel %vm681_vm2, %v900_v48, 0.0  ;;  %v902_v40 = vmul.f32 %v2092_v44, %v1819_v62  ;;  %vm805_vm10 = vcmp.lt.s32.totalorder %v773_v19, 512 }
 0x192   : > { %v743_v25 = vadd.s32 224, %v1684_v63  ;;  %v2108_v10 = vsel %vm804_vm9, 1.0, %v2356_v8  ;;  %v776_v21 = vadd.s32 %v1687_v1, %v742_v32  ;;  %v952_v12 = vsel %vm681_vm2, %v901_v50, 0.0 }
 0x193   : > { %v949_v53 = vadd.f32 %v948_v60, %v947_v17  ;;  %2362 = vst [vmem:[#allocation16_spill] sm:$0xff] %v2108_v10  ;;  %v903_v13 = vmul.f32 %v2100_v58, %v1876_v41  ;;  %vm806_vm11 = vcmp.lt.s32.totalorder %v774_v57, 512  ;;  %v744_v60 = vadd.s32 232, %v1684_v63 }
 0x194   : > { %v2116_v48 = vsel %vm805_vm10, 1.0, %v2356_v8  ;;  %vm807_vm12 = vcmp.lt.s32.totalorder %v775_v47, 512  ;;  %v954_v17 = vsel %vm681_vm2, %v902_v40, 0.0  ;;  %v904_v44 = vmul.f32 %v2108_v10, %v1863_v35 }
 0x195   : > { %v951_v61 = vadd.f32 %v950_v28, %v949_v53  ;;  %v777_v32 = vadd.s32 %v1687_v1, %v743_v25  ;;  %v745_v50 = vadd.s32 240, %v1684_v63  ;;  %v2124_v53 = vsel %vm806_vm11, 1.0, %v2356_v8 }
 0x196   : > { %vm808_vm13 = vcmp.lt.s32.totalorder %v776_v21, 512  ;;  %v956_v28 = vsel %vm681_vm2, %v903_v13, 0.0  ;;  %v905_v47 = vmul.f32 %v2116_v48, %v1910_v9  ;;  %v746_v40 = vadd.s32 248, %v1684_v63 }
 0x197   : > { %v953_v19 = vadd.f32 %v952_v12, %v951_v61  ;;  %v778_v61 = vadd.s32 %v1687_v1, %v744_v60  ;;  %v2132_v12 = vsel %vm807_vm12, 1.0, %v2356_v8  ;;  %v958_v10 = vsel %vm681_vm2, %v904_v44, 0.0 }
 0x198   : > { %v906_v58 = vmul.f32 %v2124_v53, %v1900_v0  ;;  %vm809_vm14 = vcmp.lt.s32.totalorder %v777_v32, 512  ;;  %v779_v21 = vadd.s32 %v1687_v1, %v745_v50  ;;  %v2139_v13 = vsel %vm808_vm13, 1.0, %v2356_v8 }
 0x199   : > { %v955_v57 = vadd.f32 %v954_v17, %v953_v19  ;;  %2363 = vst [vmem:[#allocation17_spill] sm:$0xff] %v2139_v13  ;;  %v960_v60 = vsel %vm681_vm2, %v905_v47, 0.0  ;;  %v907_v63 = vmul.f32 %v2132_v12, %v1957_v56  ;;  %vm810_vm15 = vcmp.lt.s32.totalorder %v778_v61, 512 }
 0x19a   : > { %v780_v17 = vadd.s32 %v1687_v1, %v746_v40  ;;  %v2146_v44 = vsel %vm809_vm14, 1.0, %v2356_v8  ;;  %v962_v32 = vsel %vm681_vm2, %v906_v58, 0.0  ;;  %v908_v50 = vmul.f32 %v2139_v13, %v1941_v45 }
 0x19b   : > { %v957_v25 = vadd.f32 %v956_v28, %v955_v57  ;;  %2364 = vst [vmem:[#allocation18_spill] sm:$0xff] %v2146_v44  ;;  %vm811_vm0 = vcmp.lt.s32.totalorder %v779_v21, 512  ;;  %v964_v47 = vsel %vm681_vm2, %v907_v63, 0.0  ;;  %v909_v61 = vmul.f32 %v2146_v44, %v1997_v54 }
 0x19c   : > { %vm812_vm1 = vcmp.lt.s32.totalorder %v780_v17, 512  ;;  %v2158_v1 = vsel %vm811_vm0, 1.0, %v2356_v8  ;;  %v966_v58 = vsel %vm681_vm2, %v908_v50, 0.0  ;;  %vm1152_vm3 = vcmask 1040384  }
 0x19d   : > { %v959_v19 = vadd.f32 %v958_v10, %v957_v25  ;;  %v2152_v10 = vsel %vm810_vm15, 1.0, %v2356_v8  ;;  %2366 = vst [vmem:[#allocation20_spill] sm:$0xff] %v2158_v1  ;;  %v2164_v21 = vsel %vm812_vm1, 1.0, %v2356_v8  ;;  %v911_v63 = vmul.f32 %v2158_v1, %v2039_v15 }
 0x19e   : > { %2365 = vst [vmem:[#allocation19_spill] sm:$0xff] %v2152_v10  ;;  %v910_v25 = vmul.f32 %v2152_v10, %v1986_v20  ;;  %vm1154_vm4 = vcmask 123904  }
 0x19f   : > { %v961_v57 = vadd.f32 %v960_v60, %v959_v19  ;;  %v968_v60 = vsel %vm681_vm2, %v909_v61, 0.0  ;;  %v972_v50 = vsel %vm681_vm2, %v911_v63, 0.0 }
 0x1a0   : > { %v970_v17 = vsel %vm681_vm2, %v910_v25, 0.0 }
 0x1a1   : > { %v963_v28 = vadd.f32 %v962_v32, %v961_v57  ;;  %v912_v32 = vmul.f32 %v2164_v21, %v2029_v7 }
 0x1a3   : > { %v965_v40 = vadd.f32 %v964_v47, %v963_v28  ;;  %v974_v10 = vsel %vm681_vm2, %v912_v32, 0.0 }
 0x1a5   : > { %v967_v19 = vadd.f32 %v966_v58, %v965_v40 }
 0x1a7   : > { %v969_v57 = vadd.f32 %v968_v60, %v967_v19  ;;  %v985_v19 = vstv %s1467_s23 }
 0x1a9   : > { %v971_v28 = vadd.f32 %v970_v17, %v969_v57 }
 0x1ab   : > { %v973_v47 = vadd.f32 %v972_v50, %v971_v28 }
 0x1ad   : > { %v975_v8 = vadd.f32 %v974_v10, %v973_v47 }
 0x1af   : > { %v976_v44 = vrot.slane %v975_v8, 4 }
 0x1b1   : > { %v977_v40 = vadd.f32 %v976_v44, %v975_v8 }
 0x1b3   : > { %v978_v58 = vrot.slane %v977_v40, 2 }
 0x1b5   : > { %v979_v61 = vadd.f32 %v978_v58, %v977_v40 }
 0x1b7   : > { %v980_v13 = vrot.slane %v979_v61, 1 }
 0x1b9   : > { %v2174_v1 = vadd.f32 %v980_v13, %v979_v61 }
 0x1bb   : > { %v2177_v25 = vmul.f32 %v985_v19, %v2174_v1 }
 0x1bd   : > { %v1001_v60 = vsub.f32 %v2032_v29, %v2177_v25  ;;  %v987_v10 = vsub.f32 %v1735_v30, %v2177_v25  ;;  %v988_v44 = vsub.f32 %v1727_v24, %v2177_v25  ;;  %v989_v13 = vsub.f32 %v1781_v49, %v2177_v25 }
 0x1be   : > { %v990_v57 = vsub.f32 %v1772_v42, %v2177_v25  ;;  %v992_v30 = vsub.f32 %v1816_v34, %v2177_v25  ;;  %v993_v49 = vsub.f32 %v1866_v38, %v2177_v25 }
 0x1bf   : > { %v2182_v63 = vmul.f32 %v2023_v4, %v1001_v60  ;;  %v1019_v17 = vmul.f32 %v1714_v18, %v987_v10  ;;  %v1020_v32 = vmul.f32 %v1708_v16, %v988_v44  ;;  %v991_v4 = vsub.f32 %v1827_v5, %v2177_v25 }
 0x1c0   : > { %v1021_v29 = vmul.f32 %v1760_v37, %v989_v13  ;;  %v1022_v24 = vmul.f32 %v1756_v36, %v990_v57  ;;  %v994_v16 = vsub.f32 %v1854_v22, %v2177_v25  ;;  %v1024_v5 = vmul.f32 %v1793_v51, %v992_v30 }
 0x1c1   : > { %v1051_v28 = vmul.f32 %v1019_v17, %v1019_v17  ;;  %v1052_v50 = vmul.f32 %v1020_v32, %v1020_v32  ;;  %v1023_v42 = vmul.f32 %v1796_v52, %v991_v4  ;;  %v995_v36 = vsub.f32 %v1903_v2, %v2177_v25 }
 0x1c2   : > { %v1053_v18 = vmul.f32 %v1021_v29, %v1021_v29  ;;  %v1054_v47 = vmul.f32 %v1022_v24, %v1022_v24  ;;  %v1025_v40 = vmul.f32 %v1823_v3, %v993_v49  ;;  %v996_v22 = vsub.f32 %v1894_v55, %v2177_v25 }
 0x1c3   : > { %v1083_v37 = vsel %vm681_vm2, %v1051_v28, 0.0  ;;  %v1084_v34 = vsel %vm681_vm2, %v1052_v50, 0.0  ;;  %v1055_v38 = vmul.f32 %v1023_v42, %v1023_v42  ;;  %v1026_v51 = vmul.f32 %v1812_v59, %v994_v16  ;;  %v2367_v28 = vld [vmem:[#allocation5_spill] sm:$0xff]  ;;  %v2368_v42 = vld [vmem:[#allocation8_spill] sm:$0xff] }
 0x1c4   : > { %v1085_v8 = vadd.f32 %v1084_v34, %v1083_v37  ;;  %v1086_v52 = vsel %vm681_vm2, %v1053_v18, 0.0  ;;  %v1056_v61 = vmul.f32 %v1024_v5, %v1024_v5  ;;  %v1088_v19 = vsel %vm681_vm2, %v1054_v47, 0.0  ;;  %v2370_v37 = vld [vmem:[#allocation7_spill] sm:$0xff] }
 0x1c5   : > { %v997_v10 = vsub.f32 %v1944_v46, %v2177_v25  ;;  %v1027_v2 = vmul.f32 %v1870_v39, %v995_v36  ;;  %v1057_v44 = vmul.f32 %v1025_v40, %v1025_v40  ;;  %v1090_v3 = vsel %vm681_vm2, %v1055_v38, 0.0 }
 0x1c6   : > { %v1087_v58 = vadd.f32 %v1086_v52, %v1085_v8  ;;  %v998_v57 = vsub.f32 %v1935_v23, %v2177_v25  ;;  %v1028_v55 = vmul.f32 %v1858_v27, %v996_v22  ;;  %v1058_v17 = vmul.f32 %v1026_v51, %v1026_v51  ;;  %v2371_v22 = vld [vmem:[#allocation3_spill] sm:$0xff] }
 0x1c7   : > { %v1092_v59 = vsel %vm681_vm2, %v1056_v61, 0.0  ;;  %v999_v4 = vsub.f32 %v1989_v26, %v2177_v25  ;;  %v1029_v46 = vmul.f32 %v1918_v11, %v997_v10  ;;  %v1059_v29 = vmul.f32 %v1027_v2, %v1027_v2  ;;  %v2369_v11 = vld [vmem:[#allocation9_spill] sm:$0xff]  ;;  %v2372_v61 = vld [vmem:[#allocation10_spill] sm:$0xff] }
 0x1c8   : > { %v1089_v60 = vadd.f32 %v1088_v19, %v1087_v58  ;;  %v1094_v39 = vsel %vm681_vm2, %v1057_v44, 0.0  ;;  %v1000_v24 = vsub.f32 %v1978_v14, %v2177_v25  ;;  %v1030_v23 = vmul.f32 %v2367_v28, %v998_v57  ;;  %v2373_v44 = vld [vmem:[#allocation4_spill] sm:$0xff] }
 0x1c9   : > { %v1060_v50 = vmul.f32 %v1028_v55, %v1028_v55  ;;  %v1096_v27 = vsel %vm681_vm2, %v1058_v17, 0.0  ;;  %v1031_v18 = vmul.f32 %v2368_v42, %v999_v4  ;;  %v1061_v16 = vmul.f32 %v1029_v46, %v1029_v46 }
 0x1ca   : > { %v1091_v13 = vadd.f32 %v1090_v3, %v1089_v60  ;;  %v1098_v26 = vsel %vm681_vm2, %v1059_v29, 0.0  ;;  %v1002_v47 = vsub.f32 %v2369_v11, %v2177_v25  ;;  %v1032_v34 = vmul.f32 %v2370_v37, %v1000_v24  ;;  %v2376_v24 = vld [vmem:[#allocation12_spill] sm:$0xff] }
 0x1cb   : > { %v1062_v8 = vmul.f32 %v1030_v23, %v1030_v23  ;;  %v1100_v14 = vsel %vm681_vm2, %v1060_v50, 0.0  ;;  %v1003_v40 = vsub.f32 %v1738_v31, %v2177_v25  ;;  %v1063_v38 = vmul.f32 %v1031_v18, %v1031_v18 }
 0x1cc   : > { %v1093_v32 = vadd.f32 %v1092_v59, %v1091_v13  ;;  %v1102_v52 = vsel %vm681_vm2, %v1061_v16, 0.0  ;;  %v1004_v51 = vsub.f32 %v2371_v22, %v2177_v25  ;;  %v1034_v19 = vmul.f32 %v2372_v61, %v1002_v47  ;;  %v2374_v13 = vld [vmem:[#allocation6_spill] sm:$0xff] }
 0x1cd   : > { %v1064_v60 = vmul.f32 %v1032_v34, %v1032_v34  ;;  %v1104_v10 = vsel %vm681_vm2, %v1062_v8, 0.0  ;;  %v1005_v3 = vsub.f32 %v2373_v44, %v2177_v25  ;;  %v1035_v57 = vmul.f32 %v2374_v13, %v1003_v40  ;;  %v2378_v34 = vld [vmem:[#allocation14_spill] sm:$0xff] }
 0x1ce   : > { %v1095_v30 = vadd.f32 %v1094_v39, %v1093_v32  ;;  %v1065_v31 = vmul.f32 %v2182_v63, %v2182_v63  ;;  %v1106_v55 = vsel %vm681_vm2, %v1063_v38, 0.0  ;;  %v1006_v59 = vsub.f32 %v1775_v43, %v2177_v25  ;;  %v2375_v32 = vld [vmem:[#allocation11_spill] sm:$0xff] }
 0x1cf   : > { %v1036_v4 = vmul.f32 %v2375_v32, %v1004_v51  ;;  %v1066_v46 = vmul.f32 %v1034_v19, %v1034_v19  ;;  %v1108_v29 = vsel %vm681_vm2, %v1064_v60, 0.0  ;;  %v1037_v28 = vmul.f32 %v2376_v24, %v1005_v3  ;;  %v2379_v38 = vld [vmem:[#allocation15_spill] sm:$0xff]  ;;  %v2380_v51 = vld [vmem:[#allocation16_spill] sm:$0xff]  ;;  %v2382_v24 = vld [vmem:[#allocation18_spill] sm:$0xff] }
 0x1d0   : > { %v1097_v49 = vadd.f32 %v1096_v27, %v1095_v30  ;;  %v1007_v30 = vsub.f32 %v1830_v6, %v2177_v25  ;;  %v1067_v23 = vmul.f32 %v1035_v57, %v1035_v57  ;;  %v1110_v63 = vsel %vm681_vm2, %v1065_v31, 0.0 }
 0x1d1   : > { %v1008_v27 = vsub.f32 %v1819_v62, %v2177_v25  ;;  %v1068_v42 = vmul.f32 %v1036_v4, %v1036_v4  ;;  %v1112_v18 = vsel %vm681_vm2, %v1066_v46, 0.0  ;;  %v1010_v37 = vsub.f32 %v1863_v35, %v2177_v25  ;;  %v2381_v46 = vld [vmem:[#allocation17_spill] sm:$0xff] }
 0x1d2   : > { %v1099_v5 = vadd.f32 %v1098_v26, %v1097_v49  ;;  %v2377_v49 = vld [vmem:[#allocation13_spill] sm:$0xff]  ;;  %v1009_v26 = vsub.f32 %v1876_v41, %v2177_v25  ;;  %v1039_v6 = vmul.f32 %v2084_v33, %v1007_v30  ;;  %v1114_v11 = vsel %vm681_vm2, %v1067_v23, 0.0 }
 0x1d3   : > { %v1038_v43 = vmul.f32 %v2377_v49, %v1006_v59  ;;  %v1040_v62 = vmul.f32 %v2378_v34, %v1008_v27  ;;  %v1011_v40 = vsub.f32 %v1910_v9, %v2177_v25  ;;  %v1012_v22 = vsub.f32 %v1900_v0, %v2177_v25 }
 0x1d4   : > { %v1101_v36 = vadd.f32 %v1100_v14, %v1099_v5  ;;  %v1069_v5 = vmul.f32 %v1037_v28, %v1037_v28  ;;  %v1116_v14 = vsel %vm681_vm2, %v1068_v42, 0.0  ;;  %v1041_v41 = vmul.f32 %v2379_v38, %v1009_v26  ;;  %v2384_v42 = vld [vmem:[#allocation20_spill] sm:$0xff] }
 0x1d5   : > { %v1070_v8 = vmul.f32 %v1038_v43, %v1038_v43  ;;  %v1042_v35 = vmul.f32 %v2380_v51, %v1010_v37  ;;  %v1072_v61 = vmul.f32 %v1040_v62, %v1040_v62  ;;  %v1043_v9 = vmul.f32 %v2116_v48, %v1011_v40 }
 0x1d6   : > { %v1103_v58 = vadd.f32 %v1102_v52, %v1101_v36  ;;  %v1071_v52 = vmul.f32 %v1039_v6, %v1039_v6  ;;  %v1118_v33 = vsel %vm681_vm2, %v1069_v5, 0.0  ;;  %v1014_v13 = vsub.f32 %v1941_v45, %v2177_v25 }
 0x1d7   : > { %v1120_v19 = vsel %vm681_vm2, %v1070_v8, 0.0  ;;  %v1044_v0 = vmul.f32 %v2124_v53, %v1012_v22  ;;  %v1074_v57 = vmul.f32 %v1042_v35, %v1042_v35  ;;  %v1124_v31 = vsel %vm681_vm2, %v1072_v61, 0.0 }
 0x1d8   : > { %v1105_v2 = vadd.f32 %v1104_v10, %v1103_v58  ;;  %v1013_v10 = vsub.f32 %v1957_v56, %v2177_v25  ;;  %v1122_v44 = vsel %vm681_vm2, %v1071_v52, 0.0  ;;  %v1075_v59 = vmul.f32 %v1043_v9, %v1043_v9 }
 0x1d9   : > { %v1016_v4 = vsub.f32 %v1986_v20, %v2177_v25  ;;  %v1046_v45 = vmul.f32 %v2381_v46, %v1014_v13  ;;  %v1128_v53 = vsel %vm681_vm2, %v1074_v57, 0.0  ;;  %v1017_v30 = vsub.f32 %v2039_v15, %v2177_v25 }
 0x1da   : > { %v1107_v17 = vadd.f32 %v1106_v55, %v1105_v2  ;;  %v1073_v2 = vmul.f32 %v1041_v41, %v1041_v41  ;;  %v1045_v56 = vmul.f32 %v2132_v12, %v1013_v10  ;;  %v1130_v12 = vsel %vm681_vm2, %v1075_v59, 0.0 }
 0x1db   : > { %v1078_v27 = vmul.f32 %v1046_v45, %v1046_v45 }
 0x1dc   : > { %v1109_v39 = vadd.f32 %v1108_v29, %v1107_v17  ;;  %v1015_v17 = vsub.f32 %v1997_v54, %v2177_v25  ;;  %v1126_v48 = vsel %vm681_vm2, %v1073_v2, 0.0  ;;  %v1076_v29 = vmul.f32 %v1044_v0, %v1044_v0 }
 0x1dd   : > { %v1077_v28 = vmul.f32 %v1045_v56, %v1045_v56 }
 0x1de   : > { %v1111_v50 = vadd.f32 %v1110_v63, %v1109_v39  ;;  %v1047_v54 = vmul.f32 %v2382_v24, %v1015_v17  ;;  %v1018_v63 = vsub.f32 %v2029_v7, %v2177_v25  ;;  %v1132_v49 = vsel %vm681_vm2, %v1076_v29, 0.0 }
 0x1df   : > { %v1134_v15 = vsel %vm681_vm2, %v1077_v28, 0.0 }
 0x1e0   : > { %v1113_v16 = vadd.f32 %v1112_v18, %v1111_v50  ;;  %v2383_v50 = vld [vmem:[#allocation19_spill] sm:$0xff]  ;;  %v1049_v18 = vmul.f32 %v2384_v42, %v1017_v30  ;;  %v1050_v6 = vmul.f32 %v2164_v21, %v1018_v63 }
 0x1e1   : > { %v1048_v20 = vmul.f32 %v2383_v50, %v1016_v4 }
 0x1e2   : > { %v1115_v47 = vadd.f32 %v1114_v11, %v1113_v16  ;;  %v1079_v16 = vmul.f32 %v1047_v54, %v1047_v54  ;;  %v1136_v11 = vsel %vm681_vm2, %v1078_v27, 0.0  ;;  %v1081_v25 = vmul.f32 %v1049_v18, %v1049_v18 }
 0x1e3   : > { %v1080_v5 = vmul.f32 %v1048_v20, %v1048_v20  ;;  %v1082_v34 = vmul.f32 %v1050_v6, %v1050_v6 }
 0x1e4   : > { %v1117_v36 = vadd.f32 %v1116_v14, %v1115_v47  ;;  %v1138_v47 = vsel %vm681_vm2, %v1079_v16, 0.0  ;;  %v1142_v14 = vsel %vm681_vm2, %v1081_v25, 0.0 }
 0x1e5   : > { %v1140_v62 = vsel %vm681_vm2, %v1080_v5, 0.0  ;;  %v1144_v40 = vsel %vm681_vm2, %v1082_v34, 0.0 }
 0x1e6   : > { %v1119_v58 = vadd.f32 %v1118_v33, %v1117_v36 }
 0x1e8   : > { %v1121_v60 = vadd.f32 %v1120_v19, %v1119_v58 }
 0x1ea   : > { %v1123_v3 = vadd.f32 %v1122_v44, %v1121_v60 }
 0x1ec   : > { %v1125_v55 = vadd.f32 %v1124_v31, %v1123_v3 }
 0x1ee   : > { %v1127_v32 = vadd.f32 %v1126_v48, %v1125_v55 }
 0x1f0   : > { %v1129_v39 = vadd.f32 %v1128_v53, %v1127_v32 }
 0x1f2   : > { %v1131_v23 = vadd.f32 %v1130_v12, %v1129_v39 }
 0x1f4   : > { %v1133_v43 = vadd.f32 %v1132_v49, %v1131_v23 }
 0x1f6   : > { %v1135_v26 = vadd.f32 %v1134_v15, %v1133_v43 }
 0x1f8   : > { %v1137_v7 = vadd.f32 %v1136_v11, %v1135_v26 }
 0x1fa   : > { %v1139_v37 = vadd.f32 %v1138_v47, %v1137_v7 }
 0x1fc   : > { %v1141_v8 = vadd.f32 %v1140_v62, %v1139_v37 }
 0x1fe   : > { %v1143_v36 = vadd.f32 %v1142_v14, %v1141_v8 }
 0x200   : > { %v1145_v38 = vadd.f32 %v1144_v40, %v1143_v36 }
 0x202   : > { %v1146_v21 = vrot.slane %v1145_v38, 4 }
 0x204   : > { %v1147_v41 = vadd.f32 %v1146_v21, %v1145_v38 }
 0x206   : > { %v1148_v52 = vrot.slane %v1147_v41, 2 }
 0x208   : > { %v1149_v33 = vadd.f32 %v1148_v52, %v1147_v41 }
 0x20a   : > { %v1150_v58 = vrot.slane %v1149_v33, 1 }
 0x20c   : > { %v1151_v22 = vadd.f32 %v1150_v58, %v1149_v33 }
 0x20e   : > { %v1153_v51 = vsel %vm1152_vm3, %v2174_v1, %v1151_v22 }
 0x20f   : > { %1155 = vst.msk [vmem:[%s294_s5] sm:$0x3] %vm1154_vm4, %v1153_v51 }
 0x210 PF: > { %s20_s26 = sadd.s32 1, %s1487_s26  }
 0x211   : > { %p17_p6 = scmp.ge.s32.totalorder %s20_s26, 4  }
 0x213   :  { %19 = sbr.rel (!%p17_p6) target bundleno = 3 (0x3), region = 86 }

// kernel: tile.63
= control target key start
LH: loop header
LB: loop body
LE: loop exit
PB: predicated region body
PF: predicated region fallthrough
CT: control target
= control target key end

     0   :  { %s28_s0 = inlined_call_operand.vmem [shape: f32[16], index: 0, kind: input, shape index: {}]   ;;  %s29_s1 = inlined_call_operand.vmem [shape: f32[16,16], index: 1, kind: output, shape index: {}]  }
   0x1   :  { %v4_v0 = vld [vmem:[%s28_s0] ss:$0 sm:$0xff] }
   0x2   :  { %5 = vst [vmem:[%s29_s1] sm:$0xff] %v4_v0  ;;  %8 = vst [vmem:[%s29_s1 + $0x8] sm:$0xff] %v4_v0 }

// kernel: tile.64
= control target key start
LH: loop header
LB: loop body
LE: loop exit
PB: predicated region body
PF: predicated region fallthrough
CT: control target
= control target key end

     0   :  { %s7_s6 = smov 3  ;;  %s21_s9 = smov 3  ;;  %vm4_vm0 = vcmask 130048   ;;  %vm11_vm1 = vcmask 1048448   ;;  %vm18_vm2 = vcmask 917248   ;;  %vm25_vm3 = vcmask 786048   ;;  %s128_s0 = inlined_call_operand.vmem [shape: f32[16,16], index: 0, kind: input, shape index: {}]   ;;  %s129_s1 = inlined_call_operand.vmem [shape: f32[1,256], index: 1, kind: output, shape index: {}]  }
   0x1   :  { %v66_v0 = vld [vmem:[%s128_s0 + $0x7] ss:$8 sm:%s7_s6]   ;;  %s81_s10 = smov 112   ;;  %v68_v1 = vld [vmem:[%s128_s0 + $0x5] ss:$8 sm:%s21_s9]   ;;  %s14_s13 = smov 3 }
   0x2   :  { %9 = vrot.lane.b32.xlu0 %v66_v0, %s81_s10  ;;  %s82_s14 = smov 80   ;;  %v67_v2 = vld [vmem:[%s128_s0 + $0x6] ss:$8 sm:%s14_s13]   ;;  %s28_s17 = smov 3  ;;  %vm32_vm4 = vcmask 654848   ;;  %vm39_vm5 = vcmask 523648  }
   0x3   :  { %23 = vrot.lane.b32.xlu1 %v68_v1, %s82_s14  ;;  %v69_v3 = vld [vmem:[%s128_s0 + $0x4] ss:$8 sm:%s28_s17]   ;;  %s35_s20 = smov 3  ;;  %s42_s21 = smov 3  ;;  %vm46_vm6 = vcmask 392448   ;;  %vm53_vm7 = vcmask 261248  }
   0x4   :  { %s83_s22 = smov 96   ;;  %s84_s23 = smov 64   ;;  %v70_v4 = vld [vmem:[%s128_s0 + $0x3] ss:$8 sm:%s35_s20]   ;;  %v71_v5 = vld [vmem:[%s128_s0 + $0x2] ss:$8 sm:%s42_s21]  }
   0x5   :  { %s2_s26 = smov 3  ;;  %s49_s29 = smov 3 }
   0x6   :  { %16 = vrot.lane.b32.xlu0 %v67_v2, %s83_s22  ;;  %v3_v6 = vld [vmem:[%s128_s0] ss:$8 sm:%s2_s26]   ;;  %s85_s3 = smov 48   ;;  %s86_s4 = smov 32  }
   0x7   :  { %30 = vrot.lane.b32.xlu1 %v69_v3, %s84_s23  ;;  %5 = vst.msk [vmem:[#allocation0] ss:$8 sm:$0x3] %vm4_vm0, %v3_v6   ;;  %v72_v7 = vld [vmem:[%s128_s0 + $0x1] ss:$8 sm:%s49_s29]   ;;  %s87_s0 = smov 16  }
   0xa   :  { %37 = vrot.lane.b32.xlu0 %v70_v4, %s85_s3 }
   0xb   :  { %44 = vrot.lane.b32.xlu1 %v71_v5, %s86_s4 }
   0xe   :  { %51 = vrot.lane.b32.xlu0 %v72_v7, %s87_s0 }
  0x74   :  { %v10_v8 = vpop.permute.xlu0 %9  }
  0x75   :  { %12 = vst.msk [vmem:[#allocation0] ss:$8 sm:$0x3] %vm11_vm1, %v10_v8   ;;  %v24_v9 = vpop.permute.xlu1 %23  }
  0x78   :  { %v17_v10 = vpop.permute.xlu0 %16  }
  0x79   :  { %19 = vst.msk [vmem:[#allocation0] ss:$8 sm:$0x3] %vm18_vm2, %v17_v10   ;;  %v31_v11 = vpop.permute.xlu1 %30  }
  0x7a   :  { %26 = vst.msk [vmem:[#allocation0] ss:$8 sm:$0x3] %vm25_vm3, %v24_v9  }
  0x7b   :  { %33 = vst.msk [vmem:[#allocation0] ss:$8 sm:$0x3] %vm32_vm4, %v31_v11  }
  0x7c   :  { %v38_v12 = vpop.permute.xlu0 %37  }
  0x7d   :  { %40 = vst.msk [vmem:[#allocation0] ss:$8 sm:$0x3] %vm39_vm5, %v38_v12   ;;  %v45_v13 = vpop.permute.xlu1 %44  }
  0x7e   :  { %47 = vst.msk [vmem:[#allocation0] ss:$8 sm:$0x3] %vm46_vm6, %v45_v13  }
  0x80   :  { %v52_v14 = vpop.permute.xlu0 %51  }
  0x81   :  { %54 = vst.msk [vmem:[#allocation0] ss:$8 sm:$0x3] %vm53_vm7, %v52_v14  }
  0x88   :  { %v58_v15 = vld [vmem:[#allocation0] sm:$0x1]  ;;  %v62_v16 = vld [vmem:[#allocation0 + $0x8] sm:$0x1] }
  0x89   :  { %60 = vst [vmem:[%s129_s1] sm:$0x1] %v58_v15  ;;  %73 = vst [vmem:[%s129_s1 + $0x1] sm:$0x1] %v62_v16 }

// kernel: _lambda_.12
= control target key start
LH: loop header
LB: loop body
LE: loop exit
PB: predicated region body
PF: predicated region fallthrough
CT: control target
= control target key end

     0   :  { %s995_s26 = smov 0   ;;  %s1276_s0 = inlined_call_operand.vmem [shape: f32[128,256], index: 0, kind: input, shape index: {}]   ;;  %s1277_s1 = inlined_call_operand.vmem [shape: f32[256,32], index: 1, kind: input, shape index: {}]   ;;  %s1278_s2 = inlined_call_operand.vmem [shape: f32[1,32], index: 2, kind: input, shape index: {}]   ;;  %s1279_s3 = inlined_call_operand.vmem [shape: f32[1,256], index: 3, kind: input, shape index: {}]   ;;  %s1280_s4 = inlined_call_operand.vmem [shape: f32[1,256], index: 4, kind: input, shape index: {}]   ;;  %s1281_s5 = inlined_call_operand.<no memory space> [shape: f32[1,1], index: 5, kind: input, shape index: {}]   ;;  %s1282_s6 = inlined_call_operand.vmem [shape: f32[128,32], index: 6, kind: output, shape index: {0}]   ;;  %s1283_s7 = inlined_call_operand.vmem [shape: f32[2,2,32], index: 7, kind: output, shape index: {1}]  }
   0x1   :  { %v13_v0 = vstv %s1281_s5 }
   0x2   :  { %14 = vst [vmem:[#allocation2] sm:$0x1] %v13_v0 }
   0x3 LB: > { %s1001_s27 = sadd.s32 4294967295, %s948_s26   ;;  %p802_p0 = scmp.ge.s32.totalorder %s948_s26, 1  ;;  %s948_s26 = sphi %s995_s26, %s20_s26  }
   0x4   : > { %p244_p1 = scmp.lt.s32.totalorder %s948_s26, 3 }
   0x6   : > { %p245_p2 = pnand %p802_p0, %p244_p1 }
   0x7   : > { %v444_v2 = vld [vmem:[%s1277_s1 + $0x80] sm:$0xff] (!%p245_p2)  ;;  %v445_v3 = vld [vmem:[%s1277_s1 + $0x88] sm:$0xff] (!%p245_p2)  ;;  %v950_v4 = vmov (!%p245_p2), 0   ;;  %v446_v8 = vld [vmem:[%s1277_s1 + $0x90] sm:$0xff] (!%p245_p2)  ;;  %s811_s12 = sshll.u32 (!%p245_p2), %s1001_s27, 6  ;;  %s803_s5 = sshll.u32 (!%p245_p2), %s1001_s27, 3  ;;  %v316_v53 = vlaneseq (!%p245_p2) }
   0x8   : > { %248 = sbr.rel (%p245_p2) target bundleno = 433 (0x1b1), region = 44  ;;  %939 = vset.pattern.permute.xlu0 (!%p245_p2), %v950_v4  ;;  %v879_v5 = vpack.c.bf16 (!%p245_p2), %v445_v3, %v444_v2  ;;  %v428_v6 = vld [vmem:[%s1277_s1] sm:$0xff] (!%p245_p2)  ;;  %v429_v7 = vld [vmem:[%s1277_s1 + $0x8] sm:$0xff] (!%p245_p2)  ;;  %v447_v10 = vld [vmem:[%s1277_s1 + $0x98] sm:$0xff] (!%p245_p2)  ;;  %s624_s13 = ssub.s32 (!%p245_p2), 128, %s811_s12 }
   0x9   : > { %v809_v1 = vld [vmem:[#allocation2] ss:$0 sm:$0xff] (!%p245_p2)  ;;  %v881_v9 = vpack.c.bf16 (!%p245_p2), %v429_v7, %v428_v6  ;;  %v430_v11 = vld [vmem:[%s1277_s1 + $0x10] sm:$0xff] (!%p245_p2)  ;;  %v431_v12 = vld [vmem:[%s1277_s1 + $0x18] sm:$0xff] (!%p245_p2)  ;;  %v883_v13 = vpack.c.bf16 (!%p245_p2), %v447_v10, %v446_v8  ;;  %p625_p3 = scmp.lt.s32.totalorder (!%p245_p2), %s624_s13, 64  ;;  %p282_p4 = scmp.lt.s32.totalorder (!%p245_p2), %s803_s5, 15 }
   0xa   : > { %393 = vperm.xlu0 (!%p245_p2), %939, %v809_v1   ;;  %880 = vmatprep.subr.bf16.mxu0 (!%p245_p2), %v879_v5  ;;  %v448_v14 = vld [vmem:[%s1277_s1 + $0xa0] sm:$0xff] (!%p245_p2)  ;;  %v449_v15 = vld [vmem:[%s1277_s1 + $0xa8] sm:$0xff] (!%p245_p2)  ;;  %v885_v16 = vpack.c.bf16 (!%p245_p2), %v431_v12, %v430_v11  ;;  %v450_v20 = vld [vmem:[%s1277_s1 + $0xb0] sm:$0xff] (!%p245_p2)  ;;  %v1107_v54 = vshrl.u32 (!%p245_p2), %v316_v53, 7  ;;  %p294_p5 = scmp.lt.s32.totalorder (!%p245_p2), %s1001_s27, 1 }
   0xb   : > { %911 = vmatprep.subr.bf16.mxu1 (!%p245_p2), %v879_v5  ;;  %882 = vmatpush3.bf16.msra.mxu0 (!%p245_p2), %v881_v9  ;;  %v887_v17 = vpack.c.bf16 (!%p245_p2), %v449_v15, %v448_v14  ;;  %v432_v18 = vld [vmem:[%s1277_s1 + $0x20] sm:$0xff] (!%p245_p2)  ;;  %v433_v19 = vld [vmem:[%s1277_s1 + $0x28] sm:$0xff] (!%p245_p2)  ;;  %v451_v21 = vld [vmem:[%s1277_s1 + $0xb8] sm:$0xff] (!%p245_p2) }
   0xc   : > { %919 = vmatpush3.bf16.msra.mxu1 (!%p245_p2), %v881_v9  ;;  %884 = vmatprep.subr.bf16.mxu0 (!%p245_p2), %v883_v13  ;;  %v889_v22 = vpack.c.bf16 (!%p245_p2), %v433_v19, %v432_v18  ;;  %v891_v23 = vpack.c.bf16 (!%p245_p2), %v451_v21, %v450_v20  ;;  %v434_v24 = vld [vmem:[%s1277_s1 + $0x30] sm:$0xff] (!%p245_p2)  ;;  %v435_v25 = vld [vmem:[%s1277_s1 + $0x38] sm:$0xff] (!%p245_p2)  ;;  %v452_v26 = vld [vmem:[%s1277_s1 + $0xc0] sm:$0xff] (!%p245_p2)  ;;  %v322_v55 = vsub.s32 (!%p245_p2), 1, %v1107_v54  ;;  %v318_v56 = vsub.s32 (!%p245_p2), 0, %v1107_v54 }
   0xd   : > { %912 = vmatprep.subr.bf16.mxu1 (!%p245_p2), %v883_v13  ;;  %v453_v27 = vld [vmem:[%s1277_s1 + $0xc8] sm:$0xff] (!%p245_p2)  ;;  %v893_v28 = vpack.c.bf16 (!%p245_p2), %v435_v25, %v434_v24  ;;  %v436_v30 = vld [vmem:[%s1277_s1 + $0x40] sm:$0xff] (!%p245_p2)  ;;  %v454_v32 = vld [vmem:[%s1277_s1 + $0xd0] sm:$0xff] (!%p245_p2) }
   0xe   : > { %v895_v29 = vpack.c.bf16 (!%p245_p2), %v453_v27, %v452_v26  ;;  %v437_v31 = vld [vmem:[%s1277_s1 + $0x48] sm:$0xff] (!%p245_p2)  ;;  %v455_v33 = vld [vmem:[%s1277_s1 + $0xd8] sm:$0xff] (!%p245_p2)  ;;  %v438_v36 = vld [vmem:[%s1277_s1 + $0x50] sm:$0xff] (!%p245_p2) }
   0xf   : > { %886 = vmatpush3.bf16.msra.mxu0 %v885_v16  ;;  %v897_v34 = vpack.c.bf16 %v437_v31, %v436_v30  ;;  %v899_v35 = vpack.c.bf16 %v455_v33, %v454_v32  ;;  %v439_v37 = vld [vmem:[%s1277_s1 + $0x58] sm:$0xff]  ;;  %v456_v38 = vld [vmem:[%s1277_s1 + $0xe0] sm:$0xff]  ;;  %v457_v39 = vld [vmem:[%s1277_s1 + $0xe8] sm:$0xff]  ;;  %s1285_s13 = smov (!%p625_p3, %s624_s13), 64  ;;  %s1287_s5 = smov (!%p282_p4, %s803_s5), 15 }
  0x10   : > { %920 = vmatpush3.bf16.msra.mxu1 %v885_v16  ;;  %888 = vmatprep.subr.bf16.mxu0 %v887_v17  ;;  %v901_v40 = vpack.c.bf16 %v439_v37, %v438_v36  ;;  %v903_v41 = vpack.c.bf16 %v457_v39, %v456_v38  ;;  %v440_v42 = vld [vmem:[%s1277_s1 + $0x60] sm:$0xff]  ;;  %v441_v43 = vld [vmem:[%s1277_s1 + $0x68] sm:$0xff]  ;;  %v458_v44 = vld [vmem:[%s1277_s1 + $0xf0] sm:$0xff]  ;;  %s627_s22 = scvt.s32.f32 %s1285_s13  ;;  %s822_s29 = sshll.u32 %s1287_s5, 4 }
  0x11   : > { %913 = vmatprep.subr.bf16.mxu1 %v887_v17  ;;  %v459_v45 = vld [vmem:[%s1277_s1 + $0xf8] sm:$0xff]  ;;  %v905_v46 = vpack.c.bf16 %v441_v43, %v440_v42  ;;  %v442_v48 = vld [vmem:[%s1277_s1 + $0x70] sm:$0xff]  ;;  %v314_v57 = vld [vmem:[%s1279_s3] sm:$0x3]  ;;  %s1118_s11 = scalar_lea.vmem %s1276_s0, %s822_s29  ;;  %s807_s15 = sshll.u32 %s1287_s5, 3 }
  0x12   : > { %v907_v47 = vpack.c.bf16 %v459_v45, %v458_v44  ;;  %v443_v49 = vld [vmem:[%s1277_s1 + $0x78] sm:$0xff]  ;;  %v657_v50 = vstv %s627_s22  ;;  %v323_v58 = vrot.slane %v314_v57, %v322_v55  ;;  %v342_v59 = vld [vmem:[%s1280_s4] sm:$0x3]  ;;  %v319_v60 = vrot.slane %v314_v57, %v318_v56  ;;  %v299_v61 = vld [vmem:[%s1118_s11 + $0x8] sm:$0xff]  ;;  %s1188_s19 = scalar_lea.vmem %s1282_s6, %s807_s15  ;;  %s1289_s27 = smov (!%p294_p5, %s1001_s27), 1 }
  0x13   : > { %890 = vmatpush3.bf16.msra.mxu0 %v889_v22  ;;  %940 = vrcp.f32 %v657_v50  ;;  %v909_v51 = vpack.c.bf16 %v443_v49, %v442_v48  ;;  %v307_v62 = vld [vmem:[%s1118_s11 + $0x48] sm:$0xff]  ;;  %v298_v63 = vld [vmem:[%s1118_s11] sm:$0xff]  ;;  %v301_v1 = vld [vmem:[%s1118_s11 + $0x18] sm:$0xff]  ;;  %v1129_v3 = vrot.slane %v342_v59, %v322_v55  ;;  %v1131_v7 = vrot.slane %v342_v59, %v318_v56  ;;  %s808_s21 = sshll.u32 %s1289_s27, 1 }
  0x14   : > { %921 = vmatpush3.bf16.msra.mxu1 %v889_v22  ;;  %892 = vmatprep.subr.bf16.mxu0 %v891_v23  ;;  %v306_v0 = vld [vmem:[%s1118_s11 + $0x40] sm:$0xff]  ;;  %v309_v2 = vld [vmem:[%s1118_s11 + $0x58] sm:$0xff]  ;;  %v327_v4 = vmul.f32 %v323_v58, %v299_v61  ;;  %v335_v5 = vmul.f32 %v323_v58, %v307_v62  ;;  %v326_v6 = vmul.f32 %v319_v60, %v298_v63  ;;  %v300_v11 = vld [vmem:[%s1118_s11 + $0x10] sm:$0xff]  ;;  %s297_s24 = scalar_lea.vmem %s1283_s7, %s808_s21 }
  0x15   : > { %914 = vmatprep.subr.bf16.mxu1 %v891_v23  ;;  %v334_v8 = vmul.f32 %v319_v60, %v306_v0  ;;  %v329_v9 = vmul.f32 %v323_v58, %v301_v1  ;;  %v337_v10 = vmul.f32 %v323_v58, %v309_v2  ;;  %v308_v12 = vld [vmem:[%s1118_s11 + $0x50] sm:$0xff]  ;;  %v303_v13 = vld [vmem:[%s1118_s11 + $0x28] sm:$0xff]  ;;  %v302_v18 = vld [vmem:[%s1118_s11 + $0x20] sm:$0xff]  ;;  %v328_v24 = vmul.f32 %v319_v60, %v300_v11 }
  0x16   : > { %v311_v14 = vld [vmem:[%s1118_s11 + $0x68] sm:$0xff]  ;;  %v355_v15 = vadd.f32 %v1129_v3, %v327_v4  ;;  %v363_v16 = vadd.f32 %v1129_v3, %v335_v5  ;;  %v354_v17 = vadd.f32 %v1131_v7, %v326_v6  ;;  %v310_v19 = vld [vmem:[%s1118_s11 + $0x60] sm:$0xff]  ;;  %v305_v20 = vld [vmem:[%s1118_s11 + $0x38] sm:$0xff]  ;;  %v336_v25 = vmul.f32 %v319_v60, %v308_v12 }
  0x17   : > { %894 = vmatpush3.bf16.msra.mxu0 %v893_v28  ;;  %v362_v21 = vadd.f32 %v1131_v7, %v334_v8  ;;  %v357_v22 = vadd.f32 %v1129_v3, %v329_v9  ;;  %v365_v23 = vadd.f32 %v1129_v3, %v337_v10  ;;  %v331_v26 = vmul.f32 %v323_v58, %v303_v13  ;;  %v313_v31 = vld [vmem:[%s1118_s11 + $0x78] sm:$0xff]  ;;  %v304_v32 = vld [vmem:[%s1118_s11 + $0x30] sm:$0xff] }
  0x18   : > { %922 = vmatpush3.bf16.msra.mxu1 %v893_v28  ;;  %896 = vmatprep.subr.bf16.mxu0 %v895_v29  ;;  %v339_v27 = vmul.f32 %v323_v58, %v311_v14  ;;  %v330_v28 = vmul.f32 %v319_v60, %v302_v18  ;;  %v333_v30 = vmul.f32 %v323_v58, %v305_v20  ;;  %vm371_vm0 = vcmp.ge.f32.partialorder %v355_v15, 0.0  ;;  %v312_v38 = vld [vmem:[%s1118_s11 + $0x70] sm:$0xff] }
  0x19   : > { %915 = vmatprep.subr.bf16.mxu1 %v895_v29  ;;  %v338_v29 = vmul.f32 %v319_v60, %v310_v19  ;;  %vm379_vm1 = vcmp.ge.f32.partialorder %v363_v16, 0.0  ;;  %vm370_vm2 = vcmp.ge.f32.partialorder %v354_v17, 0.0  ;;  %vm378_vm3 = vcmp.ge.f32.partialorder %v362_v21, 0.0 }
  0x1a   : > { %vm373_vm4 = vcmp.ge.f32.partialorder %v357_v22, 0.0  ;;  %vm381_vm5 = vcmp.ge.f32.partialorder %v365_v23, 0.0  ;;  %v356_v33 = vadd.f32 %v1131_v7, %v328_v24  ;;  %v367_v36 = vadd.f32 %v1129_v3, %v339_v27 }
  0x1b   : > { %898 = vmatpush3.bf16.msra.mxu0 %v897_v34  ;;  %v341_v37 = vmul.f32 %v323_v58, %v313_v31  ;;  %v361_v42 = vadd.f32 %v1129_v3, %v333_v30  ;;  %v332_v43 = vmul.f32 %v319_v60, %v304_v32  ;;  %v591_v18 = vstv %s811_s12 }
  0x1c   : > { %923 = vmatpush3.bf16.msra.mxu1 %v897_v34  ;;  %900 = vmatprep.subr.bf16.mxu0 %v899_v35  ;;  %v364_v34 = vadd.f32 %v1131_v7, %v336_v25  ;;  %vm372_vm6 = vcmp.ge.f32.partialorder %v356_v33, 0.0  ;;  %vm383_vm9 = vcmp.ge.f32.partialorder %v367_v36, 0.0  ;;  %v592_v19 = vadd.s32 %v591_v18, %v1107_v54 }
  0x1d   : > { %916 = vmatprep.subr.bf16.mxu1 %v899_v35  ;;  %v941_v52 = vpop.eup %940  ;;  %v359_v35 = vadd.f32 %v1129_v3, %v331_v26  ;;  %v369_v59 = vadd.f32 %v1129_v3, %v341_v37  ;;  %v360_v0 = vadd.f32 %v1131_v7, %v332_v43  ;;  %vm377_vm12 = vcmp.ge.f32.partialorder %v361_v42, 0.0 }
  0x1e   : > { %927 = vpush %v941_v52  ;;  %vm380_vm7 = vcmp.ge.f32.partialorder %v364_v34, 0.0  ;;  %v584_v27 = vadd.s32 16, %v1107_v54  ;;  %v585_v37 = vadd.s32 24, %v1107_v54 }
  0x1f   : > { %902 = vmatpush3.bf16.msra.mxu0 %v901_v40  ;;  %vm375_vm8 = vcmp.ge.f32.partialorder %v359_v35, 0.0  ;;  %vm385_vm13 = vcmp.ge.f32.partialorder %v369_v59, 0.0  ;;  %vm376_vm14 = vcmp.ge.f32.partialorder %v360_v0, 0.0 }
  0x20   : > { %924 = vmatpush3.bf16.msra.mxu1 %v901_v40  ;;  %904 = vmatprep.subr.bf16.mxu0 %v903_v41  ;;  %v358_v40 = vadd.f32 %v1131_v7, %v330_v28  ;;  %v588_v28 = vadd.s32 48, %v1107_v54  ;;  %v594_v43 = vadd.s32 %v591_v18, %v584_v27 }
  0x21   : > { %917 = vmatprep.subr.bf16.mxu1 %v903_v41  ;;  %v366_v41 = vadd.f32 %v1131_v7, %v338_v29  ;;  %v1178_v29 = vld [vmem:[%s1278_s2] ss:$0 sm:$0xff] }
  0x22   : > { %vm374_vm10 = vcmp.ge.f32.partialorder %v358_v40, 0.0 }
  0x23   : > { %906 = vmatpush3.bf16.msra.mxu0 %v905_v46  ;;  %vm382_vm11 = vcmp.ge.f32.partialorder %v366_v41, 0.0 }
  0x24   : > { %925 = vmatpush3.bf16.msra.mxu1 %v905_v46  ;;  %908 = vmatprep.subr.bf16.mxu0 %v907_v47 }
  0x25   : > { %918 = vmatprep.subr.bf16.mxu1 %v907_v47 }
  0x27   : > { %910 = vmatpush3.bf16.msra.mxu0 %v909_v51 }
  0x28   : > { %926 = vmatpush3.bf16.msra.mxu1 %v909_v51  ;;  %v340_v51 = vmul.f32 %v319_v60, %v312_v38  ;;  %v589_v38 = vadd.s32 56, %v1107_v54 }
  0x2a   : > { %v368_v1 = vadd.f32 %v1131_v7, %v340_v51 }
  0x2c   : > { %vm384_vm15 = vcmp.ge.f32.partialorder %v368_v1, 0.0 }
  0x4f   : > { %s928_s20 = spop %927 }
  0x89   : > { %v394_v39 = vpop.permute.xlu0 %393 }
  0x8a   : > { %v397_v44 = vmul.f32 %v394_v39, %v355_v15  ;;  %v405_v45 = vmul.f32 %v394_v39, %v363_v16  ;;  %v396_v46 = vmul.f32 %v394_v39, %v354_v17  ;;  %v404_v47 = vmul.f32 %v394_v39, %v362_v21 }
  0x8b   : > { %v399_v48 = vmul.f32 %v394_v39, %v357_v22  ;;  %v407_v49 = vmul.f32 %v394_v39, %v365_v23  ;;  %v398_v50 = vmul.f32 %v394_v39, %v356_v33  ;;  %v406_v58 = vmul.f32 %v394_v39, %v364_v34 }
  0x8c   : > { %v413_v52 = vsel %vm371_vm0, %v355_v15, %v397_v44  ;;  %v421_v53 = vsel %vm379_vm1, %v363_v16, %v405_v45  ;;  %v412_v55 = vsel %vm370_vm2, %v354_v17, %v396_v46  ;;  %v420_v56 = vsel %vm378_vm3, %v362_v21, %v404_v47 }
  0x8d   : > { %531 = vmatprep.mubr.f32.mxu0 %v413_v52  ;;  %551 = vmatprep.mubr.f32.mxu1 %v421_v53  ;;  %v415_v57 = vsel %vm373_vm4, %v357_v22, %v399_v48  ;;  %v423_v60 = vsel %vm381_vm5, %v365_v23, %v407_v49  ;;  %v401_v61 = vmul.f32 %v394_v39, %v359_v35  ;;  %v586_v17 = vadd.s32 32, %v1107_v54 }
  0x8e   : > { %532 = vmatmul.mubr.f32.vlgmr.msra.gmra.mrb[0].mxu0 %v412_v55  ;;  %552 = vmatmul.mubr.f32.vlgmr.msra.gmra.mrb[0].mxu1 %v420_v56  ;;  %v409_v62 = vmul.f32 %v394_v39, %v367_v36  ;;  %v414_v63 = vsel %vm372_vm6, %v356_v33, %v398_v50  ;;  %v422_v2 = vsel %vm380_vm7, %v364_v34, %v406_v58  ;;  %v583_v21 = vadd.s32 8, %v1107_v54 }
  0x8f   : > { %536 = vmatprep.mubr.f32.mxu0 %v415_v57  ;;  %556 = vmatprep.mubr.f32.mxu1 %v423_v60  ;;  %v400_v4 = vmul.f32 %v394_v39, %v358_v40  ;;  %v408_v3 = vmul.f32 %v394_v39, %v366_v41  ;;  %v403_v5 = vmul.f32 %v394_v39, %v361_v42  ;;  %v587_v22 = vadd.s32 40, %v1107_v54 }
  0x90   : > { %v417_v6 = vsel %vm375_vm8, %v359_v35, %v401_v61  ;;  %v425_v8 = vsel %vm383_vm9, %v367_v36, %v409_v62  ;;  %v411_v9 = vmul.f32 %v394_v39, %v369_v59  ;;  %v402_v12 = vmul.f32 %v394_v39, %v360_v0 }
  0x91   : > { %v416_v10 = vsel %vm374_vm10, %v358_v40, %v400_v4  ;;  %v424_v11 = vsel %vm382_vm11, %v366_v41, %v408_v3  ;;  %v410_v7 = vmul.f32 %v394_v39, %v368_v1  ;;  %v419_v13 = vsel %vm377_vm12, %v361_v42, %v403_v5 }
  0x92   : > { %537 = vmatmul.mubr.f32.gmra.mrb[2].mxu0 %v414_v63  ;;  %557 = vmatmul.mubr.f32.gmra.mrb[2].mxu1 %v422_v2  ;;  %v427_v14 = vsel %vm385_vm13, %v369_v59, %v411_v9  ;;  %v418_v15 = vsel %vm376_vm14, %v360_v0, %v402_v12  ;;  %v596_v20 = vadd.s32 %v591_v18, %v586_v17  ;;  %vm600_vm0 = vcmp.lt.s32.totalorder %v592_v19, 128 }
  0x93   : > { %541 = vmatprep.mubr.f32.mxu0 %v417_v6  ;;  %561 = vmatprep.mubr.f32.mxu1 %v425_v8  ;;  %v426_v16 = vsel %vm384_vm15, %v368_v1, %v410_v7  ;;  %v593_v23 = vadd.s32 %v591_v18, %v583_v21  ;;  %v597_v24 = vadd.s32 %v591_v18, %v587_v22  ;;  %vm572_vm2 = vcmask 261120  }
  0x94   : > { %vm604_vm1 = vcmp.lt.s32.totalorder %v596_v20, 128  ;;  %v951_v33 = vmov 0.0   ;;  %v598_v44 = vadd.s32 %v591_v18, %v588_v28  ;;  %v595_v52 = vadd.s32 %v591_v18, %v585_v37 }
  0x95   : > { %v1180_v34 = vsel %vm600_vm0, 1.0, %v951_v33  ;;  %v1183_v36 = vsel %vm604_vm1, 1.0, %v951_v33  ;;  %vm601_vm3 = vcmp.lt.s32.totalorder %v593_v23, 128  ;;  %vm605_vm4 = vcmp.lt.s32.totalorder %v597_v24, 128 }
  0x96   : > { %542 = vmatmul.mubr.f32.gmra.mrb[4].mxu0 %v416_v10  ;;  %562 = vmatmul.mubr.f32.gmra.mrb[4].mxu1 %v424_v11  ;;  %v1209_v50 = vsel %vm601_vm3, 1.0, %v951_v33  ;;  %v1212_v51 = vsel %vm605_vm4, 1.0, %v951_v33  ;;  %v599_v53 = vadd.s32 %v591_v18, %v589_v38  ;;  %vm602_vm5 = vcmp.lt.s32.totalorder %v594_v43, 128 }
  0x97   : > { %546 = vmatprep.mubr.f32.mxu0 %v419_v13  ;;  %566 = vmatprep.mubr.f32.mxu1 %v427_v14  ;;  %vm606_vm6 = vcmp.lt.s32.totalorder %v598_v44, 128  ;;  %v814_v1 = vsel %vm602_vm5, 1.0, %v951_v33  ;;  %vm603_vm7 = vcmp.lt.s32.totalorder %v595_v52, 128  ;;  %v660_v43 = vstv %s928_s20 }
  0x98   : > { %v818_v2 = vsel %vm606_vm6, 1.0, %v951_v33  ;;  %vm607_vm8 = vcmp.lt.s32.totalorder %v599_v53, 128  ;;  %vm707_vm9 = vcmask 1040384   ;;  %vm709_vm10 = vcmask 254976  }
  0x99   : > { %v819_v17 = vsel %vm607_vm8, 1.0, %v951_v33 }
  0x9a   : > { %547 = vmatmul.mubr.f32.gmra.mrb[6].mxu0 %v418_v15  ;;  %567 = vmatmul.mubr.f32.gmra.mrb[6].mxu1 %v426_v16  ;;  %v815_v16 = vsel %vm603_vm7, 1.0, %v951_v33 }
 0x161   : > { %v855_v25 = vpop.f32.mrb[0].mxu0  ;;  %v867_v26 = vpop.f32.mrb[0].mxu1 }
 0x162   : > { %v856_v30 = vpop.f32.mrb[1].mxu0  ;;  %v868_v31 = vpop.f32.mrb[1].mxu1 }
 0x163   : > { %v857_v32 = vadd.f32 %v856_v30, %v855_v25  ;;  %v869_v35 = vadd.f32 %v868_v31, %v867_v26 }
 0x165   : > { %v1193_v39 = vadd.f32 %v857_v32, %v1178_v29  ;;  %v1196_v40 = vadd.f32 %v869_v35, %v1178_v29  ;;  %v858_v41 = vpop.f32.mrb[2].mxu0  ;;  %v870_v42 = vpop.f32.mrb[2].mxu1 }
 0x166   : > { %v859_v45 = vpop.f32.mrb[3].mxu0  ;;  %v871_v46 = vpop.f32.mrb[3].mxu1 }
 0x167   : > { %573 = vst.msk [vmem:[%s1188_s19] sm:$0xff] %vm572_vm2, %v1193_v39  ;;  %v628_v47 = vmul.f32 %v1180_v34, %v1193_v39  ;;  %577 = vst.msk [vmem:[%s1188_s19 + $0x20] sm:$0xff] %vm572_vm2, %v1196_v40  ;;  %v632_v54 = vmul.f32 %v1183_v36, %v1196_v40  ;;  %v860_v48 = vadd.f32 %v859_v45, %v858_v41 }
 0x168   : > { %v872_v49 = vadd.f32 %v871_v46, %v870_v42 }
 0x169   : > { %v1215_v55 = vadd.f32 %v860_v48, %v1178_v29  ;;  %v861_v57 = vpop.f32.mrb[4].mxu0  ;;  %v873_v58 = vpop.f32.mrb[4].mxu1  ;;  %v636_v4 = vsel %vm572_vm2, %v628_v47, 0.0  ;;  %v643_v26 = vsel %vm572_vm2, %v632_v54, 0.0 }
 0x16a   : > { %v1218_v56 = vadd.f32 %v872_v49, %v1178_v29  ;;  %v862_v59 = vpop.f32.mrb[5].mxu0  ;;  %v874_v60 = vpop.f32.mrb[5].mxu1 }
 0x16b   : > { %574 = vst.msk [vmem:[%s1188_s19 + $0x8] sm:$0xff] %vm572_vm2, %v1215_v55  ;;  %v629_v61 = vmul.f32 %v1209_v50, %v1215_v55  ;;  %v863_v63 = vadd.f32 %v862_v59, %v861_v57  ;;  %v875_v0 = vadd.f32 %v874_v60, %v873_v58 }
 0x16c   : > { %578 = vst.msk [vmem:[%s1188_s19 + $0x28] sm:$0xff] %vm572_vm2, %v1218_v56  ;;  %v633_v62 = vmul.f32 %v1212_v51, %v1218_v56 }
 0x16d   : > { %v637_v3 = vsel %vm572_vm2, %v629_v61, 0.0  ;;  %v544_v5 = vadd.f32 %v863_v63, %v1178_v29  ;;  %v564_v6 = vadd.f32 %v875_v0, %v1178_v29  ;;  %v864_v8 = vpop.f32.mrb[6].mxu0  ;;  %v876_v9 = vpop.f32.mrb[6].mxu1 }
 0x16e   : > { %v638_v10 = vadd.f32 %v637_v3, %v636_v4  ;;  %v865_v11 = vpop.f32.mrb[7].mxu0  ;;  %v877_v12 = vpop.f32.mrb[7].mxu1  ;;  %v645_v28 = vsel %vm572_vm2, %v633_v62, 0.0 }
 0x16f   : > { %575 = vst.msk [vmem:[%s1188_s19 + $0x10] sm:$0xff] %vm572_vm2, %v544_v5  ;;  %v630_v7 = vmul.f32 %v814_v1, %v544_v5  ;;  %579 = vst.msk [vmem:[%s1188_s19 + $0x30] sm:$0xff] %vm572_vm2, %v564_v6  ;;  %v634_v13 = vmul.f32 %v818_v2, %v564_v6  ;;  %v866_v14 = vadd.f32 %v865_v11, %v864_v8 }
 0x170   : > { %v878_v15 = vadd.f32 %v877_v12, %v876_v9 }
 0x171   : > { %v639_v18 = vsel %vm572_vm2, %v630_v7, 0.0  ;;  %v549_v19 = vadd.f32 %v866_v14, %v1178_v29  ;;  %v647_v31 = vsel %vm572_vm2, %v634_v13, 0.0 }
 0x172   : > { %v569_v20 = vadd.f32 %v878_v15, %v1178_v29  ;;  %v640_v21 = vadd.f32 %v639_v18, %v638_v10 }
 0x173   : > { %576 = vst.msk [vmem:[%s1188_s19 + $0x18] sm:$0xff] %vm572_vm2, %v549_v19  ;;  %v631_v22 = vmul.f32 %v815_v16, %v549_v19 }
 0x174   : > { %580 = vst.msk [vmem:[%s1188_s19 + $0x38] sm:$0xff] %vm572_vm2, %v569_v20  ;;  %v635_v23 = vmul.f32 %v819_v17, %v569_v20 }
 0x175   : > { %v641_v24 = vsel %vm572_vm2, %v631_v22, 0.0 }
 0x176   : > { %v642_v25 = vadd.f32 %v641_v24, %v640_v21  ;;  %v649_v29 = vsel %vm572_vm2, %v635_v23, 0.0 }
 0x178   : > { %v644_v27 = vadd.f32 %v643_v26, %v642_v25 }
 0x17a   : > { %v646_v30 = vadd.f32 %v645_v28, %v644_v27 }
 0x17c   : > { %v648_v32 = vadd.f32 %v647_v31, %v646_v30 }
 0x17e   : > { %v650_v33 = vadd.f32 %v649_v29, %v648_v32 }
 0x180   : > { %v651_v35 = vrot.slane %v650_v33, 4 }
 0x182   : > { %v652_v37 = vadd.f32 %v651_v35, %v650_v33 }
 0x184   : > { %v653_v38 = vrot.slane %v652_v37, 2 }
 0x186   : > { %v654_v41 = vadd.f32 %v653_v38, %v652_v37 }
 0x188   : > { %v655_v42 = vrot.slane %v654_v41, 1 }
 0x18a   : > { %v656_v44 = vadd.f32 %v655_v42, %v654_v41 }
 0x18c   : > { %v661_v45 = vmul.f32 %v660_v43, %v656_v44 }
 0x18e   : > { %v662_v46 = vsub.f32 %v1193_v39, %v661_v45  ;;  %v663_v47 = vsub.f32 %v1215_v55, %v661_v45  ;;  %v664_v54 = vsub.f32 %v544_v5, %v661_v45  ;;  %v665_v48 = vsub.f32 %v549_v19, %v661_v45 }
 0x18f   : > { %v666_v49 = vsub.f32 %v1196_v40, %v661_v45  ;;  %v667_v52 = vsub.f32 %v1218_v56, %v661_v45  ;;  %v668_v53 = vsub.f32 %v564_v6, %v661_v45  ;;  %v669_v57 = vsub.f32 %v569_v20, %v661_v45 }
 0x190   : > { %v670_v58 = vmul.f32 %v1180_v34, %v662_v46  ;;  %v671_v59 = vmul.f32 %v1209_v50, %v663_v47  ;;  %v672_v60 = vmul.f32 %v814_v1, %v664_v54  ;;  %v673_v61 = vmul.f32 %v815_v16, %v665_v48 }
 0x191   : > { %v674_v62 = vmul.f32 %v1183_v36, %v666_v49  ;;  %v675_v39 = vmul.f32 %v1212_v51, %v667_v52  ;;  %v676_v63 = vmul.f32 %v818_v2, %v668_v53  ;;  %v677_v55 = vmul.f32 %v819_v17, %v669_v57 }
 0x192   : > { %v678_v0 = vmul.f32 %v670_v58, %v670_v58  ;;  %v679_v4 = vmul.f32 %v671_v59, %v671_v59  ;;  %v680_v3 = vmul.f32 %v672_v60, %v672_v60  ;;  %v681_v40 = vmul.f32 %v673_v61, %v673_v61 }
 0x193   : > { %v682_v34 = vmul.f32 %v674_v62, %v674_v62  ;;  %v683_v8 = vmul.f32 %v675_v39, %v675_v39  ;;  %v684_v2 = vmul.f32 %v676_v63, %v676_v63  ;;  %v685_v11 = vmul.f32 %v677_v55, %v677_v55 }
 0x194   : > { %v686_v56 = vsel %vm572_vm2, %v678_v0, 0.0  ;;  %v687_v5 = vsel %vm572_vm2, %v679_v4, 0.0  ;;  %v689_v50 = vsel %vm572_vm2, %v680_v3, 0.0  ;;  %v691_v36 = vsel %vm572_vm2, %v681_v40, 0.0 }
 0x195   : > { %v688_v6 = vadd.f32 %v687_v5, %v686_v56  ;;  %v693_v9 = vsel %vm572_vm2, %v682_v34, 0.0  ;;  %v695_v12 = vsel %vm572_vm2, %v683_v8, 0.0  ;;  %v697_v13 = vsel %vm572_vm2, %v684_v2, 0.0 }
 0x196   : > { %v699_v15 = vsel %vm572_vm2, %v685_v11, 0.0 }
 0x197   : > { %v690_v1 = vadd.f32 %v689_v50, %v688_v6 }
 0x199   : > { %v692_v51 = vadd.f32 %v691_v36, %v690_v1 }
 0x19b   : > { %v694_v10 = vadd.f32 %v693_v9, %v692_v51 }
 0x19d   : > { %v696_v7 = vadd.f32 %v695_v12, %v694_v10 }
 0x19f   : > { %v698_v14 = vadd.f32 %v697_v13, %v696_v7 }
 0x1a1   : > { %v700_v16 = vadd.f32 %v699_v15, %v698_v14 }
 0x1a3   : > { %v701_v17 = vrot.slane %v700_v16, 4 }
 0x1a5   : > { %v702_v18 = vadd.f32 %v701_v17, %v700_v16 }
 0x1a7   : > { %v703_v19 = vrot.slane %v702_v18, 2 }
 0x1a9   : > { %v704_v20 = vadd.f32 %v703_v19, %v702_v18 }
 0x1ab   : > { %v705_v21 = vrot.slane %v704_v20, 1 }
 0x1ad   : > { %v706_v22 = vadd.f32 %v705_v21, %v704_v20 }
 0x1af   : > { %v708_v23 = vsel %vm707_vm9, %v656_v44, %v706_v22 }
 0x1b0   : > { %710 = vst.msk [vmem:[%s297_s24] sm:$0x3] %vm709_vm10, %v708_v23 }
 0x1b1 PF: > { %s20_s26 = sadd.s32 1, %s948_s26  }
 0x1b2   : > { %p17_p6 = scmp.ge.s32.totalorder %s20_s26, 4  }
 0x1b4   :  { %19 = sbr.rel (!%p17_p6) target bundleno = 3 (0x3), region = 86 }

// kernel: tile.73
= control target key start
LH: loop header
LB: loop body
LE: loop exit
PB: predicated region body
PF: predicated region fallthrough
CT: control target
= control target key end

     0   :  { %s28_s0 = inlined_call_operand.vmem [shape: f32[32], index: 0, kind: input, shape index: {}]   ;;  %s29_s1 = inlined_call_operand.vmem [shape: f32[16,32], index: 1, kind: output, shape index: {}]  }
   0x1   :  { %v4_v0 = vld [vmem:[%s28_s0] ss:$0 sm:$0xff] }
   0x2   :  { %5 = vst [vmem:[%s29_s1] sm:$0xff] %v4_v0  ;;  %8 = vst [vmem:[%s29_s1 + $0x8] sm:$0xff] %v4_v0 }

// kernel: tile.74
= control target key start
LH: loop header
LB: loop body
LE: loop exit
PB: predicated region body
PF: predicated region fallthrough
CT: control target
= control target key end

     0   :  { %s57_s8 = smov 96   ;;  %vm3_vm0 = vcmask 261120   ;;  %s59_s15 = smov 64   ;;  %vm9_vm1 = vcmask 1048320   ;;  %vm15_vm2 = vcmask 785920   ;;  %vm21_vm3 = vcmask 523520   ;;  %s94_s0 = inlined_call_operand.vmem [shape: f32[16,32], index: 0, kind: input, shape index: {}]   ;;  %s95_s1 = inlined_call_operand.vmem [shape: f32[1,512], index: 1, kind: output, shape index: {}]  }
   0x1   :  { %v48_v0 = vld [vmem:[%s94_s0 + $0x3] ss:$4 sm:$0xf]   ;;  %v49_v1 = vld [vmem:[%s94_s0 + $0x2] ss:$4 sm:$0xf]  }
   0x2   :  { %7 = vrot.lane.b32.xlu0 %v48_v0, %s57_s8  ;;  %v50_v2 = vld [vmem:[%s94_s0 + $0x1] ss:$4 sm:$0xf]   ;;  %v2_v3 = vld [vmem:[%s94_s0] ss:$4 sm:$0xf]  }
   0x3   :  { %s58_s0 = smov 32   ;;  %4 = vst.msk [vmem:[#allocation0] ss:$8 sm:$0xf] %vm3_vm0, %v2_v3  }
   0x4   :  { %19 = vrot.lane.b32.xlu1 %v50_v2, %s58_s0 }
   0x6   :  { %13 = vrot.lane.b32.xlu0 %v49_v1, %s59_s15 }
  0x74   :  { %v8_v4 = vpop.permute.xlu0 %7  }
  0x75   :  { %10 = vst.msk [vmem:[#allocation0] ss:$8 sm:$0xf] %vm9_vm1, %v8_v4  }
  0x76   :  { %v20_v5 = vpop.permute.xlu1 %19  }
  0x78   :  { %v14_v6 = vpop.permute.xlu0 %13  }
  0x79   :  { %16 = vst.msk [vmem:[#allocation0] ss:$8 sm:$0xf] %vm15_vm2, %v14_v6  }
  0x7a   :  { %22 = vst.msk [vmem:[#allocation0] ss:$8 sm:$0xf] %vm21_vm3, %v20_v5  }
  0x81   :  { %v26_v7 = vld [vmem:[#allocation0] sm:$0x1]  ;;  %v30_v8 = vld [vmem:[#allocation0 + $0x8] sm:$0x1]  ;;  %v35_v9 = vld [vmem:[#allocation0 + $0x10] sm:$0x1] }
  0x82   :  { %28 = vst [vmem:[%s95_s1] sm:$0x1] %v26_v7  ;;  %51 = vst [vmem:[%s95_s1 + $0x1] sm:$0x1] %v30_v8  ;;  %v41_v10 = vld [vmem:[#allocation0 + $0x18] sm:$0x1] }
  0x83   :  { %52 = vst [vmem:[%s95_s1 + $0x2] sm:$0x1] %v35_v9  ;;  %53 = vst [vmem:[%s95_s1 + $0x3] sm:$0x1] %v41_v10 }

// kernel: _lambda_.13
= control target key start
LH: loop header
LB: loop body
LE: loop exit
PB: predicated region body
PF: predicated region fallthrough
CT: control target
= control target key end

     0   :  { %s1262_s26 = smov 0   ;;  %s1831_s0 = inlined_call_operand.vmem [shape: f32[112,512], index: 0, kind: input, shape index: {}]   ;;  %s1832_s1 = inlined_call_operand.vmem [shape: f32[512,64], index: 1, kind: input, shape index: {}]   ;;  %s1833_s2 = inlined_call_operand.vmem [shape: f32[1,64], index: 2, kind: input, shape index: {}]   ;;  %s1834_s3 = inlined_call_operand.vmem [shape: f32[1,512], index: 3, kind: input, shape index: {}]   ;;  %s1835_s4 = inlined_call_operand.vmem [shape: f32[1,512], index: 4, kind: input, shape index: {}]   ;;  %s1836_s5 = inlined_call_operand.<no memory space> [shape: f32[1,1], index: 5, kind: input, shape index: {}]   ;;  %s1837_s6 = inlined_call_operand.vmem [shape: f32[112,64], index: 6, kind: output, shape index: {0}]   ;;  %s1838_s7 = inlined_call_operand.vmem [shape: f32[2,2,64], index: 7, kind: output, shape index: {1}]  }
   0x1   :  { %v13_v0 = vstv %s1836_s5 }
   0x2   :  { %14 = vst [vmem:[#allocation2] sm:$0x1] %v13_v0 }
   0x3 LB: > { %s1268_s27 = sadd.s32 4294967295, %s1215_s26   ;;  %p1007_p0 = scmp.ge.s32.totalorder %s1215_s26, 1  ;;  %s1215_s26 = sphi %s1262_s26, %s20_s26  }
   0x4   : > { %p244_p1 = scmp.lt.s32.totalorder %s1215_s26, 3 }
   0x6   : > { %p245_p2 = pnand %p1007_p0, %p244_p1 }
   0x7   : > { %v536_v2 = vld [vmem:[%s1832_s1 + $0x80] sm:$0xff] (!%p245_p2)  ;;  %v537_v3 = vld [vmem:[%s1832_s1 + $0x88] sm:$0xff] (!%p245_p2)  ;;  %v1217_v4 = vmov (!%p245_p2), 0   ;;  %v538_v15 = vld [vmem:[%s1832_s1 + $0x90] sm:$0xff] (!%p245_p2)  ;;  %s807_s22 = smul.u32 (!%p245_p2), 56, %s1268_s27  ;;  %p294_p5 = scmp.lt.s32.totalorder (!%p245_p2), %s1268_s27, 1 }
   0x8   : > { %248 = sbr.rel (%p245_p2) target bundleno = 437 (0x1b5), region = 44  ;;  %1206 = vset.pattern.permute.xlu0 (!%p245_p2), %v1217_v4  ;;  %v1130_v5 = vpack.c.bf16 (!%p245_p2), %v537_v3, %v536_v2  ;;  %v568_v6 = vld [vmem:[%s1832_s1 + $0x180] sm:$0xff] (!%p245_p2)  ;;  %v569_v7 = vld [vmem:[%s1832_s1 + $0x188] sm:$0xff] (!%p245_p2)  ;;  %v539_v16 = vld [vmem:[%s1832_s1 + $0x98] sm:$0xff] (!%p245_p2) }
   0x9   : > { %v1012_v1 = vld [vmem:[#allocation2] ss:$0 sm:$0xff] (!%p245_p2)  ;;  %v1162_v9 = vpack.c.bf16 (!%p245_p2), %v569_v7, %v568_v6  ;;  %v521_v10 = vld [vmem:[%s1832_s1 + $0x8] sm:$0xff] (!%p245_p2)  ;;  %v570_v17 = vld [vmem:[%s1832_s1 + $0x190] sm:$0xff] (!%p245_p2)  ;;  %v1134_v18 = vpack.c.bf16 (!%p245_p2), %v539_v16, %v538_v15  ;;  %s837_s23 = ssub.s32 (!%p245_p2), 98, %s807_s22  ;;  %s281_s25 = smul.u32 (!%p245_p2), 7, %s1268_s27 }
   0xa   : > { %v520_v8 = vld [vmem:[%s1832_s1] sm:$0xff] (!%p245_p2)  ;;  %461 = vperm.xlu0 (!%p245_p2), %1206, %v1012_v1   ;;  %v553_v12 = vld [vmem:[%s1832_s1 + $0x108] sm:$0xff] (!%p245_p2)  ;;  %1131 = vmatprep.subr.bf16.mxu0 (!%p245_p2), %v1130_v5  ;;  %v571_v19 = vld [vmem:[%s1832_s1 + $0x198] sm:$0xff] (!%p245_p2)  ;;  %p838_p3 = scmp.lt.s32.totalorder (!%p245_p2), %s837_s23, 56 }
   0xb   : > { %v552_v11 = vld [vmem:[%s1832_s1 + $0x100] sm:$0xff] (!%p245_p2)  ;;  %v1132_v13 = vpack.c.bf16 (!%p245_p2), %v521_v10, %v520_v8  ;;  %1163 = vmatprep.subr.bf16.mxu1 (!%p245_p2), %v1162_v9  ;;  %v522_v20 = vld [vmem:[%s1832_s1 + $0x10] sm:$0xff] (!%p245_p2)  ;;  %v523_v21 = vld [vmem:[%s1832_s1 + $0x18] sm:$0xff] (!%p245_p2)  ;;  %v1166_v22 = vpack.c.bf16 (!%p245_p2), %v571_v19, %v570_v17  ;;  %p282_p4 = scmp.lt.s32.totalorder (!%p245_p2), %s281_s25, 13 }
   0xc   : > { %v1164_v14 = vpack.c.bf16 (!%p245_p2), %v553_v12, %v552_v11  ;;  %v1136_v23 = vpack.c.bf16 (!%p245_p2), %v523_v21, %v522_v20  ;;  %v554_v24 = vld [vmem:[%s1832_s1 + $0x110] sm:$0xff] (!%p245_p2)  ;;  %v555_v25 = vld [vmem:[%s1832_s1 + $0x118] sm:$0xff] (!%p245_p2)  ;;  %v540_v26 = vld [vmem:[%s1832_s1 + $0xa0] sm:$0xff] (!%p245_p2) }
   0xd   : > { %1133 = vmatpush3.bf16.msra.mxu0 (!%p245_p2), %v1132_v13  ;;  %v1168_v27 = vpack.c.bf16 (!%p245_p2), %v555_v25, %v554_v24  ;;  %v541_v28 = vld [vmem:[%s1832_s1 + $0xa8] sm:$0xff] (!%p245_p2)  ;;  %v572_v29 = vld [vmem:[%s1832_s1 + $0x1a0] sm:$0xff] (!%p245_p2)  ;;  %v542_v37 = vld [vmem:[%s1832_s1 + $0xb0] sm:$0xff] (!%p245_p2) }
   0xe   : > { %1165 = vmatpush3.bf16.msra.mxu1 (!%p245_p2), %v1164_v14  ;;  %1135 = vmatprep.subr.bf16.mxu0 (!%p245_p2), %v1134_v18  ;;  %v573_v30 = vld [vmem:[%s1832_s1 + $0x1a8] sm:$0xff] (!%p245_p2)  ;;  %v1138_v31 = vpack.c.bf16 (!%p245_p2), %v541_v28, %v540_v26  ;;  %v524_v33 = vld [vmem:[%s1832_s1 + $0x20] sm:$0xff] (!%p245_p2)  ;;  %v543_v38 = vld [vmem:[%s1832_s1 + $0xb8] sm:$0xff] (!%p245_p2) }
   0xf   : > { %1167 = vmatprep.subr.bf16.mxu1 %v1166_v22  ;;  %v1170_v32 = vpack.c.bf16 %v573_v30, %v572_v29  ;;  %v525_v34 = vld [vmem:[%s1832_s1 + $0x28] sm:$0xff]  ;;  %v556_v35 = vld [vmem:[%s1832_s1 + $0x120] sm:$0xff]  ;;  %v574_v41 = vld [vmem:[%s1832_s1 + $0x1b0] sm:$0xff]  ;;  %v1142_v44 = vpack.c.bf16 %v543_v38, %v542_v37  ;;  %s1840_s23 = smov (!%p838_p3, %s837_s23), 56  ;;  %v328_v37 = vlaneseq  ;;  %s1842_s25 = smov (!%p282_p4, %s281_s25), 13 }
  0x10   : > { %v557_v36 = vld [vmem:[%s1832_s1 + $0x128] sm:$0xff]  ;;  %v1140_v39 = vpack.c.bf16 %v525_v34, %v524_v33  ;;  %v575_v42 = vld [vmem:[%s1832_s1 + $0x1b8] sm:$0xff]  ;;  %v526_v43 = vld [vmem:[%s1832_s1 + $0x30] sm:$0xff]  ;;  %s840_s24 = scvt.s32.f32 %s1840_s23  ;;  %s1023_s28 = sshll.u32 %s1842_s25, 5 }
  0x11   : > { %1137 = vmatpush3.bf16.msra.mxu0 %v1136_v23  ;;  %v1172_v40 = vpack.c.bf16 %v557_v36, %v556_v35  ;;  %v1174_v45 = vpack.c.bf16 %v575_v42, %v574_v41  ;;  %v527_v46 = vld [vmem:[%s1832_s1 + $0x38] sm:$0xff]  ;;  %v558_v47 = vld [vmem:[%s1832_s1 + $0x130] sm:$0xff]  ;;  %v544_v49 = vld [vmem:[%s1832_s1 + $0xc0] sm:$0xff]  ;;  %v1470_v38 = vshrl.u32 %v328_v37, 7  ;;  %s1479_s30 = scalar_lea.vmem %s1831_s0, %s1023_s28  ;;  %s1010_s14 = sshll.u32 %s1842_s25, 3 }
  0x12   : > { %1169 = vmatpush3.bf16.msra.mxu1 %v1168_v27  ;;  %1139 = vmatprep.subr.bf16.mxu0 %v1138_v31  ;;  %v559_v48 = vld [vmem:[%s1832_s1 + $0x138] sm:$0xff]  ;;  %v545_v50 = vld [vmem:[%s1832_s1 + $0xc8] sm:$0xff]  ;;  %v576_v51 = vld [vmem:[%s1832_s1 + $0x1c0] sm:$0xff]  ;;  %v1144_v53 = vpack.c.bf16 %v527_v46, %v526_v43  ;;  %v867_v35 = vstv %s840_s24  ;;  %s1735_s17 = scalar_lea.vmem %s1837_s6, %s1010_s14  ;;  %s1844_s27 = smov (!%p294_p5, %s1268_s27), 1 }
  0x13   : > { %1171 = vmatprep.subr.bf16.mxu1 %v1170_v32  ;;  %v577_v52 = vld [vmem:[%s1832_s1 + $0x1c8] sm:$0xff]  ;;  %v1176_v54 = vpack.c.bf16 %v559_v48, %v558_v47  ;;  %v528_v55 = vld [vmem:[%s1832_s1 + $0x40] sm:$0xff]  ;;  %v1146_v57 = vpack.c.bf16 %v545_v50, %v544_v49  ;;  %v546_v61 = vld [vmem:[%s1832_s1 + $0xd0] sm:$0xff]  ;;  %1207 = vrcp.f32 %v867_v35  ;;  %v330_v41 = vsub.s32 0, %v1470_v38  ;;  %s1011_s19 = sshll.u32 %s1844_s27, 1 }
  0x14   : > { %v529_v56 = vld [vmem:[%s1832_s1 + $0x48] sm:$0xff]  ;;  %v1178_v58 = vpack.c.bf16 %v577_v52, %v576_v51  ;;  %v560_v59 = vld [vmem:[%s1832_s1 + $0x140] sm:$0xff]  ;;  %v547_v62 = vld [vmem:[%s1832_s1 + $0xd8] sm:$0xff]  ;;  %v338_v43 = vsub.s32 2, %v1470_v38 }
  0x15   : > { %1141 = vmatpush3.bf16.msra.mxu0 %v1140_v39  ;;  %v561_v60 = vld [vmem:[%s1832_s1 + $0x148] sm:$0xff]  ;;  %v578_v63 = vld [vmem:[%s1832_s1 + $0x1d0] sm:$0xff]  ;;  %v579_v0 = vld [vmem:[%s1832_s1 + $0x1d8] sm:$0xff]  ;;  %v1148_v1 = vpack.c.bf16 %v529_v56, %v528_v55  ;;  %v1150_v5 = vpack.c.bf16 %v547_v62, %v546_v61  ;;  %v334_v39 = vsub.s32 1, %v1470_v38 }
  0x16   : > { %1173 = vmatpush3.bf16.msra.mxu1 %v1172_v40  ;;  %1143 = vmatprep.subr.bf16.mxu0 %v1142_v44  ;;  %v1180_v2 = vpack.c.bf16 %v561_v60, %v560_v59  ;;  %v530_v3 = vld [vmem:[%s1832_s1 + $0x50] sm:$0xff]  ;;  %v531_v4 = vld [vmem:[%s1832_s1 + $0x58] sm:$0xff]  ;;  %v1182_v6 = vpack.c.bf16 %v579_v0, %v578_v63  ;;  %v548_v9 = vld [vmem:[%s1832_s1 + $0xe0] sm:$0xff]  ;;  %v342_v40 = vsub.s32 3, %v1470_v38 }
  0x17   : > { %1175 = vmatprep.subr.bf16.mxu1 %v1174_v45  ;;  %v562_v7 = vld [vmem:[%s1832_s1 + $0x150] sm:$0xff]  ;;  %v563_v8 = vld [vmem:[%s1832_s1 + $0x158] sm:$0xff]  ;;  %v549_v10 = vld [vmem:[%s1832_s1 + $0xe8] sm:$0xff]  ;;  %v1152_v13 = vpack.c.bf16 %v531_v4, %v530_v3 }
  0x18   : > { %v580_v11 = vld [vmem:[%s1832_s1 + $0x1e0] sm:$0xff]  ;;  %v581_v12 = vld [vmem:[%s1832_s1 + $0x1e8] sm:$0xff]  ;;  %v1184_v14 = vpack.c.bf16 %v563_v8, %v562_v7  ;;  %v1154_v17 = vpack.c.bf16 %v549_v10, %v548_v9  ;;  %v550_v21 = vld [vmem:[%s1832_s1 + $0xf0] sm:$0xff] }
  0x19   : > { %1145 = vmatpush3.bf16.msra.mxu0 %v1144_v53  ;;  %v532_v15 = vld [vmem:[%s1832_s1 + $0x60] sm:$0xff]  ;;  %v533_v16 = vld [vmem:[%s1832_s1 + $0x68] sm:$0xff]  ;;  %v1186_v18 = vpack.c.bf16 %v581_v12, %v580_v11  ;;  %v551_v22 = vld [vmem:[%s1832_s1 + $0xf8] sm:$0xff] }
  0x1a   : > { %1177 = vmatpush3.bf16.msra.mxu1 %v1176_v54  ;;  %1147 = vmatprep.subr.bf16.mxu0 %v1146_v57  ;;  %v564_v19 = vld [vmem:[%s1832_s1 + $0x160] sm:$0xff]  ;;  %v565_v20 = vld [vmem:[%s1832_s1 + $0x168] sm:$0xff]  ;;  %v582_v23 = vld [vmem:[%s1832_s1 + $0x1f0] sm:$0xff]  ;;  %v1156_v25 = vpack.c.bf16 %v533_v16, %v532_v15  ;;  %v1158_v28 = vpack.c.bf16 %v551_v22, %v550_v21 }
  0x1b   : > { %1179 = vmatprep.subr.bf16.mxu1 %v1178_v58  ;;  %v583_v24 = vld [vmem:[%s1832_s1 + $0x1f8] sm:$0xff]  ;;  %v1188_v26 = vpack.c.bf16 %v565_v20, %v564_v19  ;;  %v534_v27 = vld [vmem:[%s1832_s1 + $0x70] sm:$0xff]  ;;  %v326_v42 = vld [vmem:[%s1834_s3] sm:$0xf] }
  0x1c   : > { %v1190_v29 = vpack.c.bf16 %v583_v24, %v582_v23  ;;  %v535_v30 = vld [vmem:[%s1832_s1 + $0x78] sm:$0xff]  ;;  %v566_v31 = vld [vmem:[%s1832_s1 + $0x170] sm:$0xff]  ;;  %v299_v44 = vld [vmem:[%s1479_s30 + $0x8] sm:$0xff]  ;;  %v1486_v45 = vrot.slane %v326_v42, %v334_v39  ;;  %v1491_v47 = vrot.slane %v326_v42, %v342_v40  ;;  %v1493_v48 = vrot.slane %v326_v42, %v330_v41 }
  0x1d   : > { %1149 = vmatpush3.bf16.msra.mxu0 %v1148_v1  ;;  %v567_v32 = vld [vmem:[%s1832_s1 + $0x178] sm:$0xff]  ;;  %v1160_v33 = vpack.c.bf16 %v535_v30, %v534_v27  ;;  %v1208_v36 = vpop.eup %1207  ;;  %v376_v46 = vld [vmem:[%s1835_s4] sm:$0xf]  ;;  %v1497_v51 = vrot.slane %v326_v42, %v338_v43  ;;  %v303_v52 = vld [vmem:[%s1479_s30 + $0x28] sm:$0xff] }
  0x1e   : > { %1181 = vmatpush3.bf16.msra.mxu1 %v1180_v2  ;;  %1151 = vmatprep.subr.bf16.mxu0 %v1150_v5  ;;  %v1192_v34 = vpack.c.bf16 %v567_v32, %v566_v31  ;;  %1194 = vpush %v1208_v36  ;;  %v301_v49 = vld [vmem:[%s1479_s30 + $0x18] sm:$0xff]  ;;  %v298_v50 = vld [vmem:[%s1479_s30] sm:$0xff]  ;;  %v300_v53 = vld [vmem:[%s1479_s30 + $0x10] sm:$0xff]  ;;  %v1502_v55 = vrot.slane %v376_v46, %v334_v39 }
  0x1f   : > { %1183 = vmatprep.subr.bf16.mxu1 %v1182_v6  ;;  %v305_v54 = vld [vmem:[%s1479_s30 + $0x38] sm:$0xff]  ;;  %v1504_v56 = vrot.slane %v376_v46, %v342_v40  ;;  %v1506_v57 = vrot.slane %v376_v46, %v330_v41  ;;  %v302_v58 = vld [vmem:[%s1479_s30 + $0x20] sm:$0xff]  ;;  %v304_v59 = vld [vmem:[%s1479_s30 + $0x30] sm:$0xff]  ;;  %v349_v60 = vmul.f32 %v1486_v45, %v299_v44  ;;  %v351_v61 = vmul.f32 %v1491_v47, %v301_v49 }
  0x20   : > { %v348_v62 = vmul.f32 %v1493_v48, %v298_v50  ;;  %v353_v63 = vmul.f32 %v1486_v45, %v303_v52  ;;  %v307_v0 = vld [vmem:[%s1479_s30 + $0x48] sm:$0xff]  ;;  %v309_v1 = vld [vmem:[%s1479_s30 + $0x58] sm:$0xff]  ;;  %v350_v2 = vmul.f32 %v1497_v51, %v300_v53  ;;  %v1517_v3 = vrot.slane %v376_v46, %v338_v43  ;;  %v306_v7 = vld [vmem:[%s1479_s30 + $0x40] sm:$0xff] }
  0x21   : > { %1153 = vmatpush3.bf16.msra.mxu0 %v1152_v13  ;;  %v355_v4 = vmul.f32 %v1491_v47, %v305_v54  ;;  %v352_v5 = vmul.f32 %v1493_v48, %v302_v58  ;;  %v354_v6 = vmul.f32 %v1497_v51, %v304_v59  ;;  %v308_v8 = vld [vmem:[%s1479_s30 + $0x50] sm:$0xff]  ;;  %v357_v9 = vmul.f32 %v1486_v45, %v307_v0  ;;  %v311_v11 = vld [vmem:[%s1479_s30 + $0x68] sm:$0xff]  ;;  %v313_v12 = vld [vmem:[%s1479_s30 + $0x78] sm:$0xff] }
  0x22   : > { %1185 = vmatpush3.bf16.msra.mxu1 %v1184_v14  ;;  %1155 = vmatprep.subr.bf16.mxu0 %v1154_v17  ;;  %v359_v10 = vmul.f32 %v1491_v47, %v309_v1  ;;  %v399_v13 = vadd.f32 %v1502_v55, %v349_v60  ;;  %v401_v14 = vadd.f32 %v1504_v56, %v351_v61  ;;  %v310_v17 = vld [vmem:[%s1479_s30 + $0x60] sm:$0xff]  ;;  %v315_v30 = vld [vmem:[%s1479_s30 + $0x88] sm:$0xff]  ;;  %v316_v35 = vld [vmem:[%s1479_s30 + $0x90] sm:$0xff] }
  0x23   : > { %1187 = vmatprep.subr.bf16.mxu1 %v1186_v18  ;;  %v398_v15 = vadd.f32 %v1506_v57, %v348_v62  ;;  %v403_v16 = vadd.f32 %v1502_v55, %v353_v63  ;;  %v400_v18 = vadd.f32 %v1517_v3, %v350_v2  ;;  %v405_v19 = vadd.f32 %v1504_v56, %v355_v4  ;;  %v319_v41 = vld [vmem:[%s1479_s30 + $0xa8] sm:$0xff]  ;;  %v321_v2 = vld [vmem:[%s1479_s30 + $0xb8] sm:$0xff] }
  0x24   : > { %v356_v20 = vmul.f32 %v1493_v48, %v306_v7  ;;  %v358_v21 = vmul.f32 %v1497_v51, %v308_v8  ;;  %v1538_v22 = vadd.f32 %v1506_v57, %v352_v5  ;;  %v1541_v23 = vadd.f32 %v1517_v3, %v354_v6 }
  0x25   : > { %1157 = vmatpush3.bf16.msra.mxu0 %v1156_v25  ;;  %v361_v24 = vmul.f32 %v1486_v45, %v311_v11  ;;  %v363_v25 = vmul.f32 %v1491_v47, %v313_v12  ;;  %v1549_v27 = vadd.f32 %v1504_v56, %v359_v10  ;;  %vm427_vm0 = vcmp.ge.f32.partialorder %v399_v13, 0.0 }
  0x26   : > { %1189 = vmatpush3.bf16.msra.mxu1 %v1188_v26  ;;  %1159 = vmatprep.subr.bf16.mxu0 %v1158_v28  ;;  %v1546_v26 = vadd.f32 %v1502_v55, %v357_v9  ;;  %v360_v28 = vmul.f32 %v1493_v48, %v310_v17  ;;  %vm429_vm1 = vcmp.ge.f32.partialorder %v401_v14, 0.0  ;;  %vm426_vm2 = vcmp.ge.f32.partialorder %v398_v15, 0.0  ;;  %v318_v17 = vld [vmem:[%s1479_s30 + $0xa0] sm:$0xff] }
  0x27   : > { %1191 = vmatprep.subr.bf16.mxu1 %v1190_v29  ;;  %vm431_vm3 = vcmp.ge.f32.partialorder %v403_v16, 0.0  ;;  %v312_v29 = vld [vmem:[%s1479_s30 + $0x70] sm:$0xff]  ;;  %vm428_vm4 = vcmp.ge.f32.partialorder %v400_v18, 0.0  ;;  %vm433_vm5 = vcmp.ge.f32.partialorder %v405_v19, 0.0  ;;  %v1555_v31 = vadd.f32 %v1506_v57, %v356_v20 }
  0x28   : > { %v1558_v32 = vadd.f32 %v1517_v3, %v358_v21  ;;  %vm430_vm6 = vcmp.ge.f32.partialorder %v1538_v22, 0.0  ;;  %vm432_vm7 = vcmp.ge.f32.partialorder %v1541_v23, 0.0  ;;  %v1566_v36 = vadd.f32 %v1502_v55, %v361_v24  ;;  %v323_v24 = vld [vmem:[%s1479_s30 + $0xc8] sm:$0xff] }
  0x29   : > { %1161 = vmatpush3.bf16.msra.mxu0 %v1160_v33  ;;  %v317_v33 = vld [vmem:[%s1479_s30 + $0x98] sm:$0xff]  ;;  %v1569_v37 = vadd.f32 %v1504_v56, %v363_v25  ;;  %vm435_vm8 = vcmp.ge.f32.partialorder %v1546_v26, 0.0  ;;  %vm437_vm9 = vcmp.ge.f32.partialorder %v1549_v27, 0.0  ;;  %v1574_v39 = vadd.f32 %v1506_v57, %v360_v28 }
  0x2a   : > { %1193 = vmatpush3.bf16.msra.mxu1 %v1192_v34  ;;  %v314_v34 = vld [vmem:[%s1479_s30 + $0x80] sm:$0xff]  ;;  %v362_v40 = vmul.f32 %v1497_v51, %v312_v29  ;;  %v365_v43 = vmul.f32 %v1486_v45, %v315_v30  ;;  %v367_v44 = vmul.f32 %v1491_v47, %v317_v33  ;;  %v366_v49 = vmul.f32 %v1497_v51, %v316_v35  ;;  %v325_v25 = vld [vmem:[%s1479_s30 + $0xd8] sm:$0xff] }
  0x2b   : > { %v364_v46 = vmul.f32 %v1493_v48, %v314_v34  ;;  %vm434_vm10 = vcmp.ge.f32.partialorder %v1555_v31, 0.0  ;;  %vm436_vm11 = vcmp.ge.f32.partialorder %v1558_v32, 0.0  ;;  %v369_v61 = vmul.f32 %v1486_v45, %v319_v41 }
  0x2c   : > { %vm439_vm12 = vcmp.ge.f32.partialorder %v1566_v36, 0.0  ;;  %v1605_v6 = vadd.f32 %v1517_v3, %v362_v40  ;;  %vm441_vm13 = vcmp.ge.f32.partialorder %v1569_v37, 0.0  ;;  %vm438_vm14 = vcmp.ge.f32.partialorder %v1574_v39, 0.0  ;;  %v322_v40 = vld [vmem:[%s1479_s30 + $0xc0] sm:$0xff] }
  0x2d   : > { %v415_v10 = vadd.f32 %v1502_v55, %v365_v43  ;;  %v417_v11 = vadd.f32 %v1504_v56, %v367_v44  ;;  %v371_v12 = vmul.f32 %v1491_v47, %v321_v2  ;;  %v368_v33 = vmul.f32 %v1493_v48, %v318_v17  ;;  %v1726_v17 = vld [vmem:[%s1833_s2] ss:$0 sm:$0xff] }
  0x2e   : > { %vm440_vm15 = vcmp.ge.f32.partialorder %v1605_v6, 0.0  ;;  %v375_v35 = vmul.f32 %v1491_v47, %v325_v25 }
  0x2f   : > { %v421_v30 = vadd.f32 %v1504_v56, %v371_v12 }
  0x4f   : > { %s1195_s18 = spop %1194 }
  0x89   : > { %v1578_v42 = vpop.permute.xlu0 %461 }
  0x8a   : > { %v465_v50 = vmul.f32 %v1578_v42, %v399_v13  ;;  %v467_v52 = vmul.f32 %v1578_v42, %v401_v14  ;;  %v464_v53 = vmul.f32 %v1578_v42, %v398_v15  ;;  %v466_v54 = vmul.f32 %v1578_v42, %v400_v18 }
  0x8b   : > { %v469_v58 = vmul.f32 %v1578_v42, %v403_v16  ;;  %v471_v59 = vmul.f32 %v1578_v42, %v405_v19  ;;  %v468_v60 = vmul.f32 %v1578_v42, %v1538_v22  ;;  %v470_v5 = vmul.f32 %v1578_v42, %v1541_v23 }
  0x8c   : > { %v493_v62 = vsel %vm427_vm0, %v399_v13, %v465_v50  ;;  %v495_v63 = vsel %vm429_vm1, %v401_v14, %v467_v52  ;;  %v492_v0 = vsel %vm426_vm2, %v398_v15, %v464_v53  ;;  %v494_v1 = vsel %vm428_vm4, %v400_v18, %v466_v54  ;;  %v320_v18 = vld [vmem:[%s1479_s30 + $0xb0] sm:$0xff] }
  0x8d   : > { %655 = vmatprep.mubr.f32.mxu0 %v493_v62  ;;  %755 = vmatprep.mubr.f32.mxu1 %v495_v63  ;;  %v497_v4 = vsel %vm431_vm3, %v403_v16, %v469_v58  ;;  %v499_v7 = vsel %vm433_vm5, %v405_v19, %v471_v59  ;;  %v473_v8 = vmul.f32 %v1578_v42, %v1546_v26  ;;  %vm443_vm0 = vcmp.ge.f32.partialorder %v415_v10, 0.0 }
  0x8e   : > { %656 = vmatmul.mubr.f32.vlgmr.msra.gmra.mrb[0].mxu0 %v492_v0  ;;  %756 = vmatmul.mubr.f32.vlgmr.msra.gmra.mrb[0].mxu1 %v494_v1  ;;  %v475_v9 = vmul.f32 %v1578_v42, %v1549_v27  ;;  %v496_v13 = vsel %vm430_vm6, %v1538_v22, %v468_v60  ;;  %v1621_v14 = vadd.f32 %v1506_v57, %v364_v46  ;;  %vm445_vm1 = vcmp.ge.f32.partialorder %v417_v11, 0.0 }
  0x8f   : > { %660 = vmatprep.mubr.f32.mxu0 %v497_v4  ;;  %760 = vmatprep.mubr.f32.mxu1 %v499_v7  ;;  %v1624_v15 = vadd.f32 %v1517_v3, %v366_v49  ;;  %v1627_v16 = vadd.f32 %v1502_v55, %v369_v61  ;;  %v498_v19 = vsel %vm432_vm7, %v1541_v23, %v470_v5  ;;  %v324_v49 = vld [vmem:[%s1479_s30 + $0xd0] sm:$0xff]  ;;  %vm449_vm5 = vcmp.ge.f32.partialorder %v421_v30, 0.0 }
  0x90   : > { %v472_v20 = vmul.f32 %v1578_v42, %v1555_v31  ;;  %v474_v21 = vmul.f32 %v1578_v42, %v1558_v32  ;;  %v477_v22 = vmul.f32 %v1578_v42, %v1566_v36  ;;  %v501_v28 = vsel %vm435_vm8, %v1546_v26, %v473_v8 }
  0x91   : > { %v503_v23 = vsel %vm437_vm9, %v1549_v27, %v475_v9  ;;  %v479_v29 = vmul.f32 %v1578_v42, %v1569_v37  ;;  %v370_v34 = vmul.f32 %v1497_v51, %v320_v18  ;;  %v476_v26 = vmul.f32 %v1578_v42, %v1574_v39 }
  0x92   : > { %661 = vmatmul.mubr.f32.gmra.mrb[2].mxu0 %v496_v13  ;;  %761 = vmatmul.mubr.f32.gmra.mrb[2].mxu1 %v498_v19  ;;  %v373_v27 = vmul.f32 %v1486_v45, %v323_v24  ;;  %v500_v41 = vsel %vm434_vm10, %v1555_v31, %v472_v20  ;;  %v502_v43 = vsel %vm436_vm11, %v1558_v32, %v474_v21  ;;  %vm442_vm2 = vcmp.ge.f32.partialorder %v1621_v14, 0.0 }
  0x93   : > { %665 = vmatprep.mubr.f32.mxu0 %v501_v28  ;;  %765 = vmatprep.mubr.f32.mxu1 %v503_v23  ;;  %v505_v44 = vsel %vm439_vm12, %v1566_v36, %v477_v22  ;;  %v478_v46 = vmul.f32 %v1578_v42, %v1605_v6  ;;  %v507_v45 = vsel %vm441_vm13, %v1569_v37, %v479_v29  ;;  %vm444_vm3 = vcmp.ge.f32.partialorder %v1624_v15, 0.0 }
  0x94   : > { %v481_v47 = vmul.f32 %v1578_v42, %v415_v10  ;;  %v483_v31 = vmul.f32 %v1578_v42, %v417_v11  ;;  %v418_v32 = vadd.f32 %v1506_v57, %v368_v33  ;;  %v420_v36 = vadd.f32 %v1517_v3, %v370_v34 }
  0x95   : > { %v372_v50 = vmul.f32 %v1493_v48, %v322_v40  ;;  %v480_v52 = vmul.f32 %v1578_v42, %v1621_v14  ;;  %v423_v37 = vadd.f32 %v1502_v55, %v373_v27  ;;  %v425_v53 = vadd.f32 %v1504_v56, %v375_v35 }
  0x96   : > { %666 = vmatmul.mubr.f32.gmra.mrb[4].mxu0 %v500_v41  ;;  %766 = vmatmul.mubr.f32.gmra.mrb[4].mxu1 %v502_v43  ;;  %v374_v54 = vmul.f32 %v1497_v51, %v324_v49  ;;  %v504_v58 = vsel %vm438_vm14, %v1574_v39, %v476_v26  ;;  %v506_v59 = vsel %vm440_vm15, %v1605_v6, %v478_v46  ;;  %vm447_vm4 = vcmp.ge.f32.partialorder %v1627_v16, 0.0 }
  0x97   : > { %670 = vmatprep.mubr.f32.mxu0 %v505_v44  ;;  %770 = vmatprep.mubr.f32.mxu1 %v507_v45  ;;  %v482_v48 = vmul.f32 %v1578_v42, %v1624_v15  ;;  %v485_v60 = vmul.f32 %v1578_v42, %v1627_v16  ;;  %v509_v55 = vsel %vm443_vm0, %v415_v10, %v481_v47  ;;  %vm446_vm6 = vcmp.ge.f32.partialorder %v418_v32, 0.0 }
  0x98   : > { %v511_v51 = vsel %vm445_vm1, %v417_v11, %v483_v31  ;;  %v487_v56 = vmul.f32 %v1578_v42, %v421_v30  ;;  %v508_v39 = vsel %vm442_vm2, %v1621_v14, %v480_v52  ;;  %v422_v61 = vadd.f32 %v1506_v57, %v372_v50 }
  0x99   : > { %v424_v62 = vadd.f32 %v1517_v3, %v374_v54  ;;  %v510_v63 = vsel %vm444_vm3, %v1624_v15, %v482_v48  ;;  %v513_v0 = vsel %vm447_vm4, %v1627_v16, %v485_v60  ;;  %v484_v1 = vmul.f32 %v1578_v42, %v418_v32 }
  0x9a   : > { %671 = vmatmul.mubr.f32.gmra.mrb[6].mxu0 %v504_v58  ;;  %771 = vmatmul.mubr.f32.gmra.mrb[6].mxu1 %v506_v59  ;;  %v486_v2 = vmul.f32 %v1578_v42, %v420_v36  ;;  %v515_v4 = vsel %vm449_vm5, %v421_v30, %v487_v56  ;;  %vm448_vm7 = vcmp.ge.f32.partialorder %v420_v36, 0.0  ;;  %v489_v5 = vmul.f32 %v1578_v42, %v423_v37 }
  0x9b   : > { %675 = vmatprep.mubr.f32.mxu0 %v509_v55  ;;  %775 = vmatprep.mubr.f32.mxu1 %v511_v51  ;;  %v491_v57 = vmul.f32 %v1578_v42, %v425_v53  ;;  %vm451_vm8 = vcmp.ge.f32.partialorder %v423_v37, 0.0  ;;  %vm453_vm9 = vcmp.ge.f32.partialorder %v425_v53, 0.0  ;;  %v512_v3 = vsel %vm446_vm6, %v418_v32, %v484_v1 }
  0x9c   : > { %v514_v6 = vsel %vm448_vm7, %v420_v36, %v486_v2  ;;  %v488_v7 = vmul.f32 %v1578_v42, %v422_v61  ;;  %v490_v8 = vmul.f32 %v1578_v42, %v424_v62  ;;  %v517_v9 = vsel %vm451_vm8, %v423_v37, %v489_v5 }
  0x9d   : > { %v519_v10 = vsel %vm453_vm9, %v425_v53, %v491_v57  ;;  %vm450_vm10 = vcmp.ge.f32.partialorder %v422_v61, 0.0  ;;  %vm452_vm11 = vcmp.ge.f32.partialorder %v424_v62, 0.0  ;;  %v1718_v13 = vstv %s807_s22  ;;  %s297_s22 = scalar_lea.vmem %s1838_s7, %s1011_s19 }
  0x9e   : > { %676 = vmatmul.mubr.f32.gmra.mrb[8].mxu0 %v508_v39  ;;  %776 = vmatmul.mubr.f32.gmra.mrb[8].mxu1 %v510_v63  ;;  %v516_v11 = vsel %vm450_vm10, %v422_v61, %v488_v7  ;;  %v518_v12 = vsel %vm452_vm11, %v424_v62, %v490_v8  ;;  %v809_v14 = vadd.s32 %v1718_v13, %v1470_v38  ;;  %v801_v42 = vadd.s32 8, %v1470_v38 }
  0x9f   : > { %680 = vmatprep.mubr.f32.mxu0 %v513_v0  ;;  %780 = vmatprep.mubr.f32.mxu1 %v515_v4  ;;  %v802_v20 = vadd.s32 16, %v1470_v38  ;;  %vm791_vm13 = vcmask 523264   ;;  %v1218_v29 = vmov 0.0   ;;  %v803_v27 = vadd.s32 24, %v1470_v38 }
  0xa0   : > { %vm816_vm12 = vcmp.lt.s32.totalorder %v809_v14, 98  ;;  %v810_v24 = vadd.s32 %v1718_v13, %v801_v42  ;;  %v804_v36 = vadd.s32 32, %v1470_v38  ;;  %v805_v39 = vadd.s32 40, %v1470_v38 }
  0xa1   : > { %v1738_v30 = vsel %vm816_vm12, 1.0, %v1218_v29  ;;  %v811_v26 = vadd.s32 %v1718_v13, %v802_v20  ;;  %v812_v32 = vadd.s32 %v1718_v13, %v803_v27  ;;  %vm912_vm4 = vcmask 1040384  }
  0xa2   : > { %681 = vmatmul.mubr.f32.gmra.mrb[10].mxu0 %v512_v3  ;;  %781 = vmatmul.mubr.f32.gmra.mrb[10].mxu1 %v514_v6  ;;  %vm817_vm14 = vcmp.lt.s32.totalorder %v810_v24, 98  ;;  %v813_v56 = vadd.s32 %v1718_v13, %v804_v36  ;;  %v814_v8 = vadd.s32 %v1718_v13, %v805_v39  ;;  %vm914_vm5 = vcmask 517120  }
  0xa3   : > { %685 = vmatprep.mubr.f32.mxu0 %v517_v9  ;;  %785 = vmatprep.mubr.f32.mxu1 %v519_v10  ;;  %v1751_v45 = vsel %vm817_vm14, 1.0, %v1218_v29  ;;  %vm818_vm15 = vcmp.lt.s32.totalorder %v811_v26, 98  ;;  %vm819_vm0 = vcmp.lt.s32.totalorder %v812_v32, 98  ;;  %v806_v9 = vadd.s32 48, %v1470_v38 }
  0xa4   : > { %v1764_v58 = vsel %vm818_vm15, 1.0, %v1218_v29  ;;  %v1779_v3 = vsel %vm819_vm0, 1.0, %v1218_v29  ;;  %vm820_vm1 = vcmp.lt.s32.totalorder %v813_v56, 98  ;;  %vm821_vm2 = vcmp.lt.s32.totalorder %v814_v8, 98 }
  0xa5   : > { %v1018_v38 = vsel %vm820_vm1, 1.0, %v1218_v29 }
  0xa6   : > { %686 = vmatmul.mubr.f32.gmra.mrb[12].mxu0 %v516_v11  ;;  %786 = vmatmul.mubr.f32.gmra.mrb[12].mxu1 %v518_v12 }
 0x161   : > { %v1056_v15 = vpop.f32.mrb[0].mxu0  ;;  %v1109_v16 = vpop.f32.mrb[0].mxu1 }
 0x162   : > { %v1057_v18 = vpop.f32.mrb[1].mxu0  ;;  %v1110_v19 = vpop.f32.mrb[1].mxu1 }
 0x163   : > { %v1058_v21 = vadd.f32 %v1057_v18, %v1056_v15  ;;  %v1111_v22 = vadd.f32 %v1110_v19, %v1109_v16 }
 0x165   : > { %v658_v25 = vadd.f32 %v1058_v21, %v1726_v17  ;;  %v1059_v28 = vpop.f32.mrb[2].mxu0  ;;  %v1112_v23 = vpop.f32.mrb[2].mxu1 }
 0x166   : > { %v1060_v33 = vpop.f32.mrb[3].mxu0  ;;  %v1113_v34 = vpop.f32.mrb[3].mxu1 }
 0x167   : > { %v1742_v35 = vadd.f32 %v1111_v22, %v658_v25  ;;  %v1061_v40 = vadd.f32 %v1060_v33, %v1059_v28  ;;  %v1114_v41 = vadd.f32 %v1113_v34, %v1112_v23  ;;  %v815_v22 = vadd.s32 %v1718_v13, %v806_v9 }
 0x169   : > { %792 = vst.msk [vmem:[%s1735_s17] sm:$0xff] %vm791_vm13, %v1742_v35  ;;  %v841_v43 = vmul.f32 %v1738_v30, %v1742_v35  ;;  %v663_v44 = vadd.f32 %v1061_v40, %v1726_v17  ;;  %v1062_v46 = vpop.f32.mrb[4].mxu0  ;;  %v1115_v49 = vpop.f32.mrb[4].mxu1  ;;  %vm822_vm3 = vcmp.lt.s32.totalorder %v815_v22, 98 }
 0x16a   : > { %v1063_v47 = vpop.f32.mrb[5].mxu0  ;;  %v1116_v31 = vpop.f32.mrb[5].mxu1 }
 0x16b   : > { %v1755_v50 = vadd.f32 %v1114_v41, %v663_v44  ;;  %v1064_v52 = vadd.f32 %v1063_v47, %v1062_v46  ;;  %v1117_v37 = vadd.f32 %v1116_v31, %v1115_v49  ;;  %v848_v60 = vsel %vm791_vm13, %v841_v43, 0.0 }
 0x16c   : > { %v1019_v41 = vsel %vm821_vm2, 1.0, %v1218_v29 }
 0x16d   : > { %793 = vst.msk [vmem:[%s1735_s17 + $0x8] sm:$0xff] %vm791_vm13, %v1755_v50  ;;  %v842_v53 = vmul.f32 %v1751_v45, %v1755_v50  ;;  %v668_v54 = vadd.f32 %v1064_v52, %v1726_v17  ;;  %v1065_v59 = vpop.f32.mrb[6].mxu0  ;;  %v1118_v48 = vpop.f32.mrb[6].mxu1  ;;  %v1020_v52 = vsel %vm822_vm3, 1.0, %v1218_v29 }
 0x16e   : > { %v1066_v55 = vpop.f32.mrb[7].mxu0  ;;  %v1119_v51 = vpop.f32.mrb[7].mxu1 }
 0x16f   : > { %v849_v61 = vsel %vm791_vm13, %v842_v53, 0.0  ;;  %v1770_v62 = vadd.f32 %v1117_v37, %v668_v54  ;;  %v1067_v63 = vadd.f32 %v1066_v55, %v1065_v59  ;;  %v1120_v0 = vadd.f32 %v1119_v51, %v1118_v48 }
 0x170   : > { %v850_v1 = vadd.f32 %v849_v61, %v848_v60 }
 0x171   : > { %794 = vst.msk [vmem:[%s1735_s17 + $0x10] sm:$0xff] %vm791_vm13, %v1770_v62  ;;  %v843_v2 = vmul.f32 %v1764_v58, %v1770_v62  ;;  %v673_v4 = vadd.f32 %v1067_v63, %v1726_v17  ;;  %v1068_v5 = vpop.f32.mrb[8].mxu0  ;;  %v1121_v57 = vpop.f32.mrb[8].mxu1  ;;  %v870_v63 = vstv %s1195_s18 }
 0x172   : > { %v1069_v6 = vpop.f32.mrb[9].mxu0  ;;  %v1122_v7 = vpop.f32.mrb[9].mxu1 }
 0x173   : > { %v851_v10 = vsel %vm791_vm13, %v843_v2, 0.0  ;;  %v1784_v11 = vadd.f32 %v1120_v0, %v673_v4  ;;  %v1070_v12 = vadd.f32 %v1069_v6, %v1068_v5  ;;  %v1123_v14 = vadd.f32 %v1122_v7, %v1121_v57 }
 0x174   : > { %v852_v42 = vadd.f32 %v851_v10, %v850_v1 }
 0x175   : > { %795 = vst.msk [vmem:[%s1735_s17 + $0x18] sm:$0xff] %vm791_vm13, %v1784_v11  ;;  %v844_v15 = vmul.f32 %v1779_v3, %v1784_v11  ;;  %v678_v16 = vadd.f32 %v1070_v12, %v1726_v17  ;;  %v1071_v18 = vpop.f32.mrb[10].mxu0  ;;  %v1124_v19 = vpop.f32.mrb[10].mxu1 }
 0x176   : > { %v1072_v20 = vpop.f32.mrb[11].mxu0  ;;  %v1125_v21 = vpop.f32.mrb[11].mxu1 }
 0x177   : > { %v853_v24 = vsel %vm791_vm13, %v844_v15, 0.0  ;;  %v778_v25 = vadd.f32 %v1123_v14, %v678_v16  ;;  %v1073_v28 = vadd.f32 %v1072_v20, %v1071_v18  ;;  %v1126_v23 = vadd.f32 %v1125_v21, %v1124_v19 }
 0x178   : > { %v854_v33 = vadd.f32 %v853_v24, %v852_v42 }
 0x179   : > { %796 = vst.msk [vmem:[%s1735_s17 + $0x20] sm:$0xff] %vm791_vm13, %v778_v25  ;;  %v845_v34 = vmul.f32 %v1018_v38, %v778_v25  ;;  %v683_v26 = vadd.f32 %v1073_v28, %v1726_v17  ;;  %v1074_v27 = vpop.f32.mrb[12].mxu0  ;;  %v1127_v40 = vpop.f32.mrb[12].mxu1 }
 0x17a   : > { %v1075_v43 = vpop.f32.mrb[13].mxu0  ;;  %v1128_v44 = vpop.f32.mrb[13].mxu1 }
 0x17b   : > { %v855_v13 = vsel %vm791_vm13, %v845_v34, 0.0  ;;  %v783_v46 = vadd.f32 %v1126_v23, %v683_v26  ;;  %v1076_v49 = vadd.f32 %v1075_v43, %v1074_v27  ;;  %v1129_v47 = vadd.f32 %v1128_v44, %v1127_v40 }
 0x17c   : > { %v856_v31 = vadd.f32 %v855_v13, %v854_v33 }
 0x17d   : > { %797 = vst.msk [vmem:[%s1735_s17 + $0x28] sm:$0xff] %vm791_vm13, %v783_v46  ;;  %v846_v32 = vmul.f32 %v1019_v41, %v783_v46  ;;  %v688_v36 = vadd.f32 %v1076_v49, %v1726_v17 }
 0x17f   : > { %v857_v37 = vsel %vm791_vm13, %v846_v32, 0.0  ;;  %v788_v53 = vadd.f32 %v1129_v47, %v688_v36 }
 0x180   : > { %v858_v54 = vadd.f32 %v857_v37, %v856_v31 }
 0x181   : > { %798 = vst.msk [vmem:[%s1735_s17 + $0x30] sm:$0xff] %vm791_vm13, %v788_v53  ;;  %v847_v59 = vmul.f32 %v1020_v52, %v788_v53 }
 0x183   : > { %v859_v48 = vsel %vm791_vm13, %v847_v59, 0.0 }
 0x184   : > { %v860_v60 = vadd.f32 %v859_v48, %v858_v54 }
 0x186   : > { %v861_v55 = vrot.slane %v860_v60, 4 }
 0x188   : > { %v862_v51 = vadd.f32 %v861_v55, %v860_v60 }
 0x18a   : > { %v863_v56 = vrot.slane %v862_v51, 2 }
 0x18c   : > { %v864_v39 = vadd.f32 %v863_v56, %v862_v51 }
 0x18e   : > { %v865_v61 = vrot.slane %v864_v39, 1 }
 0x190   : > { %v866_v17 = vadd.f32 %v865_v61, %v864_v39 }
 0x192   : > { %v871_v0 = vmul.f32 %v870_v63, %v866_v17 }
 0x194   : > { %v872_v29 = vsub.f32 %v1742_v35, %v871_v0  ;;  %v873_v1 = vsub.f32 %v1755_v50, %v871_v0  ;;  %v874_v2 = vsub.f32 %v1770_v62, %v871_v0  ;;  %v875_v4 = vsub.f32 %v1784_v11, %v871_v0 }
 0x195   : > { %v876_v5 = vsub.f32 %v778_v25, %v871_v0  ;;  %v877_v57 = vsub.f32 %v783_v46, %v871_v0  ;;  %v878_v6 = vsub.f32 %v788_v53, %v871_v0 }
 0x196   : > { %v879_v7 = vmul.f32 %v1738_v30, %v872_v29  ;;  %v880_v8 = vmul.f32 %v1751_v45, %v873_v1  ;;  %v881_v9 = vmul.f32 %v1764_v58, %v874_v2  ;;  %v882_v10 = vmul.f32 %v1779_v3, %v875_v4 }
 0x197   : > { %v883_v12 = vmul.f32 %v1018_v38, %v876_v5  ;;  %v884_v14 = vmul.f32 %v1019_v41, %v877_v57  ;;  %v885_v35 = vmul.f32 %v1020_v52, %v878_v6 }
 0x198   : > { %v886_v42 = vmul.f32 %v879_v7, %v879_v7  ;;  %v887_v50 = vmul.f32 %v880_v8, %v880_v8  ;;  %v888_v15 = vmul.f32 %v881_v9, %v881_v9  ;;  %v889_v62 = vmul.f32 %v882_v10, %v882_v10 }
 0x199   : > { %v890_v30 = vmul.f32 %v883_v12, %v883_v12  ;;  %v891_v19 = vmul.f32 %v884_v14, %v884_v14  ;;  %v892_v20 = vmul.f32 %v885_v35, %v885_v35 }
 0x19a   : > { %v893_v11 = vsel %vm791_vm13, %v886_v42, 0.0  ;;  %v894_v16 = vsel %vm791_vm13, %v887_v50, 0.0  ;;  %v896_v45 = vsel %vm791_vm13, %v888_v15, 0.0  ;;  %v898_v3 = vsel %vm791_vm13, %v889_v62, 0.0 }
 0x19b   : > { %v895_v18 = vadd.f32 %v894_v16, %v893_v11  ;;  %v900_v21 = vsel %vm791_vm13, %v890_v30, 0.0  ;;  %v902_v24 = vsel %vm791_vm13, %v891_v19, 0.0  ;;  %v904_v28 = vsel %vm791_vm13, %v892_v20, 0.0 }
 0x19d   : > { %v897_v58 = vadd.f32 %v896_v45, %v895_v18 }
 0x19f   : > { %v899_v38 = vadd.f32 %v898_v3, %v897_v58 }
 0x1a1   : > { %v901_v22 = vadd.f32 %v900_v21, %v899_v38 }
 0x1a3   : > { %v903_v25 = vadd.f32 %v902_v24, %v901_v22 }
 0x1a5   : > { %v905_v23 = vadd.f32 %v904_v28, %v903_v25 }
 0x1a7   : > { %v906_v33 = vrot.slane %v905_v23, 4 }
 0x1a9   : > { %v907_v34 = vadd.f32 %v906_v33, %v905_v23 }
 0x1ab   : > { %v908_v26 = vrot.slane %v907_v34, 2 }
 0x1ad   : > { %v909_v27 = vadd.f32 %v908_v26, %v907_v34 }
 0x1af   : > { %v910_v40 = vrot.slane %v909_v27, 1 }
 0x1b1   : > { %v911_v41 = vadd.f32 %v910_v40, %v909_v27 }
 0x1b3   : > { %v913_v43 = vsel %vm912_vm4, %v866_v17, %v911_v41 }
 0x1b4   : > { %915 = vst.msk [vmem:[%s297_s22] sm:$0x3] %vm914_vm5, %v913_v43 }
 0x1b5 PF: > { %s20_s26 = sadd.s32 1, %s1215_s26  }
 0x1b6   : > { %p17_p6 = scmp.ge.s32.totalorder %s20_s26, 4  }
 0x1b8   :  { %19 = sbr.rel (!%p17_p6) target bundleno = 3 (0x3), region = 86 }

// kernel: _lambda_.15
= control target key start
LH: loop header
LB: loop body
LE: loop exit
PB: predicated region body
PF: predicated region fallthrough
CT: control target
= control target key end

     0   :  { %s924_s21 = smov 0   ;;  %s1135_s0 = inlined_call_operand.vmem [shape: f32[512,48], index: 0, kind: input, shape index: {}]   ;;  %s1136_s1 = inlined_call_operand.vmem [shape: f32[48,8], index: 1, kind: input, shape index: {}]   ;;  %s1137_s2 = inlined_call_operand.vmem [shape: f32[1,8], index: 2, kind: input, shape index: {}]   ;;  %s1138_s3 = inlined_call_operand.vmem [shape: f32[1,48], index: 3, kind: input, shape index: {}]   ;;  %s1139_s4 = inlined_call_operand.vmem [shape: f32[1,48], index: 4, kind: input, shape index: {}]   ;;  %s1140_s5 = inlined_call_operand.<no memory space> [shape: f32[1,1], index: 5, kind: input, shape index: {}]   ;;  %s1141_s6 = inlined_call_operand.vmem [shape: f32[512,8], index: 6, kind: output, shape index: {}]  }
   0x1 LB: > { %s713_s3 = sadd.s32 4294967295, %s887_s21   ;;  %p717_p0 = scmp.ge.s32.totalorder %s887_s21, 1  ;;  %s887_s21 = sphi %s924_s21, %s18_s21  }
   0x2   : > { %p215_p1 = scmp.lt.s32.totalorder %s887_s21, 3 }
   0x4   : > { %p216_p2 = pnand %p717_p0, %p215_p1 }
   0x5   : > { %v289_v0 = vld [vmem:[%s1136_s1] sm:$0xff] (!%p216_p2)  ;;  %v290_v1 = vld [vmem:[%s1136_s1 + $0x8] sm:$0xff] (!%p216_p2)  ;;  %v291_v2 = vld [vmem:[%s1136_s1 + $0x10] sm:$0xff] (!%p216_p2)  ;;  %s718_s26 = sshll.u32 (!%p216_p2), %s713_s3, 5  ;;  %vm302_vm0 = vcmask (!%p216_p2), 392192   ;;  %vm624_vm1 = vcmask (!%p216_p2), 64512  }
   0x6   : > { %219 = sbr.rel (%p216_p2) target bundleno = 265 (0x109), region = 44  ;;  %v855_v3 = vpack.c.bf16 (!%p216_p2), %v290_v1, %v289_v0  ;;  %v292_v4 = vld [vmem:[%s1136_s1 + $0x18] sm:$0xff] (!%p216_p2)  ;;  %p246_p3 = scmp.lt.s32.totalorder (!%p216_p2), %s718_s26, 63  ;;  %v293_v6 = vld [vmem:[%s1136_s1 + $0x20] sm:$0xff] (!%p216_p2)  ;;  %v294_v7 = vld [vmem:[%s1136_s1 + $0x28] sm:$0xff] (!%p216_p2) }
   0x7   : > { %v859_v5 = vpack.c.bf16 (!%p216_p2), %v292_v4, %v291_v2  ;;  %v863_v8 = vpack.c.bf16 (!%p216_p2), %v294_v7, %v293_v6  ;;  %v1027_v41 = vld [vmem:[%s1137_s2] ss:$0 sm:$0xff] (!%p216_p2) }
   0x8   : > { %856 = vmatprep.subr.bf16.mxu0 (!%p216_p2), %v855_v3  ;;  %867 = vmatprep.subr.bf16.mxu1 (!%p216_p2), %v855_v3 }
   0x9   : > { %858 = vmatpush3.bf16.msra.mxu0 (!%p216_p2), %v855_v3  ;;  %870 = vmatpush3.bf16.msra.mxu1 (!%p216_p2), %v855_v3 }
   0xa   : > { %860 = vmatprep.subr.bf16.mxu0 (!%p216_p2), %v859_v5  ;;  %868 = vmatprep.subr.bf16.mxu1 (!%p216_p2), %v859_v5 }
   0xd   : > { %s1143_s26 = smov (!%p246_p3, %s718_s26), 63  ;;  %862 = vmatpush3.bf16.msra.mxu0 %v859_v5  ;;  %871 = vmatpush3.bf16.msra.mxu1 %v859_v5 }
   0xe   : > { %s719_s9 = sshll.u32 %s1143_s26, 3  ;;  %864 = vmatprep.subr.bf16.mxu0 %v863_v8  ;;  %869 = vmatprep.subr.bf16.mxu1 %v863_v8 }
   0xf   : > { %s958_s12 = scalar_lea.vmem %s1135_s0, %s719_s9  ;;  %s1034_s17 = scalar_lea.vmem %s1141_s6, %s719_s9 }
  0x10   : > { %v257_v9 = vld [vmem:[%s958_s12] sm:$0xff]  ;;  %v258_v11 = vld [vmem:[%s958_s12 + $0x8] sm:$0xff]  ;;  %v259_v13 = vld [vmem:[%s958_s12 + $0x10] sm:$0xff] }
  0x11   : > { %v273_v10 = vld [vmem:[%s958_s12 + $0x80] sm:$0xff]  ;;  %807 = vmatprep.mubr.msk.f32.mxu0 %vm302_vm0, %v257_v9  ;;  %866 = vmatpush3.bf16.msra.mxu0 %v863_v8  ;;  %v274_v12 = vld [vmem:[%s958_s12 + $0x88] sm:$0xff]  ;;  %v275_v14 = vld [vmem:[%s958_s12 + $0x90] sm:$0xff] }
  0x12   : > { %831 = vmatprep.mubr.msk.f32.mxu1 %vm302_vm0, %v273_v10  ;;  %872 = vmatpush3.bf16.msra.mxu1 %v863_v8  ;;  %v260_v15 = vld [vmem:[%s958_s12 + $0x18] sm:$0xff]  ;;  %v261_v17 = vld [vmem:[%s958_s12 + $0x20] sm:$0xff]  ;;  %v262_v19 = vld [vmem:[%s958_s12 + $0x28] sm:$0xff] }
  0x13   : > { %v276_v16 = vld [vmem:[%s958_s12 + $0x98] sm:$0xff]  ;;  %v277_v18 = vld [vmem:[%s958_s12 + $0xa0] sm:$0xff]  ;;  %v278_v20 = vld [vmem:[%s958_s12 + $0xa8] sm:$0xff] }
  0x14   : > { %808 = vmatmul.mubr.msk.f32.vlgmr.msra.gmra.mrb[0].mxu0 %vm302_vm0, %v258_v11  ;;  %v263_v21 = vld [vmem:[%s958_s12 + $0x30] sm:$0xff]  ;;  %v264_v23 = vld [vmem:[%s958_s12 + $0x38] sm:$0xff]  ;;  %v265_v25 = vld [vmem:[%s958_s12 + $0x40] sm:$0xff] }
  0x15   : > { %832 = vmatmul.mubr.msk.f32.vlgmr.msra.gmra.mrb[0].mxu1 %vm302_vm0, %v274_v12  ;;  %810 = vmatprep.mubr.msk.f32.mxu0 %vm302_vm0, %v259_v13  ;;  %v279_v22 = vld [vmem:[%s958_s12 + $0xb0] sm:$0xff]  ;;  %v280_v24 = vld [vmem:[%s958_s12 + $0xb8] sm:$0xff]  ;;  %v281_v26 = vld [vmem:[%s958_s12 + $0xc0] sm:$0xff] }
  0x16   : > { %834 = vmatprep.mubr.msk.f32.mxu1 %vm302_vm0, %v275_v14  ;;  %v266_v27 = vld [vmem:[%s958_s12 + $0x48] sm:$0xff]  ;;  %v267_v29 = vld [vmem:[%s958_s12 + $0x50] sm:$0xff]  ;;  %v268_v31 = vld [vmem:[%s958_s12 + $0x58] sm:$0xff] }
  0x17   : > { %v282_v28 = vld [vmem:[%s958_s12 + $0xc8] sm:$0xff]  ;;  %v283_v30 = vld [vmem:[%s958_s12 + $0xd0] sm:$0xff]  ;;  %v284_v32 = vld [vmem:[%s958_s12 + $0xd8] sm:$0xff] }
  0x18   : > { %811 = vmatmul.mubr.msk.f32.gmra.mrb[2].mxu0 %vm302_vm0, %v260_v15  ;;  %v269_v33 = vld [vmem:[%s958_s12 + $0x60] sm:$0xff]  ;;  %v270_v35 = vld [vmem:[%s958_s12 + $0x68] sm:$0xff]  ;;  %v271_v37 = vld [vmem:[%s958_s12 + $0x70] sm:$0xff] }
  0x19   : > { %835 = vmatmul.mubr.msk.f32.gmra.mrb[2].mxu1 %vm302_vm0, %v276_v16  ;;  %813 = vmatprep.mubr.msk.f32.mxu0 %vm302_vm0, %v261_v17  ;;  %v285_v34 = vld [vmem:[%s958_s12 + $0xe0] sm:$0xff]  ;;  %v286_v36 = vld [vmem:[%s958_s12 + $0xe8] sm:$0xff]  ;;  %v287_v38 = vld [vmem:[%s958_s12 + $0xf0] sm:$0xff] }
  0x1a   : > { %837 = vmatprep.mubr.msk.f32.mxu1 %vm302_vm0, %v277_v18  ;;  %v272_v39 = vld [vmem:[%s958_s12 + $0x78] sm:$0xff] }
  0x1b   : > { %v288_v40 = vld [vmem:[%s958_s12 + $0xf8] sm:$0xff] }
  0x1c   : > { %814 = vmatmul.mubr.msk.f32.gmra.mrb[4].mxu0 %vm302_vm0, %v262_v19 }
  0x1d   : > { %838 = vmatmul.mubr.msk.f32.gmra.mrb[4].mxu1 %vm302_vm0, %v278_v20  ;;  %816 = vmatprep.mubr.msk.f32.mxu0 %vm302_vm0, %v263_v21 }
  0x1e   : > { %840 = vmatprep.mubr.msk.f32.mxu1 %vm302_vm0, %v279_v22 }
  0x20   : > { %817 = vmatmul.mubr.msk.f32.gmra.mrb[6].mxu0 %vm302_vm0, %v264_v23 }
  0x21   : > { %841 = vmatmul.mubr.msk.f32.gmra.mrb[6].mxu1 %vm302_vm0, %v280_v24  ;;  %819 = vmatprep.mubr.msk.f32.mxu0 %vm302_vm0, %v265_v25 }
  0x22   : > { %843 = vmatprep.mubr.msk.f32.mxu1 %vm302_vm0, %v281_v26 }
  0x24   : > { %820 = vmatmul.mubr.msk.f32.gmra.mrb[8].mxu0 %vm302_vm0, %v266_v27 }
  0x25   : > { %844 = vmatmul.mubr.msk.f32.gmra.mrb[8].mxu1 %vm302_vm0, %v282_v28  ;;  %822 = vmatprep.mubr.msk.f32.mxu0 %vm302_vm0, %v267_v29 }
  0x26   : > { %846 = vmatprep.mubr.msk.f32.mxu1 %vm302_vm0, %v283_v30 }
  0x28   : > { %823 = vmatmul.mubr.msk.f32.gmra.mrb[10].mxu0 %vm302_vm0, %v268_v31 }
  0x29   : > { %847 = vmatmul.mubr.msk.f32.gmra.mrb[10].mxu1 %vm302_vm0, %v284_v32  ;;  %825 = vmatprep.mubr.msk.f32.mxu0 %vm302_vm0, %v269_v33 }
  0x2a   : > { %849 = vmatprep.mubr.msk.f32.mxu1 %vm302_vm0, %v285_v34 }
  0x2c   : > { %826 = vmatmul.mubr.msk.f32.gmra.mrb[12].mxu0 %vm302_vm0, %v270_v35 }
  0x2d   : > { %850 = vmatmul.mubr.msk.f32.gmra.mrb[12].mxu1 %vm302_vm0, %v286_v36  ;;  %828 = vmatprep.mubr.msk.f32.mxu0 %vm302_vm0, %v271_v37 }
  0x2e   : > { %852 = vmatprep.mubr.msk.f32.mxu1 %vm302_vm0, %v287_v38 }
  0x30   : > { %829 = vmatmul.mubr.msk.f32.gmra.mrb[14].mxu0 %vm302_vm0, %v272_v39 }
  0x31   : > { %853 = vmatmul.mubr.msk.f32.gmra.mrb[14].mxu1 %vm302_vm0, %v288_v40 }
  0xe7   : > { %v809_v42 = vpop.f32.mrb[0].mxu0 }
  0xe8   : > { %v833_v43 = vpop.f32.mrb[0].mxu1  ;;  %v471_v44 = vadd.f32 %v809_v42, %v1027_v41  ;;  %v465_v46 = vpop.f32.mrb[1].mxu0 }
  0xe9   : > { %v551_v45 = vadd.f32 %v833_v43, %v1027_v41  ;;  %v545_v47 = vpop.f32.mrb[1].mxu1  ;;  %v466_v48 = vadd.f32 %v1027_v41, %v465_v46 }
  0xea   : > { %v546_v49 = vadd.f32 %v1027_v41, %v545_v47  ;;  %626 = vst.msk [vmem:[%s1034_s17 + $0x8] sm:$0xff] %vm624_vm1, %v471_v44 }
  0xeb   : > { %642 = vst.msk [vmem:[%s1034_s17 + $0x88] sm:$0xff] %vm624_vm1, %v551_v45  ;;  %625 = vst.msk [vmem:[%s1034_s17] sm:$0xff] %vm624_vm1, %v466_v48  ;;  %v812_v50 = vpop.f32.mrb[2].mxu0 }
  0xec   : > { %641 = vst.msk [vmem:[%s1034_s17 + $0x80] sm:$0xff] %vm624_vm1, %v546_v49  ;;  %v836_v51 = vpop.f32.mrb[2].mxu1  ;;  %v481_v52 = vadd.f32 %v812_v50, %v1027_v41  ;;  %v475_v54 = vpop.f32.mrb[3].mxu0 }
  0xed   : > { %v561_v53 = vadd.f32 %v836_v51, %v1027_v41  ;;  %v555_v55 = vpop.f32.mrb[3].mxu1  ;;  %v476_v56 = vadd.f32 %v1027_v41, %v475_v54 }
  0xee   : > { %v556_v57 = vadd.f32 %v1027_v41, %v555_v55  ;;  %628 = vst.msk [vmem:[%s1034_s17 + $0x18] sm:$0xff] %vm624_vm1, %v481_v52 }
  0xef   : > { %644 = vst.msk [vmem:[%s1034_s17 + $0x98] sm:$0xff] %vm624_vm1, %v561_v53  ;;  %627 = vst.msk [vmem:[%s1034_s17 + $0x10] sm:$0xff] %vm624_vm1, %v476_v56  ;;  %v815_v58 = vpop.f32.mrb[4].mxu0 }
  0xf0   : > { %643 = vst.msk [vmem:[%s1034_s17 + $0x90] sm:$0xff] %vm624_vm1, %v556_v57  ;;  %v839_v59 = vpop.f32.mrb[4].mxu1  ;;  %v491_v60 = vadd.f32 %v815_v58, %v1027_v41  ;;  %v485_v62 = vpop.f32.mrb[5].mxu0 }
  0xf1   : > { %v571_v61 = vadd.f32 %v839_v59, %v1027_v41  ;;  %v565_v63 = vpop.f32.mrb[5].mxu1  ;;  %v486_v0 = vadd.f32 %v1027_v41, %v485_v62 }
  0xf2   : > { %v566_v1 = vadd.f32 %v1027_v41, %v565_v63  ;;  %630 = vst.msk [vmem:[%s1034_s17 + $0x28] sm:$0xff] %vm624_vm1, %v491_v60 }
  0xf3   : > { %646 = vst.msk [vmem:[%s1034_s17 + $0xa8] sm:$0xff] %vm624_vm1, %v571_v61  ;;  %629 = vst.msk [vmem:[%s1034_s17 + $0x20] sm:$0xff] %vm624_vm1, %v486_v0  ;;  %v818_v2 = vpop.f32.mrb[6].mxu0 }
  0xf4   : > { %645 = vst.msk [vmem:[%s1034_s17 + $0xa0] sm:$0xff] %vm624_vm1, %v566_v1  ;;  %v842_v3 = vpop.f32.mrb[6].mxu1  ;;  %v501_v4 = vadd.f32 %v818_v2, %v1027_v41  ;;  %v495_v6 = vpop.f32.mrb[7].mxu0 }
  0xf5   : > { %v581_v5 = vadd.f32 %v842_v3, %v1027_v41  ;;  %v575_v7 = vpop.f32.mrb[7].mxu1  ;;  %v496_v8 = vadd.f32 %v1027_v41, %v495_v6 }
  0xf6   : > { %v576_v9 = vadd.f32 %v1027_v41, %v575_v7  ;;  %632 = vst.msk [vmem:[%s1034_s17 + $0x38] sm:$0xff] %vm624_vm1, %v501_v4 }
  0xf7   : > { %648 = vst.msk [vmem:[%s1034_s17 + $0xb8] sm:$0xff] %vm624_vm1, %v581_v5  ;;  %631 = vst.msk [vmem:[%s1034_s17 + $0x30] sm:$0xff] %vm624_vm1, %v496_v8  ;;  %v821_v10 = vpop.f32.mrb[8].mxu0 }
  0xf8   : > { %647 = vst.msk [vmem:[%s1034_s17 + $0xb0] sm:$0xff] %vm624_vm1, %v576_v9  ;;  %v845_v11 = vpop.f32.mrb[8].mxu1  ;;  %v511_v12 = vadd.f32 %v821_v10, %v1027_v41  ;;  %v505_v14 = vpop.f32.mrb[9].mxu0 }
  0xf9   : > { %v591_v13 = vadd.f32 %v845_v11, %v1027_v41  ;;  %v585_v15 = vpop.f32.mrb[9].mxu1  ;;  %v506_v16 = vadd.f32 %v1027_v41, %v505_v14 }
  0xfa   : > { %v586_v17 = vadd.f32 %v1027_v41, %v585_v15  ;;  %634 = vst.msk [vmem:[%s1034_s17 + $0x48] sm:$0xff] %vm624_vm1, %v511_v12 }
  0xfb   : > { %650 = vst.msk [vmem:[%s1034_s17 + $0xc8] sm:$0xff] %vm624_vm1, %v591_v13  ;;  %633 = vst.msk [vmem:[%s1034_s17 + $0x40] sm:$0xff] %vm624_vm1, %v506_v16  ;;  %v824_v18 = vpop.f32.mrb[10].mxu0 }
  0xfc   : > { %649 = vst.msk [vmem:[%s1034_s17 + $0xc0] sm:$0xff] %vm624_vm1, %v586_v17  ;;  %v848_v19 = vpop.f32.mrb[10].mxu1  ;;  %v521_v20 = vadd.f32 %v824_v18, %v1027_v41  ;;  %v515_v22 = vpop.f32.mrb[11].mxu0 }
  0xfd   : > { %v601_v21 = vadd.f32 %v848_v19, %v1027_v41  ;;  %v595_v23 = vpop.f32.mrb[11].mxu1  ;;  %v516_v24 = vadd.f32 %v1027_v41, %v515_v22 }
  0xfe   : > { %v596_v25 = vadd.f32 %v1027_v41, %v595_v23  ;;  %636 = vst.msk [vmem:[%s1034_s17 + $0x58] sm:$0xff] %vm624_vm1, %v521_v20 }
  0xff   : > { %652 = vst.msk [vmem:[%s1034_s17 + $0xd8] sm:$0xff] %vm624_vm1, %v601_v21  ;;  %635 = vst.msk [vmem:[%s1034_s17 + $0x50] sm:$0xff] %vm624_vm1, %v516_v24  ;;  %v827_v26 = vpop.f32.mrb[12].mxu0 }
 0x100   : > { %651 = vst.msk [vmem:[%s1034_s17 + $0xd0] sm:$0xff] %vm624_vm1, %v596_v25  ;;  %v851_v27 = vpop.f32.mrb[12].mxu1  ;;  %v531_v28 = vadd.f32 %v827_v26, %v1027_v41  ;;  %v525_v30 = vpop.f32.mrb[13].mxu0 }
 0x101   : > { %v611_v29 = vadd.f32 %v851_v27, %v1027_v41  ;;  %v605_v31 = vpop.f32.mrb[13].mxu1  ;;  %v526_v32 = vadd.f32 %v1027_v41, %v525_v30 }
 0x102   : > { %v606_v33 = vadd.f32 %v1027_v41, %v605_v31  ;;  %638 = vst.msk [vmem:[%s1034_s17 + $0x68] sm:$0xff] %vm624_vm1, %v531_v28 }
 0x103   : > { %654 = vst.msk [vmem:[%s1034_s17 + $0xe8] sm:$0xff] %vm624_vm1, %v611_v29  ;;  %637 = vst.msk [vmem:[%s1034_s17 + $0x60] sm:$0xff] %vm624_vm1, %v526_v32  ;;  %v830_v34 = vpop.f32.mrb[14].mxu0 }
 0x104   : > { %653 = vst.msk [vmem:[%s1034_s17 + $0xe0] sm:$0xff] %vm624_vm1, %v606_v33  ;;  %v854_v35 = vpop.f32.mrb[14].mxu1  ;;  %v541_v36 = vadd.f32 %v830_v34, %v1027_v41  ;;  %v535_v38 = vpop.f32.mrb[15].mxu0 }
 0x105   : > { %v621_v37 = vadd.f32 %v854_v35, %v1027_v41  ;;  %v615_v39 = vpop.f32.mrb[15].mxu1  ;;  %v536_v40 = vadd.f32 %v1027_v41, %v535_v38 }
 0x106   : > { %v616_v42 = vadd.f32 %v1027_v41, %v615_v39  ;;  %640 = vst.msk [vmem:[%s1034_s17 + $0x78] sm:$0xff] %vm624_vm1, %v541_v36 }
 0x107   : > { %656 = vst.msk [vmem:[%s1034_s17 + $0xf8] sm:$0xff] %vm624_vm1, %v621_v37  ;;  %639 = vst.msk [vmem:[%s1034_s17 + $0x70] sm:$0xff] %vm624_vm1, %v536_v40 }
 0x108   : > { %655 = vst.msk [vmem:[%s1034_s17 + $0xf0] sm:$0xff] %vm624_vm1, %v616_v42 }
 0x109 PF: > { %s18_s21 = sadd.s32 1, %s887_s21  }
 0x10a   : > { %p15_p4 = scmp.ge.s32.totalorder %s18_s21, 4  }
 0x10c   :  { %17 = sbr.rel (!%p15_p4) target bundleno = 1 (0x1), region = 74 }

// kernel: _lambda_.16
= control target key start
LH: loop header
LB: loop body
LE: loop exit
PB: predicated region body
PF: predicated region fallthrough
CT: control target
= control target key end

     0   :  { %s898_s26 = smov 0   ;;  %s1059_s0 = inlined_call_operand.vmem [shape: f32[128,128], index: 0, kind: input, shape index: {}]   ;;  %s1060_s1 = inlined_call_operand.vmem [shape: f32[128,16], index: 1, kind: input, shape index: {}]   ;;  %s1061_s2 = inlined_call_operand.vmem [shape: f32[1,16], index: 2, kind: input, shape index: {}]   ;;  %s1062_s3 = inlined_call_operand.vmem [shape: f32[1,128], index: 3, kind: input, shape index: {}]   ;;  %s1063_s4 = inlined_call_operand.vmem [shape: f32[1,128], index: 4, kind: input, shape index: {}]   ;;  %s1064_s5 = inlined_call_operand.<no memory space> [shape: f32[1,1], index: 5, kind: input, shape index: {}]   ;;  %s1065_s6 = inlined_call_operand.vmem [shape: f32[128,16], index: 6, kind: output, shape index: {0}]   ;;  %s1066_s7 = inlined_call_operand.vmem [shape: f32[2,2,16], index: 7, kind: output, shape index: {1}]  }
   0x1   :  { %v13_v0 = vstv %s1064_s5 }
   0x2   :  { %14 = vst [vmem:[#allocation2] sm:$0x1] %v13_v0 }
   0x3 LB: > { %s904_s3 = sadd.s32 4294967295, %s851_s26   ;;  %p695_p0 = scmp.ge.s32.totalorder %s851_s26, 1  ;;  %s851_s26 = sphi %s898_s26, %s20_s26  }
   0x4   : > { %p243_p1 = scmp.lt.s32.totalorder %s851_s26, 3 }
   0x6   : > { %p244_p2 = pnand %p695_p0, %p243_p1 }
   0x7   : > { %v337_v2 = vld [vmem:[%s1060_s1] sm:$0xff] (!%p244_p2)  ;;  %v338_v3 = vld [vmem:[%s1060_s1 + $0x8] sm:$0xff] (!%p244_p2)  ;;  %v853_v4 = vmov (!%p244_p2), 0   ;;  %v339_v6 = vld [vmem:[%s1060_s1 + $0x10] sm:$0xff] (!%p244_p2)  ;;  %s703_s22 = sshll.u32 (!%p244_p2), %s904_s3, 6  ;;  %s696_s13 = sshll.u32 (!%p244_p2), %s904_s3, 3  ;;  %v474_v54 = vlaneseq (!%p244_p2) }
   0x8   : > { %247 = sbr.rel (%p244_p2) target bundleno = 425 (0x1a9), region = 44  ;;  %842 = vset.pattern.permute.xlu0 (!%p244_p2), %v853_v4  ;;  %v782_v5 = vpack.c.bf16 (!%p244_p2), %v338_v3, %v337_v2  ;;  %v340_v7 = vld [vmem:[%s1060_s1 + $0x18] sm:$0xff] (!%p244_p2)  ;;  %v341_v9 = vld [vmem:[%s1060_s1 + $0x20] sm:$0xff] (!%p244_p2)  ;;  %v342_v10 = vld [vmem:[%s1060_s1 + $0x28] sm:$0xff] (!%p244_p2)  ;;  %s517_s23 = ssub.s32 (!%p244_p2), 128, %s703_s22  ;;  %v484_v58 = vstv (!%p244_p2), %s703_s22  ;;  %vm465_vm12 = vcmask (!%p244_p2), 130048  }
   0x9   : > { %v701_v1 = vld [vmem:[#allocation2] ss:$0 sm:$0xff] (!%p244_p2)  ;;  %v786_v8 = vpack.c.bf16 (!%p244_p2), %v340_v7, %v339_v6  ;;  %v790_v11 = vpack.c.bf16 (!%p244_p2), %v342_v10, %v341_v9  ;;  %v343_v12 = vld [vmem:[%s1060_s1 + $0x30] sm:$0xff] (!%p244_p2)  ;;  %v344_v13 = vld [vmem:[%s1060_s1 + $0x38] sm:$0xff] (!%p244_p2)  ;;  %p518_p3 = scmp.lt.s32.totalorder (!%p244_p2), %s517_s23, 64  ;;  %p280_p4 = scmp.lt.s32.totalorder (!%p244_p2), %s696_s13, 15 }
   0xa   : > { %318 = vperm.xlu0 (!%p244_p2), %842, %v701_v1   ;;  %783 = vmatprep.subr.bf16.mxu0 (!%p244_p2), %v782_v5  ;;  %v794_v14 = vpack.c.bf16 (!%p244_p2), %v344_v13, %v343_v12  ;;  %v345_v15 = vld [vmem:[%s1060_s1 + $0x40] sm:$0xff] (!%p244_p2)  ;;  %v346_v16 = vld [vmem:[%s1060_s1 + $0x48] sm:$0xff] (!%p244_p2)  ;;  %v347_v18 = vld [vmem:[%s1060_s1 + $0x50] sm:$0xff] (!%p244_p2)  ;;  %v475_v55 = vshrl.u32 (!%p244_p2), %v474_v54, 7  ;;  %v854_v9 = vmov (!%p244_p2), 0.0   ;;  %p291_p5 = scmp.lt.s32.totalorder (!%p244_p2), %s904_s3, 1 }
   0xb   : > { %814 = vmatprep.subr.bf16.mxu1 (!%p244_p2), %v782_v5  ;;  %785 = vmatpush3.bf16.msra.mxu0 (!%p244_p2), %v782_v5  ;;  %v798_v17 = vpack.c.bf16 (!%p244_p2), %v346_v16, %v345_v15  ;;  %v348_v19 = vld [vmem:[%s1060_s1 + $0x58] sm:$0xff] (!%p244_p2)  ;;  %v349_v21 = vld [vmem:[%s1060_s1 + $0x60] sm:$0xff] (!%p244_p2)  ;;  %v350_v22 = vld [vmem:[%s1060_s1 + $0x68] sm:$0xff] (!%p244_p2) }
   0xc   : > { %822 = vmatpush3.bf16.msra.mxu1 (!%p244_p2), %v782_v5  ;;  %787 = vmatprep.subr.bf16.mxu0 (!%p244_p2), %v786_v8  ;;  %v802_v20 = vpack.c.bf16 (!%p244_p2), %v348_v19, %v347_v18  ;;  %v806_v24 = vpack.c.bf16 (!%p244_p2), %v350_v22, %v349_v21  ;;  %v351_v25 = vld [vmem:[%s1060_s1 + $0x70] sm:$0xff] (!%p244_p2)  ;;  %v352_v26 = vld [vmem:[%s1060_s1 + $0x78] sm:$0xff] (!%p244_p2)  ;;  %v476_v56 = vadd.s32 (!%p244_p2), 8, %v475_v55  ;;  %v480_v57 = vadd.s32 (!%p244_p2), 40, %v475_v55  ;;  %v702_v7 = vld [vmem:[%s1061_s2] ss:$0 sm:$0xff] (!%p244_p2) }
   0xd   : > { %815 = vmatprep.subr.bf16.mxu1 (!%p244_p2), %v786_v8  ;;  %v810_v27 = vpack.c.bf16 (!%p244_p2), %v352_v26, %v351_v25  ;;  %v479_v59 = vadd.s32 (!%p244_p2), 32, %v475_v55  ;;  %v478_v62 = vadd.s32 (!%p244_p2), 24, %v475_v55  ;;  %v485_v63 = vadd.s32 (!%p244_p2), %v484_v58, %v475_v55 }
   0xe   : > { %v486_v60 = vadd.s32 (!%p244_p2), %v484_v58, %v476_v56  ;;  %v490_v61 = vadd.s32 (!%p244_p2), %v484_v58, %v480_v57  ;;  %v482_v1 = vadd.s32 (!%p244_p2), 56, %v475_v55  ;;  %v477_v2 = vadd.s32 (!%p244_p2), 16, %v475_v55 }
   0xf   : > { %789 = vmatpush3.bf16.msra.mxu0 %v786_v8  ;;  %s1068_s23 = smov (!%p518_p3, %s517_s23), 64  ;;  %s1070_s13 = smov (!%p280_p4, %s696_s13), 15  ;;  %v489_v0 = vadd.s32 %v484_v58, %v479_v59  ;;  %v481_v3 = vadd.s32 48, %v475_v55  ;;  %v488_v4 = vadd.s32 %v484_v58, %v478_v62  ;;  %vm493_vm10 = vcmp.lt.s32.totalorder %v485_v63, 128 }
  0x10   : > { %823 = vmatpush3.bf16.msra.mxu1 %v786_v8  ;;  %791 = vmatprep.subr.bf16.mxu0 %v790_v11  ;;  %s520_s27 = scvt.s32.f32 %s1068_s23  ;;  %s697_s14 = sshll.u32 %s1070_s13, 3  ;;  %vm494_vm8 = vcmp.lt.s32.totalorder %v486_v60, 128  ;;  %vm498_vm9 = vcmp.lt.s32.totalorder %v490_v61, 128  ;;  %v492_v5 = vadd.s32 %v484_v58, %v482_v1  ;;  %v487_v6 = vadd.s32 %v484_v58, %v477_v2 }
  0x11   : > { %816 = vmatprep.subr.bf16.mxu1 %v790_v11  ;;  %s283_s17 = scalar_lea.vmem %s1059_s0, %s697_s14  ;;  %vm497_vm11 = vcmp.lt.s32.totalorder %v489_v0, 128  ;;  %v491_v8 = vadd.s32 %v484_v58, %v481_v3  ;;  %v973_v10 = vsel %vm494_vm8, 1.0, %v854_v9  ;;  %s980_s22 = scalar_lea.vmem %s1065_s6, %s697_s14  ;;  %v982_v13 = vsel %vm498_vm9, 1.0, %v854_v9 }
  0x12   : > { %v550_v23 = vstv %s520_s27  ;;  %v295_v29 = vld [vmem:[%s283_s17] sm:$0xff]  ;;  %v296_v31 = vld [vmem:[%s283_s17 + $0x8] sm:$0xff]  ;;  %v297_v33 = vld [vmem:[%s283_s17 + $0x10] sm:$0xff]  ;;  %v986_v15 = vsel %vm497_vm11, 1.0, %v854_v9  ;;  %vm496_vm13 = vcmp.lt.s32.totalorder %v488_v4, 128  ;;  %vm500_vm14 = vcmp.lt.s32.totalorder %v492_v5, 128 }
  0x13   : > { %793 = vmatpush3.bf16.msra.mxu0 %v790_v11  ;;  %843 = vrcp.f32 %v550_v23  ;;  %v299_v30 = vld [vmem:[%s283_s17 + $0x20] sm:$0xff]  ;;  %v300_v32 = vld [vmem:[%s283_s17 + $0x28] sm:$0xff]  ;;  %v301_v34 = vld [vmem:[%s283_s17 + $0x30] sm:$0xff]  ;;  %vm303_vm0 = vcmp.ge.f32.partialorder %v295_v29, 0.0  ;;  %vm304_vm2 = vcmp.ge.f32.partialorder %v296_v31, 0.0  ;;  %vm305_vm4 = vcmp.ge.f32.partialorder %v297_v33, 0.0 }
  0x14   : > { %824 = vmatpush3.bf16.msra.mxu1 %v790_v11  ;;  %795 = vmatprep.subr.bf16.mxu0 %v794_v14  ;;  %vm307_vm1 = vcmp.ge.f32.partialorder %v299_v30, 0.0  ;;  %vm308_vm3 = vcmp.ge.f32.partialorder %v300_v32, 0.0  ;;  %v298_v40 = vld [vmem:[%s283_s17 + $0x18] sm:$0xff]  ;;  %vm309_vm5 = vcmp.ge.f32.partialorder %v301_v34, 0.0  ;;  %vm495_vm15 = vcmp.lt.s32.totalorder %v487_v6, 128  ;;  %s1072_s3 = smov (!%p291_p5, %s904_s3), 1 }
  0x15   : > { %817 = vmatprep.subr.bf16.mxu1 %v794_v14  ;;  %v302_v41 = vld [vmem:[%s283_s17 + $0x38] sm:$0xff]  ;;  %vm306_vm6 = vcmp.ge.f32.partialorder %v298_v40, 0.0  ;;  %s700_s24 = sshll.u32 %s1072_s3, 1 }
  0x16   : > { %vm310_vm7 = vcmp.ge.f32.partialorder %v302_v41, 0.0  ;;  %s294_s5 = scalar_lea.vmem %s1066_s7, %s700_s24 }
  0x17   : > { %797 = vmatpush3.bf16.msra.mxu0 %v794_v14 }
  0x18   : > { %825 = vmatpush3.bf16.msra.mxu1 %v794_v14  ;;  %799 = vmatprep.subr.bf16.mxu0 %v798_v17  ;;  %v984_v14 = vsel %vm493_vm10, 1.0, %v854_v9 }
  0x19   : > { %818 = vmatprep.subr.bf16.mxu1 %v798_v17 }
  0x1b   : > { %801 = vmatpush3.bf16.msra.mxu0 %v798_v17 }
  0x1c   : > { %826 = vmatpush3.bf16.msra.mxu1 %v798_v17  ;;  %803 = vmatprep.subr.bf16.mxu0 %v802_v20 }
  0x1d   : > { %819 = vmatprep.subr.bf16.mxu1 %v802_v20  ;;  %v844_v28 = vpop.eup %843 }
  0x1e   : > { %830 = vpush %v844_v28 }
  0x1f   : > { %805 = vmatpush3.bf16.msra.mxu0 %v802_v20 }
  0x20   : > { %827 = vmatpush3.bf16.msra.mxu1 %v802_v20  ;;  %807 = vmatprep.subr.bf16.mxu0 %v806_v24 }
  0x21   : > { %820 = vmatprep.subr.bf16.mxu1 %v806_v24 }
  0x23   : > { %809 = vmatpush3.bf16.msra.mxu0 %v806_v24 }
  0x24   : > { %828 = vmatpush3.bf16.msra.mxu1 %v806_v24  ;;  %811 = vmatprep.subr.bf16.mxu0 %v810_v27  ;;  %v707_v24 = vsel %vm496_vm13, 1.0, %v854_v9 }
  0x25   : > { %821 = vmatprep.subr.bf16.mxu1 %v810_v27 }
  0x27   : > { %813 = vmatpush3.bf16.msra.mxu0 %v810_v27 }
  0x28   : > { %829 = vmatpush3.bf16.msra.mxu1 %v810_v27 }
  0x4f   : > { %s831_s23 = spop %830 }
  0x50   : > { %v553_v62 = vstv %s831_s23 }
  0x89   : > { %v319_v35 = vpop.permute.xlu0 %318 }
  0x8a   : > { %v321_v36 = vmul.f32 %v319_v35, %v295_v29  ;;  %v325_v37 = vmul.f32 %v319_v35, %v299_v30  ;;  %v322_v38 = vmul.f32 %v319_v35, %v296_v31  ;;  %v326_v39 = vmul.f32 %v319_v35, %v300_v32 }
  0x8b   : > { %v323_v42 = vmul.f32 %v319_v35, %v297_v33  ;;  %v327_v43 = vmul.f32 %v319_v35, %v301_v34  ;;  %v324_v48 = vmul.f32 %v319_v35, %v298_v40  ;;  %v328_v49 = vmul.f32 %v319_v35, %v302_v41 }
  0x8c   : > { %v329_v44 = vsel %vm303_vm0, %v295_v29, %v321_v36  ;;  %v333_v45 = vsel %vm307_vm1, %v299_v30, %v325_v37  ;;  %v330_v46 = vsel %vm304_vm2, %v296_v31, %v322_v38  ;;  %v334_v47 = vsel %vm308_vm3, %v300_v32, %v326_v39 }
  0x8d   : > { %770 = vmatprep.mubr.f32.mxu0 %v329_v44  ;;  %776 = vmatprep.mubr.f32.mxu1 %v333_v45  ;;  %v331_v50 = vsel %vm305_vm4, %v297_v33, %v323_v42  ;;  %v335_v51 = vsel %vm309_vm5, %v301_v34, %v327_v43  ;;  %v332_v52 = vsel %vm306_vm6, %v298_v40, %v324_v48  ;;  %vm499_vm0 = vcmp.lt.s32.totalorder %v491_v8, 128 }
  0x8e   : > { %771 = vmatmul.mubr.f32.vlgmr.msra.gmra.mrb[0].mxu0 %v330_v46  ;;  %777 = vmatmul.mubr.f32.vlgmr.msra.gmra.mrb[0].mxu1 %v334_v47  ;;  %v336_v53 = vsel %vm310_vm7, %v302_v41, %v328_v49  ;;  %v711_v29 = vsel %vm500_vm14, 1.0, %v854_v9  ;;  %v706_v30 = vsel %vm495_vm15, 1.0, %v854_v9  ;;  %v710_v36 = vsel %vm499_vm0, 1.0, %v854_v9 }
  0x8f   : > { %773 = vmatprep.mubr.f32.mxu0 %v331_v50  ;;  %779 = vmatprep.mubr.f32.mxu1 %v335_v51  ;;  %vm600_vm1 = vcmask 1040384   ;;  %vm602_vm2 = vcmask 123904  }
  0x92   : > { %774 = vmatmul.mubr.f32.gmra.mrb[2].mxu0 %v332_v52  ;;  %780 = vmatmul.mubr.f32.gmra.mrb[2].mxu1 %v336_v53 }
 0x161   : > { %v772_v11 = vpop.f32.mrb[0].mxu0  ;;  %v778_v12 = vpop.f32.mrb[0].mxu1 }
 0x162   : > { %v988_v16 = vadd.f32 %v772_v11, %v702_v7  ;;  %v990_v17 = vadd.f32 %v778_v12, %v702_v7  ;;  %v426_v18 = vpop.f32.mrb[1].mxu0  ;;  %v446_v19 = vpop.f32.mrb[1].mxu1 }
 0x163   : > { %v992_v20 = vadd.f32 %v702_v7, %v426_v18  ;;  %v994_v21 = vadd.f32 %v702_v7, %v446_v19 }
 0x164   : > { %467 = vst.msk [vmem:[%s980_s22 + $0x8] sm:$0xff] %vm465_vm12, %v988_v16  ;;  %v522_v22 = vmul.f32 %v973_v10, %v988_v16  ;;  %471 = vst.msk [vmem:[%s980_s22 + $0x28] sm:$0xff] %vm465_vm12, %v990_v17  ;;  %v526_v23 = vmul.f32 %v982_v13, %v990_v17 }
 0x165   : > { %466 = vst.msk [vmem:[%s980_s22] sm:$0xff] %vm465_vm12, %v992_v20  ;;  %v521_v25 = vmul.f32 %v984_v14, %v992_v20  ;;  %470 = vst.msk [vmem:[%s980_s22 + $0x20] sm:$0xff] %vm465_vm12, %v994_v21  ;;  %v525_v26 = vmul.f32 %v986_v15, %v994_v21  ;;  %v775_v27 = vpop.f32.mrb[2].mxu0  ;;  %v781_v28 = vpop.f32.mrb[2].mxu1 }
 0x166   : > { %v530_v31 = vsel %vm465_vm12, %v522_v22, 0.0  ;;  %v442_v32 = vadd.f32 %v775_v27, %v702_v7  ;;  %v462_v33 = vadd.f32 %v781_v28, %v702_v7  ;;  %v436_v34 = vpop.f32.mrb[3].mxu0  ;;  %v456_v35 = vpop.f32.mrb[3].mxu1  ;;  %v538_v51 = vsel %vm465_vm12, %v526_v23, 0.0 }
 0x167   : > { %v529_v37 = vsel %vm465_vm12, %v521_v25, 0.0  ;;  %v437_v38 = vadd.f32 %v702_v7, %v436_v34  ;;  %v457_v39 = vadd.f32 %v702_v7, %v456_v35  ;;  %v536_v49 = vsel %vm465_vm12, %v525_v26, 0.0 }
 0x168   : > { %v531_v40 = vadd.f32 %v530_v31, %v529_v37  ;;  %469 = vst.msk [vmem:[%s980_s22 + $0x18] sm:$0xff] %vm465_vm12, %v442_v32  ;;  %v524_v41 = vmul.f32 %v707_v24, %v442_v32  ;;  %473 = vst.msk [vmem:[%s980_s22 + $0x38] sm:$0xff] %vm465_vm12, %v462_v33  ;;  %v528_v42 = vmul.f32 %v711_v29, %v462_v33 }
 0x169   : > { %468 = vst.msk [vmem:[%s980_s22 + $0x10] sm:$0xff] %vm465_vm12, %v437_v38  ;;  %v523_v43 = vmul.f32 %v706_v30, %v437_v38  ;;  %472 = vst.msk [vmem:[%s980_s22 + $0x30] sm:$0xff] %vm465_vm12, %v457_v39  ;;  %v527_v44 = vmul.f32 %v710_v36, %v457_v39 }
 0x16a   : > { %v534_v47 = vsel %vm465_vm12, %v524_v41, 0.0  ;;  %v542_v55 = vsel %vm465_vm12, %v528_v42, 0.0 }
 0x16b   : > { %v532_v45 = vsel %vm465_vm12, %v523_v43, 0.0  ;;  %v540_v53 = vsel %vm465_vm12, %v527_v44, 0.0 }
 0x16c   : > { %v533_v46 = vadd.f32 %v532_v45, %v531_v40 }
 0x16e   : > { %v535_v48 = vadd.f32 %v534_v47, %v533_v46 }
 0x170   : > { %v537_v50 = vadd.f32 %v536_v49, %v535_v48 }
 0x172   : > { %v539_v52 = vadd.f32 %v538_v51, %v537_v50 }
 0x174   : > { %v541_v54 = vadd.f32 %v540_v53, %v539_v52 }
 0x176   : > { %v543_v56 = vadd.f32 %v542_v55, %v541_v54 }
 0x178   : > { %v544_v57 = vrot.slane %v543_v56, 4 }
 0x17a   : > { %v545_v58 = vadd.f32 %v544_v57, %v543_v56 }
 0x17c   : > { %v546_v59 = vrot.slane %v545_v58, 2 }
 0x17e   : > { %v547_v60 = vadd.f32 %v546_v59, %v545_v58 }
 0x180   : > { %v548_v61 = vrot.slane %v547_v60, 1 }
 0x182   : > { %v549_v63 = vadd.f32 %v548_v61, %v547_v60 }
 0x184   : > { %v554_v0 = vmul.f32 %v553_v62, %v549_v63 }
 0x186   : > { %v555_v1 = vsub.f32 %v992_v20, %v554_v0  ;;  %v556_v2 = vsub.f32 %v988_v16, %v554_v0  ;;  %v557_v3 = vsub.f32 %v437_v38, %v554_v0  ;;  %v558_v4 = vsub.f32 %v442_v32, %v554_v0 }
 0x187   : > { %v559_v5 = vsub.f32 %v994_v21, %v554_v0  ;;  %v560_v6 = vsub.f32 %v990_v17, %v554_v0  ;;  %v561_v7 = vsub.f32 %v457_v39, %v554_v0  ;;  %v562_v8 = vsub.f32 %v462_v33, %v554_v0 }
 0x188   : > { %v563_v9 = vmul.f32 %v984_v14, %v555_v1  ;;  %v564_v11 = vmul.f32 %v973_v10, %v556_v2  ;;  %v565_v12 = vmul.f32 %v706_v30, %v557_v3  ;;  %v566_v18 = vmul.f32 %v707_v24, %v558_v4 }
 0x189   : > { %v567_v19 = vmul.f32 %v986_v15, %v559_v5  ;;  %v568_v20 = vmul.f32 %v982_v13, %v560_v6  ;;  %v569_v22 = vmul.f32 %v710_v36, %v561_v7  ;;  %v570_v16 = vmul.f32 %v711_v29, %v562_v8 }
 0x18a   : > { %v571_v23 = vmul.f32 %v563_v9, %v563_v9  ;;  %v572_v25 = vmul.f32 %v564_v11, %v564_v11  ;;  %v573_v26 = vmul.f32 %v565_v12, %v565_v12  ;;  %v574_v21 = vmul.f32 %v566_v18, %v566_v18 }
 0x18b   : > { %v575_v14 = vmul.f32 %v567_v19, %v567_v19  ;;  %v576_v30 = vmul.f32 %v568_v20, %v568_v20  ;;  %v577_v29 = vmul.f32 %v569_v22, %v569_v22  ;;  %v578_v33 = vmul.f32 %v570_v16, %v570_v16 }
 0x18c   : > { %v579_v17 = vsel %vm465_vm12, %v571_v23, 0.0  ;;  %v580_v27 = vsel %vm465_vm12, %v572_v25, 0.0  ;;  %v582_v10 = vsel %vm465_vm12, %v573_v26, 0.0  ;;  %v584_v13 = vsel %vm465_vm12, %v574_v21, 0.0 }
 0x18d   : > { %v581_v28 = vadd.f32 %v580_v27, %v579_v17  ;;  %v586_v31 = vsel %vm465_vm12, %v575_v14, 0.0  ;;  %v588_v34 = vsel %vm465_vm12, %v576_v30, 0.0  ;;  %v590_v36 = vsel %vm465_vm12, %v577_v29, 0.0 }
 0x18e   : > { %v592_v38 = vsel %vm465_vm12, %v578_v33, 0.0 }
 0x18f   : > { %v583_v24 = vadd.f32 %v582_v10, %v581_v28 }
 0x191   : > { %v585_v15 = vadd.f32 %v584_v13, %v583_v24 }
 0x193   : > { %v587_v32 = vadd.f32 %v586_v31, %v585_v15 }
 0x195   : > { %v589_v35 = vadd.f32 %v588_v34, %v587_v32 }
 0x197   : > { %v591_v37 = vadd.f32 %v590_v36, %v589_v35 }
 0x199   : > { %v593_v39 = vadd.f32 %v592_v38, %v591_v37 }
 0x19b   : > { %v594_v40 = vrot.slane %v593_v39, 4 }
 0x19d   : > { %v595_v41 = vadd.f32 %v594_v40, %v593_v39 }
 0x19f   : > { %v596_v42 = vrot.slane %v595_v41, 2 }
 0x1a1   : > { %v597_v43 = vadd.f32 %v596_v42, %v595_v41 }
 0x1a3   : > { %v598_v44 = vrot.slane %v597_v43, 1 }
 0x1a5   : > { %v599_v45 = vadd.f32 %v598_v44, %v597_v43 }
 0x1a7   : > { %v601_v46 = vsel %vm600_vm1, %v549_v63, %v599_v45 }
 0x1a8   : > { %603 = vst.msk [vmem:[%s294_s5] sm:$0x3] %vm602_vm2, %v601_v46 }
 0x1a9 PF: > { %s20_s26 = sadd.s32 1, %s851_s26  }
 0x1aa   : > { %p17_p6 = scmp.ge.s32.totalorder %s20_s26, 4  }
 0x1ac   :  { %19 = sbr.rel (!%p17_p6) target bundleno = 3 (0x3), region = 86 }

// kernel: _lambda_.17
= control target key start
LH: loop header
LB: loop body
LE: loop exit
PB: predicated region body
PF: predicated region fallthrough
CT: control target
= control target key end

     0   :  { %s785_s26 = smov 0   ;;  %s930_s0 = inlined_call_operand.vmem [shape: f32[32,256], index: 0, kind: input, shape index: {}]   ;;  %s931_s1 = inlined_call_operand.vmem [shape: f32[256,32], index: 1, kind: input, shape index: {}]   ;;  %s932_s2 = inlined_call_operand.vmem [shape: f32[1,32], index: 2, kind: input, shape index: {}]   ;;  %s933_s3 = inlined_call_operand.vmem [shape: f32[1,256], index: 3, kind: input, shape index: {}]   ;;  %s934_s4 = inlined_call_operand.vmem [shape: f32[1,256], index: 4, kind: input, shape index: {}]   ;;  %s935_s5 = inlined_call_operand.<no memory space> [shape: f32[1,1], index: 5, kind: input, shape index: {}]   ;;  %s936_s6 = inlined_call_operand.vmem [shape: f32[32,32], index: 6, kind: output, shape index: {0}]   ;;  %s937_s7 = inlined_call_operand.vmem [shape: f32[2,2,32], index: 7, kind: output, shape index: {1}]  }
   0x1   :  { %v13_v0 = vstv %s935_s5 }
   0x2   :  { %14 = vst [vmem:[#allocation2] sm:$0x1] %v13_v0 }
   0x3 LB: > { %s791_s27 = sadd.s32 4294967295, %s738_s26   ;;  %p616_p0 = scmp.ge.s32.totalorder %s738_s26, 1  ;;  %s738_s26 = sphi %s785_s26, %s20_s26  }
   0x4   : > { %p244_p1 = scmp.lt.s32.totalorder %s738_s26, 3 }
   0x6   : > { %p245_p2 = pnand %p616_p0, %p244_p1 }
   0x7   : > { %v372_v2 = vld [vmem:[%s931_s1 + $0x80] sm:$0xff] (!%p245_p2)  ;;  %v373_v3 = vld [vmem:[%s931_s1 + $0x88] sm:$0xff] (!%p245_p2)  ;;  %v740_v4 = vmov (!%p245_p2), 0   ;;  %v374_v8 = vld [vmem:[%s931_s1 + $0x90] sm:$0xff] (!%p245_p2)  ;;  %s625_s10 = sshll.u32 (!%p245_p2), %s791_s27, 4  ;;  %s617_s29 = sshll.u32 (!%p245_p2), %s791_s27, 1  ;;  %v304_v53 = vlaneseq (!%p245_p2) }
   0x8   : > { %248 = sbr.rel (%p245_p2) target bundleno = 401 (0x191), region = 44  ;;  %729 = vset.pattern.permute.xlu0 (!%p245_p2), %v740_v4  ;;  %v669_v5 = vpack.c.bf16 (!%p245_p2), %v373_v3, %v372_v2  ;;  %v356_v6 = vld [vmem:[%s931_s1] sm:$0xff] (!%p245_p2)  ;;  %v357_v7 = vld [vmem:[%s931_s1 + $0x8] sm:$0xff] (!%p245_p2)  ;;  %v375_v10 = vld [vmem:[%s931_s1 + $0x98] sm:$0xff] (!%p245_p2)  ;;  %s486_s11 = ssub.s32 (!%p245_p2), 32, %s625_s10  ;;  %vm470_vm6 = vcmask (!%p245_p2), 261120  }
   0x9   : > { %v623_v1 = vld [vmem:[#allocation2] ss:$0 sm:$0xff] (!%p245_p2)  ;;  %v671_v9 = vpack.c.bf16 (!%p245_p2), %v357_v7, %v356_v6  ;;  %v358_v11 = vld [vmem:[%s931_s1 + $0x10] sm:$0xff] (!%p245_p2)  ;;  %v359_v12 = vld [vmem:[%s931_s1 + $0x18] sm:$0xff] (!%p245_p2)  ;;  %v673_v13 = vpack.c.bf16 (!%p245_p2), %v375_v10, %v374_v8  ;;  %p487_p3 = scmp.lt.s32.totalorder (!%p245_p2), %s486_s11, 16  ;;  %p282_p4 = scmp.lt.s32.totalorder (!%p245_p2), %s617_s29, 3 }
   0xa   : > { %345 = vperm.xlu0 (!%p245_p2), %729, %v623_v1   ;;  %670 = vmatprep.subr.bf16.mxu0 (!%p245_p2), %v669_v5  ;;  %v376_v14 = vld [vmem:[%s931_s1 + $0xa0] sm:$0xff] (!%p245_p2)  ;;  %v377_v15 = vld [vmem:[%s931_s1 + $0xa8] sm:$0xff] (!%p245_p2)  ;;  %v675_v16 = vpack.c.bf16 (!%p245_p2), %v359_v12, %v358_v11  ;;  %v378_v20 = vld [vmem:[%s931_s1 + $0xb0] sm:$0xff] (!%p245_p2)  ;;  %v305_v54 = vshrl.u32 (!%p245_p2), %v304_v53, 7  ;;  %p294_p5 = scmp.lt.s32.totalorder (!%p245_p2), %s791_s27, 1  ;;  %vm521_vm7 = vcmask (!%p245_p2), 1040384  }
   0xb   : > { %701 = vmatprep.subr.bf16.mxu1 (!%p245_p2), %v669_v5  ;;  %672 = vmatpush3.bf16.msra.mxu0 (!%p245_p2), %v671_v9  ;;  %v677_v17 = vpack.c.bf16 (!%p245_p2), %v377_v15, %v376_v14  ;;  %v360_v18 = vld [vmem:[%s931_s1 + $0x20] sm:$0xff] (!%p245_p2)  ;;  %v361_v19 = vld [vmem:[%s931_s1 + $0x28] sm:$0xff] (!%p245_p2)  ;;  %v379_v21 = vld [vmem:[%s931_s1 + $0xb8] sm:$0xff] (!%p245_p2)  ;;  %vm523_vm8 = vcmask (!%p245_p2), 254976  }
   0xc   : > { %709 = vmatpush3.bf16.msra.mxu1 (!%p245_p2), %v671_v9  ;;  %674 = vmatprep.subr.bf16.mxu0 (!%p245_p2), %v673_v13  ;;  %v679_v22 = vpack.c.bf16 (!%p245_p2), %v361_v19, %v360_v18  ;;  %v681_v23 = vpack.c.bf16 (!%p245_p2), %v379_v21, %v378_v20  ;;  %v362_v24 = vld [vmem:[%s931_s1 + $0x30] sm:$0xff] (!%p245_p2)  ;;  %v363_v25 = vld [vmem:[%s931_s1 + $0x38] sm:$0xff] (!%p245_p2)  ;;  %v380_v26 = vld [vmem:[%s931_s1 + $0xc0] sm:$0xff] (!%p245_p2)  ;;  %v306_v55 = vsub.s32 (!%p245_p2), 0, %v305_v54  ;;  %v310_v56 = vsub.s32 (!%p245_p2), 1, %v305_v54 }
   0xd   : > { %702 = vmatprep.subr.bf16.mxu1 (!%p245_p2), %v673_v13  ;;  %v381_v27 = vld [vmem:[%s931_s1 + $0xc8] sm:$0xff] (!%p245_p2)  ;;  %v683_v28 = vpack.c.bf16 (!%p245_p2), %v363_v25, %v362_v24  ;;  %v364_v30 = vld [vmem:[%s931_s1 + $0x40] sm:$0xff] (!%p245_p2)  ;;  %v382_v32 = vld [vmem:[%s931_s1 + $0xd0] sm:$0xff] (!%p245_p2)  ;;  %v475_v20 = vadd.s32 (!%p245_p2), 8, %v305_v54  ;;  %v477_v21 = vstv (!%p245_p2), %s625_s10 }
   0xe   : > { %v685_v29 = vpack.c.bf16 (!%p245_p2), %v381_v27, %v380_v26  ;;  %v365_v31 = vld [vmem:[%s931_s1 + $0x48] sm:$0xff] (!%p245_p2)  ;;  %v383_v33 = vld [vmem:[%s931_s1 + $0xd8] sm:$0xff] (!%p245_p2)  ;;  %v366_v37 = vld [vmem:[%s931_s1 + $0x50] sm:$0xff] (!%p245_p2) }
   0xf   : > { %676 = vmatpush3.bf16.msra.mxu0 %v675_v16  ;;  %s939_s11 = smov (!%p487_p3, %s486_s11), 16  ;;  %v687_v35 = vpack.c.bf16 %v365_v31, %v364_v30  ;;  %v689_v36 = vpack.c.bf16 %v383_v33, %v382_v32  ;;  %v367_v38 = vld [vmem:[%s931_s1 + $0x58] sm:$0xff]  ;;  %v384_v39 = vld [vmem:[%s931_s1 + $0xe0] sm:$0xff]  ;;  %v385_v40 = vld [vmem:[%s931_s1 + $0xe8] sm:$0xff]  ;;  %s941_s29 = smov (!%p282_p4, %s617_s29), 3  ;;  %v741_v31 = vmov 0.0  }
  0x10   : > { %710 = vmatpush3.bf16.msra.mxu1 %v675_v16  ;;  %678 = vmatprep.subr.bf16.mxu0 %v677_v17  ;;  %s489_s20 = scvt.s32.f32 %s939_s11  ;;  %v691_v41 = vpack.c.bf16 %v367_v38, %v366_v37  ;;  %v693_v42 = vpack.c.bf16 %v385_v40, %v384_v39  ;;  %v368_v43 = vld [vmem:[%s931_s1 + $0x60] sm:$0xff]  ;;  %v369_v44 = vld [vmem:[%s931_s1 + $0x68] sm:$0xff]  ;;  %v386_v45 = vld [vmem:[%s931_s1 + $0xf0] sm:$0xff]  ;;  %s630_s30 = sshll.u32 %s941_s29, 4 }
  0x11   : > { %703 = vmatprep.subr.bf16.mxu1 %v677_v17  ;;  %v387_v46 = vld [vmem:[%s931_s1 + $0xf8] sm:$0xff]  ;;  %v695_v47 = vpack.c.bf16 %v369_v44, %v368_v43  ;;  %v370_v49 = vld [vmem:[%s931_s1 + $0x70] sm:$0xff]  ;;  %s286_s11 = scalar_lea.vmem %s930_s0, %s630_s30  ;;  %v302_v57 = vld [vmem:[%s933_s3] sm:$0x3]  ;;  %s621_s16 = sshll.u32 %s941_s29, 3 }
  0x12   : > { %v501_v34 = vstv %s489_s20  ;;  %v697_v48 = vpack.c.bf16 %v387_v46, %v386_v45  ;;  %v371_v50 = vld [vmem:[%s931_s1 + $0x78] sm:$0xff]  ;;  %v298_v58 = vld [vmem:[%s286_s11] sm:$0xff]  ;;  %v307_v59 = vrot.slane %v302_v57, %v306_v55  ;;  %v311_v60 = vrot.slane %v302_v57, %v310_v56  ;;  %v299_v62 = vld [vmem:[%s286_s11 + $0x8] sm:$0xff]  ;;  %s292_s21 = scalar_lea.vmem %s936_s6, %s621_s16  ;;  %s943_s27 = smov (!%p294_p5, %s791_s27), 1 }
  0x13   : > { %680 = vmatpush3.bf16.msra.mxu0 %v679_v22  ;;  %730 = vrcp.f32 %v501_v34  ;;  %v699_v52 = vpack.c.bf16 %v371_v50, %v370_v49  ;;  %v318_v61 = vld [vmem:[%s934_s4] sm:$0x3]  ;;  %v300_v63 = vld [vmem:[%s286_s11 + $0x10] sm:$0xff]  ;;  %v301_v0 = vld [vmem:[%s286_s11 + $0x18] sm:$0xff]  ;;  %s622_s22 = sshll.u32 %s943_s27, 1 }
  0x14   : > { %711 = vmatpush3.bf16.msra.mxu1 %v679_v22  ;;  %682 = vmatprep.subr.bf16.mxu0 %v681_v23  ;;  %v323_v1 = vrot.slane %v318_v61, %v306_v55  ;;  %v327_v2 = vrot.slane %v318_v61, %v310_v56  ;;  %v314_v3 = vmul.f32 %v307_v59, %v298_v58  ;;  %v624_v26 = vld [vmem:[%s932_s2] ss:$0 sm:$0xff]  ;;  %s297_s25 = scalar_lea.vmem %s937_s7, %s622_s22 }
  0x15   : > { %704 = vmatprep.subr.bf16.mxu1 %v681_v23  ;;  %v315_v4 = vmul.f32 %v311_v60, %v299_v62  ;;  %v316_v5 = vmul.f32 %v307_v59, %v300_v63  ;;  %v317_v6 = vmul.f32 %v311_v60, %v301_v0  ;;  %v478_v22 = vadd.s32 %v477_v21, %v305_v54 }
  0x16   : > { %v330_v7 = vadd.f32 %v323_v1, %v314_v3  ;;  %v479_v23 = vadd.s32 %v477_v21, %v475_v20 }
  0x17   : > { %684 = vmatpush3.bf16.msra.mxu0 %v683_v28  ;;  %v331_v8 = vadd.f32 %v327_v2, %v315_v4  ;;  %v332_v9 = vadd.f32 %v323_v1, %v316_v5  ;;  %v333_v10 = vadd.f32 %v327_v2, %v317_v6  ;;  %vm480_vm4 = vcmp.lt.s32.totalorder %v478_v22, 32 }
  0x18   : > { %712 = vmatpush3.bf16.msra.mxu1 %v683_v28  ;;  %686 = vmatprep.subr.bf16.mxu0 %v685_v29  ;;  %vm334_vm2 = vcmp.ge.f32.partialorder %v330_v7, 0.0  ;;  %vm481_vm5 = vcmp.lt.s32.totalorder %v479_v23, 32  ;;  %v626_v32 = vsel %vm480_vm4, 1.0, %v741_v31 }
  0x19   : > { %705 = vmatprep.subr.bf16.mxu1 %v685_v29  ;;  %vm335_vm0 = vcmp.ge.f32.partialorder %v331_v8, 0.0  ;;  %vm337_vm1 = vcmp.ge.f32.partialorder %v333_v10, 0.0  ;;  %vm336_vm3 = vcmp.ge.f32.partialorder %v332_v9, 0.0  ;;  %v627_v33 = vsel %vm481_vm5, 1.0, %v741_v31 }
  0x1b   : > { %688 = vmatpush3.bf16.msra.mxu0 %v687_v35 }
  0x1c   : > { %713 = vmatpush3.bf16.msra.mxu1 %v687_v35  ;;  %690 = vmatprep.subr.bf16.mxu0 %v689_v36 }
  0x1d   : > { %706 = vmatprep.subr.bf16.mxu1 %v689_v36  ;;  %v731_v51 = vpop.eup %730 }
  0x1e   : > { %717 = vpush %v731_v51 }
  0x1f   : > { %692 = vmatpush3.bf16.msra.mxu0 %v691_v41 }
  0x20   : > { %714 = vmatpush3.bf16.msra.mxu1 %v691_v41  ;;  %694 = vmatprep.subr.bf16.mxu0 %v693_v42 }
  0x21   : > { %707 = vmatprep.subr.bf16.mxu1 %v693_v42 }
  0x23   : > { %696 = vmatpush3.bf16.msra.mxu0 %v695_v47 }
  0x24   : > { %715 = vmatpush3.bf16.msra.mxu1 %v695_v47  ;;  %698 = vmatprep.subr.bf16.mxu0 %v697_v48 }
  0x25   : > { %708 = vmatprep.subr.bf16.mxu1 %v697_v48 }
  0x27   : > { %700 = vmatpush3.bf16.msra.mxu0 %v699_v52 }
  0x28   : > { %716 = vmatpush3.bf16.msra.mxu1 %v699_v52 }
  0x4f   : > { %s718_s10 = spop %717 }
  0x50   : > { %v504_v46 = vstv %s718_s10 }
  0x89   : > { %v346_v11 = vpop.permute.xlu0 %345 }
  0x8a   : > { %v348_v12 = vmul.f32 %v346_v11, %v330_v7  ;;  %v349_v13 = vmul.f32 %v346_v11, %v331_v8  ;;  %v350_v14 = vmul.f32 %v346_v11, %v332_v9  ;;  %v351_v15 = vmul.f32 %v346_v11, %v333_v10 }
  0x8c   : > { %v353_v16 = vsel %vm335_vm0, %v331_v8, %v349_v13  ;;  %v355_v17 = vsel %vm337_vm1, %v333_v10, %v351_v15  ;;  %v352_v18 = vsel %vm334_vm2, %v330_v7, %v348_v12  ;;  %v354_v19 = vsel %vm336_vm3, %v332_v9, %v350_v14 }
  0x8d   : > { %459 = vmatprep.mubr.f32.mxu0 %v353_v16  ;;  %464 = vmatprep.mubr.f32.mxu1 %v355_v17 }
  0x8e   : > { %460 = vmatmul.mubr.f32.vlgmr.msra.gmra.mrb[0].mxu0 %v352_v18  ;;  %465 = vmatmul.mubr.f32.vlgmr.msra.gmra.mrb[0].mxu1 %v354_v19 }
 0x161   : > { %v663_v24 = vpop.f32.mrb[0].mxu0  ;;  %v666_v25 = vpop.f32.mrb[0].mxu1 }
 0x162   : > { %v664_v27 = vpop.f32.mrb[1].mxu0  ;;  %v667_v28 = vpop.f32.mrb[1].mxu1 }
 0x163   : > { %v665_v29 = vadd.f32 %v664_v27, %v663_v24  ;;  %v668_v30 = vadd.f32 %v667_v28, %v666_v25 }
 0x165   : > { %v462_v34 = vadd.f32 %v665_v29, %v624_v26  ;;  %v467_v35 = vadd.f32 %v668_v30, %v624_v26 }
 0x167   : > { %471 = vst.msk [vmem:[%s292_s21] sm:$0xff] %vm470_vm6, %v462_v34  ;;  %v490_v36 = vmul.f32 %v626_v32, %v462_v34  ;;  %v491_v37 = vmul.f32 %v627_v33, %v467_v35  ;;  %472 = vst.msk [vmem:[%s292_s21 + $0x8] sm:$0xff] %vm470_vm6, %v467_v35 }
 0x169   : > { %v492_v38 = vsel %vm470_vm6, %v490_v36, 0.0  ;;  %v493_v39 = vsel %vm470_vm6, %v491_v37, 0.0 }
 0x16a   : > { %v494_v40 = vadd.f32 %v493_v39, %v492_v38 }
 0x16c   : > { %v495_v41 = vrot.slane %v494_v40, 4 }
 0x16e   : > { %v496_v42 = vadd.f32 %v495_v41, %v494_v40 }
 0x170   : > { %v497_v43 = vrot.slane %v496_v42, 2 }
 0x172   : > { %v498_v44 = vadd.f32 %v497_v43, %v496_v42 }
 0x174   : > { %v499_v45 = vrot.slane %v498_v44, 1 }
 0x176   : > { %v500_v47 = vadd.f32 %v499_v45, %v498_v44 }
 0x178   : > { %v505_v48 = vmul.f32 %v504_v46, %v500_v47 }
 0x17a   : > { %v506_v49 = vsub.f32 %v462_v34, %v505_v48  ;;  %v507_v50 = vsub.f32 %v467_v35, %v505_v48 }
 0x17c   : > { %v508_v51 = vmul.f32 %v626_v32, %v506_v49  ;;  %v509_v52 = vmul.f32 %v627_v33, %v507_v50 }
 0x17e   : > { %v510_v53 = vmul.f32 %v508_v51, %v508_v51  ;;  %v511_v54 = vmul.f32 %v509_v52, %v509_v52 }
 0x180   : > { %v512_v55 = vsel %vm470_vm6, %v510_v53, 0.0  ;;  %v513_v56 = vsel %vm470_vm6, %v511_v54, 0.0 }
 0x181   : > { %v514_v57 = vadd.f32 %v513_v56, %v512_v55 }
 0x183   : > { %v515_v58 = vrot.slane %v514_v57, 4 }
 0x185   : > { %v516_v59 = vadd.f32 %v515_v58, %v514_v57 }
 0x187   : > { %v517_v60 = vrot.slane %v516_v59, 2 }
 0x189   : > { %v518_v61 = vadd.f32 %v517_v60, %v516_v59 }
 0x18b   : > { %v519_v62 = vrot.slane %v518_v61, 1 }
 0x18d   : > { %v520_v63 = vadd.f32 %v519_v62, %v518_v61 }
 0x18f   : > { %v522_v0 = vsel %vm521_vm7, %v500_v47, %v520_v63 }
 0x190   : > { %524 = vst.msk [vmem:[%s297_s25] sm:$0x3] %vm523_vm8, %v522_v0 }
 0x191 PF: > { %s20_s26 = sadd.s32 1, %s738_s26  }
 0x192   : > { %p17_p6 = scmp.ge.s32.totalorder %s20_s26, 4  }
 0x194   :  { %19 = sbr.rel (!%p17_p6) target bundleno = 3 (0x3), region = 86 }

// kernel: _lambda_.18
= control target key start
LH: loop header
LB: loop body
LE: loop exit
PB: predicated region body
PF: predicated region fallthrough
CT: control target
= control target key end

     0   :  { %s990_s26 = smov 0   ;;  %s1240_s0 = inlined_call_operand.vmem [shape: f32[32,512], index: 0, kind: input, shape index: {}]   ;;  %s1241_s1 = inlined_call_operand.vmem [shape: f32[512,64], index: 1, kind: input, shape index: {}]   ;;  %s1242_s2 = inlined_call_operand.vmem [shape: f32[1,64], index: 2, kind: input, shape index: {}]   ;;  %s1243_s3 = inlined_call_operand.vmem [shape: f32[1,512], index: 3, kind: input, shape index: {}]   ;;  %s1244_s4 = inlined_call_operand.vmem [shape: f32[1,512], index: 4, kind: input, shape index: {}]   ;;  %s1245_s5 = inlined_call_operand.<no memory space> [shape: f32[1,1], index: 5, kind: input, shape index: {}]   ;;  %s1246_s6 = inlined_call_operand.vmem [shape: f32[32,64], index: 6, kind: output, shape index: {0}]   ;;  %s1247_s7 = inlined_call_operand.vmem [shape: f32[2,2,64], index: 7, kind: output, shape index: {1}]  }
   0x1   :  { %v13_v0 = vstv %s1245_s5 }
   0x2   :  { %14 = vst [vmem:[#allocation2] sm:$0x1] %v13_v0 }
   0x3 LB: > { %s996_s27 = sadd.s32 4294967295, %s943_s26   ;;  %p767_p0 = scmp.ge.s32.totalorder %s943_s26, 1  ;;  %s943_s26 = sphi %s990_s26, %s20_s26  }
   0x4   : > { %p244_p1 = scmp.lt.s32.totalorder %s943_s26, 3 }
   0x6   : > { %p245_p2 = pnand %p767_p0, %p244_p1 }
   0x7   : > { %v416_v2 = vld [vmem:[%s1241_s1 + $0x80] sm:$0xff] (!%p245_p2)  ;;  %v417_v3 = vld [vmem:[%s1241_s1 + $0x88] sm:$0xff] (!%p245_p2)  ;;  %v945_v4 = vmov (!%p245_p2), 0   ;;  %v418_v15 = vld [vmem:[%s1241_s1 + $0x90] sm:$0xff] (!%p245_p2)  ;;  %s776_s24 = sshll.u32 (!%p245_p2), %s996_s27, 4  ;;  %s768_s29 = sshll.u32 (!%p245_p2), %s996_s27, 1 }
   0x8   : > { %248 = sbr.rel (%p245_p2) target bundleno = 407 (0x197), region = 44  ;;  %934 = vset.pattern.permute.xlu0 (!%p245_p2), %v945_v4  ;;  %v858_v5 = vpack.c.bf16 (!%p245_p2), %v417_v3, %v416_v2  ;;  %v448_v6 = vld [vmem:[%s1241_s1 + $0x180] sm:$0xff] (!%p245_p2)  ;;  %v449_v7 = vld [vmem:[%s1241_s1 + $0x188] sm:$0xff] (!%p245_p2)  ;;  %v419_v16 = vld [vmem:[%s1241_s1 + $0x98] sm:$0xff] (!%p245_p2)  ;;  %s637_s9 = ssub.s32 (!%p245_p2), 18, %s776_s24  ;;  %vm621_vm9 = vcmask (!%p245_p2), 523264  }
   0x9   : > { %v774_v1 = vld [vmem:[#allocation2] ss:$0 sm:$0xff] (!%p245_p2)  ;;  %v890_v9 = vpack.c.bf16 (!%p245_p2), %v449_v7, %v448_v6  ;;  %v401_v10 = vld [vmem:[%s1241_s1 + $0x8] sm:$0xff] (!%p245_p2)  ;;  %v450_v17 = vld [vmem:[%s1241_s1 + $0x190] sm:$0xff] (!%p245_p2)  ;;  %v862_v18 = vpack.c.bf16 (!%p245_p2), %v419_v16, %v418_v15  ;;  %p638_p3 = scmp.lt.s32.totalorder (!%p245_p2), %s637_s9, 16  ;;  %p282_p4 = scmp.lt.s32.totalorder (!%p245_p2), %s768_s29, 3 }
   0xa   : > { %v400_v8 = vld [vmem:[%s1241_s1] sm:$0xff] (!%p245_p2)  ;;  %381 = vperm.xlu0 (!%p245_p2), %934, %v774_v1   ;;  %v433_v12 = vld [vmem:[%s1241_s1 + $0x108] sm:$0xff] (!%p245_p2)  ;;  %859 = vmatprep.subr.bf16.mxu0 (!%p245_p2), %v858_v5  ;;  %v451_v19 = vld [vmem:[%s1241_s1 + $0x198] sm:$0xff] (!%p245_p2)  ;;  %p294_p5 = scmp.lt.s32.totalorder (!%p245_p2), %s996_s27, 1  ;;  %vm672_vm11 = vcmask (!%p245_p2), 1040384   ;;  %vm674_vm12 = vcmask (!%p245_p2), 517120  }
   0xb   : > { %v432_v11 = vld [vmem:[%s1241_s1 + $0x100] sm:$0xff] (!%p245_p2)  ;;  %v860_v13 = vpack.c.bf16 (!%p245_p2), %v401_v10, %v400_v8  ;;  %891 = vmatprep.subr.bf16.mxu1 (!%p245_p2), %v890_v9  ;;  %v402_v20 = vld [vmem:[%s1241_s1 + $0x10] sm:$0xff] (!%p245_p2)  ;;  %v403_v21 = vld [vmem:[%s1241_s1 + $0x18] sm:$0xff] (!%p245_p2)  ;;  %v894_v22 = vpack.c.bf16 (!%p245_p2), %v451_v19, %v450_v17 }
   0xc   : > { %v892_v14 = vpack.c.bf16 (!%p245_p2), %v433_v12, %v432_v11  ;;  %v864_v23 = vpack.c.bf16 (!%p245_p2), %v403_v21, %v402_v20  ;;  %v434_v24 = vld [vmem:[%s1241_s1 + $0x110] sm:$0xff] (!%p245_p2)  ;;  %v435_v25 = vld [vmem:[%s1241_s1 + $0x118] sm:$0xff] (!%p245_p2)  ;;  %v420_v26 = vld [vmem:[%s1241_s1 + $0xa0] sm:$0xff] (!%p245_p2) }
   0xd   : > { %861 = vmatpush3.bf16.msra.mxu0 (!%p245_p2), %v860_v13  ;;  %v896_v27 = vpack.c.bf16 (!%p245_p2), %v435_v25, %v434_v24  ;;  %v421_v28 = vld [vmem:[%s1241_s1 + $0xa8] sm:$0xff] (!%p245_p2)  ;;  %v452_v29 = vld [vmem:[%s1241_s1 + $0x1a0] sm:$0xff] (!%p245_p2)  ;;  %v422_v37 = vld [vmem:[%s1241_s1 + $0xb0] sm:$0xff] (!%p245_p2) }
   0xe   : > { %893 = vmatpush3.bf16.msra.mxu1 (!%p245_p2), %v892_v14  ;;  %863 = vmatprep.subr.bf16.mxu0 (!%p245_p2), %v862_v18  ;;  %v453_v30 = vld [vmem:[%s1241_s1 + $0x1a8] sm:$0xff] (!%p245_p2)  ;;  %v866_v31 = vpack.c.bf16 (!%p245_p2), %v421_v28, %v420_v26  ;;  %v404_v33 = vld [vmem:[%s1241_s1 + $0x20] sm:$0xff] (!%p245_p2)  ;;  %v423_v38 = vld [vmem:[%s1241_s1 + $0xb8] sm:$0xff] (!%p245_p2) }
   0xf   : > { %895 = vmatprep.subr.bf16.mxu1 %v894_v22  ;;  %v898_v32 = vpack.c.bf16 %v453_v30, %v452_v29  ;;  %v405_v34 = vld [vmem:[%s1241_s1 + $0x28] sm:$0xff]  ;;  %v436_v35 = vld [vmem:[%s1241_s1 + $0x120] sm:$0xff]  ;;  %v454_v41 = vld [vmem:[%s1241_s1 + $0x1b0] sm:$0xff]  ;;  %v870_v44 = vpack.c.bf16 %v423_v38, %v422_v37  ;;  %s1249_s9 = smov (!%p638_p3, %s637_s9), 16  ;;  %v308_v37 = vlaneseq  ;;  %s1251_s29 = smov (!%p282_p4, %s768_s29), 3 }
  0x10   : > { %v437_v36 = vld [vmem:[%s1241_s1 + $0x128] sm:$0xff]  ;;  %v868_v39 = vpack.c.bf16 %v405_v34, %v404_v33  ;;  %v455_v42 = vld [vmem:[%s1241_s1 + $0x1b8] sm:$0xff]  ;;  %v406_v43 = vld [vmem:[%s1241_s1 + $0x30] sm:$0xff]  ;;  %s640_s30 = scvt.s32.f32 %s1249_s9  ;;  %s772_s17 = sshll.u32 %s1251_s29, 3 }
  0x11   : > { %865 = vmatpush3.bf16.msra.mxu0 %v864_v23  ;;  %v900_v40 = vpack.c.bf16 %v437_v36, %v436_v35  ;;  %v902_v45 = vpack.c.bf16 %v455_v42, %v454_v41  ;;  %v407_v46 = vld [vmem:[%s1241_s1 + $0x38] sm:$0xff]  ;;  %v438_v47 = vld [vmem:[%s1241_s1 + $0x130] sm:$0xff]  ;;  %v424_v49 = vld [vmem:[%s1241_s1 + $0xc0] sm:$0xff]  ;;  %v1199_v38 = vshrl.u32 %v308_v37, 7  ;;  %s292_s19 = scalar_lea.vmem %s1246_s6, %s772_s17  ;;  %s1253_s27 = smov (!%p294_p5, %s996_s27), 1 }
  0x12   : > { %897 = vmatpush3.bf16.msra.mxu1 %v896_v27  ;;  %867 = vmatprep.subr.bf16.mxu0 %v866_v31  ;;  %v439_v48 = vld [vmem:[%s1241_s1 + $0x138] sm:$0xff]  ;;  %v425_v50 = vld [vmem:[%s1241_s1 + $0xc8] sm:$0xff]  ;;  %v456_v51 = vld [vmem:[%s1241_s1 + $0x1c0] sm:$0xff]  ;;  %v872_v53 = vpack.c.bf16 %v407_v46, %v406_v43  ;;  %v652_v10 = vstv %s640_s30  ;;  %s781_s30 = sshll.u32 %s1251_s29, 5  ;;  %s773_s21 = sshll.u32 %s1253_s27, 1 }
  0x13   : > { %899 = vmatprep.subr.bf16.mxu1 %v898_v32  ;;  %v457_v52 = vld [vmem:[%s1241_s1 + $0x1c8] sm:$0xff]  ;;  %v904_v54 = vpack.c.bf16 %v439_v48, %v438_v47  ;;  %v408_v55 = vld [vmem:[%s1241_s1 + $0x40] sm:$0xff]  ;;  %v874_v57 = vpack.c.bf16 %v425_v50, %v424_v49  ;;  %v426_v61 = vld [vmem:[%s1241_s1 + $0xd0] sm:$0xff]  ;;  %935 = vrcp.f32 %v652_v10  ;;  %v310_v42 = vsub.s32 0, %v1199_v38  ;;  %s286_s13 = scalar_lea.vmem %s1240_s0, %s781_s30  ;;  %s297_s25 = scalar_lea.vmem %s1247_s7, %s773_s21 }
  0x14   : > { %v409_v56 = vld [vmem:[%s1241_s1 + $0x48] sm:$0xff]  ;;  %v906_v58 = vpack.c.bf16 %v457_v52, %v456_v51  ;;  %v440_v59 = vld [vmem:[%s1241_s1 + $0x140] sm:$0xff]  ;;  %v427_v62 = vld [vmem:[%s1241_s1 + $0xd8] sm:$0xff]  ;;  %v318_v43 = vsub.s32 2, %v1199_v38 }
  0x15   : > { %869 = vmatpush3.bf16.msra.mxu0 %v868_v39  ;;  %v441_v60 = vld [vmem:[%s1241_s1 + $0x148] sm:$0xff]  ;;  %v458_v63 = vld [vmem:[%s1241_s1 + $0x1d0] sm:$0xff]  ;;  %v459_v0 = vld [vmem:[%s1241_s1 + $0x1d8] sm:$0xff]  ;;  %v876_v1 = vpack.c.bf16 %v409_v56, %v408_v55  ;;  %v878_v5 = vpack.c.bf16 %v427_v62, %v426_v61  ;;  %v314_v39 = vsub.s32 1, %v1199_v38 }
  0x16   : > { %901 = vmatpush3.bf16.msra.mxu1 %v900_v40  ;;  %871 = vmatprep.subr.bf16.mxu0 %v870_v44  ;;  %v908_v2 = vpack.c.bf16 %v441_v60, %v440_v59  ;;  %v410_v3 = vld [vmem:[%s1241_s1 + $0x50] sm:$0xff]  ;;  %v411_v4 = vld [vmem:[%s1241_s1 + $0x58] sm:$0xff]  ;;  %v910_v6 = vpack.c.bf16 %v459_v0, %v458_v63  ;;  %v428_v9 = vld [vmem:[%s1241_s1 + $0xe0] sm:$0xff]  ;;  %v322_v40 = vsub.s32 3, %v1199_v38 }
  0x17   : > { %903 = vmatprep.subr.bf16.mxu1 %v902_v45  ;;  %v442_v7 = vld [vmem:[%s1241_s1 + $0x150] sm:$0xff]  ;;  %v443_v8 = vld [vmem:[%s1241_s1 + $0x158] sm:$0xff]  ;;  %v429_v11 = vld [vmem:[%s1241_s1 + $0xe8] sm:$0xff]  ;;  %v880_v14 = vpack.c.bf16 %v411_v4, %v410_v3 }
  0x18   : > { %v460_v12 = vld [vmem:[%s1241_s1 + $0x1e0] sm:$0xff]  ;;  %v461_v13 = vld [vmem:[%s1241_s1 + $0x1e8] sm:$0xff]  ;;  %v912_v15 = vpack.c.bf16 %v443_v8, %v442_v7  ;;  %v882_v18 = vpack.c.bf16 %v429_v11, %v428_v9  ;;  %v430_v22 = vld [vmem:[%s1241_s1 + $0xf0] sm:$0xff] }
  0x19   : > { %873 = vmatpush3.bf16.msra.mxu0 %v872_v53  ;;  %v412_v16 = vld [vmem:[%s1241_s1 + $0x60] sm:$0xff]  ;;  %v413_v17 = vld [vmem:[%s1241_s1 + $0x68] sm:$0xff]  ;;  %v914_v19 = vpack.c.bf16 %v461_v13, %v460_v12  ;;  %v431_v23 = vld [vmem:[%s1241_s1 + $0xf8] sm:$0xff] }
  0x1a   : > { %905 = vmatpush3.bf16.msra.mxu1 %v904_v54  ;;  %875 = vmatprep.subr.bf16.mxu0 %v874_v57  ;;  %v444_v20 = vld [vmem:[%s1241_s1 + $0x160] sm:$0xff]  ;;  %v445_v21 = vld [vmem:[%s1241_s1 + $0x168] sm:$0xff]  ;;  %v462_v24 = vld [vmem:[%s1241_s1 + $0x1f0] sm:$0xff]  ;;  %v884_v26 = vpack.c.bf16 %v413_v17, %v412_v16  ;;  %v886_v29 = vpack.c.bf16 %v431_v23, %v430_v22 }
  0x1b   : > { %907 = vmatprep.subr.bf16.mxu1 %v906_v58  ;;  %v463_v25 = vld [vmem:[%s1241_s1 + $0x1f8] sm:$0xff]  ;;  %v916_v27 = vpack.c.bf16 %v445_v21, %v444_v20  ;;  %v414_v28 = vld [vmem:[%s1241_s1 + $0x70] sm:$0xff]  ;;  %v306_v41 = vld [vmem:[%s1243_s3] sm:$0xf] }
  0x1c   : > { %v918_v30 = vpack.c.bf16 %v463_v25, %v462_v24  ;;  %v415_v31 = vld [vmem:[%s1241_s1 + $0x78] sm:$0xff]  ;;  %v446_v32 = vld [vmem:[%s1241_s1 + $0x170] sm:$0xff]  ;;  %v315_v44 = vrot.slane %v306_v41, %v314_v39  ;;  %v323_v45 = vrot.slane %v306_v41, %v322_v40  ;;  %v299_v46 = vld [vmem:[%s286_s13 + $0x8] sm:$0xff]  ;;  %v311_v49 = vrot.slane %v306_v41, %v310_v42 }
  0x1d   : > { %877 = vmatpush3.bf16.msra.mxu0 %v876_v1  ;;  %v447_v33 = vld [vmem:[%s1241_s1 + $0x178] sm:$0xff]  ;;  %v936_v34 = vpop.eup %935  ;;  %v888_v35 = vpack.c.bf16 %v415_v31, %v414_v28  ;;  %v336_v47 = vld [vmem:[%s1244_s4] sm:$0xf]  ;;  %v319_v50 = vrot.slane %v306_v41, %v318_v43  ;;  %v300_v52 = vld [vmem:[%s286_s13 + $0x10] sm:$0xff] }
  0x1e   : > { %909 = vmatpush3.bf16.msra.mxu1 %v908_v2  ;;  %879 = vmatprep.subr.bf16.mxu0 %v878_v5  ;;  %v920_v36 = vpack.c.bf16 %v447_v33, %v446_v32  ;;  %922 = vpush %v936_v34  ;;  %v301_v48 = vld [vmem:[%s286_s13 + $0x18] sm:$0xff]  ;;  %v298_v51 = vld [vmem:[%s286_s13] sm:$0xff]  ;;  %v329_v53 = vmul.f32 %v315_v44, %v299_v46  ;;  %v303_v57 = vld [vmem:[%s286_s13 + $0x28] sm:$0xff]  ;;  %v626_v32 = vadd.s32 8, %v1199_v38  ;;  %v946_v46 = vmov 0.0  }
  0x1f   : > { %911 = vmatprep.subr.bf16.mxu1 %v910_v6  ;;  %v345_v54 = vrot.slane %v336_v47, %v314_v39  ;;  %v331_v55 = vmul.f32 %v323_v45, %v301_v48  ;;  %v353_v56 = vrot.slane %v336_v47, %v322_v40  ;;  %v305_v58 = vld [vmem:[%s286_s13 + $0x38] sm:$0xff]  ;;  %v328_v59 = vmul.f32 %v311_v49, %v298_v51  ;;  %v302_v63 = vld [vmem:[%s286_s13 + $0x20] sm:$0xff]  ;;  %v304_v0 = vld [vmem:[%s286_s13 + $0x30] sm:$0xff] }
  0x20   : > { %v341_v60 = vrot.slane %v336_v47, %v310_v42  ;;  %v330_v61 = vmul.f32 %v319_v50, %v300_v52  ;;  %v349_v62 = vrot.slane %v336_v47, %v318_v43  ;;  %v333_v1 = vmul.f32 %v315_v44, %v303_v57 }
  0x21   : > { %881 = vmatpush3.bf16.msra.mxu0 %v880_v14  ;;  %v335_v2 = vmul.f32 %v323_v45, %v305_v58  ;;  %v359_v3 = vadd.f32 %v345_v54, %v329_v53  ;;  %v361_v4 = vadd.f32 %v353_v56, %v331_v55  ;;  %v332_v7 = vmul.f32 %v311_v49, %v302_v63 }
  0x22   : > { %913 = vmatpush3.bf16.msra.mxu1 %v912_v15  ;;  %883 = vmatprep.subr.bf16.mxu0 %v882_v18  ;;  %v358_v5 = vadd.f32 %v341_v60, %v328_v59  ;;  %v360_v6 = vadd.f32 %v349_v62, %v330_v61  ;;  %v334_v8 = vmul.f32 %v319_v50, %v304_v0 }
  0x23   : > { %915 = vmatprep.subr.bf16.mxu1 %v914_v19  ;;  %v363_v9 = vadd.f32 %v345_v54, %v333_v1  ;;  %v365_v10 = vadd.f32 %v353_v56, %v335_v2  ;;  %vm367_vm0 = vcmp.ge.f32.partialorder %v359_v3, 0.0  ;;  %vm369_vm1 = vcmp.ge.f32.partialorder %v361_v4, 0.0 }
  0x24   : > { %vm366_vm2 = vcmp.ge.f32.partialorder %v358_v5, 0.0  ;;  %vm368_vm3 = vcmp.ge.f32.partialorder %v360_v6, 0.0  ;;  %v362_v12 = vadd.f32 %v341_v60, %v332_v7  ;;  %v364_v13 = vadd.f32 %v349_v62, %v334_v8 }
  0x25   : > { %885 = vmatpush3.bf16.msra.mxu0 %v884_v26  ;;  %vm371_vm4 = vcmp.ge.f32.partialorder %v363_v9, 0.0  ;;  %vm373_vm5 = vcmp.ge.f32.partialorder %v365_v10, 0.0 }
  0x26   : > { %917 = vmatpush3.bf16.msra.mxu1 %v916_v27  ;;  %887 = vmatprep.subr.bf16.mxu0 %v886_v29  ;;  %vm370_vm6 = vcmp.ge.f32.partialorder %v362_v12, 0.0  ;;  %vm372_vm7 = vcmp.ge.f32.partialorder %v364_v13, 0.0 }
  0x27   : > { %919 = vmatprep.subr.bf16.mxu1 %v918_v30  ;;  %v628_v30 = vstv %s776_s24 }
  0x28   : > { %v629_v31 = vadd.s32 %v628_v30, %v1199_v38  ;;  %v630_v41 = vadd.s32 %v628_v30, %v626_v32 }
  0x29   : > { %889 = vmatpush3.bf16.msra.mxu0 %v888_v35  ;;  %v775_v35 = vld [vmem:[%s1242_s2] ss:$0 sm:$0xff] }
  0x2a   : > { %921 = vmatpush3.bf16.msra.mxu1 %v920_v36  ;;  %vm631_vm8 = vcmp.lt.s32.totalorder %v629_v31, 18  ;;  %vm632_vm10 = vcmp.lt.s32.totalorder %v630_v41, 18 }
  0x2b   : > { %v777_v47 = vsel %vm631_vm8, 1.0, %v946_v46  ;;  %v778_v53 = vsel %vm632_vm10, 1.0, %v946_v46 }
  0x4f   : > { %s923_s20 = spop %922 }
  0x50   : > { %v655_v0 = vstv %s923_s20 }
  0x89   : > { %v382_v11 = vpop.permute.xlu0 %381 }
  0x8a   : > { %v385_v14 = vmul.f32 %v382_v11, %v359_v3  ;;  %v387_v15 = vmul.f32 %v382_v11, %v361_v4  ;;  %v384_v16 = vmul.f32 %v382_v11, %v358_v5  ;;  %v386_v17 = vmul.f32 %v382_v11, %v360_v6 }
  0x8b   : > { %v389_v18 = vmul.f32 %v382_v11, %v363_v9  ;;  %v391_v19 = vmul.f32 %v382_v11, %v365_v10  ;;  %v388_v24 = vmul.f32 %v382_v11, %v362_v12  ;;  %v390_v25 = vmul.f32 %v382_v11, %v364_v13 }
  0x8c   : > { %v393_v20 = vsel %vm367_vm0, %v359_v3, %v385_v14  ;;  %v395_v21 = vsel %vm369_vm1, %v361_v4, %v387_v15  ;;  %v392_v22 = vsel %vm366_vm2, %v358_v5, %v384_v16  ;;  %v394_v23 = vsel %vm368_vm3, %v360_v6, %v386_v17 }
  0x8d   : > { %535 = vmatprep.mubr.f32.mxu0 %v393_v20  ;;  %610 = vmatprep.mubr.f32.mxu1 %v395_v21  ;;  %v397_v26 = vsel %vm371_vm4, %v363_v9, %v389_v18  ;;  %v399_v27 = vsel %vm373_vm5, %v365_v10, %v391_v19  ;;  %v396_v28 = vsel %vm370_vm6, %v362_v12, %v388_v24 }
  0x8e   : > { %536 = vmatmul.mubr.f32.vlgmr.msra.gmra.mrb[0].mxu0 %v392_v22  ;;  %611 = vmatmul.mubr.f32.vlgmr.msra.gmra.mrb[0].mxu1 %v394_v23  ;;  %v398_v29 = vsel %vm372_vm7, %v364_v13, %v390_v25 }
  0x8f   : > { %540 = vmatprep.mubr.f32.mxu0 %v397_v26  ;;  %615 = vmatprep.mubr.f32.mxu1 %v399_v27 }
  0x92   : > { %541 = vmatmul.mubr.f32.gmra.mrb[2].mxu0 %v396_v28  ;;  %616 = vmatmul.mubr.f32.gmra.mrb[2].mxu1 %v398_v29 }
 0x161   : > { %v814_v33 = vpop.f32.mrb[0].mxu0  ;;  %v852_v34 = vpop.f32.mrb[0].mxu1 }
 0x162   : > { %v815_v36 = vpop.f32.mrb[1].mxu0  ;;  %v853_v37 = vpop.f32.mrb[1].mxu1 }
 0x163   : > { %v816_v39 = vadd.f32 %v815_v36, %v814_v33  ;;  %v854_v40 = vadd.f32 %v853_v37, %v852_v34 }
 0x165   : > { %v538_v42 = vadd.f32 %v816_v39, %v775_v35  ;;  %v817_v43 = vpop.f32.mrb[2].mxu0  ;;  %v855_v44 = vpop.f32.mrb[2].mxu1 }
 0x166   : > { %v818_v38 = vpop.f32.mrb[3].mxu0  ;;  %v856_v45 = vpop.f32.mrb[3].mxu1 }
 0x167   : > { %v613_v48 = vadd.f32 %v854_v40, %v538_v42  ;;  %v819_v49 = vadd.f32 %v818_v38, %v817_v43  ;;  %v857_v50 = vadd.f32 %v856_v45, %v855_v44 }
 0x169   : > { %622 = vst.msk [vmem:[%s292_s19] sm:$0xff] %vm621_vm9, %v613_v48  ;;  %v543_v51 = vadd.f32 %v819_v49, %v775_v35  ;;  %v641_v52 = vmul.f32 %v777_v47, %v613_v48 }
 0x16b   : > { %v618_v54 = vadd.f32 %v857_v50, %v543_v51  ;;  %v643_v56 = vsel %vm621_vm9, %v641_v52, 0.0 }
 0x16d   : > { %623 = vst.msk [vmem:[%s292_s19 + $0x8] sm:$0xff] %vm621_vm9, %v618_v54  ;;  %v642_v55 = vmul.f32 %v778_v53, %v618_v54 }
 0x16f   : > { %v644_v57 = vsel %vm621_vm9, %v642_v55, 0.0 }
 0x170   : > { %v645_v58 = vadd.f32 %v644_v57, %v643_v56 }
 0x172   : > { %v646_v59 = vrot.slane %v645_v58, 4 }
 0x174   : > { %v647_v60 = vadd.f32 %v646_v59, %v645_v58 }
 0x176   : > { %v648_v61 = vrot.slane %v647_v60, 2 }
 0x178   : > { %v649_v62 = vadd.f32 %v648_v61, %v647_v60 }
 0x17a   : > { %v650_v63 = vrot.slane %v649_v62, 1 }
 0x17c   : > { %v651_v1 = vadd.f32 %v650_v63, %v649_v62 }
 0x17e   : > { %v656_v2 = vmul.f32 %v655_v0, %v651_v1 }
 0x180   : > { %v657_v3 = vsub.f32 %v613_v48, %v656_v2  ;;  %v658_v4 = vsub.f32 %v618_v54, %v656_v2 }
 0x182   : > { %v659_v5 = vmul.f32 %v777_v47, %v657_v3  ;;  %v660_v6 = vmul.f32 %v778_v53, %v658_v4 }
 0x184   : > { %v661_v7 = vmul.f32 %v659_v5, %v659_v5  ;;  %v662_v8 = vmul.f32 %v660_v6, %v660_v6 }
 0x186   : > { %v663_v9 = vsel %vm621_vm9, %v661_v7, 0.0  ;;  %v664_v10 = vsel %vm621_vm9, %v662_v8, 0.0 }
 0x187   : > { %v665_v11 = vadd.f32 %v664_v10, %v663_v9 }
 0x189   : > { %v666_v12 = vrot.slane %v665_v11, 4 }
 0x18b   : > { %v667_v13 = vadd.f32 %v666_v12, %v665_v11 }
 0x18d   : > { %v668_v14 = vrot.slane %v667_v13, 2 }
 0x18f   : > { %v669_v15 = vadd.f32 %v668_v14, %v667_v13 }
 0x191   : > { %v670_v16 = vrot.slane %v669_v15, 1 }
 0x193   : > { %v671_v17 = vadd.f32 %v670_v16, %v669_v15 }
 0x195   : > { %v673_v18 = vsel %vm672_vm11, %v651_v1, %v671_v17 }
 0x196   : > { %675 = vst.msk [vmem:[%s297_s25] sm:$0x3] %vm674_vm12, %v673_v18 }
 0x197 PF: > { %s20_s26 = sadd.s32 1, %s943_s26  }
 0x198   : > { %p17_p6 = scmp.ge.s32.totalorder %s20_s26, 4  }
 0x19a   :  { %19 = sbr.rel (!%p17_p6) target bundleno = 3 (0x3), region = 86 }

// kernel: tile.83
= control target key start
LH: loop header
LB: loop body
LE: loop exit
PB: predicated region body
PF: predicated region fallthrough
CT: control target
= control target key end

     0   :  { %s28_s0 = inlined_call_operand.vmem [shape: f32[64], index: 0, kind: input, shape index: {}]   ;;  %s29_s1 = inlined_call_operand.vmem [shape: f32[16,64], index: 1, kind: output, shape index: {}]  }
   0x1   :  { %v4_v0 = vld [vmem:[%s28_s0] ss:$0 sm:$0xff] }
   0x2   :  { %5 = vst [vmem:[%s29_s1] sm:$0xff] %v4_v0  ;;  %8 = vst [vmem:[%s29_s1 + $0x8] sm:$0xff] %v4_v0 }

// kernel: tile.84
= control target key start
LH: loop header
LB: loop body
LE: loop exit
PB: predicated region body
PF: predicated region fallthrough
CT: control target
= control target key end

     0   :  { %vm3_vm0 = vcmask 523264   ;;  %vm10_vm1 = vcmask 1048064   ;;  %s116_s0 = inlined_call_operand.vmem [shape: f32[16,64], index: 0, kind: input, shape index: {}]   ;;  %s117_s1 = inlined_call_operand.vmem [shape: f32[1,1024], index: 1, kind: output, shape index: {}]  }
   0x1   :  { %v66_v0 = vld [vmem:[%s116_s0 + $0x1] ss:$2 sm:$0xff]   ;;  %v2_v1 = vld [vmem:[%s116_s0] ss:$2 sm:$0xff]   ;;  %s75_s0 = smov 64  }
   0x2   :  { %8 = vrot.lane.b32.xlu0 %v66_v0, %s75_s0  ;;  %4 = vst.msk [vmem:[#allocation0] ss:$8 sm:$0xf] %vm3_vm0, %v2_v1   ;;  %5 = vst.msk [vmem:[#allocation0] ss:$8 sm:$0xf0] %vm3_vm0, %v2_v1  }
  0x74   :  { %v9_v2 = vpop.permute.xlu0 %8  }
  0x75   :  { %11 = vst.msk [vmem:[#allocation0] ss:$8 sm:$0xf] %vm10_vm1, %v9_v2   ;;  %12 = vst.msk [vmem:[#allocation0] ss:$8 sm:$0xf0] %vm10_vm1, %v9_v2  }
  0x7c   :  { %v16_v3 = vld [vmem:[#allocation0] sm:$0x1]  ;;  %v20_v4 = vld [vmem:[#allocation0 + $0x8] sm:$0x1]  ;;  %v25_v5 = vld [vmem:[#allocation0 + $0x10] sm:$0x1] }
  0x7d   :  { %18 = vst [vmem:[%s117_s1] sm:$0x1] %v16_v3  ;;  %67 = vst [vmem:[%s117_s1 + $0x1] sm:$0x1] %v20_v4  ;;  %v31_v6 = vld [vmem:[#allocation0 + $0x18] sm:$0x1] }
  0x7e   :  { %68 = vst [vmem:[%s117_s1 + $0x2] sm:$0x1] %v25_v5  ;;  %v37_v7 = vld [vmem:[#allocation0 + $0x20] sm:$0x1]  ;;  %v43_v8 = vld [vmem:[#allocation0 + $0x28] sm:$0x1] }
  0x7f   :  { %69 = vst [vmem:[%s117_s1 + $0x3] sm:$0x1] %v31_v6  ;;  %70 = vst [vmem:[%s117_s1 + $0x4] sm:$0x1] %v37_v7  ;;  %v49_v9 = vld [vmem:[#allocation0 + $0x30] sm:$0x1] }
  0x80   :  { %71 = vst [vmem:[%s117_s1 + $0x5] sm:$0x1] %v43_v8  ;;  %v55_v10 = vld [vmem:[#allocation0 + $0x38] sm:$0x1]  ;;  %72 = vst [vmem:[%s117_s1 + $0x6] sm:$0x1] %v49_v9 }
  0x81   :  { %73 = vst [vmem:[%s117_s1 + $0x7] sm:$0x1] %v55_v10 }

// kernel: _lambda_.14
= control target key start
LH: loop header
LB: loop body
LE: loop exit
PB: predicated region body
PF: predicated region fallthrough
CT: control target
= control target key end

     0   :  { %s1542_s25 = smov 0   ;;  %s2574_s0 = inlined_call_operand.vmem [shape: f32[80,1024], index: 0, kind: input, shape index: {}]   ;;  %s2575_s1 = inlined_call_operand.vmem [shape: f32[1024,1], index: 1, kind: input, shape index: {}]   ;;  %s2576_s2 = inlined_call_operand.<no memory space> [shape: f32[1,1], index: 2, kind: input, shape index: {}]   ;;  %s2577_s3 = inlined_call_operand.vmem [shape: f32[1,1024], index: 3, kind: input, shape index: {}]   ;;  %s2578_s4 = inlined_call_operand.vmem [shape: f32[1,1024], index: 4, kind: input, shape index: {}]   ;;  %s2579_s6 = inlined_call_operand.vmem [shape: f32[80,1], index: 6, kind: output, shape index: {}]   ;;  %s2580_s5 = inlined_call_operand.<no memory space> [shape: f32[1,1], index: 5, kind: input, shape index: {}]  }
   0x1   :  { %v11_v0 = vstv %s2576_s2  ;;  %v13_v1 = vstv %s2580_s5 }
   0x2   :  { %12 = vst [vmem:[#allocation2] sm:$0x1] %v11_v0  ;;  %14 = vst [vmem:[#allocation3] sm:$0x1] %v13_v1 }
   0x3 LB: > { %s1153_s26 = sadd.s32 4294967295, %s1498_s25   ;;  %p1157_p0 = scmp.ge.s32.totalorder %s1498_s25, 1  ;;  %s1498_s25 = sphi %s1542_s25, %s20_s25  }
   0x4   : > { %p218_p1 = scmp.lt.s32.totalorder %s1498_s25, 3 }
   0x6   : > { %p219_p2 = pnand %p1157_p0, %p218_p1 }
   0x8   : > { %222 = sbr.rel (%p219_p2) target bundleno = 420 (0x1a4), region = 44 }
   0xf   : > { %v1161_v2 = vld [vmem:[#allocation3] ss:$0 sm:$0xff]  ;;  %v613_v4 = vld [vmem:[%s2575_s1 + $0x88] sm:$0xff]  ;;  %v1500_v5 = vmov 0   ;;  %v614_v16 = vld [vmem:[%s2575_s1 + $0x90] sm:$0xff]  ;;  %s249_s17 = smul.u32 5, %s1153_s26 }
  0x10   : > { %v612_v3 = vld [vmem:[%s2575_s1 + $0x80] sm:$0xff]  ;;  %1491 = vset.pattern.permute.xlu0 %v1500_v5  ;;  %v645_v8 = vld [vmem:[%s2575_s1 + $0x188] sm:$0xff]  ;;  %v615_v17 = vld [vmem:[%s2575_s1 + $0x98] sm:$0xff] }
  0x11   : > { %v1354_v6 = vpack.c.bf16 %v613_v4, %v612_v3  ;;  %v644_v7 = vld [vmem:[%s2575_s1 + $0x180] sm:$0xff]  ;;  %513 = vperm.xlu0 %1491, %v1161_v2   ;;  %v597_v11 = vld [vmem:[%s2575_s1 + $0x8] sm:$0xff]  ;;  %v646_v18 = vld [vmem:[%s2575_s1 + $0x190] sm:$0xff]  ;;  %v1358_v19 = vpack.c.bf16 %v615_v17, %v614_v16  ;;  %p250_p3 = scmp.lt.s32.totalorder %s249_s17, 9 }
  0x12   : > { %v596_v9 = vld [vmem:[%s2575_s1] sm:$0xff]  ;;  %v1386_v10 = vpack.c.bf16 %v645_v8, %v644_v7  ;;  %v629_v13 = vld [vmem:[%s2575_s1 + $0x108] sm:$0xff]  ;;  %v647_v20 = vld [vmem:[%s2575_s1 + $0x198] sm:$0xff] }
  0x13   : > { %v628_v12 = vld [vmem:[%s2575_s1 + $0x100] sm:$0xff]  ;;  %1355 = vmatprep.subr.bf16.mxu0 %v1354_v6  ;;  %v1356_v14 = vpack.c.bf16 %v597_v11, %v596_v9  ;;  %v598_v21 = vld [vmem:[%s2575_s1 + $0x10] sm:$0xff]  ;;  %v599_v22 = vld [vmem:[%s2575_s1 + $0x18] sm:$0xff]  ;;  %v1390_v23 = vpack.c.bf16 %v647_v20, %v646_v18  ;;  %s2633_s17 = smov (!%p250_p3, %s249_s17), 9 }
  0x14   : > { %v1388_v15 = vpack.c.bf16 %v629_v13, %v628_v12  ;;  %1387 = vmatprep.subr.bf16.mxu1 %v1386_v10  ;;  %v1360_v24 = vpack.c.bf16 %v599_v22, %v598_v21  ;;  %v630_v25 = vld [vmem:[%s2575_s1 + $0x110] sm:$0xff]  ;;  %v631_v26 = vld [vmem:[%s2575_s1 + $0x118] sm:$0xff]  ;;  %v616_v27 = vld [vmem:[%s2575_s1 + $0xa0] sm:$0xff]  ;;  %s1165_s18 = sshll.u32 %s2633_s17, 6 }
  0x15   : > { %1357 = vmatpush3.bf16.msra.mxu0 %v1356_v14  ;;  %v1392_v28 = vpack.c.bf16 %v631_v26, %v630_v25  ;;  %v617_v29 = vld [vmem:[%s2575_s1 + $0xa8] sm:$0xff]  ;;  %v648_v30 = vld [vmem:[%s2575_s1 + $0x1a0] sm:$0xff]  ;;  %v618_v38 = vld [vmem:[%s2575_s1 + $0xb0] sm:$0xff]  ;;  %s1773_s22 = scalar_lea.vmem %s2574_s0, %s1165_s18 }
  0x16   : > { %1389 = vmatpush3.bf16.msra.mxu1 %v1388_v15  ;;  %1359 = vmatprep.subr.bf16.mxu0 %v1358_v19  ;;  %v649_v31 = vld [vmem:[%s2575_s1 + $0x1a8] sm:$0xff]  ;;  %v1362_v32 = vpack.c.bf16 %v617_v29, %v616_v27  ;;  %v600_v34 = vld [vmem:[%s2575_s1 + $0x20] sm:$0xff]  ;;  %v619_v39 = vld [vmem:[%s2575_s1 + $0xb8] sm:$0xff] }
  0x17   : > { %1391 = vmatprep.subr.bf16.mxu1 %v1390_v23  ;;  %v1394_v33 = vpack.c.bf16 %v649_v31, %v648_v30  ;;  %v601_v35 = vld [vmem:[%s2575_s1 + $0x28] sm:$0xff]  ;;  %v632_v36 = vld [vmem:[%s2575_s1 + $0x120] sm:$0xff]  ;;  %v650_v42 = vld [vmem:[%s2575_s1 + $0x1b0] sm:$0xff]  ;;  %v1366_v45 = vpack.c.bf16 %v619_v39, %v618_v38 }
  0x18   : > { %v633_v37 = vld [vmem:[%s2575_s1 + $0x128] sm:$0xff]  ;;  %v1364_v40 = vpack.c.bf16 %v601_v35, %v600_v34  ;;  %v651_v43 = vld [vmem:[%s2575_s1 + $0x1b8] sm:$0xff]  ;;  %v602_v44 = vld [vmem:[%s2575_s1 + $0x30] sm:$0xff] }
  0x19   : > { %1361 = vmatpush3.bf16.msra.mxu0 %v1360_v24  ;;  %v1396_v41 = vpack.c.bf16 %v633_v37, %v632_v36  ;;  %v1398_v46 = vpack.c.bf16 %v651_v43, %v650_v42  ;;  %v603_v47 = vld [vmem:[%s2575_s1 + $0x38] sm:$0xff]  ;;  %v634_v48 = vld [vmem:[%s2575_s1 + $0x130] sm:$0xff]  ;;  %v620_v50 = vld [vmem:[%s2575_s1 + $0xc0] sm:$0xff]  ;;  %v304_v42 = vlaneseq }
  0x1a   : > { %1393 = vmatpush3.bf16.msra.mxu1 %v1392_v28  ;;  %1363 = vmatprep.subr.bf16.mxu0 %v1362_v32  ;;  %v635_v49 = vld [vmem:[%s2575_s1 + $0x138] sm:$0xff]  ;;  %v621_v51 = vld [vmem:[%s2575_s1 + $0xc8] sm:$0xff]  ;;  %v652_v52 = vld [vmem:[%s2575_s1 + $0x1c0] sm:$0xff]  ;;  %v1368_v54 = vpack.c.bf16 %v603_v47, %v602_v44 }
  0x1b   : > { %1395 = vmatprep.subr.bf16.mxu1 %v1394_v33  ;;  %v653_v53 = vld [vmem:[%s2575_s1 + $0x1c8] sm:$0xff]  ;;  %v1400_v55 = vpack.c.bf16 %v635_v49, %v634_v48  ;;  %v604_v56 = vld [vmem:[%s2575_s1 + $0x40] sm:$0xff]  ;;  %v1370_v58 = vpack.c.bf16 %v621_v51, %v620_v50  ;;  %v622_v62 = vld [vmem:[%s2575_s1 + $0xd0] sm:$0xff]  ;;  %v1758_v43 = vshrl.u32 %v304_v42, 7 }
  0x1c   : > { %v605_v57 = vld [vmem:[%s2575_s1 + $0x48] sm:$0xff]  ;;  %v1402_v59 = vpack.c.bf16 %v653_v53, %v652_v52  ;;  %v636_v60 = vld [vmem:[%s2575_s1 + $0x140] sm:$0xff]  ;;  %v623_v63 = vld [vmem:[%s2575_s1 + $0xd8] sm:$0xff] }
  0x1d   : > { %1365 = vmatpush3.bf16.msra.mxu0 %v1364_v40  ;;  %v637_v61 = vld [vmem:[%s2575_s1 + $0x148] sm:$0xff]  ;;  %v654_v0 = vld [vmem:[%s2575_s1 + $0x1d0] sm:$0xff]  ;;  %v655_v1 = vld [vmem:[%s2575_s1 + $0x1d8] sm:$0xff]  ;;  %v1372_v2 = vpack.c.bf16 %v605_v57, %v604_v56  ;;  %v1374_v6 = vpack.c.bf16 %v623_v63, %v622_v62  ;;  %v310_v44 = vsub.s32 1, %v1758_v43  ;;  %v306_v47 = vsub.s32 0, %v1758_v43 }
  0x1e   : > { %1397 = vmatpush3.bf16.msra.mxu1 %v1396_v41  ;;  %1367 = vmatprep.subr.bf16.mxu0 %v1366_v45  ;;  %v1404_v3 = vpack.c.bf16 %v637_v61, %v636_v60  ;;  %v606_v4 = vld [vmem:[%s2575_s1 + $0x50] sm:$0xff]  ;;  %v607_v5 = vld [vmem:[%s2575_s1 + $0x58] sm:$0xff]  ;;  %v1406_v7 = vpack.c.bf16 %v655_v1, %v654_v0  ;;  %v624_v10 = vld [vmem:[%s2575_s1 + $0xe0] sm:$0xff]  ;;  %v314_v48 = vsub.s32 2, %v1758_v43 }
  0x1f   : > { %1399 = vmatprep.subr.bf16.mxu1 %v1398_v46  ;;  %v638_v8 = vld [vmem:[%s2575_s1 + $0x150] sm:$0xff]  ;;  %v639_v9 = vld [vmem:[%s2575_s1 + $0x158] sm:$0xff]  ;;  %v625_v11 = vld [vmem:[%s2575_s1 + $0xe8] sm:$0xff]  ;;  %v1376_v14 = vpack.c.bf16 %v607_v5, %v606_v4  ;;  %v318_v46 = vsub.s32 3, %v1758_v43 }
  0x20   : > { %v656_v12 = vld [vmem:[%s2575_s1 + $0x1e0] sm:$0xff]  ;;  %v657_v13 = vld [vmem:[%s2575_s1 + $0x1e8] sm:$0xff]  ;;  %v1408_v15 = vpack.c.bf16 %v639_v9, %v638_v8  ;;  %v1378_v18 = vpack.c.bf16 %v625_v11, %v624_v10  ;;  %v626_v22 = vld [vmem:[%s2575_s1 + $0xf0] sm:$0xff] }
  0x21   : > { %1369 = vmatpush3.bf16.msra.mxu0 %v1368_v54  ;;  %v608_v16 = vld [vmem:[%s2575_s1 + $0x60] sm:$0xff]  ;;  %v609_v17 = vld [vmem:[%s2575_s1 + $0x68] sm:$0xff]  ;;  %v1410_v19 = vpack.c.bf16 %v657_v13, %v656_v12  ;;  %v627_v23 = vld [vmem:[%s2575_s1 + $0xf8] sm:$0xff] }
  0x22   : > { %1401 = vmatpush3.bf16.msra.mxu1 %v1400_v55  ;;  %1371 = vmatprep.subr.bf16.mxu0 %v1370_v58  ;;  %v640_v20 = vld [vmem:[%s2575_s1 + $0x160] sm:$0xff]  ;;  %v641_v21 = vld [vmem:[%s2575_s1 + $0x168] sm:$0xff]  ;;  %v658_v24 = vld [vmem:[%s2575_s1 + $0x1f0] sm:$0xff]  ;;  %v1380_v26 = vpack.c.bf16 %v609_v17, %v608_v16  ;;  %v1382_v30 = vpack.c.bf16 %v627_v23, %v626_v22 }
  0x23   : > { %1403 = vmatprep.subr.bf16.mxu1 %v1402_v59  ;;  %v659_v25 = vld [vmem:[%s2575_s1 + $0x1f8] sm:$0xff]  ;;  %v1412_v27 = vpack.c.bf16 %v641_v21, %v640_v20  ;;  %v610_v28 = vld [vmem:[%s2575_s1 + $0x70] sm:$0xff]  ;;  %v676_v34 = vld [vmem:[%s2575_s1 + $0x280] sm:$0xff] }
  0x24   : > { %v611_v29 = vld [vmem:[%s2575_s1 + $0x78] sm:$0xff]  ;;  %v1414_v31 = vpack.c.bf16 %v659_v25, %v658_v24  ;;  %v642_v32 = vld [vmem:[%s2575_s1 + $0x170] sm:$0xff]  ;;  %v677_v35 = vld [vmem:[%s2575_s1 + $0x288] sm:$0xff] }
  0x25   : > { %1373 = vmatpush3.bf16.msra.mxu0 %v1372_v2  ;;  %v643_v33 = vld [vmem:[%s2575_s1 + $0x178] sm:$0xff]  ;;  %v708_v36 = vld [vmem:[%s2575_s1 + $0x380] sm:$0xff]  ;;  %v709_v37 = vld [vmem:[%s2575_s1 + $0x388] sm:$0xff]  ;;  %v1384_v38 = vpack.c.bf16 %v611_v29, %v610_v28  ;;  %v1418_v40 = vpack.c.bf16 %v677_v35, %v676_v34 }
  0x26   : > { %1405 = vmatpush3.bf16.msra.mxu1 %v1404_v3  ;;  %1375 = vmatprep.subr.bf16.mxu0 %v1374_v6  ;;  %v1416_v39 = vpack.c.bf16 %v643_v33, %v642_v32  ;;  %v1450_v41 = vpack.c.bf16 %v709_v37, %v708_v36  ;;  %v1765_v45 = vld [vmem:[%s2577_s3] sm:$0xff]  ;;  %v263_v50 = vld [vmem:[%s1773_s22 + $0x8] sm:$0xff]  ;;  %v265_v55 = vld [vmem:[%s1773_s22 + $0x18] sm:$0xff] }
  0x27   : > { %1407 = vmatprep.subr.bf16.mxu1 %v1406_v7  ;;  %v1776_v49 = vrot.slane %v1765_v45, %v310_v44  ;;  %v1782_v51 = vld [vmem:[%s2578_s4] sm:$0xff]  ;;  %v1785_v52 = vrot.slane %v1765_v45, %v318_v46  ;;  %v1788_v53 = vrot.slane %v1765_v45, %v306_v47  ;;  %v1791_v54 = vrot.slane %v1765_v45, %v314_v48  ;;  %v264_v57 = vld [vmem:[%s1773_s22 + $0x10] sm:$0xff]  ;;  %v271_v62 = vld [vmem:[%s1773_s22 + $0x48] sm:$0xff] }
  0x28   : > { %v262_v56 = vld [vmem:[%s1773_s22] sm:$0xff]  ;;  %v1798_v59 = vrot.slane %v1782_v51, %v310_v44  ;;  %v1801_v60 = vrot.slane %v1782_v51, %v318_v46  ;;  %v1804_v61 = vrot.slane %v1782_v51, %v306_v47  ;;  %v1811_v2 = vrot.slane %v1782_v51, %v314_v48  ;;  %v273_v3 = vld [vmem:[%s1773_s22 + $0x58] sm:$0xff]  ;;  %v1822_v5 = vld [vmem:[%s2575_s1 + $0x208] sm:$0xff] }
  0x29   : > { %1377 = vmatpush3.bf16.msra.mxu0 %v1376_v14  ;;  %v345_v58 = vmul.f32 %v1776_v49, %v263_v50  ;;  %v347_v63 = vmul.f32 %v1785_v52, %v265_v55  ;;  %v344_v0 = vmul.f32 %v1788_v53, %v262_v56  ;;  %v346_v1 = vmul.f32 %v1791_v54, %v264_v57  ;;  %v1817_v4 = vld [vmem:[%s2575_s1 + $0x200] sm:$0xff]  ;;  %v1832_v7 = vld [vmem:[%s2575_s1 + $0x308] sm:$0xff]  ;;  %v1838_v9 = vld [vmem:[%s2575_s1 + $0x290] sm:$0xff] }
  0x2a   : > { %1409 = vmatpush3.bf16.msra.mxu1 %v1408_v15  ;;  %1379 = vmatprep.subr.bf16.mxu0 %v1378_v18  ;;  %v1827_v6 = vld [vmem:[%s2575_s1 + $0x300] sm:$0xff]  ;;  %v353_v8 = vmul.f32 %v1776_v49, %v271_v62  ;;  %v1843_v10 = vld [vmem:[%s2575_s1 + $0x298] sm:$0xff]  ;;  %v355_v11 = vmul.f32 %v1785_v52, %v273_v3  ;;  %v1849_v12 = vld [vmem:[%s2575_s1 + $0x390] sm:$0xff] }
  0x2b   : > { %1411 = vmatprep.subr.bf16.mxu1 %v1410_v19  ;;  %v1854_v13 = vld [vmem:[%s2575_s1 + $0x398] sm:$0xff]  ;;  %v270_v14 = vld [vmem:[%s1773_s22 + $0x40] sm:$0xff]  ;;  %v272_v15 = vld [vmem:[%s1773_s22 + $0x50] sm:$0xff]  ;;  %v1860_v17 = vadd.f32 %v1798_v59, %v345_v58  ;;  %v1863_v18 = vadd.f32 %v1801_v60, %v347_v63  ;;  %v1866_v19 = vadd.f32 %v1804_v61, %v344_v0  ;;  %v1869_v20 = vadd.f32 %v1811_v2, %v346_v1 }
  0x2c   : > { %v1874_v21 = vld [vmem:[%s2575_s1 + $0x210] sm:$0xff]  ;;  %v1879_v22 = vld [vmem:[%s2575_s1 + $0x218] sm:$0xff]  ;;  %v279_v23 = vld [vmem:[%s1773_s22 + $0x88] sm:$0xff]  ;;  %v352_v32 = vmul.f32 %v1788_v53, %v270_v14  ;;  %v354_v33 = vmul.f32 %v1791_v54, %v272_v15 }
  0x2d   : > { %1381 = vmatpush3.bf16.msra.mxu0 %v1380_v26  ;;  %v1885_v24 = vld [vmem:[%s2575_s1 + $0x310] sm:$0xff]  ;;  %v1890_v25 = vld [vmem:[%s2575_s1 + $0x318] sm:$0xff]  ;;  %v1906_v34 = vld [vmem:[%s2575_s1 + $0x2a0] sm:$0xff]  ;;  %vm467_vm0 = vcmp.ge.f32.partialorder %v1860_v17, 0.0  ;;  %vm469_vm1 = vcmp.ge.f32.partialorder %v1863_v18, 0.0  ;;  %vm466_vm2 = vcmp.ge.f32.partialorder %v1866_v19, 0.0 }
  0x2e   : > { %1413 = vmatpush3.bf16.msra.mxu1 %v1412_v27  ;;  %1383 = vmatprep.subr.bf16.mxu0 %v1382_v30  ;;  %v281_v26 = vld [vmem:[%s1773_s22 + $0x98] sm:$0xff]  ;;  %v1911_v35 = vld [vmem:[%s2575_s1 + $0x2a8] sm:$0xff]  ;;  %v278_v36 = vld [vmem:[%s1773_s22 + $0x80] sm:$0xff]  ;;  %vm468_vm3 = vcmp.ge.f32.partialorder %v1869_v20, 0.0  ;;  %v1974_v15 = vadd.f32 %v1804_v61, %v352_v32 }
  0x2f   : > { %1415 = vmatprep.subr.bf16.mxu1 %v1414_v31  ;;  %v1899_v31 = vadd.f32 %v1798_v59, %v353_v8  ;;  %v280_v37 = vld [vmem:[%s1773_s22 + $0x90] sm:$0xff]  ;;  %v1926_v42 = vld [vmem:[%s2575_s1 + $0x3a0] sm:$0xff]  ;;  %v1931_v44 = vld [vmem:[%s2575_s1 + $0x3a8] sm:$0xff]  ;;  %v363_v50 = vmul.f32 %v1785_v52, %v281_v26  ;;  %v360_v1 = vmul.f32 %v1788_v53, %v278_v36 }
  0x30   : > { %v287_v46 = vld [vmem:[%s1773_s22 + $0xc8] sm:$0xff]  ;;  %v289_v47 = vld [vmem:[%s1773_s22 + $0xd8] sm:$0xff]  ;;  %v1945_v55 = vld [vmem:[%s2575_s1 + $0x220] sm:$0xff]  ;;  %v362_v3 = vmul.f32 %v1791_v54, %v280_v37  ;;  %vm474_vm6 = vcmp.ge.f32.partialorder %v1974_v15, 0.0 }
  0x31   : > { %1385 = vmatpush3.bf16.msra.mxu0 %v1384_v38  ;;  %2590 = vst [vmem:[#allocation4_spill] sm:$0xff] %v1945_v55  ;;  %v1950_v56 = vld [vmem:[%s2575_s1 + $0x228] sm:$0xff]  ;;  %v1955_v57 = vld [vmem:[%s2575_s1 + $0x320] sm:$0xff]  ;;  %v288_v62 = vld [vmem:[%s1773_s22 + $0xd0] sm:$0xff]  ;;  %vm475_vm4 = vcmp.ge.f32.partialorder %v1899_v31, 0.0  ;;  %v369_v26 = vmul.f32 %v1776_v49, %v287_v46  ;;  %v371_v36 = vmul.f32 %v1785_v52, %v289_v47  ;;  %v2020_v46 = vadd.f32 %v1801_v60, %v363_v50 }
  0x32   : > { %1417 = vmatpush3.bf16.msra.mxu1 %v1416_v39  ;;  %1419 = vmatprep.subr.bf16.mxu0 %v1418_v40  ;;  %v1918_v39 = vadd.f32 %v1801_v60, %v355_v11  ;;  %2591 = vst [vmem:[#allocation5_spill] sm:$0xff] %v1955_v57  ;;  %v286_v58 = vld [vmem:[%s1773_s22 + $0xc0] sm:$0xff]  ;;  %v1968_v8 = vld [vmem:[%s2575_s1 + $0x328] sm:$0xff]  ;;  %v297_v14 = vld [vmem:[%s1773_s22 + $0x118] sm:$0xff]  ;;  %v370_v0 = vmul.f32 %v1791_v54, %v288_v62 }
  0x33   : > { %1451 = vmatprep.subr.bf16.mxu1 %v1450_v41  ;;  %v361_v41 = vmul.f32 %v1776_v49, %v279_v23  ;;  %2592 = vst [vmem:[#allocation6_spill] sm:$0xff] %v1968_v8  ;;  %v295_v11 = vld [vmem:[%s1773_s22 + $0x108] sm:$0xff]  ;;  %v1977_v23 = vadd.f32 %v1811_v2, %v354_v33  ;;  %v1984_v37 = vld [vmem:[%s2575_s1 + $0x2b0] sm:$0xff]  ;;  %v1989_v29 = vld [vmem:[%s2575_s1 + $0x2b8] sm:$0xff]  ;;  %v368_v28 = vmul.f32 %v1788_v53, %v286_v58  ;;  %vm485_vm9 = vcmp.ge.f32.partialorder %v2020_v46, 0.0 }
  0x34   : > { %v1994_v32 = vld [vmem:[%s2575_s1 + $0x3b0] sm:$0xff]  ;;  %vm477_vm5 = vcmp.ge.f32.partialorder %v1918_v39, 0.0  ;;  %v2005_v47 = vld [vmem:[%s2575_s1 + $0x3b8] sm:$0xff]  ;;  %v377_v40 = vmul.f32 %v1776_v49, %v295_v11  ;;  %v379_v38 = vmul.f32 %v1785_v52, %v297_v14  ;;  %v2039_v50 = vld [vmem:[%s2575_s1 + $0x2c0] sm:$0xff]  ;;  %v2042_v48 = vadd.f32 %v1804_v61, %v360_v1 }
  0x35   : > { %v1998_v33 = vadd.f32 %v1798_v59, %v361_v41  ;;  %v2012_v63 = vld [vmem:[%s2575_s1 + $0x230] sm:$0xff]  ;;  %v2017_v41 = vld [vmem:[%s2575_s1 + $0x238] sm:$0xff]  ;;  %2595 = vst [vmem:[#allocation9_spill] sm:$0xff] %v2039_v50  ;;  %v2045_v30 = vadd.f32 %v1811_v2, %v362_v3  ;;  %v2054_v52 = vld [vmem:[%s2575_s1 + $0x2c8] sm:$0xff]  ;;  %v2067_v3 = vadd.f32 %v1798_v59, %v369_v26  ;;  %v2070_v14 = vadd.f32 %v1801_v60, %v371_v36 }
  0x36   : > { %v2027_v58 = vld [vmem:[%s2575_s1 + $0x330] sm:$0xff]  ;;  %v2032_v62 = vld [vmem:[%s2575_s1 + $0x338] sm:$0xff]  ;;  %2596 = vst [vmem:[#allocation10_spill] sm:$0xff] %v2054_v52  ;;  %v2059_v11 = vld [vmem:[%s2575_s1 + $0x3c0] sm:$0xff]  ;;  %v2077_v16 = vadd.f32 %v1804_v61, %v368_v28  ;;  %v2080_v57 = vadd.f32 %v1811_v2, %v370_v0  ;;  %v2090_v49 = vadd.f32 %v1798_v59, %v377_v40  ;;  %v2093_v27 = vadd.f32 %v1801_v60, %v379_v38 }
  0x37   : > { %2593 = vst [vmem:[#allocation7_spill] sm:$0xff] %v2027_v58  ;;  %2594 = vst [vmem:[#allocation8_spill] sm:$0xff] %v2032_v62  ;;  %v2064_v1 = vld [vmem:[%s2575_s1 + $0x3c8] sm:$0xff]  ;;  %v294_v8 = vld [vmem:[%s1773_s22 + $0x100] sm:$0xff]  ;;  %vm476_vm7 = vcmp.ge.f32.partialorder %v1977_v23, 0.0  ;;  %vm483_vm8 = vcmp.ge.f32.partialorder %v1998_v33, 0.0 }
  0x38   : > { %2597 = vst [vmem:[#allocation11_spill] sm:$0xff] %v2059_v11  ;;  %2598 = vst [vmem:[#allocation12_spill] sm:$0xff] %v2064_v1  ;;  %v296_v60 = vld [vmem:[%s1773_s22 + $0x110] sm:$0xff]  ;;  %v376_v0 = vmul.f32 %v1788_v53, %v294_v8  ;;  %v2116_v28 = vld [vmem:[%s2575_s1 + $0x240] sm:$0xff]  ;;  %v2599_v1 = vsub.s32 5, %v1758_v43  ;;  %vm482_vm10 = vcmp.ge.f32.partialorder %v2042_v48, 0.0 }
  0x39   : > { %v2121_v11 = vld [vmem:[%s2575_s1 + $0x248] sm:$0xff]  ;;  %vm484_vm11 = vcmp.ge.f32.partialorder %v2045_v30, 0.0  ;;  %vm491_vm12 = vcmp.ge.f32.partialorder %v2067_v3, 0.0  ;;  %vm493_vm13 = vcmp.ge.f32.partialorder %v2070_v14, 0.0  ;;  %vm490_vm14 = vcmp.ge.f32.partialorder %v2077_v16, 0.0 }
  0x3a   : > { %v2126_v50 = vrot.slane %v1765_v45, %v2599_v1  ;;  %vm492_vm15 = vcmp.ge.f32.partialorder %v2080_v57, 0.0 }
  0x90   : > { %v2087_v55 = vpop.permute.xlu0 %513 }
  0x91   : > { %v517_v26 = vmul.f32 %v2087_v55, %v1860_v17  ;;  %v519_v36 = vmul.f32 %v2087_v55, %v1863_v18  ;;  %v516_v58 = vmul.f32 %v2087_v55, %v1866_v19  ;;  %v518_v59 = vmul.f32 %v2087_v55, %v1869_v20 }
  0x92   : > { %v525_v38 = vmul.f32 %v2087_v55, %v1899_v31  ;;  %v527_v40 = vmul.f32 %v2087_v55, %v1918_v39  ;;  %v524_v1 = vmul.f32 %v2087_v55, %v1974_v15 }
  0x93   : > { %v557_v52 = vsel %vm467_vm0, %v1860_v17, %v517_v26  ;;  %v559_v53 = vsel %vm469_vm1, %v1863_v18, %v519_v36  ;;  %v556_v8 = vsel %vm466_vm2, %v1866_v19, %v516_v58  ;;  %v558_v62 = vsel %vm468_vm3, %v1869_v20, %v518_v59  ;;  %v267_v26 = vld [vmem:[%s1773_s22 + $0x28] sm:$0xff] }
  0x94   : > { %795 = vmatprep.mubr.f32.mxu0 %v557_v52  ;;  %885 = vmatprep.mubr.f32.mxu1 %v559_v53  ;;  %v526_v17 = vmul.f32 %v2087_v55, %v1977_v23  ;;  %v378_v18 = vmul.f32 %v1791_v54, %v296_v60  ;;  %v565_v19 = vsel %vm475_vm4, %v1899_v31, %v525_v38  ;;  %v2600_v58 = vsub.s32 7, %v1758_v43  ;;  %v269_v60 = vld [vmem:[%s1773_s22 + $0x38] sm:$0xff] }
  0x95   : > { %796 = vmatmul.mubr.f32.vlgmr.msra.gmra.mrb[0].mxu0 %v556_v8  ;;  %886 = vmatmul.mubr.f32.vlgmr.msra.gmra.mrb[0].mxu1 %v558_v62  ;;  %v1436_v20 = vpack.c.bf16 %v2121_v11, %v2116_v28  ;;  %v2601_v54 = vpack.c.bf16 %v1822_v5, %v1817_v4  ;;  %v2602_v62 = vpack.c.bf16 %v1832_v7, %v1827_v6  ;;  %v2603_v6 = vsub.s32 5, %v1758_v43  ;;  %v283_v28 = vld [vmem:[%s1773_s22 + $0xa8] sm:$0xff] }
  0x96   : > { %v2156_v52 = vrot.slane %v1765_v45, %v2600_v58  ;;  %v567_v31 = vsel %vm477_vm5, %v1918_v39, %v527_v40  ;;  %v533_v36 = vmul.f32 %v2087_v55, %v1998_v33  ;;  %v535_v59 = vmul.f32 %v2087_v55, %v2020_v46  ;;  %800 = vmatprep.mubr.f32.mxu0 %v565_v19 }
  0x97   : > { %1421 = vmatpush3.bf16.msra.mxu0 %v2601_v54  ;;  %1453 = vmatpush3.bf16.msra.mxu1 %v2602_v62  ;;  %v532_v4 = vmul.f32 %v2087_v55, %v2042_v48  ;;  %v349_v5 = vmul.f32 %v2126_v50, %v267_v26  ;;  %v2180_v7 = vrot.slane %v1782_v51, %v2603_v6  ;;  %v2614_v54 = vld [vmem:[#allocation5_spill] sm:$0xff]  ;;  %vm499_vm0 = vcmp.ge.f32.partialorder %v2090_v49, 0.0 }
  0x98   : > { %890 = vmatprep.mubr.f32.mxu1 %v567_v31  ;;  %v2604_v39 = vpack.c.bf16 %v1843_v10, %v1838_v9  ;;  %v2605_v38 = vpack.c.bf16 %v1854_v13, %v1849_v12  ;;  %v564_v40 = vsel %vm474_vm6, %v1974_v15, %v524_v1  ;;  %v566_v53 = vsel %vm476_vm7, %v1977_v23, %v526_v17 }
  0x99   : > { %v534_v8 = vmul.f32 %v2087_v55, %v2045_v30  ;;  %801 = vmatmul.mubr.f32.gmra.mrb[2].mxu0 %v564_v40  ;;  %891 = vmatmul.mubr.f32.gmra.mrb[2].mxu1 %v566_v53  ;;  %v541_v9 = vmul.f32 %v2087_v55, %v2067_v3  ;;  %v351_v10 = vmul.f32 %v2156_v52, %v269_v60  ;;  %v2297_v60 = vld [vmem:[%s2575_s1 + $0x3d8] sm:$0xff]  ;;  %vm501_vm1 = vcmp.ge.f32.partialorder %v2093_v27, 0.0 }
  0x9a   : > { %1423 = vmatprep.subr.bf16.mxu0 %v2604_v39  ;;  %1455 = vmatprep.subr.bf16.mxu1 %v2605_v38  ;;  %v2606_v12 = vmov %v2600_v58  ;;  %v2607_v15 = vpack.c.bf16 %v1879_v22, %v1874_v21  ;;  %v2608_v23 = vpack.c.bf16 %v1890_v25, %v1885_v24  ;;  %v573_v1 = vsel %vm483_vm8, %v1998_v33, %v533_v36  ;;  %v2234_v25 = vld [vmem:[%s2575_s1 + $0x340] sm:$0xff]  ;;  %v2613_v58 = vld [vmem:[#allocation6_spill] sm:$0xff] }
  0x9b   : > { %v2204_v13 = vrot.slane %v1782_v51, %v2606_v12  ;;  %v575_v17 = vsel %vm485_vm9, %v2020_v46, %v535_v59  ;;  %v543_v26 = vmul.f32 %v2087_v55, %v2070_v14  ;;  %805 = vmatprep.mubr.f32.mxu0 %v573_v1  ;;  %v572_v21 = vsel %vm482_vm10, %v2042_v48, %v532_v4 }
  0x9c   : > { %1425 = vmatpush3.bf16.msra.mxu0 %v2607_v15  ;;  %1457 = vmatpush3.bf16.msra.mxu1 %v2608_v23  ;;  %v2226_v22 = vadd.f32 %v1804_v61, %v376_v0  ;;  %v2229_v24 = vadd.f32 %v1811_v2, %v378_v18  ;;  %v2609_v33 = vpack.c.bf16 %v1911_v35, %v1906_v34  ;;  %v2253_v34 = vld [vmem:[%s2575_s1 + $0x348] sm:$0xff]  ;;  %v2258_v35 = vld [vmem:[%s2575_s1 + $0x2d0] sm:$0xff]  ;;  %v2618_v53 = vsub.s32 4, %v1758_v43 }
  0x9d   : > { %895 = vmatprep.mubr.f32.mxu1 %v575_v17  ;;  %v2610_v48 = vpack.c.bf16 %v1931_v44, %v1926_v42  ;;  %v574_v61 = vsel %vm484_vm11, %v2045_v30, %v534_v8  ;;  %v540_v2 = vmul.f32 %v2087_v55, %v2077_v16  ;;  %v542_v46 = vmul.f32 %v2087_v55, %v2080_v57  ;;  %v2263_v30 = vld [vmem:[%s2575_s1 + $0x2d8] sm:$0xff]  ;;  %v2611_v18 = vld [vmem:[#allocation4_spill] sm:$0xff] }
  0x9e   : > { %1427 = vmatprep.subr.bf16.mxu0 %v2609_v33  ;;  %806 = vmatmul.mubr.f32.gmra.mrb[4].mxu0 %v572_v21  ;;  %v549_v42 = vmul.f32 %v2087_v55, %v2090_v49  ;;  %v2269_v44 = vadd.f32 %v2180_v7, %v349_v5  ;;  %v2272_v0 = vadd.f32 %v2204_v13, %v351_v10  ;;  %vm498_vm2 = vcmp.ge.f32.partialorder %v2226_v22, 0.0  ;;  %v2621_v10 = vld [vmem:[#allocation7_spill] sm:$0xff]  ;;  %v275_v33 = vld [vmem:[%s1773_s22 + $0x68] sm:$0xff] }
  0x9f   : > { %1459 = vmatprep.subr.bf16.mxu1 %v2610_v48  ;;  %896 = vmatmul.mubr.f32.gmra.mrb[4].mxu1 %v574_v61  ;;  %v2612_v19 = vpack.c.bf16 %v1950_v56, %v2611_v18  ;;  %v2615_v62 = vpack.c.bf16 %v2613_v58, %v2614_v54  ;;  %v581_v31 = vsel %vm491_vm12, %v2067_v3, %v541_v9  ;;  %v2292_v56 = vld [vmem:[%s2575_s1 + $0x3d0] sm:$0xff]  ;;  %vm500_vm3 = vcmp.ge.f32.partialorder %v2229_v24, 0.0  ;;  %v2620_v9 = vld [vmem:[#allocation8_spill] sm:$0xff] }
  0xa0   : > { %v583_v36 = vsel %vm493_vm13, %v2070_v14, %v543_v26  ;;  %v551_v59 = vmul.f32 %v2087_v55, %v2093_v27  ;;  %810 = vmatprep.mubr.f32.mxu0 %v581_v31  ;;  %v548_v3 = vmul.f32 %v2087_v55, %v2226_v22  ;;  %v1468_v14 = vpack.c.bf16 %v2253_v34, %v2234_v25  ;;  %v266_v17 = vld [vmem:[%s1773_s22 + $0x20] sm:$0xff]  ;;  %v2624_v48 = vld [vmem:[#allocation10_spill] sm:$0xff]  ;;  %v2625_v61 = vld [vmem:[#allocation9_spill] sm:$0xff] }
  0xa1   : > { %1429 = vmatpush3.bf16.msra.mxu0 %v2612_v19  ;;  %1461 = vmatpush3.bf16.msra.mxu1 %v2615_v62  ;;  %v1438_v4 = vpack.c.bf16 %v2263_v30, %v2258_v35  ;;  %v2616_v5 = vpack.c.bf16 %v1989_v29, %v1984_v37  ;;  %v2617_v6 = vpack.c.bf16 %v2005_v47, %v1994_v32  ;;  %v2324_v29 = vld [vmem:[%s2575_s1 + $0x250] sm:$0xff]  ;;  %v2329_v37 = vld [vmem:[%s2575_s1 + $0x258] sm:$0xff]  ;;  %vm471_vm4 = vcmp.ge.f32.partialorder %v2269_v44, 0.0  ;;  %v720_v26 = vld [vmem:[%s2575_s1 + $0x3e0] sm:$0xff] }
  0xa2   : > { %900 = vmatprep.mubr.f32.mxu1 %v583_v36  ;;  %v580_v39 = vsel %vm490_vm14, %v2077_v16, %v540_v2  ;;  %v582_v38 = vsel %vm492_vm15, %v2080_v57, %v542_v46  ;;  %v550_v40 = vmul.f32 %v2087_v55, %v2229_v24  ;;  %v589_v16 = vsel %vm499_vm0, %v2090_v49, %v549_v42  ;;  %v2340_v32 = vld [vmem:[%s2575_s1 + $0x350] sm:$0xff]  ;;  %v2345_v47 = vld [vmem:[%s2575_s1 + $0x358] sm:$0xff]  ;;  %v2627_v46 = vld [vmem:[#allocation12_spill] sm:$0xff] }
  0xa3   : > { %1431 = vmatprep.subr.bf16.mxu0 %v2616_v5  ;;  %1463 = vmatprep.subr.bf16.mxu1 %v2617_v6  ;;  %v1470_v57 = vpack.c.bf16 %v2297_v60, %v2292_v56  ;;  %v2350_v8 = vrot.slane %v1765_v45, %v2618_v53  ;;  %v2619_v49 = vpack.c.bf16 %v2017_v41, %v2012_v63  ;;  %v2368_v63 = vld [vmem:[%s2575_s1 + $0x2e0] sm:$0xff]  ;;  %v689_v41 = vld [vmem:[%s2575_s1 + $0x2e8] sm:$0xff]  ;;  %vm473_vm5 = vcmp.ge.f32.partialorder %v2272_v0, 0.0  ;;  %v268_v62 = vld [vmem:[%s1773_s22 + $0x30] sm:$0xff] }
  0xa4   : > { %811 = vmatmul.mubr.f32.gmra.mrb[6].mxu0 %v580_v39  ;;  %901 = vmatmul.mubr.f32.gmra.mrb[6].mxu1 %v582_v38  ;;  %v2622_v12 = vpack.c.bf16 %v2620_v9, %v2621_v10  ;;  %v591_v15 = vsel %vm501_vm1, %v2093_v27, %v551_v59  ;;  %v521_v23 = vmul.f32 %v2087_v55, %v2269_v44  ;;  %v2623_v21 = vsub.s32 6, %v1758_v43  ;;  %v2628_v34 = vld [vmem:[#allocation11_spill] sm:$0xff]  ;;  %v721_v58 = vld [vmem:[%s2575_s1 + $0x3e8] sm:$0xff]  ;;  %v276_v60 = vld [vmem:[%s1773_s22 + $0x70] sm:$0xff] }
  0xa5   : > { %1433 = vmatpush3.bf16.msra.mxu0 %v2619_v49  ;;  %v523_v1 = vmul.f32 %v2087_v55, %v2272_v0  ;;  %815 = vmatprep.mubr.f32.mxu0 %v589_v16  ;;  %v1440_v27 = vpack.c.bf16 %v2329_v37, %v2324_v29  ;;  %v2626_v2 = vpack.c.bf16 %v2624_v48, %v2625_v61  ;;  %v672_v54 = vld [vmem:[%s2575_s1 + $0x260] sm:$0xff]  ;;  %v277_v59 = vld [vmem:[%s1773_s22 + $0x78] sm:$0xff]  ;;  %v673_v6 = vld [vmem:[%s2575_s1 + $0x268] sm:$0xff] }
  0xa6   : > { %1465 = vmatpush3.bf16.msra.mxu1 %v2622_v12  ;;  %905 = vmatprep.mubr.f32.mxu1 %v591_v15  ;;  %v2384_v25 = vrot.slane %v1765_v45, %v2623_v21  ;;  %v2629_v42 = vpack.c.bf16 %v2627_v46, %v2628_v34  ;;  %v588_v18 = vsel %vm498_vm2, %v2226_v22, %v548_v3  ;;  %v274_v56 = vld [vmem:[%s1773_s22 + $0x60] sm:$0xff]  ;;  %v285_v29 = vld [vmem:[%s1773_s22 + $0xb8] sm:$0xff]  ;;  %v722_v16 = vld [vmem:[%s2575_s1 + $0x3f0] sm:$0xff] }
  0xa7   : > { %1435 = vmatprep.subr.bf16.mxu0 %v2626_v2  ;;  %v590_v45 = vsel %vm500_vm3, %v2229_v24, %v550_v40  ;;  %v1472_v19 = vpack.c.bf16 %v2345_v47, %v2340_v32  ;;  %v1442_v22 = vpack.c.bf16 %v689_v41, %v2368_v63  ;;  %v348_v31 = vmul.f32 %v2350_v8, %v266_v17  ;;  %v704_v39 = vld [vmem:[%s2575_s1 + $0x360] sm:$0xff]  ;;  %v691_v37 = vld [vmem:[%s2575_s1 + $0x2f8] sm:$0xff]  ;;  %v706_v9 = vld [vmem:[%s2575_s1 + $0x370] sm:$0xff] }
  0xa8   : > { %1467 = vmatprep.subr.bf16.mxu1 %v2629_v42  ;;  %816 = vmatmul.mubr.f32.gmra.mrb[8].mxu0 %v588_v18  ;;  %v2630_v24 = vmov %v2618_v53  ;;  %v561_v3 = vsel %vm471_vm4, %v2269_v44, %v521_v23  ;;  %v563_v5 = vsel %vm473_vm5, %v2272_v0, %v523_v1  ;;  %v357_v11 = vmul.f32 %v2126_v50, %v275_v33  ;;  %v705_v44 = vld [vmem:[%s2575_s1 + $0x368] sm:$0xff]  ;;  %v690_v0 = vld [vmem:[%s2575_s1 + $0x2f0] sm:$0xff]  ;;  %v723_v43 = vld [vmem:[%s2575_s1 + $0x3f8] sm:$0xff] }
  0xa9   : > { %906 = vmatmul.mubr.f32.gmra.mrb[8].mxu1 %v590_v45  ;;  %v2413_v36 = vrot.slane %v1782_v51, %v2630_v24  ;;  %1437 = vmatpush3.bf16.msra.mxu0 %v1436_v20  ;;  %v1474_v20 = vpack.c.bf16 %v721_v58, %v720_v26  ;;  %v2631_v38 = vmov %v2623_v21  ;;  %v356_v32 = vmul.f32 %v2350_v8, %v274_v56  ;;  %v675_v49 = vld [vmem:[%s2575_s1 + $0x278] sm:$0xff]  ;;  %v282_v41 = vld [vmem:[%s1773_s22 + $0xa0] sm:$0xff]  ;;  %v284_v17 = vld [vmem:[%s1773_s22 + $0xb0] sm:$0xff] }
  0xaa   : > { %1469 = vmatpush3.bf16.msra.mxu1 %v1468_v14  ;;  %975 = vmatprep.mubr.f32.mxu0 %v561_v3  ;;  %v350_v14 = vmul.f32 %v2384_v25, %v268_v62  ;;  %v2445_v40 = vrot.slane %v1782_v51, %v2631_v38  ;;  %v359_v51 = vmul.f32 %v2156_v52, %v277_v59  ;;  %v707_v10 = vld [vmem:[%s2575_s1 + $0x378] sm:$0xff]  ;;  %v291_v33 = vld [vmem:[%s1773_s22 + $0xe8] sm:$0xff]  ;;  %v290_v45 = vld [vmem:[%s1773_s22 + $0xe0] sm:$0xff] }
  0xab   : > { %1065 = vmatprep.mubr.f32.mxu1 %v563_v5  ;;  %1439 = vmatprep.subr.bf16.mxu0 %v1438_v4  ;;  %v358_v35 = vmul.f32 %v2384_v25, %v276_v60  ;;  %v1444_v30 = vpack.c.bf16 %v673_v6, %v672_v54  ;;  %v674_v4 = vld [vmem:[%s2575_s1 + $0x270] sm:$0xff]  ;;  %v365_v47 = vmul.f32 %v2126_v50, %v283_v28  ;;  %v293_v48 = vld [vmem:[%s1773_s22 + $0xf8] sm:$0xff] }
  0xac   : > { %1471 = vmatprep.subr.bf16.mxu1 %v1470_v57  ;;  %v430_v57 = vadd.f32 %v2413_v36, %v348_v31  ;;  %v1476_v53 = vpack.c.bf16 %v705_v44, %v704_v39  ;;  %v439_v12 = vadd.f32 %v2180_v7, %v357_v11  ;;  %v367_v15 = vmul.f32 %v2156_v52, %v285_v29  ;;  %v301_v24 = vld [vmem:[%s1773_s22 + $0x138] sm:$0xff] }
  0xad   : > { %1441 = vmatpush3.bf16.msra.mxu0 %v1440_v27  ;;  %v1446_v23 = vpack.c.bf16 %v691_v37, %v690_v0  ;;  %v1478_v1 = vpack.c.bf16 %v723_v43, %v722_v16  ;;  %v432_v63 = vadd.f32 %v2445_v40, %v350_v14  ;;  %v441_v27 = vadd.f32 %v2204_v13, %v359_v51  ;;  %v298_v37 = vld [vmem:[%s1773_s22 + $0x120] sm:$0xff] }
  0xae   : > { %1473 = vmatpush3.bf16.msra.mxu1 %v1472_v19  ;;  %1443 = vmatprep.subr.bf16.mxu0 %v1442_v22  ;;  %v2484_v26 = vadd.f32 %v2413_v36, %v356_v32  ;;  %v2487_v21 = vadd.f32 %v2445_v40, %v358_v35  ;;  %v1448_v61 = vpack.c.bf16 %v675_v49, %v674_v4  ;;  %vm470_vm6 = vcmp.ge.f32.partialorder %v430_v57, 0.0  ;;  %v292_v19 = vld [vmem:[%s1773_s22 + $0xf0] sm:$0xff]  ;;  %v299_v22 = vld [vmem:[%s1773_s22 + $0x128] sm:$0xff] }
  0xaf   : > { %1475 = vmatprep.subr.bf16.mxu1 %v1474_v20  ;;  %v1480_v2 = vpack.c.bf16 %v707_v10, %v706_v9  ;;  %v447_v46 = vadd.f32 %v2180_v7, %v365_v47  ;;  %vm479_vm7 = vcmp.ge.f32.partialorder %v439_v12, 0.0  ;;  %v449_v34 = vadd.f32 %v2204_v13, %v367_v15 }
  0xb0   : > { %v364_v42 = vmul.f32 %v2350_v8, %v282_v41  ;;  %v366_v18 = vmul.f32 %v2384_v25, %v284_v17  ;;  %v520_v58 = vmul.f32 %v2087_v55, %v430_v57  ;;  %vm472_vm8 = vcmp.ge.f32.partialorder %v432_v63, 0.0 }
  0xb1   : > { %1445 = vmatpush3.bf16.msra.mxu0 %v1444_v30  ;;  %v373_v54 = vmul.f32 %v2126_v50, %v291_v33  ;;  %v375_v62 = vmul.f32 %v2156_v52, %v293_v48  ;;  %v522_v31 = vmul.f32 %v2087_v55, %v432_v63  ;;  %vm481_vm9 = vcmp.ge.f32.partialorder %v441_v27, 0.0 }
  0xb2   : > { %1477 = vmatpush3.bf16.msra.mxu1 %v1476_v53  ;;  %1447 = vmatprep.subr.bf16.mxu0 %v1446_v23  ;;  %vm478_vm10 = vcmp.ge.f32.partialorder %v2484_v26, 0.0  ;;  %vm480_vm11 = vcmp.ge.f32.partialorder %v2487_v21, 0.0  ;;  %v529_v59 = vmul.f32 %v2087_v55, %v439_v12  ;;  %v531_v56 = vmul.f32 %v2087_v55, %v441_v27 }
  0xb3   : > { %1479 = vmatprep.subr.bf16.mxu1 %v1478_v1  ;;  %v372_v60 = vmul.f32 %v2350_v8, %v290_v45  ;;  %v374_v3 = vmul.f32 %v2384_v25, %v292_v19  ;;  %vm487_vm12 = vcmp.ge.f32.partialorder %v447_v46, 0.0  ;;  %v446_v5 = vadd.f32 %v2413_v36, %v364_v42 }
  0xb4   : > { %v448_v6 = vadd.f32 %v2445_v40, %v366_v18  ;;  %v381_v39 = vmul.f32 %v2126_v50, %v299_v22  ;;  %v560_v11 = vsel %vm470_vm6, %v430_v57, %v520_v58  ;;  %v455_v28 = vadd.f32 %v2180_v7, %v373_v54  ;;  %v300_v50 = vld [vmem:[%s1773_s22 + $0x130] sm:$0xff]  ;;  %v1162_v18 = vld [vmem:[#allocation2] ss:$0 sm:$0xff]  ;;  %s1160_s22 = sshll.u32 %s2633_s17, 3 }
  0xb5   : > { %1449 = vmatpush3.bf16.msra.mxu0 %v1448_v61  ;;  %v457_v20 = vadd.f32 %v2204_v13, %v375_v62  ;;  %v383_v44 = vmul.f32 %v2156_v52, %v301_v24  ;;  %v562_v0 = vsel %vm472_vm8, %v432_v63, %v522_v31  ;;  %v528_v14 = vmul.f32 %v2087_v55, %v2484_v26  ;;  %s2559_s8 = scalar_lea.vmem %s2579_s6, %s1160_s22 }
  0xb6   : > { %1481 = vmatpush3.bf16.msra.mxu1 %v1480_v2  ;;  %v530_v38 = vmul.f32 %v2087_v55, %v2487_v21  ;;  %v537_v29 = vmul.f32 %v2087_v55, %v447_v46  ;;  %v569_v16 = vsel %vm479_vm7, %v439_v12, %v529_v59  ;;  %v571_v43 = vsel %vm481_vm9, %v441_v27, %v531_v56 }
  0xb7   : > { %vm489_vm13 = vcmp.ge.f32.partialorder %v449_v34, 0.0  ;;  %v539_v52 = vmul.f32 %v2087_v55, %v449_v34  ;;  %vm486_vm14 = vcmp.ge.f32.partialorder %v446_v5, 0.0  ;;  %v454_v51 = vadd.f32 %v2413_v36, %v372_v60 }
  0xb8   : > { %976 = vmatmul.mubr.f32.vlgmr.msra.gmra.mrb[10].mxu0 %v560_v11  ;;  %v456_v32 = vadd.f32 %v2445_v40, %v374_v3  ;;  %v463_v35 = vadd.f32 %v2180_v7, %v381_v39  ;;  %v536_v30 = vmul.f32 %v2087_v55, %v446_v5  ;;  %v465_v4 = vadd.f32 %v2204_v13, %v383_v44 }
  0xb9   : > { %1066 = vmatmul.mubr.f32.vlgmr.msra.gmra.mrb[10].mxu1 %v562_v0  ;;  %980 = vmatprep.mubr.f32.mxu0 %v569_v16  ;;  %v380_v57 = vmul.f32 %v2350_v8, %v298_v37  ;;  %v382_v47 = vmul.f32 %v2384_v25, %v300_v50  ;;  %v568_v53 = vsel %vm478_vm10, %v2484_v26, %v528_v14  ;;  %vm488_vm15 = vcmp.ge.f32.partialorder %v448_v6, 0.0 }
  0xba   : > { %1070 = vmatprep.mubr.f32.mxu1 %v571_v43  ;;  %v570_v49 = vsel %vm480_vm11, %v2487_v21, %v530_v38  ;;  %v577_v9 = vsel %vm487_vm12, %v447_v46, %v537_v29  ;;  %v538_v7 = vmul.f32 %v2087_v55, %v448_v6  ;;  %v579_v13 = vsel %vm489_vm13, %v449_v34, %v539_v52 }
  0xbb   : > { %v545_v8 = vmul.f32 %v2087_v55, %v455_v28  ;;  %v547_v25 = vmul.f32 %v2087_v55, %v457_v20  ;;  %vm495_vm0 = vcmp.ge.f32.partialorder %v455_v28, 0.0  ;;  %vm497_vm1 = vcmp.ge.f32.partialorder %v457_v20, 0.0 }
  0xbc   : > { %981 = vmatmul.mubr.f32.gmra.mrb[12].mxu0 %v568_v53  ;;  %v576_v10 = vsel %vm486_vm14, %v446_v5, %v536_v30  ;;  %vm494_vm2 = vcmp.ge.f32.partialorder %v454_v51, 0.0  ;;  %v462_v12 = vadd.f32 %v2413_v36, %v380_v57  ;;  %v464_v15 = vadd.f32 %v2445_v40, %v382_v47 }
  0xbd   : > { %1071 = vmatmul.mubr.f32.gmra.mrb[12].mxu1 %v570_v49  ;;  %985 = vmatprep.mubr.f32.mxu0 %v577_v9  ;;  %v578_v23 = vsel %vm488_vm15, %v448_v6, %v538_v7  ;;  %v544_v1 = vmul.f32 %v2087_v55, %v454_v51  ;;  %v546_v63 = vmul.f32 %v2087_v55, %v456_v32  ;;  %vm496_vm3 = vcmp.ge.f32.partialorder %v456_v32, 0.0 }
  0xbe   : > { %1075 = vmatprep.mubr.f32.mxu1 %v579_v13  ;;  %v553_v41 = vmul.f32 %v2087_v55, %v463_v35  ;;  %v585_v17 = vsel %vm495_vm0, %v455_v28, %v545_v8  ;;  %v587_v27 = vsel %vm497_vm1, %v457_v20, %v547_v25  ;;  %v555_v26 = vmul.f32 %v2087_v55, %v465_v4 }
  0xbf   : > { %vm503_vm4 = vcmp.ge.f32.partialorder %v463_v35, 0.0  ;;  %vm505_vm5 = vcmp.ge.f32.partialorder %v465_v4, 0.0  ;;  %v584_v36 = vsel %vm494_vm2, %v454_v51, %v544_v1  ;;  %v586_v40 = vsel %vm496_vm3, %v456_v32, %v546_v63 }
  0xc0   : > { %986 = vmatmul.mubr.f32.gmra.mrb[14].mxu0 %v576_v10  ;;  %v552_v21 = vmul.f32 %v2087_v55, %v462_v12  ;;  %v554_v33 = vmul.f32 %v2087_v55, %v464_v15  ;;  %v593_v48 = vsel %vm503_vm4, %v463_v35, %v553_v41  ;;  %v595_v61 = vsel %vm505_vm5, %v465_v4, %v555_v26 }
  0xc1   : > { %1076 = vmatmul.mubr.f32.gmra.mrb[14].mxu1 %v578_v23  ;;  %990 = vmatprep.mubr.f32.mxu0 %v585_v17  ;;  %vm502_vm6 = vcmp.ge.f32.partialorder %v462_v12, 0.0  ;;  %vm504_vm7 = vcmp.ge.f32.partialorder %v464_v15, 0.0  ;;  %vm1091_vm8 = vcmask 7168  }
  0xc2   : > { %1080 = vmatprep.mubr.f32.mxu1 %v587_v27  ;;  %v592_v2 = vsel %vm502_vm6, %v462_v12, %v552_v21  ;;  %v594_v46 = vsel %vm504_vm7, %v464_v15, %v554_v33 }
  0xc4   : > { %991 = vmatmul.mubr.f32.gmra.mrb[16].mxu0 %v584_v36 }
  0xc5   : > { %1081 = vmatmul.mubr.f32.gmra.mrb[16].mxu1 %v586_v40  ;;  %995 = vmatprep.mubr.f32.mxu0 %v593_v48 }
  0xc6   : > { %1085 = vmatprep.mubr.f32.mxu1 %v595_v61 }
  0xc8   : > { %996 = vmatmul.mubr.f32.gmra.mrb[18].mxu0 %v592_v2 }
  0xc9   : > { %1086 = vmatmul.mubr.f32.gmra.mrb[18].mxu1 %v594_v46 }
 0x168   : > { %v1198_v34 = vpop.f32.mrb[0].mxu0  ;;  %v1245_v42 = vpop.f32.mrb[0].mxu1 }
 0x169   : > { %v1199_v45 = vpop.f32.mrb[1].mxu0  ;;  %v1246_v19 = vpop.f32.mrb[1].mxu1 }
 0x16a   : > { %v1200_v58 = vadd.f32 %v1199_v45, %v1198_v34  ;;  %v1247_v54 = vadd.f32 %v1246_v19, %v1245_v42 }
 0x16c   : > { %v798_v55 = vadd.f32 %v1200_v58, %v1162_v18  ;;  %v1201_v62 = vpop.f32.mrb[2].mxu0  ;;  %v1248_v22 = vpop.f32.mrb[2].mxu1 }
 0x16d   : > { %v1202_v31 = vpop.f32.mrb[3].mxu0  ;;  %v1249_v24 = vpop.f32.mrb[3].mxu1 }
 0x16e   : > { %v888_v59 = vadd.f32 %v1247_v54, %v798_v55  ;;  %v1203_v56 = vadd.f32 %v1202_v31, %v1201_v62  ;;  %v1250_v60 = vadd.f32 %v1249_v24, %v1248_v22 }
 0x170   : > { %v803_v3 = vadd.f32 %v1203_v56, %v1162_v18 }
 0x171   : > { %v1204_v5 = vpop.f32.mrb[4].mxu0 }
 0x172   : > { %v1251_v6 = vpop.f32.mrb[4].mxu1  ;;  %v1205_v39 = vpop.f32.mrb[5].mxu0  ;;  %v893_v28 = vadd.f32 %v1250_v60, %v803_v3 }
 0x173   : > { %v1252_v11 = vpop.f32.mrb[5].mxu1  ;;  %v1206_v20 = vadd.f32 %v1205_v39, %v1204_v5 }
 0x174   : > { %v1253_v44 = vadd.f32 %v1252_v11, %v1251_v6 }
 0x175   : > { %v808_v0 = vadd.f32 %v1206_v20, %v1162_v18 }
 0x177   : > { %v1207_v14 = vpop.f32.mrb[6].mxu0  ;;  %v1254_v38 = vpop.f32.mrb[6].mxu1  ;;  %v898_v50 = vadd.f32 %v1253_v44, %v808_v0 }
 0x178   : > { %v1208_v29 = vpop.f32.mrb[7].mxu0  ;;  %v1255_v37 = vpop.f32.mrb[7].mxu1 }
 0x179   : > { %v1209_v16 = vadd.f32 %v1208_v29, %v1207_v14  ;;  %v1256_v43 = vadd.f32 %v1255_v37, %v1254_v38 }
 0x17b   : > { %v813_v52 = vadd.f32 %v1209_v16, %v1162_v18  ;;  %v1210_v51 = vpop.f32.mrb[8].mxu0 }
 0x17c   : > { %v1257_v32 = vpop.f32.mrb[8].mxu1  ;;  %v1211_v35 = vpop.f32.mrb[9].mxu0 }
 0x17d   : > { %v1258_v30 = vpop.f32.mrb[9].mxu1  ;;  %v903_v4 = vadd.f32 %v1256_v43, %v813_v52  ;;  %v1212_v57 = vadd.f32 %v1211_v35, %v1210_v51 }
 0x17e   : > { %v1259_v47 = vadd.f32 %v1258_v30, %v1257_v32 }
 0x17f   : > { %v818_v53 = vadd.f32 %v1212_v57, %v1162_v18 }
 0x181   : > { %v908_v49 = vadd.f32 %v1259_v47, %v818_v53 }
 0x18b   : > { %v1292_v9 = vpop.f32.mrb[10].mxu0 }
 0x18c   : > { %v1339_v7 = vpop.f32.mrb[10].mxu1  ;;  %v1293_v13 = vpop.f32.mrb[11].mxu0 }
 0x18d   : > { %v1340_v8 = vpop.f32.mrb[11].mxu1  ;;  %v1294_v25 = vadd.f32 %v1293_v13, %v1292_v9 }
 0x18e   : > { %v1341_v10 = vadd.f32 %v1340_v8, %v1339_v7 }
 0x18f   : > { %v978_v12 = vadd.f32 %v1294_v25, %v888_v59  ;;  %v1295_v15 = vpop.f32.mrb[12].mxu0 }
 0x190   : > { %v1342_v23 = vpop.f32.mrb[12].mxu1  ;;  %v1296_v1 = vpop.f32.mrb[13].mxu0 }
 0x191   : > { %v1343_v63 = vpop.f32.mrb[13].mxu1  ;;  %v1068_v41 = vadd.f32 %v1341_v10, %v978_v12  ;;  %v1297_v17 = vadd.f32 %v1296_v1, %v1295_v15 }
 0x192   : > { %v1344_v27 = vadd.f32 %v1343_v63, %v1342_v23 }
 0x193   : > { %1092 = vst.msk [vmem:[%s2559_s8] sm:$0xff] %vm1091_vm8, %v1068_v41  ;;  %v983_v26 = vadd.f32 %v1297_v17, %v893_v28  ;;  %v1298_v36 = vpop.f32.mrb[14].mxu0 }
 0x194   : > { %v1345_v40 = vpop.f32.mrb[14].mxu1  ;;  %v1299_v21 = vpop.f32.mrb[15].mxu0 }
 0x195   : > { %v1346_v33 = vpop.f32.mrb[15].mxu1  ;;  %v1073_v48 = vadd.f32 %v1344_v27, %v983_v26  ;;  %v1300_v61 = vadd.f32 %v1299_v21, %v1298_v36 }
 0x196   : > { %v1347_v2 = vadd.f32 %v1346_v33, %v1345_v40 }
 0x197   : > { %1093 = vst.msk [vmem:[%s2559_s8 + $0x8] sm:$0xff] %vm1091_vm8, %v1073_v48  ;;  %v988_v46 = vadd.f32 %v1300_v61, %v898_v50  ;;  %v1301_v34 = vpop.f32.mrb[16].mxu0 }
 0x198   : > { %v1348_v42 = vpop.f32.mrb[16].mxu1  ;;  %v1302_v18 = vpop.f32.mrb[17].mxu0 }
 0x199   : > { %v1349_v45 = vpop.f32.mrb[17].mxu1  ;;  %v1078_v19 = vadd.f32 %v1347_v2, %v988_v46  ;;  %v1303_v58 = vadd.f32 %v1302_v18, %v1301_v34 }
 0x19a   : > { %v1350_v54 = vadd.f32 %v1349_v45, %v1348_v42 }
 0x19b   : > { %1094 = vst.msk [vmem:[%s2559_s8 + $0x10] sm:$0xff] %vm1091_vm8, %v1078_v19  ;;  %v993_v55 = vadd.f32 %v1303_v58, %v903_v4  ;;  %v1304_v62 = vpop.f32.mrb[18].mxu0 }
 0x19c   : > { %v1351_v22 = vpop.f32.mrb[18].mxu1  ;;  %v1305_v31 = vpop.f32.mrb[19].mxu0 }
 0x19d   : > { %v1352_v24 = vpop.f32.mrb[19].mxu1  ;;  %v1083_v59 = vadd.f32 %v1350_v54, %v993_v55  ;;  %v1306_v56 = vadd.f32 %v1305_v31, %v1304_v62 }
 0x19e   : > { %v1353_v60 = vadd.f32 %v1352_v24, %v1351_v22 }
 0x19f   : > { %1095 = vst.msk [vmem:[%s2559_s8 + $0x18] sm:$0xff] %vm1091_vm8, %v1083_v59  ;;  %v998_v3 = vadd.f32 %v1306_v56, %v908_v49 }
 0x1a1   : > { %v1088_v5 = vadd.f32 %v1353_v60, %v998_v3 }
 0x1a3   : > { %1096 = vst.msk [vmem:[%s2559_s8 + $0x20] sm:$0xff] %vm1091_vm8, %v1088_v5 }
 0x1a4 PF: > { %s20_s25 = sadd.s32 1, %s1498_s25  }
 0x1a5   : > { %p17_p4 = scmp.ge.s32.totalorder %s20_s25, 4  }
 0x1a7   :  { %19 = sbr.rel (!%p17_p4) target bundleno = 3 (0x3), region = 74 }

// kernel: _lambda_.19
= control target key start
LH: loop header
LB: loop body
LE: loop exit
PB: predicated region body
PF: predicated region fallthrough
CT: control target
= control target key end

     0   :  { %v862_v0 = vmov 0   ;;  %vm584_vm8 = vcmask 7168   ;;  %s1367_s5 = inlined_call_operand.<no memory space> [shape: f32[1,1], index: 5, kind: input, shape index: {}]   ;;  %s1368_s1 = inlined_call_operand.vmem [shape: f32[1024,1], index: 1, kind: input, shape index: {}]   ;;  %s1369_s3 = inlined_call_operand.vmem [shape: f32[1,1024], index: 3, kind: input, shape index: {}]   ;;  %s1370_s0 = inlined_call_operand.vmem [shape: f32[8,1024], index: 0, kind: input, shape index: {}]   ;;  %s1371_s4 = inlined_call_operand.vmem [shape: f32[1,1024], index: 4, kind: input, shape index: {}]   ;;  %s1372_s2 = inlined_call_operand.<no memory space> [shape: f32[1,1], index: 2, kind: input, shape index: {}]   ;;  %s1373_s6 = inlined_call_operand.vmem [shape: f32[8,1], index: 6, kind: output, shape index: {}]  }
   0x1   :  { %861 = vset.pattern.permute.xlu0 %v862_v0  ;;  %v13_v1 = vstv %s1367_s5  ;;  %v185_v2 = vld [vmem:[%s1368_s1 + $0x80] sm:$0xff]  ;;  %v186_v3 = vld [vmem:[%s1368_s1 + $0x88] sm:$0xff]  ;;  %v187_v13 = vld [vmem:[%s1368_s1 + $0x90] sm:$0xff] }
   0x2   :  { %v217_v4 = vld [vmem:[%s1368_s1 + $0x180] sm:$0xff]  ;;  %14 = vst [vmem:[#allocation3] sm:$0x1] %v13_v1  ;;  %v732_v5 = vpack.c.bf16 %v186_v3, %v185_v2  ;;  %v218_v6 = vld [vmem:[%s1368_s1 + $0x188] sm:$0xff]  ;;  %v188_v15 = vld [vmem:[%s1368_s1 + $0x98] sm:$0xff] }
   0x3   :  { %v169_v7 = vld [vmem:[%s1368_s1] sm:$0xff]  ;;  %v170_v8 = vld [vmem:[%s1368_s1 + $0x8] sm:$0xff]  ;;  %v764_v9 = vpack.c.bf16 %v218_v6, %v217_v4  ;;  %v219_v16 = vld [vmem:[%s1368_s1 + $0x190] sm:$0xff]  ;;  %v736_v18 = vpack.c.bf16 %v188_v15, %v187_v13 }
   0x4   :  { %v734_v10 = vpack.c.bf16 %v170_v8, %v169_v7  ;;  %v201_v11 = vld [vmem:[%s1368_s1 + $0x100] sm:$0xff]  ;;  %v202_v12 = vld [vmem:[%s1368_s1 + $0x108] sm:$0xff]  ;;  %733 = vmatprep.subr.bf16.mxu0 %v732_v5  ;;  %v220_v17 = vld [vmem:[%s1368_s1 + $0x198] sm:$0xff] }
   0x5   :  { %v766_v14 = vpack.c.bf16 %v202_v12, %v201_v11  ;;  %765 = vmatprep.subr.bf16.mxu1 %v764_v9  ;;  %v768_v19 = vpack.c.bf16 %v220_v17, %v219_v16  ;;  %v171_v20 = vld [vmem:[%s1368_s1 + $0x10] sm:$0xff]  ;;  %v172_v21 = vld [vmem:[%s1368_s1 + $0x18] sm:$0xff]  ;;  %v189_v25 = vld [vmem:[%s1368_s1 + $0xa0] sm:$0xff] }
   0x6   :  { %735 = vmatpush3.bf16.msra.mxu0 %v734_v10  ;;  %v203_v22 = vld [vmem:[%s1368_s1 + $0x110] sm:$0xff]  ;;  %v738_v23 = vpack.c.bf16 %v172_v21, %v171_v20  ;;  %v204_v24 = vld [vmem:[%s1368_s1 + $0x118] sm:$0xff]  ;;  %v190_v26 = vld [vmem:[%s1368_s1 + $0xa8] sm:$0xff] }
   0x7   :  { %767 = vmatpush3.bf16.msra.mxu1 %v766_v14  ;;  %737 = vmatprep.subr.bf16.mxu0 %v736_v18  ;;  %v770_v27 = vpack.c.bf16 %v204_v24, %v203_v22  ;;  %v740_v28 = vpack.c.bf16 %v190_v26, %v189_v25  ;;  %v221_v29 = vld [vmem:[%s1368_s1 + $0x1a0] sm:$0xff]  ;;  %v222_v30 = vld [vmem:[%s1368_s1 + $0x1a8] sm:$0xff]  ;;  %v191_v38 = vld [vmem:[%s1368_s1 + $0xb0] sm:$0xff] }
   0x8   :  { %769 = vmatprep.subr.bf16.mxu1 %v768_v19  ;;  %v173_v31 = vld [vmem:[%s1368_s1 + $0x20] sm:$0xff]  ;;  %v772_v32 = vpack.c.bf16 %v222_v30, %v221_v29  ;;  %v174_v33 = vld [vmem:[%s1368_s1 + $0x28] sm:$0xff]  ;;  %v192_v39 = vld [vmem:[%s1368_s1 + $0xb8] sm:$0xff] }
   0x9   :  { %v205_v34 = vld [vmem:[%s1368_s1 + $0x120] sm:$0xff]  ;;  %v206_v35 = vld [vmem:[%s1368_s1 + $0x128] sm:$0xff]  ;;  %v742_v37 = vpack.c.bf16 %v174_v33, %v173_v31  ;;  %v744_v41 = vpack.c.bf16 %v192_v39, %v191_v38  ;;  %v223_v42 = vld [vmem:[%s1368_s1 + $0x1b0] sm:$0xff] }
   0xa   :  { %v590_v36 = vld [vmem:[#allocation3] ss:$0 sm:$0xff]  ;;  %739 = vmatpush3.bf16.msra.mxu0 %v738_v23  ;;  %v774_v40 = vpack.c.bf16 %v206_v35, %v205_v34  ;;  %v224_v43 = vld [vmem:[%s1368_s1 + $0x1b8] sm:$0xff]  ;;  %v175_v44 = vld [vmem:[%s1368_s1 + $0x30] sm:$0xff] }
   0xb   :  { %150 = vperm.xlu0 %861, %v590_v36   ;;  %771 = vmatpush3.bf16.msra.mxu1 %v770_v27  ;;  %v776_v45 = vpack.c.bf16 %v224_v43, %v223_v42  ;;  %v176_v46 = vld [vmem:[%s1368_s1 + $0x38] sm:$0xff]  ;;  %v207_v47 = vld [vmem:[%s1368_s1 + $0x130] sm:$0xff]  ;;  %v193_v49 = vld [vmem:[%s1368_s1 + $0xc0] sm:$0xff] }
   0xc   :  { %741 = vmatprep.subr.bf16.mxu0 %v740_v28  ;;  %773 = vmatprep.subr.bf16.mxu1 %v772_v32  ;;  %v208_v48 = vld [vmem:[%s1368_s1 + $0x138] sm:$0xff]  ;;  %v194_v50 = vld [vmem:[%s1368_s1 + $0xc8] sm:$0xff]  ;;  %v225_v51 = vld [vmem:[%s1368_s1 + $0x1c0] sm:$0xff]  ;;  %v746_v52 = vpack.c.bf16 %v176_v46, %v175_v44 }
   0xd   :  { %v226_v53 = vld [vmem:[%s1368_s1 + $0x1c8] sm:$0xff]  ;;  %v778_v54 = vpack.c.bf16 %v208_v48, %v207_v47  ;;  %v748_v55 = vpack.c.bf16 %v194_v50, %v193_v49  ;;  %v177_v56 = vld [vmem:[%s1368_s1 + $0x40] sm:$0xff]  ;;  %v195_v61 = vld [vmem:[%s1368_s1 + $0xd0] sm:$0xff] }
   0xe   :  { %743 = vmatpush3.bf16.msra.mxu0 %v742_v37  ;;  %v178_v57 = vld [vmem:[%s1368_s1 + $0x48] sm:$0xff]  ;;  %v209_v58 = vld [vmem:[%s1368_s1 + $0x140] sm:$0xff]  ;;  %v780_v59 = vpack.c.bf16 %v226_v53, %v225_v51  ;;  %v196_v62 = vld [vmem:[%s1368_s1 + $0xd8] sm:$0xff] }
   0xf   :  { %775 = vmatpush3.bf16.msra.mxu1 %v774_v40  ;;  %745 = vmatprep.subr.bf16.mxu0 %v744_v41  ;;  %v210_v60 = vld [vmem:[%s1368_s1 + $0x148] sm:$0xff]  ;;  %v227_v63 = vld [vmem:[%s1368_s1 + $0x1d0] sm:$0xff]  ;;  %v228_v0 = vld [vmem:[%s1368_s1 + $0x1d8] sm:$0xff]  ;;  %v750_v1 = vpack.c.bf16 %v178_v57, %v177_v56  ;;  %v752_v3 = vpack.c.bf16 %v196_v62, %v195_v61  ;;  %v37_v41 = vlaneseq }
  0x10   :  { %777 = vmatprep.subr.bf16.mxu1 %v776_v45  ;;  %v782_v2 = vpack.c.bf16 %v210_v60, %v209_v58  ;;  %v179_v4 = vld [vmem:[%s1368_s1 + $0x50] sm:$0xff]  ;;  %v180_v5 = vld [vmem:[%s1368_s1 + $0x58] sm:$0xff]  ;;  %v784_v7 = vpack.c.bf16 %v228_v0, %v227_v63  ;;  %v197_v9 = vld [vmem:[%s1368_s1 + $0xe0] sm:$0xff] }
  0x11   :  { %v211_v6 = vld [vmem:[%s1368_s1 + $0x150] sm:$0xff]  ;;  %v212_v8 = vld [vmem:[%s1368_s1 + $0x158] sm:$0xff]  ;;  %v198_v10 = vld [vmem:[%s1368_s1 + $0xe8] sm:$0xff]  ;;  %v754_v13 = vpack.c.bf16 %v180_v5, %v179_v4  ;;  %v1105_v42 = vshrl.u32 %v37_v41, 7 }
  0x12   :  { %747 = vmatpush3.bf16.msra.mxu0 %v746_v52  ;;  %v229_v11 = vld [vmem:[%s1368_s1 + $0x1e0] sm:$0xff]  ;;  %v230_v12 = vld [vmem:[%s1368_s1 + $0x1e8] sm:$0xff]  ;;  %v786_v14 = vpack.c.bf16 %v212_v8, %v211_v6  ;;  %v756_v15 = vpack.c.bf16 %v198_v10, %v197_v9  ;;  %v199_v21 = vld [vmem:[%s1368_s1 + $0xf0] sm:$0xff] }
  0x13   :  { %779 = vmatpush3.bf16.msra.mxu1 %v778_v54  ;;  %749 = vmatprep.subr.bf16.mxu0 %v748_v55  ;;  %v181_v16 = vld [vmem:[%s1368_s1 + $0x60] sm:$0xff]  ;;  %v182_v17 = vld [vmem:[%s1368_s1 + $0x68] sm:$0xff]  ;;  %v788_v19 = vpack.c.bf16 %v230_v12, %v229_v11  ;;  %v200_v22 = vld [vmem:[%s1368_s1 + $0xf8] sm:$0xff]  ;;  %v43_v43 = vsub.s32 1, %v1105_v42  ;;  %v51_v45 = vsub.s32 3, %v1105_v42  ;;  %v39_v46 = vsub.s32 0, %v1105_v42 }
  0x14   :  { %781 = vmatprep.subr.bf16.mxu1 %v780_v59  ;;  %v213_v18 = vld [vmem:[%s1368_s1 + $0x160] sm:$0xff]  ;;  %v214_v20 = vld [vmem:[%s1368_s1 + $0x168] sm:$0xff]  ;;  %v231_v23 = vld [vmem:[%s1368_s1 + $0x1f0] sm:$0xff]  ;;  %v758_v25 = vpack.c.bf16 %v182_v17, %v181_v16  ;;  %v760_v27 = vpack.c.bf16 %v200_v22, %v199_v21  ;;  %v47_v47 = vsub.s32 2, %v1105_v42  ;;  %v59_v48 = vsub.s32 5, %v1105_v42 }
  0x15   :  { %v232_v24 = vld [vmem:[%s1368_s1 + $0x1f8] sm:$0xff]  ;;  %v790_v26 = vpack.c.bf16 %v214_v20, %v213_v18  ;;  %v183_v28 = vld [vmem:[%s1368_s1 + $0x70] sm:$0xff]  ;;  %v249_v33 = vld [vmem:[%s1368_s1 + $0x280] sm:$0xff]  ;;  %v67_v49 = vsub.s32 7, %v1105_v42 }
  0x16   :  { %751 = vmatpush3.bf16.msra.mxu0 %v750_v1  ;;  %v184_v29 = vld [vmem:[%s1368_s1 + $0x78] sm:$0xff]  ;;  %v215_v30 = vld [vmem:[%s1368_s1 + $0x170] sm:$0xff]  ;;  %v792_v31 = vpack.c.bf16 %v232_v24, %v231_v23  ;;  %v250_v34 = vld [vmem:[%s1368_s1 + $0x288] sm:$0xff] }
  0x17   :  { %783 = vmatpush3.bf16.msra.mxu1 %v782_v2  ;;  %753 = vmatprep.subr.bf16.mxu0 %v752_v3  ;;  %v216_v32 = vld [vmem:[%s1368_s1 + $0x178] sm:$0xff]  ;;  %v281_v35 = vld [vmem:[%s1368_s1 + $0x380] sm:$0xff]  ;;  %v282_v36 = vld [vmem:[%s1368_s1 + $0x388] sm:$0xff]  ;;  %v762_v37 = vpack.c.bf16 %v184_v29, %v183_v28  ;;  %v796_v39 = vpack.c.bf16 %v250_v34, %v249_v33 }
  0x18   :  { %785 = vmatprep.subr.bf16.mxu1 %v784_v7  ;;  %v794_v38 = vpack.c.bf16 %v216_v32, %v215_v30  ;;  %v828_v40 = vpack.c.bf16 %v282_v36, %v281_v35  ;;  %v1111_v44 = vld [vmem:[%s1369_s3] sm:$0xff]  ;;  %v28_v51 = vld [vmem:[%s1370_s0 + $0x8] sm:$0xff]  ;;  %v30_v56 = vld [vmem:[%s1370_s0 + $0x18] sm:$0xff] }
  0x19   :  { %v44_v50 = vrot.slane %v1111_v44, %v43_v43  ;;  %v1125_v52 = vld [vmem:[%s1371_s4] sm:$0xff]  ;;  %v52_v53 = vrot.slane %v1111_v44, %v51_v45  ;;  %v40_v54 = vrot.slane %v1111_v44, %v39_v46  ;;  %v48_v55 = vrot.slane %v1111_v44, %v47_v47  ;;  %v29_v58 = vld [vmem:[%s1370_s0 + $0x10] sm:$0xff]  ;;  %v32_v1 = vld [vmem:[%s1370_s0 + $0x28] sm:$0xff] }
  0x1a   :  { %755 = vmatpush3.bf16.msra.mxu0 %v754_v13  ;;  %v27_v57 = vld [vmem:[%s1370_s0] sm:$0xff]  ;;  %v60_v59 = vrot.slane %v1111_v44, %v59_v48  ;;  %v68_v60 = vrot.slane %v1111_v44, %v67_v49  ;;  %v94_v62 = vrot.slane %v1125_v52, %v43_v43  ;;  %v102_v63 = vrot.slane %v1125_v52, %v51_v45  ;;  %v34_v2 = vld [vmem:[%s1370_s0 + $0x38] sm:$0xff]  ;;  %v234_v16 = vld [vmem:[%s1368_s1 + $0x208] sm:$0xff] }
  0x1b   :  { %787 = vmatpush3.bf16.msra.mxu1 %v786_v14  ;;  %757 = vmatprep.subr.bf16.mxu0 %v756_v15  ;;  %v78_v61 = vmul.f32 %v44_v50, %v28_v51  ;;  %v90_v0 = vrot.slane %v1125_v52, %v39_v46  ;;  %v80_v3 = vmul.f32 %v52_v53, %v30_v56  ;;  %v233_v11 = vld [vmem:[%s1368_s1 + $0x200] sm:$0xff]  ;;  %v266_v18 = vld [vmem:[%s1368_s1 + $0x308] sm:$0xff]  ;;  %v251_v24 = vld [vmem:[%s1368_s1 + $0x290] sm:$0xff] }
  0x1c   :  { %789 = vmatprep.subr.bf16.mxu1 %v788_v19  ;;  %v77_v4 = vmul.f32 %v40_v54, %v27_v57  ;;  %v79_v5 = vmul.f32 %v48_v55, %v29_v58  ;;  %v98_v6 = vrot.slane %v1125_v52, %v47_v47  ;;  %v82_v7 = vmul.f32 %v60_v59, %v32_v1  ;;  %v265_v17 = vld [vmem:[%s1368_s1 + $0x300] sm:$0xff]  ;;  %v252_v29 = vld [vmem:[%s1368_s1 + $0x298] sm:$0xff]  ;;  %v283_v30 = vld [vmem:[%s1368_s1 + $0x390] sm:$0xff] }
  0x1d   :  { %v110_v8 = vrot.slane %v1125_v52, %v59_v48  ;;  %v84_v9 = vmul.f32 %v68_v60, %v34_v2  ;;  %v118_v10 = vrot.slane %v1125_v52, %v67_v49  ;;  %v128_v12 = vadd.f32 %v94_v62, %v78_v61  ;;  %v235_v34 = vld [vmem:[%s1368_s1 + $0x210] sm:$0xff]  ;;  %v236_v35 = vld [vmem:[%s1368_s1 + $0x218] sm:$0xff]  ;;  %v253_v43 = vld [vmem:[%s1368_s1 + $0x2a0] sm:$0xff] }
  0x1e   :  { %759 = vmatpush3.bf16.msra.mxu0 %v758_v25  ;;  %v130_v13 = vadd.f32 %v102_v63, %v80_v3  ;;  %v127_v14 = vadd.f32 %v90_v0, %v77_v4  ;;  %v129_v15 = vadd.f32 %v98_v6, %v79_v5  ;;  %v798_v21 = vpack.c.bf16 %v234_v16, %v233_v11  ;;  %v268_v41 = vld [vmem:[%s1368_s1 + $0x318] sm:$0xff]  ;;  %v254_v47 = vld [vmem:[%s1368_s1 + $0x2a8] sm:$0xff]  ;;  %v285_v48 = vld [vmem:[%s1368_s1 + $0x3a0] sm:$0xff] }
  0x1f   :  { %791 = vmatpush3.bf16.msra.mxu1 %v790_v26  ;;  %761 = vmatprep.subr.bf16.mxu0 %v760_v27  ;;  %v132_v19 = vadd.f32 %v110_v8, %v82_v7  ;;  %v134_v20 = vadd.f32 %v118_v10, %v84_v9  ;;  %v830_v22 = vpack.c.bf16 %v266_v18, %v265_v17  ;;  %vm136_vm0 = vcmp.ge.f32.partialorder %v128_v12, 0.0  ;;  %v286_v49 = vld [vmem:[%s1368_s1 + $0x3a8] sm:$0xff]  ;;  %v237_v55 = vld [vmem:[%s1368_s1 + $0x220] sm:$0xff]  ;;  %v255_v61 = vld [vmem:[%s1368_s1 + $0x2b0] sm:$0xff] }
  0x20   :  { %793 = vmatprep.subr.bf16.mxu1 %v792_v31  ;;  %vm138_vm1 = vcmp.ge.f32.partialorder %v130_v13, 0.0  ;;  %vm135_vm2 = vcmp.ge.f32.partialorder %v127_v14, 0.0  ;;  %vm137_vm3 = vcmp.ge.f32.partialorder %v129_v15, 0.0  ;;  %v284_v31 = vld [vmem:[%s1368_s1 + $0x398] sm:$0xff]  ;;  %v800_v45 = vpack.c.bf16 %v252_v29, %v251_v24  ;;  %v238_v56 = vld [vmem:[%s1368_s1 + $0x228] sm:$0xff]  ;;  %v269_v59 = vld [vmem:[%s1368_s1 + $0x320] sm:$0xff] }
  0x21   :  { %vm140_vm4 = vcmp.ge.f32.partialorder %v132_v19, 0.0  ;;  %vm142_vm5 = vcmp.ge.f32.partialorder %v134_v20, 0.0  ;;  %v832_v46 = vpack.c.bf16 %v284_v31, %v283_v30  ;;  %v802_v50 = vpack.c.bf16 %v236_v35, %v235_v34  ;;  %v270_v60 = vld [vmem:[%s1368_s1 + $0x328] sm:$0xff]  ;;  %v256_v62 = vld [vmem:[%s1368_s1 + $0x2b8] sm:$0xff]  ;;  %v287_v63 = vld [vmem:[%s1368_s1 + $0x3b0] sm:$0xff] }
  0x22   :  { %763 = vmatpush3.bf16.msra.mxu0 %v762_v37  ;;  %v804_v57 = vpack.c.bf16 %v254_v47, %v253_v43  ;;  %v836_v58 = vpack.c.bf16 %v286_v49, %v285_v48  ;;  %v288_v0 = vld [vmem:[%s1368_s1 + $0x3b8] sm:$0xff]  ;;  %v806_v1 = vpack.c.bf16 %v238_v56, %v237_v55  ;;  %v838_v2 = vpack.c.bf16 %v270_v60, %v269_v59  ;;  %v239_v3 = vld [vmem:[%s1368_s1 + $0x230] sm:$0xff]  ;;  %v257_v9 = vld [vmem:[%s1368_s1 + $0x2c0] sm:$0xff] }
  0x23   :  { %795 = vmatpush3.bf16.msra.mxu1 %v794_v38  ;;  %797 = vmatprep.subr.bf16.mxu0 %v796_v39  ;;  %v240_v4 = vld [vmem:[%s1368_s1 + $0x238] sm:$0xff]  ;;  %v808_v5 = vpack.c.bf16 %v256_v62, %v255_v61  ;;  %v840_v6 = vpack.c.bf16 %v288_v0, %v287_v63  ;;  %v271_v7 = vld [vmem:[%s1368_s1 + $0x330] sm:$0xff]  ;;  %v258_v10 = vld [vmem:[%s1368_s1 + $0x2c8] sm:$0xff] }
  0x24   :  { %829 = vmatprep.subr.bf16.mxu1 %v828_v40  ;;  %v267_v40 = vld [vmem:[%s1368_s1 + $0x310] sm:$0xff]  ;;  %v272_v8 = vld [vmem:[%s1368_s1 + $0x338] sm:$0xff]  ;;  %v289_v11 = vld [vmem:[%s1368_s1 + $0x3c0] sm:$0xff]  ;;  %v812_v17 = vpack.c.bf16 %v258_v10, %v257_v9 }
  0x25   :  { %v834_v54 = vpack.c.bf16 %v268_v41, %v267_v40  ;;  %v242_v16 = vld [vmem:[%s1368_s1 + $0x248] sm:$0xff]  ;;  %v291_v24 = vld [vmem:[%s1368_s1 + $0x3d0] sm:$0xff]  ;;  %v244_v31 = vld [vmem:[%s1368_s1 + $0x258] sm:$0xff] }
  0x26   :  { %v243_v30 = vld [vmem:[%s1368_s1 + $0x250] sm:$0xff]  ;;  %v276_v34 = vld [vmem:[%s1368_s1 + $0x358] sm:$0xff]  ;;  %v261_v35 = vld [vmem:[%s1368_s1 + $0x2e0] sm:$0xff] }
  0x27   :  { %v31_v41 = vld [vmem:[%s1370_s0 + $0x20] sm:$0xff]  ;;  %v33_v43 = vld [vmem:[%s1370_s0 + $0x30] sm:$0xff]  ;;  %v296_v56 = vld [vmem:[%s1368_s1 + $0x3f8] sm:$0xff] }
  0x28   :  { %v245_v47 = vld [vmem:[%s1368_s1 + $0x260] sm:$0xff]  ;;  %v295_v55 = vld [vmem:[%s1368_s1 + $0x3f0] sm:$0xff] }
  0x29   :  { %v247_v63 = vld [vmem:[%s1368_s1 + $0x270] sm:$0xff] }
  0x8a   :  { %v1165_v23 = vpop.permute.xlu0 %150 }
  0x8b   :  { %v154_v25 = vmul.f32 %v1165_v23, %v128_v12  ;;  %v156_v26 = vmul.f32 %v1165_v23, %v130_v13  ;;  %v153_v27 = vmul.f32 %v1165_v23, %v127_v14  ;;  %v155_v28 = vmul.f32 %v1165_v23, %v129_v15 }
  0x8c   :  { %v158_v32 = vmul.f32 %v1165_v23, %v132_v19  ;;  %v160_v33 = vmul.f32 %v1165_v23, %v134_v20 }
  0x8d   :  { %v162_v36 = vsel %vm136_vm0, %v128_v12, %v154_v25  ;;  %v164_v37 = vsel %vm138_vm1, %v130_v13, %v156_v26  ;;  %v161_v38 = vsel %vm135_vm2, %v127_v14, %v153_v27  ;;  %v163_v39 = vsel %vm137_vm3, %v129_v15, %v155_v28  ;;  %v290_v12 = vld [vmem:[%s1368_s1 + $0x3c8] sm:$0xff]  ;;  %v241_v15 = vld [vmem:[%s1368_s1 + $0x240] sm:$0xff]  ;;  %v292_v25 = vld [vmem:[%s1368_s1 + $0x3d8] sm:$0xff] }
  0x8e   :  { %368 = vmatprep.mubr.f32.mxu0 %v162_v36  ;;  %438 = vmatprep.mubr.f32.mxu1 %v164_v37  ;;  %v166_v51 = vsel %vm140_vm4, %v132_v19, %v158_v32  ;;  %v168_v53 = vsel %vm142_vm5, %v134_v20, %v160_v33  ;;  %v810_v13 = vpack.c.bf16 %v240_v4, %v239_v3  ;;  %v273_v19 = vld [vmem:[%s1368_s1 + $0x340] sm:$0xff]  ;;  %v274_v20 = vld [vmem:[%s1368_s1 + $0x348] sm:$0xff]  ;;  %v55_v26 = vsub.s32 4, %v1105_v42  ;;  %v280_v3 = vld [vmem:[%s1368_s1 + $0x378] sm:$0xff] }
  0x8f   :  { %369 = vmatmul.mubr.f32.vlgmr.msra.gmra.mrb[0].mxu0 %v161_v38  ;;  %439 = vmatmul.mubr.f32.vlgmr.msra.gmra.mrb[0].mxu1 %v163_v39  ;;  %v842_v14 = vpack.c.bf16 %v272_v8, %v271_v7  ;;  %v844_v18 = vpack.c.bf16 %v290_v12, %v289_v11  ;;  %v63_v27 = vsub.s32 6, %v1105_v42  ;;  %v814_v28 = vpack.c.bf16 %v242_v16, %v241_v15  ;;  %v275_v42 = vld [vmem:[%s1368_s1 + $0x350] sm:$0xff]  ;;  %v262_v36 = vld [vmem:[%s1368_s1 + $0x2e8] sm:$0xff]  ;;  %v293_v37 = vld [vmem:[%s1368_s1 + $0x3e0] sm:$0xff] }
  0x90   :  { %799 = vmatpush3.bf16.msra.mxu0 %v798_v21  ;;  %831 = vmatpush3.bf16.msra.mxu1 %v830_v22  ;;  %v259_v21 = vld [vmem:[%s1368_s1 + $0x2d0] sm:$0xff]  ;;  %v260_v22 = vld [vmem:[%s1368_s1 + $0x2d8] sm:$0xff]  ;;  %v846_v29 = vpack.c.bf16 %v274_v20, %v273_v19  ;;  %v848_v33 = vpack.c.bf16 %v292_v25, %v291_v24  ;;  %v294_v38 = vld [vmem:[%s1368_s1 + $0x3e8] sm:$0xff]  ;;  %v56_v39 = vrot.slane %v1111_v44, %v55_v26  ;;  %v11_v12 = vstv %s1372_s2 }
  0x91   :  { %508 = vmatprep.mubr.f32.mxu0 %v166_v51  ;;  %578 = vmatprep.mubr.f32.mxu1 %v168_v53  ;;  %v816_v32 = vpack.c.bf16 %v260_v22, %v259_v21  ;;  %v64_v40 = vrot.slane %v1111_v44, %v63_v27  ;;  %v246_v44 = vld [vmem:[%s1368_s1 + $0x268] sm:$0xff]  ;;  %v820_v48 = vpack.c.bf16 %v262_v36, %v261_v35  ;;  %v263_v53 = vld [vmem:[%s1368_s1 + $0x2f0] sm:$0xff] }
  0x92   :  { %801 = vmatprep.subr.bf16.mxu0 %v800_v45  ;;  %833 = vmatprep.subr.bf16.mxu1 %v832_v46  ;;  %v818_v45 = vpack.c.bf16 %v244_v31, %v243_v30  ;;  %v850_v46 = vpack.c.bf16 %v276_v34, %v275_v42  ;;  %v852_v49 = vpack.c.bf16 %v294_v38, %v293_v37  ;;  %v278_v51 = vld [vmem:[%s1368_s1 + $0x368] sm:$0xff] }
  0x93   :  { %v83_v59 = vmul.f32 %v64_v40, %v33_v43  ;;  %v114_v60 = vrot.slane %v1125_v52, %v63_v27  ;;  %v822_v61 = vpack.c.bf16 %v246_v44, %v245_v47  ;;  %12 = vst [vmem:[#allocation2] sm:$0x1] %v11_v12 }
  0x94   :  { %803 = vmatpush3.bf16.msra.mxu0 %v802_v50  ;;  %835 = vmatpush3.bf16.msra.mxu1 %v834_v54  ;;  %v277_v50 = vld [vmem:[%s1368_s1 + $0x360] sm:$0xff]  ;;  %v264_v54 = vld [vmem:[%s1368_s1 + $0x2f8] sm:$0xff] }
  0x95   :  { %805 = vmatprep.subr.bf16.mxu0 %v804_v57  ;;  %837 = vmatprep.subr.bf16.mxu1 %v836_v58  ;;  %v81_v57 = vmul.f32 %v56_v39, %v31_v41  ;;  %v106_v58 = vrot.slane %v1125_v52, %v55_v26  ;;  %v854_v62 = vpack.c.bf16 %v278_v51, %v277_v50  ;;  %v279_v52 = vld [vmem:[%s1368_s1 + $0x370] sm:$0xff] }
  0x96   :  { %v824_v0 = vpack.c.bf16 %v264_v54, %v263_v53  ;;  %v858_v7 = vpack.c.bf16 %v280_v3, %v279_v52 }
  0x97   :  { %v131_v4 = vadd.f32 %v106_v58, %v81_v57 }
  0x98   :  { %807 = vmatpush3.bf16.msra.mxu0 %v806_v1  ;;  %839 = vmatpush3.bf16.msra.mxu1 %v838_v2  ;;  %v856_v1 = vpack.c.bf16 %v296_v56, %v295_v55  ;;  %v248_v2 = vld [vmem:[%s1368_s1 + $0x278] sm:$0xff] }
  0x99   :  { %809 = vmatprep.subr.bf16.mxu0 %v808_v5  ;;  %841 = vmatprep.subr.bf16.mxu1 %v840_v6  ;;  %v133_v5 = vadd.f32 %v114_v60, %v83_v59  ;;  %v826_v6 = vpack.c.bf16 %v248_v2, %v247_v63  ;;  %v157_v8 = vmul.f32 %v1165_v23, %v131_v4  ;;  %vm139_vm6 = vcmp.ge.f32.partialorder %v131_v4, 0.0 }
  0x9a   :  { %v591_v15 = vld [vmem:[#allocation2] ss:$0 sm:$0xff] }
  0x9b   :  { %v159_v9 = vmul.f32 %v1165_v23, %v133_v5  ;;  %vm141_vm7 = vcmp.ge.f32.partialorder %v133_v5, 0.0  ;;  %v165_v10 = vsel %vm139_vm6, %v131_v4, %v157_v8 }
  0x9c   :  { %811 = vmatpush3.bf16.msra.mxu0 %v810_v13  ;;  %843 = vmatpush3.bf16.msra.mxu1 %v842_v14 }
  0x9d   :  { %813 = vmatprep.subr.bf16.mxu0 %v812_v17  ;;  %845 = vmatprep.subr.bf16.mxu1 %v844_v18  ;;  %v167_v11 = vsel %vm141_vm7, %v133_v5, %v159_v9 }
  0xa0   :  { %815 = vmatpush3.bf16.msra.mxu0 %v814_v28  ;;  %847 = vmatpush3.bf16.msra.mxu1 %v846_v29 }
  0xa1   :  { %817 = vmatprep.subr.bf16.mxu0 %v816_v32  ;;  %849 = vmatprep.subr.bf16.mxu1 %v848_v33 }
  0xa4   :  { %819 = vmatpush3.bf16.msra.mxu0 %v818_v45  ;;  %851 = vmatpush3.bf16.msra.mxu1 %v850_v46 }
  0xa5   :  { %821 = vmatprep.subr.bf16.mxu0 %v820_v48  ;;  %853 = vmatprep.subr.bf16.mxu1 %v852_v49 }
  0xa8   :  { %823 = vmatpush3.bf16.msra.mxu0 %v822_v61  ;;  %855 = vmatpush3.bf16.msra.mxu1 %v854_v62 }
  0xa9   :  { %825 = vmatprep.subr.bf16.mxu0 %v824_v0  ;;  %857 = vmatprep.subr.bf16.mxu1 %v856_v1 }
  0xac   :  { %827 = vmatpush3.bf16.msra.mxu0 %v826_v6  ;;  %859 = vmatpush3.bf16.msra.mxu1 %v858_v7 }
  0xaf   :  { %509 = vmatmul.mubr.f32.vlgmr.msra.gmra.mrb[2].mxu0 %v165_v10  ;;  %579 = vmatmul.mubr.f32.vlgmr.msra.gmra.mrb[2].mxu1 %v167_v11 }
 0x162   :  { %v624_v13 = vpop.f32.mrb[0].mxu0  ;;  %v659_v14 = vpop.f32.mrb[0].mxu1 }
 0x163   :  { %v625_v16 = vpop.f32.mrb[1].mxu0  ;;  %v660_v17 = vpop.f32.mrb[1].mxu1 }
 0x164   :  { %v626_v18 = vadd.f32 %v625_v16, %v624_v13  ;;  %v661_v23 = vadd.f32 %v660_v17, %v659_v14 }
 0x166   :  { %v371_v19 = vadd.f32 %v626_v18, %v591_v15 }
 0x168   :  { %v441_v20 = vadd.f32 %v661_v23, %v371_v19 }
 0x182   :  { %v694_v21 = vpop.f32.mrb[2].mxu0  ;;  %v729_v22 = vpop.f32.mrb[2].mxu1 }
 0x183   :  { %v695_v24 = vpop.f32.mrb[3].mxu0  ;;  %v730_v25 = vpop.f32.mrb[3].mxu1 }
 0x184   :  { %v696_v26 = vadd.f32 %v695_v24, %v694_v21  ;;  %v731_v27 = vadd.f32 %v730_v25, %v729_v22 }
 0x186   :  { %v511_v28 = vadd.f32 %v696_v26, %v441_v20 }
 0x188   :  { %v581_v29 = vadd.f32 %v731_v27, %v511_v28 }
 0x18a   :  { %585 = vst.msk [vmem:[%s1373_s6] sm:$0xff] %vm584_vm8, %v581_v29 }

</bundles_post_ra>
